<compile_context>
chip_gen: v6e
topology: v6e:2x2x1
jax: 0.10.0
libtpu: 0.0.40
codegen_flags: <defaults>
</compile_context>

<pallas_src>
import functools

import jax
import jax.numpy as jnp
import numpy as np
from jax.experimental import pallas as pl
from jax.experimental.pallas import tpu as pltpu

# ---- synthetic RPN hyper-parameters (shapes implied by __init__) ----
NUM_CLASSES    = 4     # len(conf['lbls']) + 1
NUM_ANCHORS    = 4     # conf['anchors'].shape[0]
PROP_CH        = 512   # prop_feats conv out_channels (fixed in the module)
NUM_BBOX_HEADS = 11    # x,y,w,h, x3d,y3d,z3d,w3d,h3d,l3d,rY3d
HEAD_CH        = NUM_CLASSES * NUM_ANCHORS + NUM_BBOX_HEADS * NUM_ANCHORS  # 60


def _round_up(x, m):
    return ((x + m - 1) // m) * m


def _pick_tile_h(H, W, target_rows=256):
    """Largest even divisor of H whose (TH*W) row-tile stays small."""
    cands = [th for th in range(2, H + 1, 2) if H % th == 0]
    assert cands, "tiled RPN kernel expects an even feature-map height"
    fitting = [th for th in cands if th * W <= target_rows and th < H]
    return max(fitting) if fitting else min(cands)


# --------------------------------------------------------------------------
# Fused kernel: conv3x3+ReLU  ->  1x1 heads  ->  class softmax
# --------------------------------------------------------------------------
def _rpn_fused_kernel(xm_ref, xh_ref, w9_ref, bp_ref, wh_ref, bh_ref,
                      out_ref, acc_ref, *, num_classes, num_anchors, prob_off):
    # xm_ref : (1, TH, W+2, Cin)  bf16  aligned rows of the padded input
    # xh_ref : (1, 2,  W+2, Cin)  bf16  2-row halo below the aligned block
    # w9_ref : (9, Cin, Cp)       bf16  3x3 taps flattened (HWIO)
    # bp_ref : (1, Cp)            f32
    # wh_ref : (Cp, 128)          bf16  all 12 heads, zero-padded to 128 lanes
    # bh_ref : (1, 128)           f32
    # out_ref: (1, TH, W, 128)    f32   [heads(60) | 0 | prob(16) | 0]
    # acc_ref: (TH*W, Cp)         f32   VMEM scratch accumulator
    TH, W, Cout = out_ref.shape[1], out_ref.shape[2], out_ref.shape[3]
    Cin = xm_ref.shape[3]
    TM = TH * W
    A = num_anchors
    NCA = num_classes * A

    # (TH+2, W+2, Cin) halo tile.
    xt = jnp.concatenate([xm_ref[0], xh_ref[0]], axis=0)

    # 3x3 conv = 9 shifted MXU matmuls accumulated into the VMEM scratch.
    # dx (sublane shift) is hoisted to the outer loop so only 3 re-laid-out
    # copies of the tile are materialized; dy slices are free leading-axis
    # slices and the (TH, W, Cin)->(TH*W, Cin) reshape is layout-free when
    # W % 8 == 0.
    first = True
    for dx in range(3):
        xdx = xt[:, dx:dx + W, :]                         # (TH+2, W, Cin)
        for dy in range(3):
            patch = xdx[dy:dy + TH].reshape(TM, Cin)
            contrib = jnp.dot(patch, w9_ref[dy * 3 + dx],
                              preferred_element_type=jnp.float32)
            if first:
                acc_ref[...] = contrib
                first = False
            else:
                acc_ref[...] += contrib

    # prop_feats epilogue: bias + ReLU, cast to bf16 for the heads matmul.
    pf = jnp.maximum(acc_ref[...] + bp_ref[...], 0.0).astype(jnp.bfloat16)

    # All 12 heads in one lane-dense (K=Cp, N=128) matmul.
    o = jnp.dot(pf, wh_ref[...], preferred_element_type=jnp.float32) + bh_ref[...]

    # Numerically-stable softmax over classes (channel c = class*A + anchor,
    # softmax over class for each anchor) via a (TM, NC, A) reshape + reduce.
    cls3 = o[:, :NCA].reshape(TM, num_classes, A)
    m = jnp.max(cls3, axis=1, keepdims=True)
    e = jnp.exp(cls3 - m)
    s = jnp.sum(e, axis=1)                                # (TM, A)
    p = (e * pl.reciprocal(s, approx=True)[:, None, :]).reshape(TM, NCA)

    # Single 128-lane output slab: [heads | pad | prob | pad]  (unmasked store).
    out = jnp.concatenate([o[:, :prob_off], p, o[:, prob_off + NCA:]], axis=1)
    out_ref[0] = out.reshape(TH, W, Cout).astype(out_ref.dtype)


def rpn_fused(x_nhwc, params, num_classes, num_anchors):
    B, H, W, Cin = x_nhwc.shape
    w_prop = params["w_prop"]            # (3, 3, Cin, Cp)  HWIO
    b_prop = params["b_prop"]            # (Cp,)
    w_heads = params["w_heads"]          # (Cp, head_ch)
    b_heads = params["b_heads"]          # (head_ch,)
    Cp = w_prop.shape[-1]
    head_ch = w_heads.shape[-1]
    NCA = num_classes * num_anchors

    prob_off = max(64, _round_up(head_ch, 8))
    out_lanes = _round_up(prob_off + NCA, 128)
    assert head_ch <= prob_off and prob_off + NCA <= out_lanes

    TH = _pick_tile_h(H, W)
    nH = H // TH

    # bf16 activations / weights; f32 accumulation happens inside the kernel.
    xp = jnp.pad(x_nhwc.astype(jnp.bfloat16), ((0, 0), (1, 1), (1, 1), (0, 0)))
    w9 = w_prop.astype(jnp.bfloat16).reshape(9, Cin, Cp)
    bp = b_prop.astype(jnp.float32).reshape(1, Cp)
    wh = jnp.zeros((Cp, out_lanes), jnp.bfloat16).at[:, :head_ch].set(
        w_heads.astype(jnp.bfloat16))
    bh = jnp.zeros((1, out_lanes), jnp.float32).at[:, :head_ch].set(
        b_heads.astype(jnp.float32))

    kern = functools.partial(_rpn_fused_kernel, num_classes=num_classes,
                             num_anchors=num_anchors, prob_off=prob_off)

    out_slab = pl.pallas_call(
        kern,
        out_shape=jax.ShapeDtypeStruct((B, H, W, out_lanes), jnp.float32),
        grid_spec=pltpu.PrefetchScalarGridSpec(
            num_scalar_prefetch=0,
            grid=(B, nH),
            in_specs=[
                # aligned TH-row block of the padded input
                pl.BlockSpec((1, TH, W + 2, Cin), lambda b, i: (b, i, 0, 0)),
                # 2-row halo block starting at padded row i*TH + TH
                pl.BlockSpec((1, 2, W + 2, Cin),
                             lambda b, i: (b, i * (TH // 2) + TH // 2, 0, 0)),
                # weights/biases: constant index_map -> stay VMEM-resident
                pl.BlockSpec((9, Cin, Cp), lambda b, i: (0, 0, 0)),
                pl.BlockSpec((1, Cp), lambda b, i: (0, 0)),
                pl.BlockSpec((Cp, out_lanes), lambda b, i: (0, 0)),
                pl.BlockSpec((1, out_lanes), lambda b, i: (0, 0)),
            ],
            out_specs=pl.BlockSpec((1, TH, W, out_lanes),
                                   lambda b, i: (b, i, 0, 0)),
            scratch_shapes=[pltpu.VMEM((TH * W, Cp), jnp.float32)],
        ),
        compiler_params=pltpu.CompilerParams(
            dimension_semantics=("parallel", "parallel"),
            # explicit scoped-VMEM budget (stays below v7x's 64 MiB physical)
            vmem_limit_bytes=48 * 1024 * 1024,
        ),
    )(xp, xp, w9, bp, wh, bh)

    heads = out_slab[..., :head_ch]                       # (B, H, W, 60)
    prob_hw = out_slab[..., prob_off:prob_off + NCA]      # (B, H, W, 16)
    return heads, prob_hw


# --------------------------------------------------------------------------
# Forward pass (training-mode return tuple)
# --------------------------------------------------------------------------
def rpn_forward(x_nchw, params):
    B, Cin, H, W = x_nchw.shape
    NC, A = NUM_CLASSES, NUM_ANCHORS

    x = jnp.transpose(x_nchw, (0, 2, 3, 1))               # NCHW -> NHWC
    heads, prob_hw = rpn_fused(x, params, NC, A)

    # flatten_tensor(t.view(B, K, H*A, W)) maps conv output at channel (k*A+a),
    # pixel (h, w) to flat index n = (a*H + h)*W + w with K as the last dim.
    def anchor_major(t):                  # (B, H, W, K, A) -> (B, A*H*W, K)
        return jnp.transpose(t, (0, 4, 1, 2, 3)).reshape(B, A * H * W,
                                                         t.shape[3])

    cls = anchor_major(heads[..., :NC * A].reshape(B, H, W, NC, A))
    prob = anchor_major(prob_hw.reshape(B, H, W, NC, A))

    bb = []
    for j in range(NUM_BBOX_HEADS):
        sl = heads[..., NC * A + j * A: NC * A + (j + 1) * A]   # (B, H, W, A)
        bb.append(jnp.transpose(sl, (0, 3, 1, 2)).reshape(B, A * H * W))
    bbox_2d = jnp.stack(bb[:4], axis=2)   # (B, A*H*W, 4)
    bbox_3d = jnp.stack(bb[4:], axis=2)   # (B, A*H*W, 7)

    feat_size = [H, W]
    return cls, prob, bbox_2d, bbox_3d, feat_size


# --------------------------------------------------------------------------
# Pure-JAX reference mirroring the PyTorch forward, applied to the same
# bf16-rounded activations/weights the Pallas path uses (f32 accumulation).
# --------------------------------------------------------------------------
def rpn_reference(x_nchw, params):
    B, Cin, H, W = x_nchw.shape
    NC, A = NUM_CLASSES, NUM_ANCHORS
    q = lambda t: t.astype(jnp.bfloat16).astype(jnp.float32)

    x = q(x_nchw)
    pf = jax.lax.conv_general_dilated(
        x, q(params["w_prop"]), (1, 1), "SAME",
        dimension_numbers=("NCHW", "HWIO", "NCHW"),
        preferred_element_type=jnp.float32,
    ) + params["b_prop"][None, :, None, None]
    pf = q(jnp.maximum(pf, 0.0))          # heads matmul consumes bf16 pf

    heads = jnp.einsum("bchw,cd->bdhw", pf, q(params["w_heads"]),
                       preferred_element_type=jnp.float32) \
        + params["b_heads"][None, :, None, None]

    def flatten_tensor(t):                # (B, C, H', W') -> (B, H'*W', C)
        return jnp.transpose(t, (0, 2, 3, 1)).reshape(B, -1, t.shape[1])

    cls_v = heads[:, :NC * A].reshape(B, NC, H * A, W)
    prob_v = jax.nn.softmax(cls_v, axis=1)
    cls_f, prob_f = flatten_tensor(cls_v), flatten_tensor(prob_v)

    bbs = []
    for j in range(NUM_BBOX_HEADS):
        t = heads[:, NC * A + j * A: NC * A + (j + 1) * A]      # (B, A, H, W)
        bbs.append(flatten_tensor(t.reshape(B, 1, H * A, W)))
    bbox_2d = jnp.concatenate(bbs[:4], axis=2)
    bbox_3d = jnp.concatenate(bbs[4:], axis=2)
    return cls_f, prob_f, bbox_2d, bbox_3d, [H, W]


if __name__ == "__main__":
    key = jax.random.PRNGKey(0)
    B, Cin, H, W = 2, 64, 16, 16
    k = jax.random.split(key, 5)

    x = jax.random.normal(k[0], (B, Cin, H, W), jnp.float32)
    params = {
        "w_prop": 0.05 * jax.random.normal(k[1], (3, 3, Cin, PROP_CH), jnp.float32),
        "b_prop": 0.01 * jax.random.normal(k[2], (PROP_CH,), jnp.float32),
        "w_heads": 0.05 * jax.random.normal(k[3], (PROP_CH, HEAD_CH), jnp.float32),
        "b_heads": 0.01 * jax.random.normal(k[4], (HEAD_CH,), jnp.float32),
    }

    cls, prob, bbox_2d, bbox_3d, feat_size = rpn_forward(x, params)
    jax.block_until_ready((cls, prob, bbox_2d, bbox_3d))

    rcls, rprob, rb2, rb3, rfs = rpn_reference(x, params)
    for got, want in ((cls, rcls), (prob, rprob), (bbox_2d, rb2), (bbox_3d, rb3)):
        np.testing.assert_allclose(np.asarray(got), np.asarray(want),
                                   rtol=5e-3, atol=5e-3)
    assert feat_size == rfs

    print("KERNEL_OK")
</pallas_src>

<mosaic_0001>
module attributes {stable_mosaic.version = 11 : i64} {
  func.func @_rpn_fused_kernel(%arg0: i32, %arg1: i32, %arg2: memref<1x8x18x64xbf16, #tpu.memory_space<vmem>>, %arg3: memref<1x2x18x64xbf16, #tpu.memory_space<vmem>>, %arg4: memref<9x64x512xbf16, #tpu.memory_space<vmem>>, %arg5: memref<1x512xf32, #tpu.memory_space<vmem>>, %arg6: memref<512x128xbf16, #tpu.memory_space<vmem>>, %arg7: memref<1x128xf32, #tpu.memory_space<vmem>>, %arg8: memref<1x8x16x128xf32, #tpu.memory_space<vmem>>, %arg9: memref<128x512xf32, #tpu.memory_space<vmem>>) attributes {dimension_semantics = [#tpu.dimension_semantics<parallel>, #tpu.dimension_semantics<parallel>], iteration_bounds = array<i64: 2, 2>, scalar_prefetch = 0 : i64, scratch_operands = 1 : i64, tpu.core_type = #tpu.core_type<tc>, window_params = [{transform_indices = @transform_0, window_bounds = array<i64: 1, 8, 18, 64>}, {transform_indices = @transform_1, window_bounds = array<i64: 1, 2, 18, 64>}, {pipeline_mode = #tpu.pipeline_mode<synchronous>, transform_indices = @transform_2, window_bounds = array<i64: 9, 64, 512>}, {pipeline_mode = #tpu.pipeline_mode<synchronous>, transform_indices = @transform_3, window_bounds = array<i64: 1, 512>}, {pipeline_mode = #tpu.pipeline_mode<synchronous>, transform_indices = @transform_4, window_bounds = array<i64: 512, 128>}, {pipeline_mode = #tpu.pipeline_mode<synchronous>, transform_indices = @transform_5, window_bounds = array<i64: 1, 128>}, {transform_indices = @transform_6, window_bounds = array<i64: 1, 8, 16, 128>}]} {
    %c0 = arith.constant 0 : index
    %c0_0 = arith.constant 0 : index
    %c0_1 = arith.constant 0 : index
    %c0_2 = arith.constant 0 : index
    %0 = vector.load %arg2[%c0, %c0_0, %c0_1, %c0_2] : memref<1x8x18x64xbf16, #tpu.memory_space<vmem>>, vector<1x8x18x64xbf16>
    %1 = vector.shape_cast %0 : vector<1x8x18x64xbf16> to vector<8x18x64xbf16>
    %c0_3 = arith.constant 0 : index
    %c0_4 = arith.constant 0 : index
    %c0_5 = arith.constant 0 : index
    %c0_6 = arith.constant 0 : index
    %2 = vector.load %arg3[%c0_3, %c0_4, %c0_5, %c0_6] : memref<1x2x18x64xbf16, #tpu.memory_space<vmem>>, vector<1x2x18x64xbf16>
    %3 = vector.shape_cast %2 : vector<1x2x18x64xbf16> to vector<2x18x64xbf16>
    %4 = tpu.concatenate %1, %3 in 0 : vector<8x18x64xbf16>, vector<2x18x64xbf16> -> vector<10x18x64xbf16>
    %5 = vector.extract_strided_slice %4 {offsets = [0, 0, 0], sizes = [10, 16, 64], strides = [1, 1, 1]} : vector<10x18x64xbf16> to vector<10x16x64xbf16>
    %6 = vector.extract_strided_slice %5 {offsets = [0, 0, 0], sizes = [8, 16, 64], strides = [1, 1, 1]} : vector<10x16x64xbf16> to vector<8x16x64xbf16>
    %7 = vector.shape_cast %6 : vector<8x16x64xbf16> to vector<128x64xbf16>
    %c0_7 = arith.constant 0 : index
    %c0_8 = arith.constant 0 : index
    %c0_9 = arith.constant 0 : index
    %8 = vector.load %arg4[%c0_7, %c0_8, %c0_9] : memref<9x64x512xbf16, #tpu.memory_space<vmem>>, vector<1x64x512xbf16>
    %9 = vector.shape_cast %8 : vector<1x64x512xbf16> to vector<64x512xbf16>
    %cst = arith.constant dense<0.000000e+00> : vector<128x512xf32>
    %10 = tpu.matmul %7, %9, %cst {dimension_numbers = #tpu.dot_dimension_numbers<[1], [0], [0], [1], [0, 0, 1, 1], [], []>} : vector<128x64xbf16>, vector<64x512xbf16>, vector<128x512xf32> -> vector<128x512xf32>
    %c0_10 = arith.constant 0 : index
    %c0_11 = arith.constant 0 : index
    %11 = vector.load %arg9[%c0_10, %c0_11] : memref<128x512xf32, #tpu.memory_space<vmem>>, vector<128x512xf32>
    tpu.vector_store %arg9[%c0_10, %c0_11], %10 {strides = array<i32>} : memref<128x512xf32, #tpu.memory_space<vmem>>, vector<128x512xf32>,
    %12 = vector.extract_strided_slice %5 {offsets = [1, 0, 0], sizes = [8, 16, 64], strides = [1, 1, 1]} : vector<10x16x64xbf16> to vector<8x16x64xbf16>
    %13 = vector.shape_cast %12 : vector<8x16x64xbf16> to vector<128x64xbf16>
    %c3 = arith.constant 3 : index
    %c0_12 = arith.constant 0 : index
    %c0_13 = arith.constant 0 : index
    %14 = vector.load %arg4[%c3, %c0_12, %c0_13] : memref<9x64x512xbf16, #tpu.memory_space<vmem>>, vector<1x64x512xbf16>
    %15 = vector.shape_cast %14 : vector<1x64x512xbf16> to vector<64x512xbf16>
    %cst_14 = arith.constant dense<0.000000e+00> : vector<128x512xf32>
    %16 = tpu.matmul %13, %15, %cst_14 {dimension_numbers = #tpu.dot_dimension_numbers<[1], [0], [0], [1], [0, 0, 1, 1], [], []>} : vector<128x64xbf16>, vector<64x512xbf16>, vector<128x512xf32> -> vector<128x512xf32>
    %c0_15 = arith.constant 0 : index
    %c0_16 = arith.constant 0 : index
    %17 = vector.load %arg9[%c0_15, %c0_16] : memref<128x512xf32, #tpu.memory_space<vmem>>, vector<128x512xf32>
    %18 = arith.addf %17, %16 : vector<128x512xf32>
    %c0_17 = arith.constant 0 : index
    %c0_18 = arith.constant 0 : index
    %19 = vector.load %arg9[%c0_17, %c0_18] : memref<128x512xf32, #tpu.memory_space<vmem>>, vector<128x512xf32>
    tpu.vector_store %arg9[%c0_17, %c0_18], %18 {strides = array<i32>} : memref<128x512xf32, #tpu.memory_space<vmem>>, vector<128x512xf32>,
    %20 = vector.extract_strided_slice %5 {offsets = [2, 0, 0], sizes = [8, 16, 64], strides = [1, 1, 1]} : vector<10x16x64xbf16> to vector<8x16x64xbf16>
    %21 = vector.shape_cast %20 : vector<8x16x64xbf16> to vector<128x64xbf16>
    %c6 = arith.constant 6 : index
    %c0_19 = arith.constant 0 : index
    %c0_20 = arith.constant 0 : index
    %22 = vector.load %arg4[%c6, %c0_19, %c0_20] : memref<9x64x512xbf16, #tpu.memory_space<vmem>>, vector<1x64x512xbf16>
    %23 = vector.shape_cast %22 : vector<1x64x512xbf16> to vector<64x512xbf16>
    %cst_21 = arith.constant dense<0.000000e+00> : vector<128x512xf32>
    %24 = tpu.matmul %21, %23, %cst_21 {dimension_numbers = #tpu.dot_dimension_numbers<[1], [0], [0], [1], [0, 0, 1, 1], [], []>} : vector<128x64xbf16>, vector<64x512xbf16>, vector<128x512xf32> -> vector<128x512xf32>
    %c0_22 = arith.constant 0 : index
    %c0_23 = arith.constant 0 : index
    %25 = vector.load %arg9[%c0_22, %c0_23] : memref<128x512xf32, #tpu.memory_space<vmem>>, vector<128x512xf32>
    %26 = arith.addf %25, %24 : vector<128x512xf32>
    %c0_24 = arith.constant 0 : index
    %c0_25 = arith.constant 0 : index
    %27 = vector.load %arg9[%c0_24, %c0_25] : memref<128x512xf32, #tpu.memory_space<vmem>>, vector<128x512xf32>
    tpu.vector_store %arg9[%c0_24, %c0_25], %26 {strides = array<i32>} : memref<128x512xf32, #tpu.memory_space<vmem>>, vector<128x512xf32>,
    %28 = vector.extract_strided_slice %4 {offsets = [0, 1, 0], sizes = [10, 16, 64], strides = [1, 1, 1]} : vector<10x18x64xbf16> to vector<10x16x64xbf16>
    %29 = vector.extract_strided_slice %28 {offsets = [0, 0, 0], sizes = [8, 16, 64], strides = [1, 1, 1]} : vector<10x16x64xbf16> to vector<8x16x64xbf16>
    %30 = vector.shape_cast %29 : vector<8x16x64xbf16> to vector<128x64xbf16>
    %c1 = arith.constant 1 : index
    %c0_26 = arith.constant 0 : index
    %c0_27 = arith.constant 0 : index
    %31 = vector.load %arg4[%c1, %c0_26, %c0_27] : memref<9x64x512xbf16, #tpu.memory_space<vmem>>, vector<1x64x512xbf16>
    %32 = vector.shape_cast %31 : vector<1x64x512xbf16> to vector<64x512xbf16>
    %cst_28 = arith.constant dense<0.000000e+00> : vector<128x512xf32>
    %33 = tpu.matmul %30, %32, %cst_28 {dimension_numbers = #tpu.dot_dimension_numbers<[1], [0], [0], [1], [0, 0, 1, 1], [], []>} : vector<128x64xbf16>, vector<64x512xbf16>, vector<128x512xf32> -> vector<128x512xf32>
    %c0_29 = arith.constant 0 : index
    %c0_30 = arith.constant 0 : index
    %34 = vector.load %arg9[%c0_29, %c0_30] : memref<128x512xf32, #tpu.memory_space<vmem>>, vector<128x512xf32>
    %35 = arith.addf %34, %33 : vector<128x512xf32>
    %c0_31 = arith.constant 0 : index
    %c0_32 = arith.constant 0 : index
    %36 = vector.load %arg9[%c0_31, %c0_32] : memref<128x512xf32, #tpu.memory_space<vmem>>, vector<128x512xf32>
    tpu.vector_store %arg9[%c0_31, %c0_32], %35 {strides = array<i32>} : memref<128x512xf32, #tpu.memory_space<vmem>>, vector<128x512xf32>,
    %37 = vector.extract_strided_slice %28 {offsets = [1, 0, 0], sizes = [8, 16, 64], strides = [1, 1, 1]} : vector<10x16x64xbf16> to vector<8x16x64xbf16>
    %38 = vector.shape_cast %37 : vector<8x16x64xbf16> to vector<128x64xbf16>
    %c4 = arith.constant 4 : index
    %c0_33 = arith.constant 0 : index
    %c0_34 = arith.constant 0 : index
    %39 = vector.load %arg4[%c4, %c0_33, %c0_34] : memref<9x64x512xbf16, #tpu.memory_space<vmem>>, vector<1x64x512xbf16>
    %40 = vector.shape_cast %39 : vector<1x64x512xbf16> to vector<64x512xbf16>
    %cst_35 = arith.constant dense<0.000000e+00> : vector<128x512xf32>
    %41 = tpu.matmul %38, %40, %cst_35 {dimension_numbers = #tpu.dot_dimension_numbers<[1], [0], [0], [1], [0, 0, 1, 1], [], []>} : vector<128x64xbf16>, vector<64x512xbf16>, vector<128x512xf32> -> vector<128x512xf32>
    %c0_36 = arith.constant 0 : index
    %c0_37 = arith.constant 0 : index
    %42 = vector.load %arg9[%c0_36, %c0_37] : memref<128x512xf32, #tpu.memory_space<vmem>>, vector<128x512xf32>
    %43 = arith.addf %42, %41 : vector<128x512xf32>
    %c0_38 = arith.constant 0 : index
    %c0_39 = arith.constant 0 : index
    %44 = vector.load %arg9[%c0_38, %c0_39] : memref<128x512xf32, #tpu.memory_space<vmem>>, vector<128x512xf32>
    tpu.vector_store %arg9[%c0_38, %c0_39], %43 {strides = array<i32>} : memref<128x512xf32, #tpu.memory_space<vmem>>, vector<128x512xf32>,
    %45 = vector.extract_strided_slice %28 {offsets = [2, 0, 0], sizes = [8, 16, 64], strides = [1, 1, 1]} : vector<10x16x64xbf16> to vector<8x16x64xbf16>
    %46 = vector.shape_cast %45 : vector<8x16x64xbf16> to vector<128x64xbf16>
    %c7 = arith.constant 7 : index
    %c0_40 = arith.constant 0 : index
    %c0_41 = arith.constant 0 : index
    %47 = vector.load %arg4[%c7, %c0_40, %c0_41] : memref<9x64x512xbf16, #tpu.memory_space<vmem>>, vector<1x64x512xbf16>
    %48 = vector.shape_cast %47 : vector<1x64x512xbf16> to vector<64x512xbf16>
    %cst_42 = arith.constant dense<0.000000e+00> : vector<128x512xf32>
    %49 = tpu.matmul %46, %48, %cst_42 {dimension_numbers = #tpu.dot_dimension_numbers<[1], [0], [0], [1], [0, 0, 1, 1], [], []>} : vector<128x64xbf16>, vector<64x512xbf16>, vector<128x512xf32> -> vector<128x512xf32>
    %c0_43 = arith.constant 0 : index
    %c0_44 = arith.constant 0 : index
    %50 = vector.load %arg9[%c0_43, %c0_44] : memref<128x512xf32, #tpu.memory_space<vmem>>, vector<128x512xf32>
    %51 = arith.addf %50, %49 : vector<128x512xf32>
    %c0_45 = arith.constant 0 : index
    %c0_46 = arith.constant 0 : index
    %52 = vector.load %arg9[%c0_45, %c0_46] : memref<128x512xf32, #tpu.memory_space<vmem>>, vector<128x512xf32>
    tpu.vector_store %arg9[%c0_45, %c0_46], %51 {strides = array<i32>} : memref<128x512xf32, #tpu.memory_space<vmem>>, vector<128x512xf32>,
    %53 = vector.extract_strided_slice %4 {offsets = [0, 2, 0], sizes = [10, 16, 64], strides = [1, 1, 1]} : vector<10x18x64xbf16> to vector<10x16x64xbf16>
    %54 = vector.extract_strided_slice %53 {offsets = [0, 0, 0], sizes = [8, 16, 64], strides = [1, 1, 1]} : vector<10x16x64xbf16> to vector<8x16x64xbf16>
    %55 = vector.shape_cast %54 : vector<8x16x64xbf16> to vector<128x64xbf16>
    %c2 = arith.constant 2 : index
    %c0_47 = arith.constant 0 : index
    %c0_48 = arith.constant 0 : index
    %56 = vector.load %arg4[%c2, %c0_47, %c0_48] : memref<9x64x512xbf16, #tpu.memory_space<vmem>>, vector<1x64x512xbf16>
    %57 = vector.shape_cast %56 : vector<1x64x512xbf16> to vector<64x512xbf16>
    %cst_49 = arith.constant dense<0.000000e+00> : vector<128x512xf32>
    %58 = tpu.matmul %55, %57, %cst_49 {dimension_numbers = #tpu.dot_dimension_numbers<[1], [0], [0], [1], [0, 0, 1, 1], [], []>} : vector<128x64xbf16>, vector<64x512xbf16>, vector<128x512xf32> -> vector<128x512xf32>
    %c0_50 = arith.constant 0 : index
    %c0_51 = arith.constant 0 : index
    %59 = vector.load %arg9[%c0_50, %c0_51] : memref<128x512xf32, #tpu.memory_space<vmem>>, vector<128x512xf32>
    %60 = arith.addf %59, %58 : vector<128x512xf32>
    %c0_52 = arith.constant 0 : index
    %c0_53 = arith.constant 0 : index
    %61 = vector.load %arg9[%c0_52, %c0_53] : memref<128x512xf32, #tpu.memory_space<vmem>>, vector<128x512xf32>
    tpu.vector_store %arg9[%c0_52, %c0_53], %60 {strides = array<i32>} : memref<128x512xf32, #tpu.memory_space<vmem>>, vector<128x512xf32>,
    %62 = vector.extract_strided_slice %53 {offsets = [1, 0, 0], sizes = [8, 16, 64], strides = [1, 1, 1]} : vector<10x16x64xbf16> to vector<8x16x64xbf16>
    %63 = vector.shape_cast %62 : vector<8x16x64xbf16> to vector<128x64xbf16>
    %c5 = arith.constant 5 : index
    %c0_54 = arith.constant 0 : index
    %c0_55 = arith.constant 0 : index
    %64 = vector.load %arg4[%c5, %c0_54, %c0_55] : memref<9x64x512xbf16, #tpu.memory_space<vmem>>, vector<1x64x512xbf16>
    %65 = vector.shape_cast %64 : vector<1x64x512xbf16> to vector<64x512xbf16>
    %cst_56 = arith.constant dense<0.000000e+00> : vector<128x512xf32>
    %66 = tpu.matmul %63, %65, %cst_56 {dimension_numbers = #tpu.dot_dimension_numbers<[1], [0], [0], [1], [0, 0, 1, 1], [], []>} : vector<128x64xbf16>, vector<64x512xbf16>, vector<128x512xf32> -> vector<128x512xf32>
    %c0_57 = arith.constant 0 : index
    %c0_58 = arith.constant 0 : index
    %67 = vector.load %arg9[%c0_57, %c0_58] : memref<128x512xf32, #tpu.memory_space<vmem>>, vector<128x512xf32>
    %68 = arith.addf %67, %66 : vector<128x512xf32>
    %c0_59 = arith.constant 0 : index
    %c0_60 = arith.constant 0 : index
    %69 = vector.load %arg9[%c0_59, %c0_60] : memref<128x512xf32, #tpu.memory_space<vmem>>, vector<128x512xf32>
    tpu.vector_store %arg9[%c0_59, %c0_60], %68 {strides = array<i32>} : memref<128x512xf32, #tpu.memory_space<vmem>>, vector<128x512xf32>,
    %70 = vector.extract_strided_slice %53 {offsets = [2, 0, 0], sizes = [8, 16, 64], strides = [1, 1, 1]} : vector<10x16x64xbf16> to vector<8x16x64xbf16>
    %71 = vector.shape_cast %70 : vector<8x16x64xbf16> to vector<128x64xbf16>
    %c8 = arith.constant 8 : index
    %c0_61 = arith.constant 0 : index
    %c0_62 = arith.constant 0 : index
    %72 = vector.load %arg4[%c8, %c0_61, %c0_62] : memref<9x64x512xbf16, #tpu.memory_space<vmem>>, vector<1x64x512xbf16>
    %73 = vector.shape_cast %72 : vector<1x64x512xbf16> to vector<64x512xbf16>
    %cst_63 = arith.constant dense<0.000000e+00> : vector<128x512xf32>
    %74 = tpu.matmul %71, %73, %cst_63 {dimension_numbers = #tpu.dot_dimension_numbers<[1], [0], [0], [1], [0, 0, 1, 1], [], []>} : vector<128x64xbf16>, vector<64x512xbf16>, vector<128x512xf32> -> vector<128x512xf32>
    %c0_64 = arith.constant 0 : index
    %c0_65 = arith.constant 0 : index
    %75 = vector.load %arg9[%c0_64, %c0_65] : memref<128x512xf32, #tpu.memory_space<vmem>>, vector<128x512xf32>
    %76 = arith.addf %75, %74 : vector<128x512xf32>
    %c0_66 = arith.constant 0 : index
    %c0_67 = arith.constant 0 : index
    %77 = vector.load %arg9[%c0_66, %c0_67] : memref<128x512xf32, #tpu.memory_space<vmem>>, vector<128x512xf32>
    tpu.vector_store %arg9[%c0_66, %c0_67], %76 {strides = array<i32>} : memref<128x512xf32, #tpu.memory_space<vmem>>, vector<128x512xf32>,
    %c0_68 = arith.constant 0 : index
    %c0_69 = arith.constant 0 : index
    %78 = vector.load %arg9[%c0_68, %c0_69] : memref<128x512xf32, #tpu.memory_space<vmem>>, vector<128x512xf32>
    %c0_70 = arith.constant 0 : index
    %c0_71 = arith.constant 0 : index
    %79 = vector.load %arg5[%c0_70, %c0_71] : memref<1x512xf32, #tpu.memory_space<vmem>>, vector<1x512xf32>
    %80 = vector.broadcast %79 : vector<1x512xf32> to vector<128x512xf32>
    %81 = arith.addf %78, %80 : vector<128x512xf32>
    %cst_72 = arith.constant 0.000000e+00 : f32
    %82 = vector.broadcast %cst_72 : f32 to vector<128x512xf32>
    %83 = arith.maximumf %81, %82 : vector<128x512xf32>
    %84 = arith.truncf %83 : vector<128x512xf32> to vector<128x512xbf16>
    %c0_73 = arith.constant 0 : index
    %c0_74 = arith.constant 0 : index
    %85 = vector.load %arg6[%c0_73, %c0_74] : memref<512x128xbf16, #tpu.memory_space<vmem>>, vector<512x128xbf16>
    %cst_75 = arith.constant dense<0.000000e+00> : vector<128x128xf32>
    %86 = tpu.matmul %84, %85, %cst_75 {dimension_numbers = #tpu.dot_dimension_numbers<[1], [0], [0], [1], [0, 0, 1, 1], [], []>} : vector<128x512xbf16>, vector<512x128xbf16>, vector<128x128xf32> -> vector<128x128xf32>
    %c0_76 = arith.constant 0 : index
    %c0_77 = arith.constant 0 : index
    %87 = vector.load %arg7[%c0_76, %c0_77] : memref<1x128xf32, #tpu.memory_space<vmem>>, vector<1x128xf32>
    %88 = vector.broadcast %87 : vector<1x128xf32> to vector<128x128xf32>
    %89 = arith.addf %86, %88 : vector<128x128xf32>
    %90 = vector.extract_strided_slice %89 {offsets = [0, 0], sizes = [128, 16], strides = [1, 1]} : vector<128x128xf32> to vector<128x16xf32>
    %91 = vector.shape_cast %90 : vector<128x16xf32> to vector<128x4x4xf32>
    %cst_78 = arith.constant dense<0xFF800000> : vector<128x4xf32>
    %92 = vector.multi_reduction <maximumf>, %91, %cst_78 [1] : vector<128x4x4xf32> to vector<128x4xf32>
    %93 = vector.shape_cast %92 : vector<128x4xf32> to vector<128x1x4xf32>
    %94 = vector.broadcast %93 : vector<128x1x4xf32> to vector<128x4x4xf32>
    %95 = arith.subf %91, %94 : vector<128x4x4xf32>
    %96 = math.exp %95 : vector<128x4x4xf32>
    %cst_79 = arith.constant dense<0.000000e+00> : vector<128x4xf32>
    %97 = vector.multi_reduction <add>, %96, %cst_79 [1] : vector<128x4x4xf32> to vector<128x4xf32>
    %98 = tpu.reciprocal %97 {approx = true} : vector<128x4xf32> -> vector<128x4xf32>
    %99 = vector.shape_cast %98 : vector<128x4xf32> to vector<128x1x4xf32>
    %100 = vector.broadcast %99 : vector<128x1x4xf32> to vector<128x4x4xf32>
    %101 = arith.mulf %96, %100 : vector<128x4x4xf32>
    %102 = vector.shape_cast %101 : vector<128x4x4xf32> to vector<128x16xf32>
    %103 = vector.extract_strided_slice %89 {offsets = [0, 0], sizes = [128, 64], strides = [1, 1]} : vector<128x128xf32> to vector<128x64xf32>
    %104 = vector.extract_strided_slice %89 {offsets = [0, 80], sizes = [128, 48], strides = [1, 1]} : vector<128x128xf32> to vector<128x48xf32>
    %105 = tpu.concatenate %103, %102, %104 in 1 : vector<128x64xf32>, vector<128x16xf32>, vector<128x48xf32> -> vector<128x128xf32>
    %106 = vector.shape_cast %105 : vector<128x128xf32> to vector<8x16x128xf32>
    %c0_80 = arith.constant 0 : index
    %c0_81 = arith.constant 0 : index
    %c0_82 = arith.constant 0 : index
    %c0_83 = arith.constant 0 : index
    %107 = vector.load %arg8[%c0_80, %c0_81, %c0_82, %c0_83] : memref<1x8x16x128xf32, #tpu.memory_space<vmem>>, vector<1x8x16x128xf32>
    %108 = vector.shape_cast %107 : vector<1x8x16x128xf32> to vector<8x16x128xf32>
    %109 = vector.shape_cast %106 : vector<8x16x128xf32> to vector<1x8x16x128xf32>
    tpu.vector_store %arg8[%c0_80, %c0_81, %c0_82, %c0_83], %109 {strides = array<i32>} : memref<1x8x16x128xf32, #tpu.memory_space<vmem>>, vector<1x8x16x128xf32>,
    return
  }
  func.func @transform_0(%arg0: i32, %arg1: i32) -> (i32, i32, i32, i32) {
    %c0_i32 = arith.constant 0 : i32
    %c0_i32_0 = arith.constant 0 : i32
    %c0_i32_1 = arith.constant 0 : i32
    return %arg0, %arg1, %c0_i32, %c0_i32_0 : i32, i32, i32, i32
  }
  func.func @transform_1(%arg0: i32, %arg1: i32) -> (i32, i32, i32, i32) {
    %c4_i32 = arith.constant 4 : i32
    %0 = arith.muli %arg1, %c4_i32 : i32
    %c4_i32_0 = arith.constant 4 : i32
    %1 = arith.addi %0, %c4_i32_0 : i32
    %c0_i32 = arith.constant 0 : i32
    %c0_i32_1 = arith.constant 0 : i32
    %c0_i32_2 = arith.constant 0 : i32
    return %arg0, %1, %c0_i32, %c0_i32_1 : i32, i32, i32, i32
  }
  func.func @transform_2(%arg0: i32, %arg1: i32) -> (i32, i32, i32) {
    %c0_i32 = arith.constant 0 : i32
    %c0_i32_0 = arith.constant 0 : i32
    %c0_i32_1 = arith.constant 0 : i32
    %c0_i32_2 = arith.constant 0 : i32
    return %c0_i32, %c0_i32_0, %c0_i32_1 : i32, i32, i32
  }
  func.func @transform_3(%arg0: i32, %arg1: i32) -> (i32, i32) {
    %c0_i32 = arith.constant 0 : i32
    %c0_i32_0 = arith.constant 0 : i32
    %c0_i32_1 = arith.constant 0 : i32
    return %c0_i32, %c0_i32_0 : i32, i32
  }
  func.func @transform_4(%arg0: i32, %arg1: i32) -> (i32, i32) {
    %c0_i32 = arith.constant 0 : i32
    %c0_i32_0 = arith.constant 0 : i32
    %c0_i32_1 = arith.constant 0 : i32
    return %c0_i32, %c0_i32_0 : i32, i32
  }
  func.func @transform_5(%arg0: i32, %arg1: i32) -> (i32, i32) {
    %c0_i32 = arith.constant 0 : i32
    %c0_i32_0 = arith.constant 0 : i32
    %c0_i32_1 = arith.constant 0 : i32
    return %c0_i32, %c0_i32_0 : i32, i32
  }
  func.func @transform_6(%arg0: i32, %arg1: i32) -> (i32, i32, i32, i32) {
    %c0_i32 = arith.constant 0 : i32
    %c0_i32_0 = arith.constant 0 : i32
    %c0_i32_1 = arith.constant 0 : i32
    return %arg0, %arg1, %c0_i32, %c0_i32_0 : i32, i32, i32, i32
  }
}

</mosaic_0001>

<bundles_post_ra>
// kernel: tpu_custom_call.1
= control target key start
LH: loop header
LB: loop body
LE: loop exit
PB: predicated region body
PF: predicated region fallthrough
CT: control target
= control target key end

     0   :  { %11 = vsyncpa [#allocation4], 0  ;;  %s19437_s0 = inlined_call_operand.vmem [shape: bf16[2,18,18,64], index: 0, kind: input, shape index: {}]   ;;  %s19438_s1 = inlined_call_operand.vmem [shape: bf16[2,18,18,64], index: 1, kind: input, shape index: {}]   ;;  %s19439_s2 = inlined_call_operand.vmem [shape: bf16[9,64,512], index: 2, kind: input, shape index: {}]   ;;  %s19440_s3 = inlined_call_operand.vmem [shape: f32[1,512], index: 3, kind: input, shape index: {}]   ;;  %s19441_s4 = inlined_call_operand.vmem [shape: bf16[512,128], index: 4, kind: input, shape index: {}]   ;;  %s19442_s5 = inlined_call_operand.vmem [shape: f32[1,128], index: 5, kind: input, shape index: {}]   ;;  %s19443_s6 = inlined_call_operand.hbm [shape: f32[2,16,16,128], index: 6, kind: output, shape index: {}]  }
   0x1   :  { %13 = vsyncpa [#allocation4 + $0x1], 0  ;;  %s13042_s21 = smov 0   ;;  %s13044_s22 = smov 0  }
   0x2   :  { %s13046_s23 = smov 0   ;;  %s13048_s24 = smov 0  }
   0x3   :  { %s13050_s25 = smov 0   ;;  %s13052_s26 = smov 0  }
   0x4   :  { %s13054_s27 = smov 0   ;;  %s13056_s28 = smov 0  }
   0x5 LB: > { %19781 = sst [smem:[#allocation6_spill]] %s12988_s27  ;;  %s11377_s29 = sadd.s32 4294967295, %s12992_s28   ;;  %s12992_s28 = sphi %s13056_s28, %s19_s28   ;;  %s12988_s27 = sphi %s13054_s27, %s20754_s27   ;;  %s12984_s26 = sphi %s13052_s26, %s20759_s26   ;;  %s12980_s25 = sphi %s13050_s25, %s20752_s25   ;;  %s12976_s24 = sphi %s13048_s24, %s20758_s24   ;;  %s12972_s23 = sphi %s13046_s23, %s20757_s23   ;;  %s12968_s22 = sphi %s13044_s22, %s20756_s22   ;;  %s12964_s21 = sphi %s13042_s21, %s20755_s21  }
   0x6   : > { %s11378_s30 = sadd.s32 4294967294, %s12992_s28   ;;  %s28_s7 = sadd.s32 1, %s12984_s26 }
   0x7   : > { %p29_p0 = scmp.ge.s32.totalorder %s28_s7, 2  ;;  %s31_s8 = sadd.s32 1, %s12988_s27 }
   0x8   : > { %p194_p1 = scmp.ne.s32.totalorder %s12972_s23, %s12968_s22  ;;  %p195_p2 = scmp.eq.s32.totalorder %s11377_s29, 3 }
   0x9   : > { %s20761_s7 = smov (%p29_p0, %s28_s7), 0  ;;  %s20763_s8 = smov (!%p29_p0, %s31_s8), %s12988_s27 }
   0xa   : > { %19782 = sst [smem:[#allocation7_spill]] %s20761_s7  ;;  %s180_s9 = ssub.s32 %s12984_s26, %s20761_s7 }
   0xb   : > { %p13093_p3 = por %p195_p2, %p194_p1  ;;  %p33_p4 = scmp.ge.s32.totalorder %s20763_s8, 2 }
   0xc   : > { %p200_p5 = scmp.ne.s32.totalorder %s12968_s22, %s12964_s21  ;;  %p201_p6 = scmp.eq.s32.totalorder %s11378_s30, 3 }
   0xd   : > { %p11383_p7 = scmp.ge.s32.totalorder %s12992_s28, 1  ;;  %s20765_s8 = smov (%p33_p4, %s20763_s8), 0 }
   0xe   : > { %19784 = sst [smem:[#allocation8_spill]] %s20765_s8  ;;  %p13102_p8 = por %p201_p6, %p200_p5 }
   0xf   : > { %p273_p9 = scmp.lt.s32.totalorder %s12992_s28, 5  ;;  %s179_s12 = ssub.s32 %s12988_s27, %s20765_s8 }
  0x10   : > { %s184_s13 = sadd.s32 1, %s12972_s23  ;;  %s181_s14 = sor.u32 %s180_s9, %s179_s12 }
  0x11   : > { %p274_p10 = pnand %p11383_p7, %p273_p9  ;;  %p182_p11 = scmp.eq.s32.totalorder %s181_s14, 0 }
  0x13   : > { %s13111_s15 = scalar_select %p182_p11, %s12972_s23, %s184_s13  }
  0x14   : > { %277 = sbr.rel (%p274_p10) target bundleno = 2129 (0x851), region = 44 }
  0x19   : > { %v12104_v0 = vld [vmem:[%s19439_s2 + $0x64] ss:$16 sps:$4 sm:$0xff]   ;;  %s13117_s18 = sshll.u32 %s12976_s24, 3  ;;  %v12106_v1 = vld [vmem:[%s19439_s2 + $0x6c] ss:$16 sps:$4 sm:$0xff]   ;;  %v19447_v2 = vmov 0  }
  0x1a   : > { %586 = vmatprep.mubr.bf16.mxu0 %v19447_v2  ;;  %699 = vmatprep.mubr.bf16.mxu1 %v19447_v2  ;;  %p331_p12 = scmp.lt.s32.totalorder %s12980_s25, 1  ;;  %p333_p13 = scmp.lt.s32.totalorder %s13117_s18, 17  ;;  %v12108_v3 = vld [vmem:[%s19439_s2 + $0x60] ss:$16 sps:$4 sm:$0xff]   ;;  %v12109_v4 = vld [vmem:[%s19439_s2 + $0x68] ss:$16 sps:$4 sm:$0xff]  }
  0x1b   : > { %562 = vmatprep.subr.bf16.mxu0 %v12104_v0  ;;  %675 = vmatprep.subr.bf16.mxu1 %v12106_v1  ;;  %v12110_v5 = vld [vmem:[%s19439_s2 + $0x44] ss:$16 sps:$4 sm:$0xff]   ;;  %v12112_v6 = vld [vmem:[%s19439_s2 + $0x4c] ss:$16 sps:$4 sm:$0xff]   ;;  %v12114_v7 = vld [vmem:[%s19439_s2 + $0x40] ss:$16 sps:$4 sm:$0xff]  }
  0x1c   : > { %s13136_s16 = scalar_select %p331_p12, %s12980_s25, 1  ;;  %563 = vmatpush1.bf16.msra.mxu0 %v12108_v3  ;;  %676 = vmatpush1.bf16.msra.mxu1 %v12109_v4  ;;  %v12115_v8 = vld [vmem:[%s19439_s2 + $0x48] ss:$16 sps:$4 sm:$0xff]   ;;  %vm3746_vm0 = vcmask 1042432   ;;  %v12116_v9 = vld [vmem:[%s19439_s2 + $0x24] ss:$16 sps:$4 sm:$0xff]  }
  0x1d   : > { %s334_s30 = scalar_select %p333_p13, %s13117_s18, 17  ;;  %564 = vmatprep.subr.bf16.mxu0 %v12110_v5  ;;  %677 = vmatprep.subr.bf16.mxu1 %v12112_v6  ;;  %vm3747_vm1 = vcmask 1046532   ;;  %v12118_v10 = vld [vmem:[%s19439_s2 + $0x2c] ss:$16 sps:$4 sm:$0xff]   ;;  %v12120_v11 = vld [vmem:[%s19439_s2 + $0x20] ss:$16 sps:$4 sm:$0xff]  }
  0x1e   : > { %v12121_v12 = vld [vmem:[%s19439_s2 + $0x28] ss:$16 sps:$4 sm:$0xff]   ;;  %v12122_v13 = vld [vmem:[%s19439_s2 + $0x4] ss:$16 sps:$4 sm:$0xff]   ;;  %s19786_s8 = smul.u32 54, %s13136_s16  ;;  %vm13182_vm2 = vmor %vm3746_vm0, %vm3747_vm1  ;;  %v19787_v17 = vmov 0 }
  0x1f   : > { %s12018_s17 = smul.u32 3, %s334_s30  ;;  %v12124_v14 = vld [vmem:[%s19439_s2 + $0xc] ss:$16 sps:$4 sm:$0xff]   ;;  %v12126_v15 = vld [vmem:[%s19439_s2] ss:$16 sps:$4 sm:$0xff]   ;;  %v19788_v17 = vsel %vm13182_vm2, 4294967295, %v19787_v17 }
  0x20   : > { %565 = vmatpush1.bf16.msra.mxu0 %v12114_v7  ;;  %678 = vmatpush1.bf16.msra.mxu1 %v12115_v8  ;;  %v12127_v16 = vld [vmem:[%s19439_s2 + $0x8] ss:$16 sps:$4 sm:$0xff]   ;;  %19789 = vst [vmem:[#allocation9_spill] sm:$0xff] %v19788_v17  ;;  %v12131_v24 = vld [vmem:[%s19439_s2 + $0x1e4] ss:$16 sps:$4 sm:$0xff]   ;;  %vm529_vm3 = vcmask 523264  }
  0x21   : > { %s337_s30 = sadd.s32 %s19786_s8, %s12018_s17  ;;  %566 = vmatprep.subr.bf16.mxu0 %v12116_v9  ;;  %679 = vmatprep.subr.bf16.mxu1 %v12118_v10  ;;  %s11887_s8 = sadd.s32 8, %s13117_s18  ;;  %v12134_v28 = vld [vmem:[%s19439_s2 + $0x1ec] ss:$16 sps:$4 sm:$0xff]   ;;  %v12129_v29 = vld [vmem:[%s19439_s2 + $0x1e0] ss:$16 sps:$4 sm:$0xff]   ;;  %vm7377_vm7 = vcmask 27648  }
  0x22   : > { %s11386_s19 = sshll.u32 %s337_s30, 2  ;;  %v12132_v30 = vld [vmem:[%s19439_s2 + $0x1e8] ss:$16 sps:$4 sm:$0xff]   ;;  %p13215_p0 = scmp.lt.s32.totalorder %s11887_s8, 17  ;;  %v12139_v35 = vld [vmem:[%s19439_s2 + $0x1c4] ss:$16 sps:$4 sm:$0xff]  }
  0x23   : > { %s13178_s17 = scalar_lea.vmem %s19437_s0, %s11386_s19  ;;  %v12137_v36 = vld [vmem:[%s19439_s2 + $0x1c0] ss:$16 sps:$4 sm:$0xff]   ;;  %v12140_v37 = vld [vmem:[%s19439_s2 + $0x1c8] ss:$16 sps:$4 sm:$0xff]   ;;  %v12142_v38 = vld [vmem:[%s19439_s2 + $0x1cc] ss:$16 sps:$4 sm:$0xff]  }
  0x24   : > { %v13187_v18 = vld [vmem:[%s13178_s17] sm:$0xf]  ;;  %v13190_v19 = vld [vmem:[%s13178_s17 + $0x4] sm:$0xf]  ;;  %v13193_v20 = vld [vmem:[%s13178_s17 + $0x8] sm:$0x1]  ;;  %567 = vmatpush1.bf16.msra.mxu0 %v12120_v11  ;;  %680 = vmatpush1.bf16.msra.mxu1 %v12121_v12 }
  0x25   : > { %568 = vmatprep.subr.bf16.mxu0 %v12122_v13  ;;  %681 = vmatprep.subr.bf16.mxu1 %v12124_v14  ;;  %v11682_v21 = vrot.slane %v13187_v18, 9  ;;  %v3751_v22 = vrot.slane %v13190_v19, 5  ;;  %v3754_v23 = vrot.slane %v13193_v20, 5  ;;  %v11390_v25 = vcombine.low %v13187_v18, %v13190_v19  ;;  %v13224_v33 = vld [vmem:[%s13178_s17 + $0xc] sm:$0xf]  ;;  %s20767_s8 = smov (!%p13215_p0, %s11887_s8), 17 }
  0x26   : > { %v13229_v34 = vld [vmem:[%s13178_s17 + $0x10] sm:$0xf]  ;;  %v12147_v40 = vld [vmem:[%s19439_s2 + $0x1a4] ss:$16 sps:$4 sm:$0xff]   ;;  %s12020_s9 = smul.u32 3, %s20767_s8  ;;  %v1894_v0 = vshrl.u32 %v13187_v18, 16 }
  0x27   : > { %v3752_v26 = vsel %vm13182_vm2, %v11682_v21, %v3751_v22  ;;  %v3753_v27 = vrot.slane %v3751_v22, 4  ;;  %v13249_v39 = vcombine.low %v13224_v33, %v13229_v34  ;;  %v12145_v41 = vld [vmem:[%s19439_s2 + $0x1a0] ss:$16 sps:$4 sm:$0xff]   ;;  %v12150_v42 = vld [vmem:[%s19439_s2 + $0x1ac] ss:$16 sps:$4 sm:$0xff]   ;;  %s19792_s18 = smul.u32 54, %s13136_s16 }
  0x28   : > { %569 = vmatpush1.bf16.msra.mxu0 %v12126_v15  ;;  %682 = vmatpush1.bf16.msra.mxu1 %v12127_v16  ;;  %v12148_v43 = vld [vmem:[%s19439_s2 + $0x1a8] ss:$16 sps:$4 sm:$0xff]   ;;  %v13277_v45 = vld [vmem:[%s13178_s17 + $0x1c] sm:$0xf]  ;;  %v12155_v46 = vld [vmem:[%s19439_s2 + $0x184] ss:$16 sps:$4 sm:$0xff]  }
  0x29   : > { %v3755_v31 = vsel %vm13182_vm2, %v3753_v27, %v3754_v23  ;;  %957 = vmatprep.subr.bf16.mxu0 %v12131_v24  ;;  %1070 = vmatprep.subr.bf16.mxu1 %v12134_v28  ;;  %s13265_s20 = sadd.s32 %s12020_s9, %s19792_s18  ;;  %v13272_v44 = vld [vmem:[%s13178_s17 + $0x18] sm:$0xf]  ;;  %v12153_v47 = vld [vmem:[%s19439_s2 + $0x180] ss:$16 sps:$4 sm:$0xff]   ;;  %v12158_v49 = vld [vmem:[%s19439_s2 + $0x18c] ss:$16 sps:$4 sm:$0xff]  }
  0x2a   : > { %v13221_v32 = vcombine.low %v3752_v26, %v3755_v31  ;;  %v12156_v48 = vld [vmem:[%s19439_s2 + $0x188] ss:$16 sps:$4 sm:$0xff]   ;;  %v13293_v50 = vcombine.low %v13272_v44, %v13277_v45  ;;  %v12162_v51 = vld [vmem:[%s19439_s2 + $0x364] ss:$16 sps:$4 sm:$0xff]   ;;  %v12165_v52 = vld [vmem:[%s19439_s2 + $0x36c] ss:$16 sps:$4 sm:$0xff]  }
  0x2b   : > { %11414 = vmatmul.mubr.msk.bf16.vlgmr.msra.gmra.mxu0 %vm529_vm3, %v11390_v25  ;;  %11422 = vmatmul.mubr.msk.bf16.vlgmr.msra.gmra.mxu1 %vm529_vm3, %v11390_v25  ;;  %v13306_v53 = vld [vmem:[%s13178_s17 + $0x24] sm:$0xf]  ;;  %v13311_v54 = vld [vmem:[%s13178_s17 + $0x28] sm:$0xf]  ;;  %v13322_v56 = vld [vmem:[%s13178_s17 + $0x30] sm:$0xf] }
  0x2c   : > { %19791 = vst [vmem:[#allocation10_spill] sm:$0xff] %v13221_v32  ;;  %958 = vmatpush1.bf16.msra.mxu0 %v12129_v29  ;;  %1071 = vmatpush1.bf16.msra.mxu1 %v12132_v30  ;;  %v13315_v55 = vcombine.low %v13306_v53, %v13311_v54  ;;  %v13327_v57 = vld [vmem:[%s13178_s17 + $0x34] sm:$0xf]  ;;  %v13338_v59 = vld [vmem:[%s13178_s17 + $0x3c] sm:$0xf]  ;;  %v1897_v1 = vshll.u32 %v13187_v18, 16 }
  0x2d   : > { %596 = vmatprep.mubr.bf16.mxu0 %v19447_v2  ;;  %709 = vmatprep.mubr.bf16.mxu1 %v19447_v2  ;;  %v13331_v58 = vcombine.low %v13322_v56, %v13327_v57  ;;  %v13343_v60 = vld [vmem:[%s13178_s17 + $0x40] sm:$0xf]  ;;  %v13350_v62 = vld [vmem:[%s13178_s17 + $0x48] sm:$0xf]  ;;  %v13353_v63 = vld [vmem:[%s13178_s17 + $0x4c] sm:$0xf] }
  0x2e   : > { %959 = vmatprep.subr.bf16.mxu0 %v12139_v35  ;;  %1072 = vmatprep.subr.bf16.mxu1 %v12142_v38  ;;  %v13347_v61 = vcombine.low %v13338_v59, %v13343_v60  ;;  %v13365_v3 = vcombine.low %v13350_v62, %v13353_v63  ;;  %v1903_v4 = vshll.u32 %v13190_v19, 16  ;;  %v1907_v5 = vshrl.u32 %v13190_v19, 16  ;;  %v13376_v10 = vld [vmem:[%s13178_s17 + $0x54] sm:$0xf]  ;;  %v13379_v11 = vld [vmem:[%s13178_s17 + $0x58] sm:$0xf] }
  0x2f   : > { %v1896_v6 = vrot.slane %v1894_v0, 4  ;;  %v1899_v7 = vrot.slane %v1897_v1, 5  ;;  %v13383_v12 = vcombine.low %v13376_v10, %v13379_v11  ;;  %v1913_v18 = vshll.u32 %v13193_v20, 16  ;;  %v12160_v23 = vld [vmem:[%s19439_s2 + $0x360] ss:$16 sps:$4 sm:$0xff]   ;;  %s11389_s7 = sshll.u32 %s13265_s20, 2 }
  0x30   : > { %960 = vmatpush1.bf16.msra.mxu0 %v12137_v36  ;;  %1073 = vmatpush1.bf16.msra.mxu1 %v12140_v37  ;;  %v1905_v8 = vrot.slane %v1903_v4, 5  ;;  %v1909_v9 = vrot.slane %v1907_v5, 4  ;;  %v1918_v19 = vshrl.u32 %v13224_v33, 16  ;;  %v1921_v21 = vshll.u32 %v13224_v33, 16  ;;  %v12163_v24 = vld [vmem:[%s19439_s2 + $0x368] ss:$16 sps:$4 sm:$0xff]   ;;  %s13504_s18 = scalar_lea.vmem %s19438_s1, %s11389_s7 }
  0x31   : > { %961 = vmatprep.subr.bf16.mxu0 %v12147_v40  ;;  %1074 = vmatprep.subr.bf16.mxu1 %v12150_v42  ;;  %v1900_v13 = vor.u32 %v1899_v7, %v1896_v6  ;;  %v1931_v22 = vshrl.u32 %v13229_v34, 16  ;;  %vm1890_vm4 = vsmask.f32 3328  ;;  %vm1891_vm5 = vsmask.f32 7440  ;;  %s12995_s29 = smov 124  }
  0x32   : > { %v1910_v14 = vor.u32 %v1909_v9, %v1905_v8  ;;  %v1915_v25 = vrot.slane %v1913_v18, 5  ;;  %vm13401_vm6 = vmor %vm1890_vm4, %vm1891_vm5  ;;  %v12168_v26 = vld [vmem:[%s19439_s2 + $0x344] ss:$16 sps:$4 sm:$0xff]   ;;  %v12171_v27 = vld [vmem:[%s19439_s2 + $0x34c] ss:$16 sps:$4 sm:$0xff]   ;;  %v1927_v30 = vshll.u32 %v13229_v34, 16 }
  0x33   : > { %11415 = vmatmul.mubr.msk.bf16.gmra.mxu0 %vm529_vm3, %v13249_v39  ;;  %11423 = vmatmul.mubr.msk.bf16.gmra.mxu1 %vm529_vm3, %v13249_v39  ;;  %v1901_v15 = vrot.slane %v1900_v13, 4  ;;  %v1920_v33 = vrot.slane %v1918_v19, 4  ;;  %v1923_v35 = vrot.slane %v1921_v21, 5  ;;  %v1933_v37 = vrot.slane %v1931_v22, 4  ;;  %v12166_v38 = vld [vmem:[%s19439_s2 + $0x340] ss:$16 sps:$4 sm:$0xff]  }
  0x34   : > { %606 = vmatprep.mubr.bf16.mxu0 %v19447_v2  ;;  %719 = vmatprep.mubr.bf16.mxu1 %v19447_v2  ;;  %v1911_v16 = vrot.slane %v1910_v14, 4  ;;  %v1929_v36 = vrot.slane %v1927_v30, 5  ;;  %v12169_v34 = vld [vmem:[%s19439_s2 + $0x348] ss:$16 sps:$4 sm:$0xff]   ;;  %v13429_v40 = vld [vmem:[%s13178_s17 + $0x14] sm:$0x1] }
  0x35   : > { %962 = vmatpush1.bf16.msra.mxu0 %v12145_v41  ;;  %1075 = vmatpush1.bf16.msra.mxu1 %v12148_v43  ;;  %v1906_v28 = vsel %vm13401_vm6, %v1901_v15, %v1905_v8  ;;  %v1924_v41 = vor.u32 %v1923_v35, %v1920_v33  ;;  %v1937_v43 = vshll.u32 %v13429_v40, 16  ;;  %v12180_v5 = vld [vmem:[%s19439_s2 + $0x304] ss:$16 sps:$4 sm:$0xff]   ;;  %v12183_v6 = vld [vmem:[%s19439_s2 + $0x30c] ss:$16 sps:$4 sm:$0xff]   ;;  %v2065_v32 = vshll.u32 %v13376_v10, 16 }
  0x36   : > { %963 = vmatprep.subr.bf16.mxu0 %v12155_v46  ;;  %1076 = vmatprep.subr.bf16.mxu1 %v12158_v49  ;;  %v1916_v29 = vsel %vm13401_vm6, %v1911_v16, %v1915_v25  ;;  %v1934_v42 = vor.u32 %v1933_v37, %v1929_v36  ;;  %v12177_v46 = vld [vmem:[%s19439_s2 + $0x32c] ss:$16 sps:$4 sm:$0xff]   ;;  %v12178_v7 = vld [vmem:[%s19439_s2 + $0x300] ss:$16 sps:$4 sm:$0xff]   ;;  %v12181_v8 = vld [vmem:[%s19439_s2 + $0x308] ss:$16 sps:$4 sm:$0xff]  }
  0x37   : > { %v13416_v31 = vcombine.low %v1906_v28, %v1916_v29  ;;  %v1939_v49 = vrot.slane %v1937_v43, 5  ;;  %v12187_v9 = vld [vmem:[%s19439_s2 + $0xe4] ss:$16 sps:$4 sm:$0xff]   ;;  %v12190_v13 = vld [vmem:[%s19439_s2 + $0xec] ss:$16 sps:$4 sm:$0xff]   ;;  %s12996_s16 = smov 120  }
  0x38   : > { %v13513_v14 = vld [vmem:[%s13504_s18] sm:$0xf]  ;;  %v13516_v15 = vld [vmem:[%s13504_s18 + $0x4] sm:$0xf]  ;;  %v12188_v19 = vld [vmem:[%s19439_s2 + $0xe8] ss:$16 sps:$4 sm:$0xff]  }
  0x39   : > { %964 = vmatpush1.bf16.msra.mxu0 %v12153_v47  ;;  %1077 = vmatpush1.bf16.msra.mxu1 %v12156_v48  ;;  %v1925_v47 = vrot.slane %v1924_v41, 4  ;;  %v1935_v48 = vrot.slane %v1934_v42, 4  ;;  %v13520_v16 = vcombine.low %v13513_v14, %v13516_v15  ;;  %v12185_v18 = vld [vmem:[%s19439_s2 + $0xe0] ss:$16 sps:$4 sm:$0xff]   ;;  %v12193_v21 = vld [vmem:[%s19439_s2 + $0xc4] ss:$16 sps:$4 sm:$0xff]  }
  0x3a   : > { %1480 = vmatprep.subr.bf16.mxu0 %v12162_v51  ;;  %1593 = vmatprep.subr.bf16.mxu1 %v12165_v52  ;;  %v12172_v51 = vld [vmem:[%s19439_s2 + $0x320] ss:$16 sps:$4 sm:$0xff]   ;;  %v12175_v52 = vld [vmem:[%s19439_s2 + $0x328] ss:$16 sps:$4 sm:$0xff]   ;;  %v12196_v22 = vld [vmem:[%s19439_s2 + $0xcc] ss:$16 sps:$4 sm:$0xff]  }
  0x3b   : > { %11416 = vmatmul.mubr.msk.bf16.gmra.mxu0 %vm529_vm3, %v13293_v50  ;;  %11424 = vmatmul.mubr.msk.bf16.gmra.mxu1 %vm529_vm3, %v13293_v50  ;;  %v1930_v0 = vsel %vm13401_vm6, %v1925_v47, %v1929_v36  ;;  %v1940_v1 = vsel %vm13401_vm6, %v1935_v48, %v1939_v49  ;;  %v12199_v25 = vld [vmem:[%s19439_s2 + $0xa4] ss:$16 sps:$4 sm:$0xff]   ;;  %v12208_v29 = vld [vmem:[%s19439_s2 + $0x8c] ss:$16 sps:$4 sm:$0xff]   ;;  %v12203_v30 = vld [vmem:[%s19439_s2 + $0x80] ss:$16 sps:$4 sm:$0xff]  }
  0x3c   : > { %616 = vmatprep.mubr.bf16.mxu0 %v19447_v2  ;;  %729 = vmatprep.mubr.bf16.mxu1 %v19447_v2  ;;  %v13450_v4 = vcombine.low %v1930_v0, %v1940_v1  ;;  %v12205_v28 = vld [vmem:[%s19439_s2 + $0x84] ss:$16 sps:$4 sm:$0xff]   ;;  %v12206_v33 = vld [vmem:[%s19439_s2 + $0x88] ss:$16 sps:$4 sm:$0xff]   ;;  %v12215_v35 = vld [vmem:[%s19439_s2 + $0x26c] ss:$16 sps:$4 sm:$0xff]  }
  0x3d   : > { %v2658_v36 = vshll.u32 %v13516_v15, 16  ;;  %v13624_v42 = vld [vmem:[%s13504_s18 + $0xc] sm:$0xf]  ;;  %v13627_v43 = vld [vmem:[%s13504_s18 + $0x10] sm:$0xf]  ;;  %s13002_s27 = smov 8  }
  0x3e   : > { %s13003_s9 = smov 12   ;;  %vm11090_vm8 = vcmask 31744   ;;  %vm11107_vm9 = vcmask 64512   ;;  %vm11124_vm10 = vcmask 97280   ;;  %s13004_s13 = smov 64   ;;  %vm11221_vm11 = vcmask 654336  }
  0x3f   : > { %s322_s12 = sand.u32 1, %s12968_s22   ;;  %s11888_s14 = sshll.u32 %s12976_s24, 4 }
  0x40   : > { %s11384_s30 = sshll.u32 %s322_s12, 7  ;;  %s11882_s19 = sshll.u32 %s12980_s25, 5 }
  0x41   : > { %s19288_s7 = scalar_lea.vmem [#allocation3], %s11384_s30  ;;  %s11268_s20 = sadd.s32 %s11888_s14, %s11882_s19 }
  0x42   : > { %s11271_s8 = sshll.u32 %s19288_s7, 4  ;;  %s19385_s24 = scalar_lea.sflag [#allocation4], %s322_s12  ;;  %s19371_s8 = int_to_ptr.vmem [resolvable:$true] %s11271_s8 }
  0x43   : > { %11417 = vmatmul.mubr.msk.bf16.gmra.mxu0 %vm529_vm3, %v13315_v55  ;;  %11425 = vmatmul.mubr.msk.bf16.gmra.mxu1 %vm529_vm3, %v13315_v55  ;;  %s12900_s25 = scalar_lea.vmem %s19371_s8, 2048 }
  0x44   : > { %626 = vmatprep.mubr.bf16.mxu0 %v19447_v2  ;;  %739 = vmatprep.mubr.bf16.mxu1 %v19447_v2  ;;  %p12901_p1 = scmp.ne.s32.totalorder %s19371_s8, %s12900_s25 }
  0x46   : > { %p12902_p2 = pnand %p12901_p1, %p13093_p3 }
  0x48   : > { %p12903_p4 = pneg %p12902_p2 }
  0x4b   : > { %11418 = vmatmul.mubr.msk.bf16.gmra.mxu0 %vm529_vm3, %v13331_v58  ;;  %11426 = vmatmul.mubr.msk.bf16.gmra.mxu1 %vm529_vm3, %v13331_v58 }
  0x4c   : > { %636 = vmatprep.mubr.bf16.mxu0 %v19447_v2  ;;  %749 = vmatprep.mubr.bf16.mxu1 %v19447_v2 }
  0x53   : > { %11419 = vmatmul.mubr.msk.bf16.gmra.mxu0 %vm529_vm3, %v13347_v61  ;;  %11427 = vmatmul.mubr.msk.bf16.gmra.mxu1 %vm529_vm3, %v13347_v61 }
  0x54   : > { %646 = vmatprep.mubr.bf16.mxu0 %v19447_v2  ;;  %759 = vmatprep.mubr.bf16.mxu1 %v19447_v2 }
  0x5b   : > { %11420 = vmatmul.mubr.msk.bf16.gmra.mxu0 %vm529_vm3, %v13365_v3  ;;  %11428 = vmatmul.mubr.msk.bf16.gmra.mxu1 %vm529_vm3, %v13365_v3 }
  0x5c   : > { %656 = vmatprep.mubr.bf16.mxu0 %v19447_v2  ;;  %769 = vmatprep.mubr.bf16.mxu1 %v19447_v2 }
  0x63   : > { %11421 = vmatmul.mubr.msk.bf16.gmra.mxu0 %vm529_vm3, %v13383_v12  ;;  %11429 = vmatmul.mubr.msk.bf16.gmra.mxu1 %vm529_vm3, %v13383_v12 }
  0x64   : > { %981 = vmatprep.mubr.bf16.mxu0 %v19447_v2  ;;  %1094 = vmatprep.mubr.bf16.mxu1 %v19447_v2 }
  0x6b   : > { %11463 = vmatmul.mubr.msk.bf16.vlgmr.msra.gmra.mxu0 %vm529_vm3, %v13249_v39  ;;  %11471 = vmatmul.mubr.msk.bf16.vlgmr.msra.gmra.mxu1 %vm529_vm3, %v13249_v39  ;;  %v12174_v39 = vld [vmem:[%s19439_s2 + $0x324] ss:$16 sps:$4 sm:$0xff]  }
  0x6c   : > { %1481 = vmatpush1.bf16.msra.mxu0 %v12160_v23  ;;  %1594 = vmatpush1.bf16.msra.mxu1 %v12163_v24  ;;  %v12191_v23 = vld [vmem:[%s19439_s2 + $0xc0] ss:$16 sps:$4 sm:$0xff]   ;;  %v12194_v24 = vld [vmem:[%s19439_s2 + $0xc8] ss:$16 sps:$4 sm:$0xff]  }
  0x6d   : > { %991 = vmatprep.mubr.bf16.mxu0 %v19447_v2  ;;  %1104 = vmatprep.mubr.bf16.mxu1 %v19447_v2 }
  0x6e   : > { %1482 = vmatprep.subr.bf16.mxu0 %v12168_v26  ;;  %1595 = vmatprep.subr.bf16.mxu1 %v12171_v27  ;;  %v12197_v26 = vld [vmem:[%s19439_s2 + $0xa0] ss:$16 sps:$4 sm:$0xff]   ;;  %v12200_v27 = vld [vmem:[%s19439_s2 + $0xa8] ss:$16 sps:$4 sm:$0xff]  }
  0x70   : > { %1483 = vmatpush1.bf16.msra.mxu0 %v12166_v38  ;;  %1596 = vmatpush1.bf16.msra.mxu1 %v12169_v34  ;;  %v2660_v34 = vrot.slane %v2658_v36, 5 }
  0x71   : > { %1484 = vmatprep.subr.bf16.mxu0 %v12174_v39  ;;  %1597 = vmatprep.subr.bf16.mxu1 %v12177_v46 }
  0x73   : > { %11464 = vmatmul.mubr.msk.bf16.gmra.mxu0 %vm529_vm3, %v13293_v50  ;;  %11472 = vmatmul.mubr.msk.bf16.gmra.mxu1 %vm529_vm3, %v13293_v50 }
  0x74   : > { %1001 = vmatprep.mubr.bf16.mxu0 %v19447_v2  ;;  %1114 = vmatprep.mubr.bf16.mxu1 %v19447_v2 }
  0x75   : > { %1485 = vmatpush1.bf16.msra.mxu0 %v12172_v51  ;;  %1598 = vmatpush1.bf16.msra.mxu1 %v12175_v52  ;;  %v11495_v51 = vcombine.low %v13624_v42, %v13627_v43 }
  0x76   : > { %1486 = vmatprep.subr.bf16.mxu0 %v12180_v5  ;;  %1599 = vmatprep.subr.bf16.mxu1 %v12183_v6  ;;  %v1942_v6 = vshrl.u32 %v13272_v44, 16 }
  0x79   : > { %1487 = vmatpush1.bf16.msra.mxu0 %v12178_v7  ;;  %1600 = vmatpush1.bf16.msra.mxu1 %v12181_v8  ;;  %v1945_v7 = vshll.u32 %v13272_v44, 16  ;;  %v1955_v8 = vshrl.u32 %v13277_v45, 16  ;;  %v12213_v44 = vld [vmem:[%s19439_s2 + $0x268] ss:$16 sps:$4 sm:$0xff]  }
  0x7a   : > { %2238 = vmatprep.subr.bf16.mxu0 %v12187_v9  ;;  %2351 = vmatprep.subr.bf16.mxu1 %v12190_v13  ;;  %v1951_v9 = vshll.u32 %v13277_v45, 16  ;;  %v1944_v13 = vrot.slane %v1942_v6, 4  ;;  %v12221_v45 = vld [vmem:[%s19439_s2 + $0x24c] ss:$16 sps:$4 sm:$0xff]  }
  0x7b   : > { %11465 = vmatmul.mubr.msk.bf16.gmra.mxu0 %vm529_vm3, %v13315_v55  ;;  %11473 = vmatmul.mubr.msk.bf16.gmra.mxu1 %vm529_vm3, %v13315_v55 }
  0x7c   : > { %1011 = vmatprep.mubr.bf16.mxu0 %v19447_v2  ;;  %1124 = vmatprep.mubr.bf16.mxu1 %v19447_v2 }
  0x83   : > { %11466 = vmatmul.mubr.msk.bf16.gmra.mxu0 %vm529_vm3, %v13331_v58  ;;  %11474 = vmatmul.mubr.msk.bf16.gmra.mxu1 %vm529_vm3, %v13331_v58 }
  0x84   : > { %1021 = vmatprep.mubr.bf16.mxu0 %v19447_v2  ;;  %1134 = vmatprep.mubr.bf16.mxu1 %v19447_v2 }
  0x8b   : > { %11467 = vmatmul.mubr.msk.bf16.gmra.mxu0 %vm529_vm3, %v13347_v61  ;;  %11475 = vmatmul.mubr.msk.bf16.gmra.mxu1 %vm529_vm3, %v13347_v61 }
  0x8c   : > { %1031 = vmatprep.mubr.bf16.mxu0 %v19447_v2  ;;  %1144 = vmatprep.mubr.bf16.mxu1 %v19447_v2 }
  0x93   : > { %11468 = vmatmul.mubr.msk.bf16.gmra.mxu0 %vm529_vm3, %v13365_v3  ;;  %11476 = vmatmul.mubr.msk.bf16.gmra.mxu1 %vm529_vm3, %v13365_v3 }
  0x94   : > { %1041 = vmatprep.mubr.bf16.mxu0 %v19447_v2  ;;  %1154 = vmatprep.mubr.bf16.mxu1 %v19447_v2 }
  0x9b   : > { %11469 = vmatmul.mubr.msk.bf16.gmra.mxu0 %vm529_vm3, %v13383_v12  ;;  %11477 = vmatmul.mubr.msk.bf16.gmra.mxu1 %vm529_vm3, %v13383_v12 }
  0x9c   : > { %1051 = vmatprep.mubr.bf16.mxu0 %v19447_v2  ;;  %1164 = vmatprep.mubr.bf16.mxu1 %v19447_v2 }
  0xa3   : > { %11470 = vmatmul.mubr.msk.bf16.gmra.mxu0 %vm529_vm3, %v13520_v16  ;;  %11478 = vmatmul.mubr.msk.bf16.gmra.mxu1 %vm529_vm3, %v13520_v16 }
  0xa4   : > { %1504 = vmatprep.mubr.bf16.mxu0 %v19447_v2  ;;  %1617 = vmatprep.mubr.bf16.mxu1 %v19447_v2 }
  0xab   : > { %11512 = vmatmul.mubr.msk.bf16.vlgmr.msra.gmra.mxu0 %vm529_vm3, %v13293_v50  ;;  %11520 = vmatmul.mubr.msk.bf16.vlgmr.msra.gmra.mxu1 %vm529_vm3, %v13293_v50  ;;  %v12202_v50 = vld [vmem:[%s19439_s2 + $0xac] ss:$16 sps:$4 sm:$0xff]  }
  0xac   : > { %2239 = vmatpush1.bf16.msra.mxu0 %v12185_v18  ;;  %2352 = vmatpush1.bf16.msra.mxu1 %v12188_v19  ;;  %v1957_v18 = vrot.slane %v1955_v8, 4  ;;  %v371_v19 = vld [vmem:[%s13178_s17 + $0x20] sm:$0x1] }
  0xad   : > { %1514 = vmatprep.mubr.bf16.mxu0 %v19447_v2  ;;  %1627 = vmatprep.mubr.bf16.mxu1 %v19447_v2 }
  0xae   : > { %2240 = vmatprep.subr.bf16.mxu0 %v12193_v21  ;;  %2353 = vmatprep.subr.bf16.mxu1 %v12196_v22  ;;  %v12218_v21 = vld [vmem:[%s19439_s2 + $0x244] ss:$16 sps:$4 sm:$0xff]   ;;  %v1966_v22 = vshrl.u32 %v13306_v53, 16 }
  0xb0   : > { %2241 = vmatpush1.bf16.msra.mxu0 %v12191_v23  ;;  %2354 = vmatpush1.bf16.msra.mxu1 %v12194_v24  ;;  %v1969_v23 = vshll.u32 %v13306_v53, 16  ;;  %v1979_v24 = vshrl.u32 %v13311_v54, 16  ;;  %v12216_v53 = vld [vmem:[%s19439_s2 + $0x240] ss:$16 sps:$4 sm:$0xff]   ;;  %v1968_v36 = vrot.slane %v1966_v22, 4 }
  0xb1   : > { %2242 = vmatprep.subr.bf16.mxu0 %v12199_v25  ;;  %2355 = vmatprep.subr.bf16.mxu1 %v12202_v50 }
  0xb3   : > { %11513 = vmatmul.mubr.msk.bf16.gmra.mxu0 %vm529_vm3, %v13315_v55  ;;  %11521 = vmatmul.mubr.msk.bf16.gmra.mxu1 %vm529_vm3, %v13315_v55  ;;  %v12212_v55 = vld [vmem:[%s19439_s2 + $0x264] ss:$16 sps:$4 sm:$0xff]  }
  0xb4   : > { %1524 = vmatprep.mubr.bf16.mxu0 %v19447_v2  ;;  %1637 = vmatprep.mubr.bf16.mxu1 %v19447_v2 }
  0xb5   : > { %2243 = vmatpush1.bf16.msra.mxu0 %v12197_v26  ;;  %2356 = vmatpush1.bf16.msra.mxu1 %v12200_v27 }
  0xb6   : > { %2244 = vmatprep.subr.bf16.mxu0 %v12205_v28  ;;  %2357 = vmatprep.subr.bf16.mxu1 %v12208_v29  ;;  %v1961_v28 = vshll.u32 %v371_v19, 16  ;;  %v12219_v29 = vld [vmem:[%s19439_s2 + $0x248] ss:$16 sps:$4 sm:$0xff]  }
  0xb7   : > { %v12231_v19 = vld [vmem:[%s19439_s2 + $0x208] ss:$16 sps:$4 sm:$0xff]  }
  0xb9   : > { %2245 = vmatpush1.bf16.msra.mxu0 %v12203_v30  ;;  %2358 = vmatpush1.bf16.msra.mxu1 %v12206_v33  ;;  %v1975_v30 = vshll.u32 %v13311_v54, 16 }
  0xba   : > { %2783 = vmatprep.subr.bf16.mxu0 %v12212_v55  ;;  %2896 = vmatprep.subr.bf16.mxu1 %v12215_v35  ;;  %v12227_v35 = vld [vmem:[%s19439_s2 + $0x22c] ss:$16 sps:$4 sm:$0xff]  }
  0xbb   : > { %11514 = vmatmul.mubr.msk.bf16.gmra.mxu0 %vm529_vm3, %v13331_v58  ;;  %11522 = vmatmul.mubr.msk.bf16.gmra.mxu1 %vm529_vm3, %v13331_v58  ;;  %v2649_v58 = vshrl.u32 %v13513_v14, 16 }
  0xbc   : > { %1534 = vmatprep.mubr.bf16.mxu0 %v19447_v2  ;;  %1647 = vmatprep.mubr.bf16.mxu1 %v19447_v2 }
  0xbd   : > { %v2651_v37 = vrot.slane %v2649_v58, 4 }
  0xc3   : > { %11515 = vmatmul.mubr.msk.bf16.gmra.mxu0 %vm529_vm3, %v13347_v61  ;;  %11523 = vmatmul.mubr.msk.bf16.gmra.mxu1 %vm529_vm3, %v13347_v61  ;;  %v2652_v61 = vshll.u32 %v13513_v14, 16  ;;  %v1947_v14 = vrot.slane %v1945_v7, 5 }
  0xc4   : > { %1544 = vmatprep.mubr.bf16.mxu0 %v19447_v2  ;;  %1657 = vmatprep.mubr.bf16.mxu1 %v19447_v2 }
  0xc5   : > { %v2654_v38 = vrot.slane %v2652_v61, 5  ;;  %v1948_v26 = vor.u32 %v1947_v14, %v1944_v13 }
  0xc7   : > { %v2655_v39 = vor.u32 %v2654_v38, %v2651_v37  ;;  %v1949_v61 = vrot.slane %v1948_v26, 4  ;;  %v1963_v38 = vrot.slane %v1961_v28, 5 }
  0xc9   : > { %v2656_v48 = vrot.slane %v2655_v39, 4 }
  0xcb   : > { %11516 = vmatmul.mubr.msk.bf16.gmra.mxu0 %vm529_vm3, %v13365_v3  ;;  %11524 = vmatmul.mubr.msk.bf16.gmra.mxu1 %vm529_vm3, %v13365_v3  ;;  %v2662_v3 = vshrl.u32 %v13516_v15, 16  ;;  %v2661_v0 = vsel %vm13401_vm6, %v2656_v48, %v2660_v34  ;;  %v12210_v15 = vld [vmem:[%s19439_s2 + $0x260] ss:$16 sps:$4 sm:$0xff]   ;;  %v12225_v48 = vld [vmem:[%s19439_s2 + $0x228] ss:$16 sps:$4 sm:$0xff]  }
  0xcc   : > { %1554 = vmatprep.mubr.bf16.mxu0 %v19447_v2  ;;  %1667 = vmatprep.mubr.bf16.mxu1 %v19447_v2 }
  0xcd   : > { %v2664_v41 = vrot.slane %v2662_v3, 4  ;;  %v1971_v3 = vrot.slane %v1969_v23, 5 }
  0xcf   : > { %v2665_v46 = vor.u32 %v2664_v41, %v2660_v34  ;;  %v13695_v34 = vrot.slane %v1975_v30, 5  ;;  %v1981_v41 = vrot.slane %v1979_v24, 4 }
  0xd1   : > { %v2666_v49 = vrot.slane %v2665_v46, 4  ;;  %v374_v46 = vld [vmem:[%s13178_s17 + $0x2c] sm:$0x1]  ;;  %v1982_v13 = vor.u32 %v1981_v41, %v13695_v34 }
  0xd2   : > { %v1985_v14 = vshll.u32 %v374_v46, 16 }
  0xd3   : > { %11517 = vmatmul.mubr.msk.bf16.gmra.mxu0 %vm529_vm3, %v13383_v12  ;;  %11525 = vmatmul.mubr.msk.bf16.gmra.mxu1 %vm529_vm3, %v13383_v12  ;;  %v389_v12 = vld [vmem:[%s13504_s18 + $0x8] sm:$0x1]  ;;  %v1983_v28 = vrot.slane %v1982_v13, 4 }
  0xd4   : > { %1564 = vmatprep.mubr.bf16.mxu0 %v19447_v2  ;;  %1677 = vmatprep.mubr.bf16.mxu1 %v19447_v2  ;;  %v2668_v47 = vshll.u32 %v389_v12, 16 }
  0xd6   : > { %v2670_v52 = vrot.slane %v2668_v47, 5  ;;  %v12222_v47 = vld [vmem:[%s19439_s2 + $0x220] ss:$16 sps:$4 sm:$0xff]  }
  0xd8   : > { %v2671_v1 = vsel %vm13401_vm6, %v2666_v49, %v2670_v52  ;;  %v1990_v49 = vshrl.u32 %v13322_v56, 16  ;;  %v12233_v52 = vld [vmem:[%s19439_s2 + $0x20c] ss:$16 sps:$4 sm:$0xff]  }
  0xd9   : > { %v13635_v5 = vcombine.low %v2661_v0, %v2671_v1  ;;  %v1993_v0 = vshll.u32 %v13322_v56, 16  ;;  %v2003_v1 = vshrl.u32 %v13327_v57, 16 }
  0xda   : > { %v1992_v26 = vrot.slane %v1990_v49, 4 }
  0xdb   : > { %11518 = vmatmul.mubr.msk.bf16.gmra.mxu0 %vm529_vm3, %v13520_v16  ;;  %11526 = vmatmul.mubr.msk.bf16.gmra.mxu1 %vm529_vm3, %v13520_v16  ;;  %19795 = vst [vmem:[#allocation11_spill] sm:$0xff] %v13635_v5  ;;  %v13651_v16 = vrot.slane %v1951_v9, 5  ;;  %v1972_v9 = vor.u32 %v1971_v3, %v1968_v36  ;;  %v2005_v30 = vrot.slane %v2003_v1, 4  ;;  %v2014_v36 = vshrl.u32 %v13338_v59, 16 }
  0xdc   : > { %1574 = vmatprep.mubr.bf16.mxu0 %v19447_v2  ;;  %1687 = vmatprep.mubr.bf16.mxu1 %v19447_v2  ;;  %v2017_v3 = vshll.u32 %v13338_v59, 16  ;;  %v2075_v5 = vshrl.u32 %v13379_v11, 16 }
  0xdd   : > { %v1958_v27 = vor.u32 %v1957_v18, %v13651_v16  ;;  %v1954_v8 = vsel %vm13401_vm6, %v1949_v61, %v13651_v16  ;;  %v12228_v16 = vld [vmem:[%s19439_s2 + $0x200] ss:$16 sps:$4 sm:$0xff]   ;;  %v1973_v24 = vrot.slane %v1972_v9, 4  ;;  %v377_v61 = vld [vmem:[%s13178_s17 + $0x38] sm:$0x1] }
  0xde   : > { %v2009_v49 = vshll.u32 %v377_v61, 16  ;;  %v2019_v13 = vrot.slane %v2017_v3, 5 }
  0xdf   : > { %v1959_v37 = vrot.slane %v1958_v27, 4  ;;  %v1995_v27 = vrot.slane %v1993_v0, 5  ;;  %v1978_v46 = vsel %vm13401_vm6, %v1973_v24, %v13695_v34  ;;  %v2038_v24 = vshrl.u32 %v13350_v62, 16 }
  0xe1   : > { %v1964_v56 = vsel %vm13401_vm6, %v1959_v37, %v1963_v38  ;;  %v2027_v37 = vshrl.u32 %v13343_v60, 16 }
  0xe2   : > { %v13754_v23 = vcombine.low %v1954_v8, %v1964_v56  ;;  %v2016_v56 = vrot.slane %v2014_v36, 4 }
  0xe3   : > { %11519 = vmatmul.mubr.msk.bf16.gmra.mxu0 %vm529_vm3, %v11495_v51  ;;  %11527 = vmatmul.mubr.msk.bf16.gmra.mxu1 %vm529_vm3, %v11495_v51  ;;  %v12230_v51 = vld [vmem:[%s19439_s2 + $0x204] ss:$16 sps:$4 sm:$0xff]  }
  0xe4   : > { %2262 = vmatprep.mubr.bf16.mxu0 %v19447_v2  ;;  %2375 = vmatprep.mubr.bf16.mxu1 %v19447_v2  ;;  %v2020_v61 = vor.u32 %v2019_v13, %v2016_v56 }
  0xeb   : > { %v13663_v25 = vpop.f32.mrf.mxu0  ;;  %v13665_v50 = vpop.f32.mrf.mxu1  ;;  %11568 = vmatmul.mubr.msk.bf16.vlgmr.msra.gmra.mxu0 %vm529_vm3, %v13416_v31  ;;  %11576 = vmatmul.mubr.msk.bf16.vlgmr.msra.gmra.mxu1 %vm529_vm3, %v13416_v31  ;;  %v12224_v31 = vld [vmem:[%s19439_s2 + $0x224] ss:$16 sps:$4 sm:$0xff]  }
  0xec   : > { %2784 = vmatpush1.bf16.msra.mxu0 %v12210_v15  ;;  %2897 = vmatpush1.bf16.msra.mxu1 %v12213_v44  ;;  %v1999_v15 = vshll.u32 %v13327_v57, 16  ;;  %v12236_v57 = vld [vmem:[%s19439_s2 + $0x3e4] ss:$16 sps:$4 sm:$0xff]  }
  0xed   : > { %v13679_v33 = vpop.f32.mrf.mxu0  ;;  %v13681_v55 = vpop.f32.mrf.mxu1  ;;  %2272 = vmatprep.mubr.bf16.mxu0 %v19447_v2  ;;  %2385 = vmatprep.mubr.bf16.mxu1 %v19447_v2 }
  0xee   : > { %2785 = vmatprep.subr.bf16.mxu0 %v12218_v21  ;;  %2898 = vmatprep.subr.bf16.mxu1 %v12221_v45  ;;  %v12239_v21 = vld [vmem:[%s19439_s2 + $0x3ec] ss:$16 sps:$4 sm:$0xff]  }
  0xef   : > { %v13691_v54 = vpop.f32.mrf.mxu0  ;;  %v13693_v58 = vpop.f32.mrf.mxu1 }
  0xf0   : > { %2786 = vmatpush1.bf16.msra.mxu0 %v12216_v53  ;;  %2899 = vmatpush1.bf16.msra.mxu1 %v12219_v29  ;;  %v1987_v53 = vrot.slane %v1985_v14, 5  ;;  %v2001_v29 = vrot.slane %v1999_v15, 5  ;;  %v2011_v15 = vrot.slane %v2009_v49, 5  ;;  %v2021_v49 = vrot.slane %v2020_v61, 4 }
  0xf1   : > { %v13697_v12 = vpop.f32.mrf.mxu0  ;;  %v13699_v39 = vpop.f32.mrf.mxu1  ;;  %2787 = vmatprep.subr.bf16.mxu0 %v12224_v31  ;;  %2900 = vmatprep.subr.bf16.mxu1 %v12227_v35 }
  0xf2   : > { %v1988_v59 = vsel %vm13401_vm6, %v1983_v28, %v1987_v53 }
  0xf3   : > { %v13717_v6 = vpop.f32.mrf.mxu0  ;;  %v13719_v7 = vpop.f32.mrf.mxu1  ;;  %11569 = vmatmul.mubr.msk.bf16.gmra.mxu0 %vm529_vm3, %v13450_v4  ;;  %11577 = vmatmul.mubr.msk.bf16.gmra.mxu1 %vm529_vm3, %v13450_v4  ;;  %v13788_v8 = vcombine.low %v1978_v46, %v1988_v59 }
  0xf4   : > { %2282 = vmatprep.mubr.bf16.mxu0 %v19447_v2  ;;  %2395 = vmatprep.mubr.bf16.mxu1 %v19447_v2 }
  0xf5   : > { %v13734_v44 = vpop.f32.mrf.mxu0  ;;  %v13736_v18 = vpop.f32.mrf.mxu1  ;;  %2788 = vmatpush1.bf16.msra.mxu0 %v12222_v47  ;;  %2901 = vmatpush1.bf16.msra.mxu1 %v12225_v48  ;;  %v1996_v47 = vor.u32 %v1995_v27, %v1992_v26  ;;  %v2006_v48 = vor.u32 %v2005_v30, %v2001_v29  ;;  %v2041_v26 = vshll.u32 %v13350_v62, 16  ;;  %v2051_v27 = vshrl.u32 %v13353_v63, 16 }
  0xf6   : > { %2789 = vmatprep.subr.bf16.mxu0 %v12230_v51  ;;  %2902 = vmatprep.subr.bf16.mxu1 %v12233_v52  ;;  %v2023_v51 = vshll.u32 %v13343_v60, 16 }
  0xf7   : > { %v13750_v45 = vpop.f32.mrf.mxu0  ;;  %v13752_v22 = vpop.f32.mrf.mxu1  ;;  %v1997_v9 = vrot.slane %v1996_v47, 4  ;;  %v2007_v14 = vrot.slane %v2006_v48, 4 }
  0xf9   : > { %v13756_v31 = vpop.f32.mrf.mxu0  ;;  %v13758_v35 = vpop.f32.mrf.mxu1  ;;  %2790 = vmatpush1.bf16.msra.mxu0 %v12228_v16  ;;  %2903 = vmatpush1.bf16.msra.mxu1 %v12231_v19  ;;  %v2025_v16 = vrot.slane %v2023_v51, 5  ;;  %v2029_v19 = vrot.slane %v2027_v37, 4  ;;  %v2002_v30 = vsel %vm13401_vm6, %v1997_v9, %v2001_v29  ;;  %v2012_v62 = vsel %vm13401_vm6, %v2007_v14, %v2011_v15 }
  0xfa   : > { %3328 = vmatprep.subr.bf16.mxu0 %v12236_v57  ;;  %3441 = vmatprep.subr.bf16.mxu1 %v12239_v21  ;;  %v380_v21 = vld [vmem:[%s13178_s17 + $0x44] sm:$0x1]  ;;  %v2047_v37 = vshll.u32 %v13353_v63, 16  ;;  %v13821_v48 = vcombine.low %v2002_v30, %v2012_v62  ;;  %v2040_v51 = vrot.slane %v2038_v24, 4  ;;  %v2043_v9 = vrot.slane %v2041_v26, 5 }
  0xfb   : > { %v13764_v38 = vpop.f32.mrf.mxu0  ;;  %v13766_v41 = vpop.f32.mrf.mxu1  ;;  %11570 = vmatmul.mubr.msk.bf16.gmra.mxu0 %vm529_vm3, %v13754_v23  ;;  %11578 = vmatmul.mubr.msk.bf16.gmra.mxu1 %vm529_vm3, %v13754_v23  ;;  %v2030_v36 = vor.u32 %v2029_v19, %v2025_v16  ;;  %v2033_v3 = vshll.u32 %v380_v21, 16  ;;  %v2053_v15 = vrot.slane %v2051_v27, 4  ;;  %v383_v21 = vld [vmem:[%s13178_s17 + $0x50] sm:$0x1]  ;;  %v2026_v24 = vsel %vm13401_vm6, %v2021_v49, %v2025_v16 }
  0xfc   : > { %2292 = vmatprep.mubr.bf16.mxu0 %v19447_v2  ;;  %2405 = vmatprep.mubr.bf16.mxu1 %v19447_v2  ;;  %v2049_v14 = vrot.slane %v2047_v37, 5  ;;  %v2044_v26 = vor.u32 %v2043_v9, %v2040_v51  ;;  %v19800_v27 = vmov 0  }
  0xfd   : > { %v13780_v52 = vpop.f32.mrf.mxu0  ;;  %v13782_v0 = vpop.f32.mrf.mxu1  ;;  %v2031_v56 = vrot.slane %v2030_v36, 4  ;;  %v2035_v13 = vrot.slane %v2033_v3, 5  ;;  %v2057_v36 = vshll.u32 %v383_v21, 16  ;;  %v2071_v3 = vshll.u32 %v13379_v11, 16 }
  0xfe   : > { %v2054_v62 = vor.u32 %v2053_v15, %v2049_v14  ;;  %v2045_v51 = vrot.slane %v2044_v26, 4  ;;  %v2077_v15 = vrot.slane %v2075_v5, 4 }
  0xff   : > { %v13784_v1 = vpop.f32.mrf.mxu0  ;;  %v13786_v34 = vpop.f32.mrf.mxu1 }
 0x101   : > { %v13790_v57 = vpop.f32.mrf.mxu0  ;;  %v13792_v60 = vpop.f32.mrf.mxu1 }
 0x103   : > { %v13798_v28 = vpop.f32.mrf.mxu0  ;;  %v13800_v53 = vpop.f32.mrf.mxu1  ;;  %11571 = vmatmul.mubr.msk.bf16.gmra.mxu0 %vm529_vm3, %v13788_v8  ;;  %11579 = vmatmul.mubr.msk.bf16.gmra.mxu1 %vm529_vm3, %v13788_v8 }
 0x104   : > { %2302 = vmatprep.mubr.bf16.mxu0 %v19447_v2  ;;  %2415 = vmatprep.mubr.bf16.mxu1 %v19447_v2  ;;  %v2062_v2 = vshrl.u32 %v13376_v10, 16  ;;  %v2036_v10 = vsel %vm13401_vm6, %v2031_v56, %v2035_v13  ;;  %v2059_v56 = vrot.slane %v2057_v36, 5  ;;  %v2073_v13 = vrot.slane %v2071_v3, 5 }
 0x105   : > { %v13813_v46 = vpop.f32.mrf.mxu0  ;;  %v13815_v47 = vpop.f32.mrf.mxu1  ;;  %v13854_v49 = vcombine.low %v2026_v24, %v2036_v10  ;;  %v3207_v24 = vshrl.u32 %v13627_v43, 16 }
 0x106   : > { %v2064_v9 = vrot.slane %v2062_v2, 4  ;;  %v2078_v5 = vor.u32 %v2077_v15, %v2073_v13 }
 0x107   : > { %v13817_v59 = vpop.f32.mrf.mxu0  ;;  %v13819_v29 = vpop.f32.mrf.mxu1 }
 0x109   : > { %v13823_v19 = vpop.f32.mrf.mxu0  ;;  %v13825_v63 = vpop.f32.mrf.mxu1 }
 0x10a   : > { %19796 = vst [vmem:[#allocation12_spill] sm:$0xff] %v13823_v19  ;;  %19797 = vst [vmem:[#allocation13_spill] sm:$0xff] %v13825_v63  ;;  %v2067_v63 = vrot.slane %v2065_v32, 5  ;;  %v2055_v19 = vrot.slane %v2054_v62, 4 }
 0x10b   : > { %v13831_v30 = vpop.f32.mrf.mxu0  ;;  %v13833_v61 = vpop.f32.mrf.mxu1  ;;  %11572 = vmatmul.mubr.msk.bf16.gmra.mxu0 %vm529_vm3, %v13821_v48  ;;  %11580 = vmatmul.mubr.msk.bf16.gmra.mxu1 %vm529_vm3, %v13821_v48 }
 0x10c   : > { %19798 = vst [vmem:[#allocation14_spill] sm:$0xff] %v13831_v30  ;;  %19799 = vst [vmem:[#allocation15_spill] sm:$0xff] %v13833_v61  ;;  %2312 = vmatprep.mubr.bf16.mxu0 %v19800_v27  ;;  %2425 = vmatprep.mubr.bf16.mxu1 %v19800_v27  ;;  %v2068_v32 = vor.u32 %v2067_v63, %v2064_v9 }
 0x10d   : > { %v13846_v37 = vpop.f32.mrf.mxu0  ;;  %v13848_v61 = vpop.f32.mrf.mxu1 }
 0x10e   : > { %19801 = vst [vmem:[#allocation16_spill] sm:$0xff] %v13846_v37  ;;  %19802 = vst [vmem:[#allocation17_spill] sm:$0xff] %v13848_v61  ;;  %v386_v37 = vld [vmem:[%s13178_s17 + $0x5c] sm:$0x1]  ;;  %v3194_v61 = vshrl.u32 %v13624_v42, 16 }
 0x10f   : > { %v13850_v30 = vpop.f32.mrf.mxu0  ;;  %v13852_v16 = vpop.f32.mrf.mxu1  ;;  %v2081_v10 = vshll.u32 %v386_v37, 16 }
 0x110   : > { %19803 = vst [vmem:[#allocation18_spill] sm:$0xff] %v13850_v30  ;;  %19804 = vst [vmem:[#allocation19_spill] sm:$0xff] %v13852_v16  ;;  %v3197_v30 = vshll.u32 %v13624_v42, 16  ;;  %v3203_v16 = vshll.u32 %v13627_v43, 16  ;;  %v2050_v42 = vsel %vm13401_vm6, %v2045_v51, %v2049_v14  ;;  %v2060_v43 = vsel %vm13401_vm6, %v2055_v19, %v2059_v56 }
 0x111   : > { %v13856_v21 = vpop.f32.mrf.mxu0  ;;  %v13858_v11 = vpop.f32.mrf.mxu1  ;;  %v3196_v3 = vrot.slane %v3194_v61, 4  ;;  %v3209_v51 = vrot.slane %v3207_v24, 4  ;;  %v2083_v19 = vrot.slane %v2081_v10, 5 }
 0x112   : > { %19805 = vst [vmem:[#allocation20_spill] sm:$0xff] %v13856_v21  ;;  %19806 = vst [vmem:[#allocation21_spill] sm:$0xff] %v13858_v11  ;;  %v2069_v11 = vrot.slane %v2068_v32, 4  ;;  %v3205_v14 = vrot.slane %v3203_v16, 5  ;;  %v2079_v21 = vrot.slane %v2078_v5, 4 }
 0x113   : > { %v13865_v26 = vpop.f32.mrf.mxu0  ;;  %v13867_v2 = vpop.f32.mrf.mxu1  ;;  %11573 = vmatmul.mubr.msk.bf16.gmra.mxu0 %vm529_vm3, %v13854_v49  ;;  %11581 = vmatmul.mubr.msk.bf16.gmra.mxu1 %vm529_vm3, %v13854_v49  ;;  %v392_v16 = vld [vmem:[%s13504_s18 + $0x14] sm:$0x1] }
 0x114   : > { %19807 = vst [vmem:[#allocation22_spill] sm:$0xff] %v13865_v26  ;;  %19808 = vst [vmem:[#allocation23_spill] sm:$0xff] %v13867_v2  ;;  %2322 = vmatprep.mubr.bf16.mxu0 %v19800_v27  ;;  %2435 = vmatprep.mubr.bf16.mxu1 %v19800_v27  ;;  %v3199_v2 = vrot.slane %v3197_v30, 5  ;;  %v13887_v26 = vcombine.low %v2050_v42, %v2060_v43  ;;  %v2074_v30 = vsel %vm13401_vm6, %v2069_v11, %v2073_v13 }
 0x115   : > { %v13879_v62 = vpop.f32.mrf.mxu0  ;;  %v13881_v36 = vpop.f32.mrf.mxu1  ;;  %v2084_v24 = vsel %vm13401_vm6, %v2079_v21, %v2083_v19  ;;  %v3210_v42 = vor.u32 %v3209_v51, %v3205_v14  ;;  %v3213_v43 = vshll.u32 %v392_v16, 16 }
 0x116   : > { %v3200_v32 = vor.u32 %v3199_v2, %v3196_v3  ;;  %v13916_v11 = vcombine.low %v2074_v30, %v2084_v24 }
 0x117   : > { %v13883_v63 = vpop.f32.mrf.mxu0  ;;  %v13885_v9 = vpop.f32.mrf.mxu1 }
 0x118   : > { %19809 = vst [vmem:[#allocation24_spill] sm:$0xff] %v13885_v9 }
 0x119   : > { %v13889_v56 = vpop.f32.mrf.mxu0  ;;  %v13891_v37 = vpop.f32.mrf.mxu1 }
 0x11a   : > { %19810 = vst [vmem:[#allocation25_spill] sm:$0xff] %v13889_v56  ;;  %19811 = vst [vmem:[#allocation26_spill] sm:$0xff] %v13891_v37  ;;  %v3215_v56 = vrot.slane %v3213_v43, 5  ;;  %v12242_v43 = vld [vmem:[%s19439_s2 + $0x3c4] ss:$16 sps:$4 sm:$0xff]  }
 0x11b   : > { %v13893_v15 = vpop.f32.mrf.mxu0  ;;  %v13895_v61 = vpop.f32.mrf.mxu1  ;;  %11574 = vmatmul.mubr.msk.bf16.gmra.mxu0 %vm529_vm3, %v13887_v26  ;;  %11582 = vmatmul.mubr.msk.bf16.gmra.mxu1 %vm529_vm3, %v13887_v26 }
 0x11c   : > { %19812 = vst [vmem:[#allocation27_spill] sm:$0xff] %v13893_v15  ;;  %19813 = vst [vmem:[#allocation28_spill] sm:$0xff] %v13895_v61  ;;  %2332 = vmatprep.mubr.bf16.mxu0 %v19800_v27  ;;  %2445 = vmatprep.mubr.bf16.mxu1 %v19800_v27  ;;  %v3201_v61 = vrot.slane %v3200_v32, 4  ;;  %v3211_v15 = vrot.slane %v3210_v42, 4  ;;  %v12874_v32 = vld [vmem:[%s13178_s17 + $0x10] sm:$0xf] }
 0x11d   : > { %v13908_v5 = vpop.f32.mrf.mxu0  ;;  %v13910_v10 = vpop.f32.mrf.mxu1  ;;  %v3758_v42 = vrot.slane %v12874_v32, 5 }
 0x11e   : > { %v3206_v9 = vsel %vm13401_vm6, %v3201_v61, %v3205_v14  ;;  %v3216_v3 = vsel %vm13401_vm6, %v3211_v15, %v3215_v56  ;;  %v12234_v15 = vld [vmem:[%s19439_s2 + $0x3e0] ss:$16 sps:$4 sm:$0xff]   ;;  %v12237_v61 = vld [vmem:[%s19439_s2 + $0x3e8] ss:$16 sps:$4 sm:$0xff]  }
 0x11f   : > { %v13912_v37 = vpop.f32.mrf.mxu0  ;;  %v13914_v13 = vpop.f32.mrf.mxu1  ;;  %v13926_v51 = vcombine.low %v3206_v9, %v3216_v3  ;;  %v12245_v3 = vld [vmem:[%s19439_s2 + $0x3cc] ss:$16 sps:$4 sm:$0xff]  }
 0x121   : > { %v13920_v21 = vpop.f32.mrf.mxu0  ;;  %v13922_v2 = vpop.f32.mrf.mxu1  ;;  %19814 = vst [vmem:[#allocation29_spill] sm:$0xff] %v13926_v51 }
 0x123   : > { %v13928_v19 = vpop.f32.mrf.mxu0  ;;  %v13930_v16 = vpop.f32.mrf.mxu1  ;;  %11575 = vmatmul.mubr.msk.bf16.gmra.mxu0 %vm529_vm3, %v13916_v11  ;;  %11583 = vmatmul.mubr.msk.bf16.gmra.mxu1 %vm529_vm3, %v13916_v11 }
 0x124   : > { %19815 = vst [vmem:[#allocation30_spill] sm:$0xff] %v13930_v16  ;;  %2807 = vmatprep.mubr.bf16.mxu0 %v19800_v27  ;;  %2920 = vmatprep.mubr.bf16.mxu1 %v19800_v27 }
 0x125   : > { %v13938_v14 = vpop.f32.mrf.mxu0  ;;  %v13940_v20 = vpop.f32.mrf.mxu1 }
 0x126   : > { %19816 = vst [vmem:[#allocation31_spill] sm:$0xff] %v13938_v14  ;;  %19817 = vst [vmem:[#allocation32_spill] sm:$0xff] %v13940_v20  ;;  %v12240_v20 = vld [vmem:[%s19439_s2 + $0x3c0] ss:$16 sps:$4 sm:$0xff]   ;;  %v12243_v14 = vld [vmem:[%s19439_s2 + $0x3c8] ss:$16 sps:$4 sm:$0xff]  }
 0x127   : > { %v13942_v9 = vpop.f32.mrf.mxu0  ;;  %v13944_v56 = vpop.f32.mrf.mxu1 }
 0x128   : > { %19818 = vst [vmem:[#allocation33_spill] sm:$0xff] %v13942_v9  ;;  %19819 = vst [vmem:[#allocation34_spill] sm:$0xff] %v13944_v56 }
 0x129   : > { %v13952_v30 = vpop.f32.mrf.mxu0  ;;  %v13954_v24 = vpop.f32.mrf.mxu1 }
 0x12a   : > { %19820 = vst [vmem:[#allocation35_spill] sm:$0xff] %v13952_v30  ;;  %19821 = vst [vmem:[#allocation36_spill] sm:$0xff] %v13954_v24  ;;  %v12875_v30 = vld [vmem:[%s13178_s17 + $0xc] sm:$0xf] }
 0x12b   : > { %v983_v51 = vpop.f32.mrf.mxu0  ;;  %v1096_v56 = vpop.f32.mrf.mxu1  ;;  %11617 = vmatmul.mubr.msk.bf16.vlgmr.msra.gmra.mxu0 %vm529_vm3, %v13450_v4  ;;  %11625 = vmatmul.mubr.msk.bf16.vlgmr.msra.gmra.mxu1 %vm529_vm3, %v13450_v4  ;;  %v11683_v24 = vrot.slane %v12875_v30, 9  ;;  %v3761_v4 = vrot.slane %v13429_v40, 5  ;;  %v3760_v40 = vrot.slane %v3758_v42, 4 }
 0x12c   : > { %v13969_v32 = vadd.f32 %v983_v51, %v13663_v25  ;;  %v13972_v9 = vadd.f32 %v1096_v56, %v13665_v50  ;;  %3329 = vmatpush1.bf16.msra.mxu0 %v12234_v15  ;;  %3442 = vmatpush1.bf16.msra.mxu1 %v12237_v61  ;;  %v12248_v25 = vld [vmem:[%s19439_s2 + $0x3a4] ss:$16 sps:$4 sm:$0xff]   ;;  %v12251_v50 = vld [vmem:[%s19439_s2 + $0x3ac] ss:$16 sps:$4 sm:$0xff]  }
 0x12d   : > { %v985_v16 = vpop.f32.mrf.mxu0  ;;  %v1098_v30 = vpop.f32.mrf.mxu1  ;;  %2817 = vmatprep.mubr.bf16.mxu0 %v19800_v27  ;;  %2930 = vmatprep.mubr.bf16.mxu1 %v19800_v27 }
 0x12e   : > { %19822 = vst [vmem:[#allocation37_spill] sm:$0xff] %v13969_v32  ;;  %19823 = vst [vmem:[#allocation38_spill] sm:$0xff] %v13972_v9  ;;  %v13990_v51 = vadd.f32 %v985_v16, %v13679_v33  ;;  %v13993_v56 = vadd.f32 %v1098_v30, %v13681_v55  ;;  %3330 = vmatprep.subr.bf16.mxu0 %v12242_v43  ;;  %3443 = vmatprep.subr.bf16.mxu1 %v12245_v3  ;;  %v12246_v55 = vld [vmem:[%s19439_s2 + $0x3a0] ss:$16 sps:$4 sm:$0xff]  }
 0x12f   : > { %v987_v15 = vpop.f32.mrf.mxu0  ;;  %v1100_v61 = vpop.f32.mrf.mxu1  ;;  %v3759_v33 = vsel %vm13182_vm2, %v11683_v24, %v3758_v42  ;;  %v12254_v24 = vld [vmem:[%s19439_s2 + $0x384] ss:$16 sps:$4 sm:$0xff]   ;;  %v12257_v42 = vld [vmem:[%s19439_s2 + $0x38c] ss:$16 sps:$4 sm:$0xff]  }
 0x130   : > { %19824 = vst [vmem:[#allocation39_spill] sm:$0xff] %v13990_v51  ;;  %v13996_v9 = vadd.f32 %v987_v15, %v13691_v54  ;;  %v13999_v32 = vadd.f32 %v1100_v61, %v13693_v58  ;;  %3331 = vmatpush1.bf16.msra.mxu0 %v12240_v20  ;;  %3444 = vmatpush1.bf16.msra.mxu1 %v12243_v14  ;;  %v12249_v54 = vld [vmem:[%s19439_s2 + $0x3a8] ss:$16 sps:$4 sm:$0xff]   ;;  %v12263_v15 = vld [vmem:[%s19439_s2 + $0x16c] ss:$16 sps:$4 sm:$0xff]  }
 0x131   : > { %v989_v16 = vpop.f32.mrf.mxu0  ;;  %v1102_v51 = vpop.f32.mrf.mxu1  ;;  %3332 = vmatprep.subr.bf16.mxu0 %v12248_v25  ;;  %3445 = vmatprep.subr.bf16.mxu1 %v12251_v50  ;;  %v3762_v58 = vsel %vm13182_vm2, %v3760_v40, %v3761_v4  ;;  %v12252_v50 = vld [vmem:[%s19439_s2 + $0x380] ss:$16 sps:$4 sm:$0xff]   ;;  %v12260_v40 = vld [vmem:[%s19439_s2 + $0x164] ss:$16 sps:$4 sm:$0xff]  }
 0x132   : > { %v14012_v14 = vadd.f32 %v989_v16, %v13697_v12  ;;  %v14015_v20 = vadd.f32 %v1102_v51, %v13699_v39  ;;  %v14023_v43 = vcombine.low %v3759_v33, %v3762_v58 }
 0x133   : > { %v993_v3 = vpop.f32.mrf.mxu0  ;;  %v1106_v30 = vpop.f32.mrf.mxu1  ;;  %11618 = vmatmul.mubr.msk.bf16.gmra.mxu0 %vm529_vm3, %v13754_v23  ;;  %11626 = vmatmul.mubr.msk.bf16.gmra.mxu1 %vm529_vm3, %v13754_v23 }
 0x134   : > { %19825 = vst [vmem:[#allocation40_spill] sm:$0xff] %v14023_v43  ;;  %v14030_v12 = vadd.f32 %v993_v3, %v13717_v6  ;;  %v14033_v39 = vadd.f32 %v1106_v30, %v13719_v7  ;;  %2827 = vmatprep.mubr.bf16.mxu0 %v19800_v27  ;;  %2940 = vmatprep.mubr.bf16.mxu1 %v19800_v27  ;;  %v12255_v6 = vld [vmem:[%s19439_s2 + $0x388] ss:$16 sps:$4 sm:$0xff]  }
 0x135   : > { %v995_v4 = vpop.f32.mrf.mxu0  ;;  %v1108_v25 = vpop.f32.mrf.mxu1  ;;  %3333 = vmatpush1.bf16.msra.mxu0 %v12246_v55  ;;  %3446 = vmatpush1.bf16.msra.mxu1 %v12249_v54  ;;  %v19837_v43 = vld [vmem:[#allocation20_spill] sm:$0xff] }
 0x136   : > { %v14044_v51 = vadd.f32 %v995_v4, %v13734_v44  ;;  %v14047_v7 = vadd.f32 %v1108_v25, %v13736_v18  ;;  %3334 = vmatprep.subr.bf16.mxu0 %v12254_v24  ;;  %3447 = vmatprep.subr.bf16.mxu1 %v12257_v42 }
 0x137   : > { %v997_v61 = vpop.f32.mrf.mxu0  ;;  %v1110_v33 = vpop.f32.mrf.mxu1 }
 0x138   : > { %v14056_v16 = vadd.f32 %v997_v61, %v13750_v45  ;;  %v14059_v44 = vadd.f32 %v1110_v33, %v13752_v22 }
 0x139   : > { %v999_v18 = vpop.f32.mrf.mxu0  ;;  %v1112_v55 = vpop.f32.mrf.mxu1  ;;  %3335 = vmatpush1.bf16.msra.mxu0 %v12252_v50  ;;  %3448 = vmatpush1.bf16.msra.mxu1 %v12255_v6 }
 0x13a   : > { %v14062_v54 = vadd.f32 %v999_v18, %v13756_v31  ;;  %v14065_v58 = vadd.f32 %v1112_v55, %v13758_v35  ;;  %3958 = vmatprep.subr.bf16.mxu0 %v12260_v40  ;;  %4071 = vmatprep.subr.bf16.mxu1 %v12263_v15 }
 0x13b   : > { %v1003_v24 = vpop.f32.mrf.mxu0  ;;  %v1116_v42 = vpop.f32.mrf.mxu1  ;;  %11619 = vmatmul.mubr.msk.bf16.gmra.mxu0 %vm529_vm3, %v13788_v8  ;;  %11627 = vmatmul.mubr.msk.bf16.gmra.mxu1 %vm529_vm3, %v13788_v8 }
 0x13c   : > { %v14072_v45 = vadd.f32 %v1003_v24, %v13764_v38  ;;  %v14075_v22 = vadd.f32 %v1116_v42, %v13766_v41  ;;  %2837 = vmatprep.mubr.bf16.mxu0 %v19800_v27  ;;  %2950 = vmatprep.mubr.bf16.mxu1 %v19800_v27 }
 0x13d   : > { %v1005_v31 = vpop.f32.mrf.mxu0  ;;  %v1118_v35 = vpop.f32.mrf.mxu1 }
 0x13e   : > { %v14080_v3 = vadd.f32 %v1005_v31, %v13780_v52  ;;  %v14083_v30 = vadd.f32 %v1118_v35, %v13782_v0  ;;  %v19826_v31 = vld [vmem:[#allocation12_spill] sm:$0xff] }
 0x13f   : > { %v1007_v4 = vpop.f32.mrf.mxu0  ;;  %v1120_v25 = vpop.f32.mrf.mxu1 }
 0x140   : > { %v14086_v38 = vadd.f32 %v1007_v4, %v13784_v1  ;;  %v14089_v41 = vadd.f32 %v1120_v25, %v13786_v34  ;;  %v19827_v4 = vld [vmem:[#allocation13_spill] sm:$0xff] }
 0x141   : > { %v1009_v50 = vpop.f32.mrf.mxu0  ;;  %v1122_v6 = vpop.f32.mrf.mxu1 }
 0x142   : > { %v14092_v40 = vadd.f32 %v1009_v50, %v13790_v57  ;;  %v14095_v15 = vadd.f32 %v1122_v6, %v13792_v60 }
 0x143   : > { %v1013_v52 = vpop.f32.mrf.mxu0  ;;  %v1126_v61 = vpop.f32.mrf.mxu1  ;;  %11620 = vmatmul.mubr.msk.bf16.gmra.mxu0 %vm529_vm3, %v13821_v48  ;;  %11628 = vmatmul.mubr.msk.bf16.gmra.mxu1 %vm529_vm3, %v13821_v48 }
 0x144   : > { %v14102_v0 = vadd.f32 %v1013_v52, %v13798_v28  ;;  %v14105_v1 = vadd.f32 %v1126_v61, %v13800_v53  ;;  %2847 = vmatprep.mubr.bf16.mxu0 %v19800_v27  ;;  %2960 = vmatprep.mubr.bf16.mxu1 %v19800_v27 }
 0x145   : > { %v1015_v34 = vpop.f32.mrf.mxu0  ;;  %v1128_v57 = vpop.f32.mrf.mxu1 }
 0x146   : > { %v14110_v60 = vadd.f32 %v1015_v34, %v13813_v46  ;;  %v14113_v33 = vadd.f32 %v1128_v57, %v13815_v47  ;;  %v19828_v47 = vld [vmem:[#allocation14_spill] sm:$0xff]  ;;  %v19832_v34 = vld [vmem:[#allocation16_spill] sm:$0xff] }
 0x147   : > { %v1017_v18 = vpop.f32.mrf.mxu0  ;;  %v1130_v55 = vpop.f32.mrf.mxu1 }
 0x148   : > { %v14116_v28 = vadd.f32 %v1017_v18, %v13817_v59  ;;  %v14119_v53 = vadd.f32 %v1130_v55, %v13819_v29  ;;  %v19830_v29 = vld [vmem:[#allocation15_spill] sm:$0xff]  ;;  %v19833_v18 = vld [vmem:[#allocation17_spill] sm:$0xff] }
 0x149   : > { %v1019_v24 = vpop.f32.mrf.mxu0  ;;  %v1132_v42 = vpop.f32.mrf.mxu1 }
 0x14a   : > { %v14122_v35 = vadd.f32 %v1019_v24, %v19826_v31  ;;  %v14125_v25 = vadd.f32 %v1132_v42, %v19827_v4  ;;  %v19834_v31 = vld [vmem:[#allocation18_spill] sm:$0xff] }
 0x14b   : > { %v1023_v46 = vpop.f32.mrf.mxu0  ;;  %v1136_v50 = vpop.f32.mrf.mxu1  ;;  %11621 = vmatmul.mubr.msk.bf16.gmra.mxu0 %vm529_vm3, %v13854_v49  ;;  %11629 = vmatmul.mubr.msk.bf16.gmra.mxu1 %vm529_vm3, %v13854_v49 }
 0x14c   : > { %v14132_v59 = vadd.f32 %v1023_v46, %v19828_v47  ;;  %v14135_v6 = vadd.f32 %v1136_v50, %v19830_v29  ;;  %2857 = vmatprep.mubr.bf16.mxu0 %v19800_v27  ;;  %2970 = vmatprep.mubr.bf16.mxu1 %v19800_v27  ;;  %v19835_v46 = vld [vmem:[#allocation19_spill] sm:$0xff] }
 0x14d   : > { %v1025_v52 = vpop.f32.mrf.mxu0  ;;  %v1138_v61 = vpop.f32.mrf.mxu1 }
 0x14e   : > { %19829 = vst [vmem:[#allocation12_spill] sm:$0xff] %v14132_v59  ;;  %19831 = vst [vmem:[#allocation13_spill] sm:$0xff] %v14135_v6  ;;  %v14140_v57 = vadd.f32 %v1025_v52, %v19832_v34  ;;  %v14143_v55 = vadd.f32 %v1138_v61, %v19833_v18  ;;  %v19839_v6 = vld [vmem:[#allocation21_spill] sm:$0xff]  ;;  %v19841_v61 = vld [vmem:[#allocation22_spill] sm:$0xff] }
 0x14f   : > { %v1027_v24 = vpop.f32.mrf.mxu0  ;;  %v1140_v42 = vpop.f32.mrf.mxu1 }
 0x150   : > { %v14146_v4 = vadd.f32 %v1027_v24, %v19834_v31  ;;  %v14149_v50 = vadd.f32 %v1140_v42, %v19835_v46  ;;  %v19843_v24 = vld [vmem:[#allocation23_spill] sm:$0xff] }
 0x151   : > { %v1029_v47 = vpop.f32.mrf.mxu0  ;;  %v1142_v29 = vpop.f32.mrf.mxu1 }
 0x152   : > { %19836 = vst [vmem:[#allocation14_spill] sm:$0xff] %v14149_v50  ;;  %v14152_v17 = vadd.f32 %v1029_v47, %v19837_v43  ;;  %v14155_v59 = vadd.f32 %v1142_v29, %v19839_v6 }
 0x153   : > { %v1033_v52 = vpop.f32.mrf.mxu0  ;;  %v1146_v34 = vpop.f32.mrf.mxu1  ;;  %11622 = vmatmul.mubr.msk.bf16.gmra.mxu0 %vm529_vm3, %v13887_v26  ;;  %11630 = vmatmul.mubr.msk.bf16.gmra.mxu1 %vm529_vm3, %v13887_v26 }
 0x154   : > { %19838 = vst [vmem:[#allocation15_spill] sm:$0xff] %v14152_v17  ;;  %19840 = vst [vmem:[#allocation16_spill] sm:$0xff] %v14155_v59  ;;  %v14162_v18 = vadd.f32 %v1033_v52, %v19841_v61  ;;  %v14165_v42 = vadd.f32 %v1146_v34, %v19843_v24  ;;  %2867 = vmatprep.mubr.bf16.mxu0 %v19800_v27  ;;  %2980 = vmatprep.mubr.bf16.mxu1 %v19800_v27  ;;  %v19845_v61 = vld [vmem:[#allocation24_spill] sm:$0xff]  ;;  %v19847_v17 = vld [vmem:[#allocation26_spill] sm:$0xff] }
 0x155   : > { %v1035_v43 = vpop.f32.mrf.mxu0  ;;  %v1148_v6 = vpop.f32.mrf.mxu1 }
 0x156   : > { %19842 = vst [vmem:[#allocation17_spill] sm:$0xff] %v14162_v18  ;;  %19844 = vst [vmem:[#allocation18_spill] sm:$0xff] %v14165_v42  ;;  %v14170_v31 = vadd.f32 %v1035_v43, %v13879_v62  ;;  %v14173_v46 = vadd.f32 %v1148_v6, %v13881_v36  ;;  %v19846_v18 = vld [vmem:[#allocation25_spill] sm:$0xff]  ;;  %v19848_v36 = vld [vmem:[#allocation27_spill] sm:$0xff] }
 0x157   : > { %v1037_v47 = vpop.f32.mrf.mxu0  ;;  %v1150_v29 = vpop.f32.mrf.mxu1  ;;  %v19850_v6 = vld [vmem:[#allocation28_spill] sm:$0xff] }
 0x158   : > { %v14176_v52 = vadd.f32 %v1037_v47, %v13883_v63  ;;  %v14179_v34 = vadd.f32 %v1150_v29, %v19845_v61 }
 0x159   : > { %v1039_v24 = vpop.f32.mrf.mxu0  ;;  %v1152_v42 = vpop.f32.mrf.mxu1 }
 0x15a   : > { %v14182_v59 = vadd.f32 %v1039_v24, %v19846_v18  ;;  %v14185_v50 = vadd.f32 %v1152_v42, %v19847_v17 }
 0x15b   : > { %v1043_v62 = vpop.f32.mrf.mxu0  ;;  %v1156_v43 = vpop.f32.mrf.mxu1  ;;  %11623 = vmatmul.mubr.msk.bf16.gmra.mxu0 %vm529_vm3, %v13916_v11  ;;  %11631 = vmatmul.mubr.msk.bf16.gmra.mxu1 %vm529_vm3, %v13916_v11 }
 0x15c   : > { %v14192_v63 = vadd.f32 %v1043_v62, %v19848_v36  ;;  %v14195_v47 = vadd.f32 %v1156_v43, %v19850_v6  ;;  %2877 = vmatprep.mubr.bf16.mxu0 %v19800_v27  ;;  %2990 = vmatprep.mubr.bf16.mxu1 %v19800_v27 }
 0x15d   : > { %v1045_v17 = vpop.f32.mrf.mxu0  ;;  %v1158_v18 = vpop.f32.mrf.mxu1 }
 0x15e   : > { %19849 = vst [vmem:[#allocation19_spill] sm:$0xff] %v14192_v63  ;;  %19851 = vst [vmem:[#allocation20_spill] sm:$0xff] %v14195_v47  ;;  %v14200_v42 = vadd.f32 %v1045_v17, %v13908_v5  ;;  %v14203_v29 = vadd.f32 %v1158_v18, %v13910_v10  ;;  %v19856_v10 = vld [vmem:[#allocation11_spill] sm:$0xff] }
 0x15f   : > { %v1047_v61 = vpop.f32.mrf.mxu0  ;;  %v1160_v24 = vpop.f32.mrf.mxu1 }
 0x160   : > { %v14206_v62 = vadd.f32 %v1047_v61, %v13912_v37  ;;  %v14209_v43 = vadd.f32 %v1160_v24, %v13914_v13  ;;  %v19858_v13 = vld [vmem:[#allocation30_spill] sm:$0xff]  ;;  %v19860_v61 = vld [vmem:[#allocation31_spill] sm:$0xff] }
 0x161   : > { %v1049_v36 = vpop.f32.mrf.mxu0  ;;  %v1162_v6 = vpop.f32.mrf.mxu1 }
 0x162   : > { %19852 = vst [vmem:[#allocation21_spill] sm:$0xff] %v14206_v62  ;;  %19853 = vst [vmem:[#allocation22_spill] sm:$0xff] %v14209_v43  ;;  %v14212_v47 = vadd.f32 %v1049_v36, %v13920_v21  ;;  %v14215_v63 = vadd.f32 %v1162_v6, %v13922_v2  ;;  %v19862_v36 = vld [vmem:[#allocation32_spill] sm:$0xff]  ;;  %v19864_v43 = vld [vmem:[#allocation33_spill] sm:$0xff] }
 0x163   : > { %v1053_v5 = vpop.f32.mrf.mxu0  ;;  %v1166_v17 = vpop.f32.mrf.mxu1  ;;  %11624 = vmatmul.mubr.msk.bf16.gmra.mxu0 %vm529_vm3, %v19856_v10  ;;  %11632 = vmatmul.mubr.msk.bf16.gmra.mxu1 %vm529_vm3, %v19856_v10 }
 0x164   : > { %19854 = vst [vmem:[#allocation23_spill] sm:$0xff] %v14212_v47  ;;  %19855 = vst [vmem:[#allocation24_spill] sm:$0xff] %v14215_v63  ;;  %v14222_v37 = vadd.f32 %v1053_v5, %v13928_v19  ;;  %v14225_v18 = vadd.f32 %v1166_v17, %v19858_v13  ;;  %3352 = vmatprep.mubr.bf16.mxu0 %v19800_v27  ;;  %3465 = vmatprep.mubr.bf16.mxu1 %v19800_v27  ;;  %v19866_v5 = vld [vmem:[#allocation34_spill] sm:$0xff]  ;;  %v12258_v13 = vld [vmem:[%s19439_s2 + $0x160] ss:$16 sps:$4 sm:$0xff]  }
 0x165   : > { %v1055_v21 = vpop.f32.mrf.mxu0  ;;  %v1168_v2 = vpop.f32.mrf.mxu1 }
 0x166   : > { %19857 = vst [vmem:[#allocation25_spill] sm:$0xff] %v14222_v37  ;;  %19859 = vst [vmem:[#allocation26_spill] sm:$0xff] %v14225_v18  ;;  %v14230_v24 = vadd.f32 %v1055_v21, %v19860_v61  ;;  %v14233_v6 = vadd.f32 %v1168_v2, %v19862_v36  ;;  %v12261_v21 = vld [vmem:[%s19439_s2 + $0x168] ss:$16 sps:$4 sm:$0xff]   ;;  %v19868_v2 = vld [vmem:[#allocation35_spill] sm:$0xff] }
 0x167   : > { %v1057_v63 = vpop.f32.mrf.mxu0  ;;  %v1170_v47 = vpop.f32.mrf.mxu1 }
 0x168   : > { %19861 = vst [vmem:[#allocation27_spill] sm:$0xff] %v14230_v24  ;;  %19863 = vst [vmem:[#allocation28_spill] sm:$0xff] %v14233_v6  ;;  %v14236_v19 = vadd.f32 %v1057_v63, %v19864_v43  ;;  %v14239_v17 = vadd.f32 %v1170_v47, %v19866_v5  ;;  %v19870_v6 = vld [vmem:[#allocation36_spill] sm:$0xff]  ;;  %v12266_v63 = vld [vmem:[%s19439_s2 + $0x144] ss:$16 sps:$4 sm:$0xff]  }
 0x169   : > { %v1059_v61 = vpop.f32.mrf.mxu0  ;;  %v1172_v24 = vpop.f32.mrf.mxu1  ;;  %v12269_v47 = vld [vmem:[%s19439_s2 + $0x14c] ss:$16 sps:$4 sm:$0xff]  }
 0x16a   : > { %19865 = vst [vmem:[#allocation11_spill] sm:$0xff] %v14236_v19  ;;  %19867 = vst [vmem:[#allocation30_spill] sm:$0xff] %v14239_v17  ;;  %v14248_v36 = vadd.f32 %v1059_v61, %v19868_v2  ;;  %v14251_v18 = vadd.f32 %v1172_v24, %v19870_v6  ;;  %v19872_v61 = vld [vmem:[#allocation37_spill] sm:$0xff]  ;;  %v19874_v24 = vld [vmem:[#allocation38_spill] sm:$0xff] }
 0x16b   : > { %v1506_v43 = vpop.f32.mrf.mxu0  ;;  %v1619_v5 = vpop.f32.mrf.mxu1  ;;  %11666 = vmatmul.mubr.msk.bf16.vlgmr.msra.gmra.mxu0 %vm529_vm3, %v13754_v23  ;;  %11674 = vmatmul.mubr.msk.bf16.vlgmr.msra.gmra.mxu1 %vm529_vm3, %v13754_v23  ;;  %v12272_v23 = vld [vmem:[%s19439_s2 + $0x124] ss:$16 sps:$4 sm:$0xff]  }
 0x16c   : > { %19869 = vst [vmem:[#allocation31_spill] sm:$0xff] %v14248_v36  ;;  %19871 = vst [vmem:[#allocation32_spill] sm:$0xff] %v14251_v18  ;;  %v14264_v2 = vadd.f32 %v1506_v43, %v19872_v61  ;;  %v14267_v6 = vadd.f32 %v1619_v5, %v19874_v24  ;;  %3959 = vmatpush1.bf16.msra.mxu0 %v12258_v13  ;;  %4072 = vmatpush1.bf16.msra.mxu1 %v12261_v21  ;;  %v12264_v18 = vld [vmem:[%s19439_s2 + $0x140] ss:$16 sps:$4 sm:$0xff]   ;;  %v12267_v36 = vld [vmem:[%s19439_s2 + $0x148] ss:$16 sps:$4 sm:$0xff]  }
 0x16d   : > { %v1508_v17 = vpop.f32.mrf.mxu0  ;;  %v1621_v19 = vpop.f32.mrf.mxu1  ;;  %3362 = vmatprep.mubr.bf16.mxu0 %v19800_v27  ;;  %3475 = vmatprep.mubr.bf16.mxu1 %v19800_v27  ;;  %v12275_v13 = vld [vmem:[%s19439_s2 + $0x12c] ss:$16 sps:$4 sm:$0xff]   ;;  %v19876_v21 = vld [vmem:[#allocation39_spill] sm:$0xff] }
 0x16e   : > { %19873 = vst [vmem:[#allocation33_spill] sm:$0xff] %v14264_v2  ;;  %19875 = vst [vmem:[#allocation34_spill] sm:$0xff] %v14267_v6  ;;  %v14284_v43 = vadd.f32 %v1508_v17, %v19876_v21  ;;  %v14287_v5 = vadd.f32 %v1621_v19, %v13993_v56  ;;  %3960 = vmatprep.subr.bf16.mxu0 %v12266_v63  ;;  %4073 = vmatprep.subr.bf16.mxu1 %v12269_v47  ;;  %v12270_v17 = vld [vmem:[%s19439_s2 + $0x120] ss:$16 sps:$4 sm:$0xff]   ;;  %v12273_v56 = vld [vmem:[%s19439_s2 + $0x128] ss:$16 sps:$4 sm:$0xff]  }
 0x16f   : > { %v1510_v61 = vpop.f32.mrf.mxu0  ;;  %v1623_v24 = vpop.f32.mrf.mxu1  ;;  %v12281_v19 = vld [vmem:[%s19439_s2 + $0x10c] ss:$16 sps:$4 sm:$0xff]   ;;  %v12276_v47 = vld [vmem:[%s19439_s2 + $0x100] ss:$16 sps:$4 sm:$0xff]  }
 0x170   : > { %v14290_v6 = vadd.f32 %v1510_v61, %v13996_v9  ;;  %v14293_v2 = vadd.f32 %v1623_v24, %v13999_v32  ;;  %3961 = vmatpush1.bf16.msra.mxu0 %v12264_v18  ;;  %4074 = vmatpush1.bf16.msra.mxu1 %v12267_v36  ;;  %v12278_v18 = vld [vmem:[%s19439_s2 + $0x104] ss:$16 sps:$4 sm:$0xff]  }
 0x171   : > { %v1512_v37 = vpop.f32.mrf.mxu0  ;;  %v1625_v62 = vpop.f32.mrf.mxu1  ;;  %3962 = vmatprep.subr.bf16.mxu0 %v12272_v23  ;;  %4075 = vmatprep.subr.bf16.mxu1 %v12275_v13  ;;  %v12284_v23 = vld [vmem:[%s19439_s2 + $0x2e4] ss:$16 sps:$4 sm:$0xff]   ;;  %v12287_v13 = vld [vmem:[%s19439_s2 + $0x2ec] ss:$16 sps:$4 sm:$0xff]  }
 0x172   : > { %v14302_v9 = vadd.f32 %v1512_v37, %v14012_v14  ;;  %v14305_v32 = vadd.f32 %v1625_v62, %v14015_v20 }
 0x173   : > { %v1516_v36 = vpop.f32.mrf.mxu0  ;;  %v1629_v63 = vpop.f32.mrf.mxu1  ;;  %11667 = vmatmul.mubr.msk.bf16.gmra.mxu0 %vm529_vm3, %v13788_v8  ;;  %11675 = vmatmul.mubr.msk.bf16.gmra.mxu1 %vm529_vm3, %v13788_v8  ;;  %v12279_v8 = vld [vmem:[%s19439_s2 + $0x108] ss:$16 sps:$4 sm:$0xff]  }
 0x174   : > { %v14318_v14 = vadd.f32 %v1516_v36, %v14030_v12  ;;  %v14321_v20 = vadd.f32 %v1629_v63, %v14033_v39  ;;  %3372 = vmatprep.mubr.bf16.mxu0 %v19800_v27  ;;  %3485 = vmatprep.mubr.bf16.mxu1 %v19800_v27 }
 0x175   : > { %v1518_v62 = vpop.f32.mrf.mxu0  ;;  %v1631_v37 = vpop.f32.mrf.mxu1  ;;  %3963 = vmatpush1.bf16.msra.mxu0 %v12270_v17  ;;  %4076 = vmatpush1.bf16.msra.mxu1 %v12273_v56 }
 0x176   : > { %v14332_v12 = vadd.f32 %v1518_v62, %v14044_v51  ;;  %v14335_v39 = vadd.f32 %v1631_v37, %v14047_v7  ;;  %3964 = vmatprep.subr.bf16.mxu0 %v12278_v18  ;;  %4077 = vmatprep.subr.bf16.mxu1 %v12281_v19 }
 0x177   : > { %v1520_v21 = vpop.f32.mrf.mxu0  ;;  %v1633_v61 = vpop.f32.mrf.mxu1 }
 0x178   : > { %v14344_v24 = vadd.f32 %v1520_v21, %v14056_v16  ;;  %v14347_v51 = vadd.f32 %v1633_v61, %v14059_v44 }
 0x179   : > { %v1522_v7 = vpop.f32.mrf.mxu0  ;;  %v1635_v17 = vpop.f32.mrf.mxu1  ;;  %3965 = vmatpush1.bf16.msra.mxu0 %v12276_v47  ;;  %4078 = vmatpush1.bf16.msra.mxu1 %v12279_v8 }
 0x17a   : > { %v14350_v56 = vadd.f32 %v1522_v7, %v14062_v54  ;;  %v14353_v18 = vadd.f32 %v1635_v17, %v14065_v58  ;;  %4487 = vmatprep.subr.bf16.mxu0 %v12284_v23  ;;  %4600 = vmatprep.subr.bf16.mxu1 %v12287_v13 }
 0x17b   : > { %v1526_v19 = vpop.f32.mrf.mxu0  ;;  %v1639_v36 = vpop.f32.mrf.mxu1  ;;  %11668 = vmatmul.mubr.msk.bf16.gmra.mxu0 %vm529_vm3, %v13821_v48  ;;  %11676 = vmatmul.mubr.msk.bf16.gmra.mxu1 %vm529_vm3, %v13821_v48 }
 0x17c   : > { %v14360_v16 = vadd.f32 %v1526_v19, %v14072_v45  ;;  %v14363_v44 = vadd.f32 %v1639_v36, %v14075_v22  ;;  %3382 = vmatprep.mubr.bf16.mxu0 %v19800_v27  ;;  %3495 = vmatprep.mubr.bf16.mxu1 %v19800_v27 }
 0x17d   : > { %v1528_v54 = vpop.f32.mrf.mxu0  ;;  %v1641_v58 = vpop.f32.mrf.mxu1 }
 0x17e   : > { %v14368_v63 = vadd.f32 %v1528_v54, %v14080_v3  ;;  %v14371_v62 = vadd.f32 %v1641_v58, %v14083_v30 }
 0x17f   : > { %v1530_v37 = vpop.f32.mrf.mxu0  ;;  %v1643_v48 = vpop.f32.mrf.mxu1 }
 0x180   : > { %v14374_v45 = vadd.f32 %v1530_v37, %v14086_v38  ;;  %v14377_v22 = vadd.f32 %v1643_v48, %v14089_v41 }
 0x181   : > { %v1532_v47 = vpop.f32.mrf.mxu0  ;;  %v1645_v8 = vpop.f32.mrf.mxu1 }
 0x182   : > { %v14380_v23 = vadd.f32 %v1532_v47, %v14092_v40  ;;  %v14383_v13 = vadd.f32 %v1645_v8, %v14095_v15 }
 0x183   : > { %v1536_v3 = vpop.f32.mrf.mxu0  ;;  %v1649_v21 = vpop.f32.mrf.mxu1  ;;  %11669 = vmatmul.mubr.msk.bf16.gmra.mxu0 %vm529_vm3, %v13854_v49  ;;  %11677 = vmatmul.mubr.msk.bf16.gmra.mxu1 %vm529_vm3, %v13854_v49 }
 0x184   : > { %v14390_v30 = vadd.f32 %v1536_v3, %v14102_v0  ;;  %v14393_v38 = vadd.f32 %v1649_v21, %v14105_v1  ;;  %3392 = vmatprep.mubr.bf16.mxu0 %v19800_v27  ;;  %3505 = vmatprep.mubr.bf16.mxu1 %v19800_v27  ;;  %v19879_v21 = vld [vmem:[#allocation14_spill] sm:$0xff] }
 0x185   : > { %v1538_v41 = vpop.f32.mrf.mxu0  ;;  %v1651_v40 = vpop.f32.mrf.mxu1 }
 0x186   : > { %v14398_v15 = vadd.f32 %v1538_v41, %v14110_v60  ;;  %v14401_v61 = vadd.f32 %v1651_v40, %v14113_v33  ;;  %v19877_v33 = vld [vmem:[#allocation12_spill] sm:$0xff] }
 0x187   : > { %v1540_v7 = vpop.f32.mrf.mxu0  ;;  %v1653_v49 = vpop.f32.mrf.mxu1 }
 0x188   : > { %v14404_v0 = vadd.f32 %v1540_v7, %v14116_v28  ;;  %v14407_v1 = vadd.f32 %v1653_v49, %v14119_v53  ;;  %v19878_v53 = vld [vmem:[#allocation13_spill] sm:$0xff]  ;;  %v19880_v49 = vld [vmem:[#allocation15_spill] sm:$0xff] }
 0x189   : > { %v1542_v17 = vpop.f32.mrf.mxu0  ;;  %v1655_v19 = vpop.f32.mrf.mxu1 }
 0x18a   : > { %v14410_v36 = vadd.f32 %v1542_v17, %v14122_v35  ;;  %v14413_v54 = vadd.f32 %v1655_v19, %v14125_v25  ;;  %v19881_v19 = vld [vmem:[#allocation16_spill] sm:$0xff] }
 0x18b   : > { %v1546_v60 = vpop.f32.mrf.mxu0  ;;  %v1659_v58 = vpop.f32.mrf.mxu1  ;;  %11670 = vmatmul.mubr.msk.bf16.gmra.mxu0 %vm529_vm3, %v13887_v26  ;;  %11678 = vmatmul.mubr.msk.bf16.gmra.mxu1 %vm529_vm3, %v13887_v26 }
 0x18c   : > { %v14420_v28 = vadd.f32 %v1546_v60, %v19877_v33  ;;  %v14423_v37 = vadd.f32 %v1659_v58, %v19878_v53  ;;  %3402 = vmatprep.mubr.bf16.mxu0 %v19800_v27  ;;  %3515 = vmatprep.mubr.bf16.mxu1 %v19800_v27  ;;  %v19883_v33 = vld [vmem:[#allocation18_spill] sm:$0xff] }
 0x18d   : > { %v1548_v35 = vpop.f32.mrf.mxu0  ;;  %v1661_v25 = vpop.f32.mrf.mxu1 }
 0x18e   : > { %v14428_v48 = vadd.f32 %v1548_v35, %v14140_v57  ;;  %v14431_v47 = vadd.f32 %v1661_v25, %v14143_v55  ;;  %v19882_v55 = vld [vmem:[#allocation17_spill] sm:$0xff] }
 0x18f   : > { %v1550_v8 = vpop.f32.mrf.mxu0  ;;  %v1663_v26 = vpop.f32.mrf.mxu1 }
 0x190   : > { %v14434_v3 = vadd.f32 %v1550_v8, %v14146_v4  ;;  %v14437_v41 = vadd.f32 %v1663_v26, %v19879_v21 }
 0x191   : > { %v1552_v40 = vpop.f32.mrf.mxu0  ;;  %v1665_v7 = vpop.f32.mrf.mxu1 }
 0x192   : > { %v14440_v17 = vadd.f32 %v1552_v40, %v19880_v49  ;;  %v14443_v60 = vadd.f32 %v1665_v7, %v19881_v19 }
 0x193   : > { %v1556_v57 = vpop.f32.mrf.mxu0  ;;  %v1669_v58 = vpop.f32.mrf.mxu1  ;;  %11671 = vmatmul.mubr.msk.bf16.gmra.mxu0 %vm529_vm3, %v13916_v11  ;;  %11679 = vmatmul.mubr.msk.bf16.gmra.mxu1 %vm529_vm3, %v13916_v11 }
 0x194   : > { %v14450_v4 = vadd.f32 %v1556_v57, %v19882_v55  ;;  %v14453_v53 = vadd.f32 %v1669_v58, %v19883_v33  ;;  %3412 = vmatprep.mubr.bf16.mxu0 %v19800_v27  ;;  %3525 = vmatprep.mubr.bf16.mxu1 %v19800_v27  ;;  %v12876_v57 = vld [vmem:[%s13504_s18 + $0x4] sm:$0xf] }
 0x195   : > { %v1558_v35 = vpop.f32.mrf.mxu0  ;;  %v1671_v25 = vpop.f32.mrf.mxu1  ;;  %v4371_v58 = vrot.slane %v12876_v57, 5  ;;  %v12878_v57 = vld [vmem:[%s13504_s18 + $0x8] sm:$0x1] }
 0x196   : > { %v14458_v8 = vadd.f32 %v1558_v35, %v14170_v31  ;;  %v14461_v26 = vadd.f32 %v1671_v25, %v14173_v46  ;;  %v19888_v35 = vld [vmem:[#allocation19_spill] sm:$0xff] }
 0x197   : > { %v1560_v11 = vpop.f32.mrf.mxu0  ;;  %v1673_v21 = vpop.f32.mrf.mxu1 }
 0x198   : > { %v14464_v40 = vadd.f32 %v1560_v11, %v14176_v52  ;;  %v14467_v7 = vadd.f32 %v1673_v21, %v14179_v34  ;;  %v12877_v52 = vld [vmem:[%s13504_s18] sm:$0xf]  ;;  %v19890_v11 = vld [vmem:[#allocation20_spill] sm:$0xff] }
 0x199   : > { %v1562_v49 = vpop.f32.mrf.mxu0  ;;  %v1675_v19 = vpop.f32.mrf.mxu1  ;;  %v11746_v34 = vrot.slane %v12877_v52, 9  ;;  %v4374_v52 = vrot.slane %v12878_v57, 5 }
 0x19a   : > { %19884 = vst [vmem:[#allocation35_spill] sm:$0xff] %v14464_v40  ;;  %19885 = vst [vmem:[#allocation36_spill] sm:$0xff] %v14467_v7  ;;  %v14471_v55 = vadd.f32 %v1562_v49, %v14182_v59  ;;  %v14474_v31 = vadd.f32 %v1675_v19, %v14185_v50 }
 0x19b   : > { %v1566_v46 = vpop.f32.mrf.mxu0  ;;  %v1679_v33 = vpop.f32.mrf.mxu1  ;;  %11672 = vmatmul.mubr.msk.bf16.gmra.mxu0 %vm529_vm3, %v19856_v10  ;;  %11680 = vmatmul.mubr.msk.bf16.gmra.mxu1 %vm529_vm3, %v19856_v10  ;;  %v4373_v10 = vrot.slane %v4371_v58, 4 }
 0x19c   : > { %19886 = vst [vmem:[#allocation37_spill] sm:$0xff] %v14471_v55  ;;  %19887 = vst [vmem:[#allocation38_spill] sm:$0xff] %v14474_v31  ;;  %v14482_v25 = vadd.f32 %v1566_v46, %v19888_v35  ;;  %v14485_v59 = vadd.f32 %v1679_v33, %v19890_v11  ;;  %3422 = vmatprep.mubr.bf16.mxu0 %v19800_v27  ;;  %3535 = vmatprep.mubr.bf16.mxu1 %v19800_v27  ;;  %v19896_v11 = vld [vmem:[#allocation22_spill] sm:$0xff] }
 0x19d   : > { %v1568_v50 = vpop.f32.mrf.mxu0  ;;  %v1681_v21 = vpop.f32.mrf.mxu1  ;;  %v4372_v55 = vsel %vm13182_vm2, %v11746_v34, %v4371_v58  ;;  %v19905_v58 = vld [vmem:[#allocation25_spill] sm:$0xff] }
 0x19e   : > { %19889 = vst [vmem:[#allocation39_spill] sm:$0xff] %v14482_v25  ;;  %19891 = vst [vmem:[#allocation12_spill] sm:$0xff] %v14485_v59  ;;  %v14490_v49 = vadd.f32 %v1568_v50, %v14200_v42  ;;  %v14493_v19 = vadd.f32 %v1681_v21, %v14203_v29  ;;  %v19894_v25 = vld [vmem:[#allocation21_spill] sm:$0xff]  ;;  %v4375_v42 = vsel %vm13182_vm2, %v4373_v10, %v4374_v52  ;;  %v19907_v10 = vld [vmem:[#allocation26_spill] sm:$0xff] }
 0x19f   : > { %v1570_v46 = vpop.f32.mrf.mxu0  ;;  %v1683_v35 = vpop.f32.mrf.mxu1  ;;  %v14506_v21 = vcombine.low %v4372_v55, %v4375_v42  ;;  %v19909_v52 = vld [vmem:[#allocation27_spill] sm:$0xff]  ;;  %v19911_v42 = vld [vmem:[#allocation28_spill] sm:$0xff] }
 0x1a0   : > { %19892 = vst [vmem:[#allocation13_spill] sm:$0xff] %v14490_v49  ;;  %19893 = vst [vmem:[#allocation14_spill] sm:$0xff] %v14493_v19  ;;  %v14497_v33 = vadd.f32 %v1570_v46, %v19894_v25  ;;  %v14500_v59 = vadd.f32 %v1683_v35, %v19896_v11  ;;  %v19900_v19 = vld [vmem:[#allocation23_spill] sm:$0xff]  ;;  %v19902_v49 = vld [vmem:[#allocation24_spill] sm:$0xff] }
 0x1a1   : > { %v1572_v50 = vpop.f32.mrf.mxu0  ;;  %v1685_v29 = vpop.f32.mrf.mxu1  ;;  %19899 = vst [vmem:[#allocation17_spill] sm:$0xff] %v14506_v21  ;;  %v19904_v35 = vld [vmem:[#allocation29_spill] sm:$0xff]  ;;  %v19913_v21 = vld [vmem:[#allocation11_spill] sm:$0xff] }
 0x1a2   : > { %19895 = vst [vmem:[#allocation15_spill] sm:$0xff] %v14497_v33  ;;  %19897 = vst [vmem:[#allocation16_spill] sm:$0xff] %v14500_v59  ;;  %v14509_v57 = vadd.f32 %v1572_v50, %v19900_v19  ;;  %v14512_v7 = vadd.f32 %v1685_v29, %v19902_v49  ;;  %v12881_v33 = vld [vmem:[%s13178_s17 + $0x20] sm:$0x1] }
 0x1a3   : > { %v1576_v25 = vpop.f32.mrf.mxu0  ;;  %v1689_v46 = vpop.f32.mrf.mxu1  ;;  %11673 = vmatmul.mubr.msk.bf16.gmra.mxu0 %vm529_vm3, %v19904_v35  ;;  %11681 = vmatmul.mubr.msk.bf16.gmra.mxu1 %vm529_vm3, %v19904_v35  ;;  %v3768_v40 = vrot.slane %v12881_v33, 5 }
 0x1a4   : > { %19901 = vst [vmem:[#allocation18_spill] sm:$0xff] %v14509_v57  ;;  %19903 = vst [vmem:[#allocation19_spill] sm:$0xff] %v14512_v7  ;;  %v14519_v34 = vadd.f32 %v1576_v25, %v19905_v58  ;;  %v14522_v55 = vadd.f32 %v1689_v46, %v19907_v10  ;;  %3982 = vmatprep.mubr.bf16.mxu0 %v19800_v27  ;;  %4095 = vmatprep.mubr.bf16.mxu1 %v19800_v27  ;;  %v19915_v58 = vld [vmem:[#allocation30_spill] sm:$0xff]  ;;  %v12282_v10 = vld [vmem:[%s19439_s2 + $0x2e0] ss:$16 sps:$4 sm:$0xff]  }
 0x1a5   : > { %v1578_v49 = vpop.f32.mrf.mxu0  ;;  %v1691_v19 = vpop.f32.mrf.mxu1 }
 0x1a6   : > { %19906 = vst [vmem:[#allocation20_spill] sm:$0xff] %v14519_v34  ;;  %19908 = vst [vmem:[#allocation21_spill] sm:$0xff] %v14522_v55  ;;  %v14527_v11 = vadd.f32 %v1578_v49, %v19909_v52  ;;  %v14530_v50 = vadd.f32 %v1691_v19, %v19911_v42  ;;  %v12285_v49 = vld [vmem:[%s19439_s2 + $0x2e8] ss:$16 sps:$4 sm:$0xff]   ;;  %v19917_v42 = vld [vmem:[#allocation31_spill] sm:$0xff] }
 0x1a7   : > { %v1580_v29 = vpop.f32.mrf.mxu0  ;;  %v1693_v35 = vpop.f32.mrf.mxu1  ;;  %v12288_v55 = vld [vmem:[%s19439_s2 + $0x2c0] ss:$16 sps:$4 sm:$0xff]   ;;  %v12291_v34 = vld [vmem:[%s19439_s2 + $0x2c8] ss:$16 sps:$4 sm:$0xff]  }
 0x1a8   : > { %19910 = vst [vmem:[#allocation22_spill] sm:$0xff] %v14527_v11  ;;  %19912 = vst [vmem:[#allocation9_spill] sm:$0xff] %v14530_v50  ;;  %v14533_v25 = vadd.f32 %v1580_v29, %v19913_v21  ;;  %v14536_v46 = vadd.f32 %v1693_v35, %v19915_v58  ;;  %v19919_v11 = vld [vmem:[#allocation32_spill] sm:$0xff]  ;;  %v12290_v29 = vld [vmem:[%s19439_s2 + $0x2c4] ss:$16 sps:$4 sm:$0xff]  }
 0x1a9   : > { %v1582_v52 = vpop.f32.mrf.mxu0  ;;  %v1695_v19 = vpop.f32.mrf.mxu1  ;;  %v12293_v35 = vld [vmem:[%s19439_s2 + $0x2cc] ss:$16 sps:$4 sm:$0xff]  }
 0x1aa   : > { %19914 = vst [vmem:[#allocation23_spill] sm:$0xff] %v14533_v25  ;;  %19916 = vst [vmem:[#allocation24_spill] sm:$0xff] %v14536_v46  ;;  %v14545_v50 = vadd.f32 %v1582_v52, %v19917_v42  ;;  %v14548_v21 = vadd.f32 %v1695_v19, %v19919_v11  ;;  %v19921_v25 = vld [vmem:[#allocation10_spill] sm:$0xff]  ;;  %v19922_v52 = vld [vmem:[#allocation33_spill] sm:$0xff] }
 0x1ab   : > { %v2264_v58 = vpop.f32.mrf.mxu0  ;;  %v2377_v46 = vpop.f32.mrf.mxu1  ;;  %11730 = vmatmul.mubr.msk.bf16.vlgmr.msra.gmra.mxu0 %vm529_vm3, %v19921_v25  ;;  %11738 = vmatmul.mubr.msk.bf16.vlgmr.msra.gmra.mxu1 %vm529_vm3, %v19921_v25  ;;  %v19924_v11 = vld [vmem:[#allocation34_spill] sm:$0xff] }
 0x1ac   : > { %19918 = vst [vmem:[#allocation29_spill] sm:$0xff] %v14545_v50  ;;  %19920 = vst [vmem:[#allocation25_spill] sm:$0xff] %v14548_v21  ;;  %v14561_v42 = vadd.f32 %v2264_v58, %v19922_v52  ;;  %v14564_v19 = vadd.f32 %v2377_v46, %v19924_v11  ;;  %4488 = vmatpush1.bf16.msra.mxu0 %v12282_v10  ;;  %4601 = vmatpush1.bf16.msra.mxu1 %v12285_v49  ;;  %v12879_v21 = vld [vmem:[%s13178_s17 + $0x1c] sm:$0xf]  ;;  %v12296_v46 = vld [vmem:[%s19439_s2 + $0x2a4] ss:$16 sps:$4 sm:$0xff]  }
 0x1ad   : > { %v3765_v50 = vrot.slane %v12879_v21, 5  ;;  %v2266_v25 = vpop.f32.mrf.mxu0  ;;  %v2379_v7 = vpop.f32.mrf.mxu1  ;;  %3992 = vmatprep.mubr.bf16.mxu0 %v19800_v27  ;;  %4105 = vmatprep.mubr.bf16.mxu1 %v19800_v27  ;;  %v12299_v10 = vld [vmem:[%s19439_s2 + $0x2ac] ss:$16 sps:$4 sm:$0xff]   ;;  %v12880_v11 = vld [vmem:[%s13178_s17 + $0x18] sm:$0xf] }
 0x1ae   : > { %19923 = vst [vmem:[#allocation26_spill] sm:$0xff] %v14561_v42  ;;  %19925 = vst [vmem:[#allocation27_spill] sm:$0xff] %v14564_v19  ;;  %v14582_v49 = vadd.f32 %v2266_v25, %v14284_v43  ;;  %v14585_v21 = vadd.f32 %v2379_v7, %v14287_v5  ;;  %4489 = vmatprep.subr.bf16.mxu0 %v12290_v29  ;;  %4602 = vmatprep.subr.bf16.mxu1 %v12293_v35  ;;  %v11684_v19 = vrot.slane %v12880_v11, 9  ;;  %v12294_v7 = vld [vmem:[%s19439_s2 + $0x2a0] ss:$16 sps:$4 sm:$0xff]   ;;  %v19926_v25 = vld [vmem:[#allocation40_spill] sm:$0xff] }
 0x1af   : > { %v2268_v58 = vpop.f32.mrf.mxu0  ;;  %v2381_v52 = vpop.f32.mrf.mxu1  ;;  %v3767_v59 = vrot.slane %v3765_v50, 4  ;;  %v19954_v31 = vld [vmem:[#allocation20_spill] sm:$0xff] }
 0x1b0   : > { %v14589_v42 = vadd.f32 %v2268_v58, %v14290_v6  ;;  %v14592_v57 = vadd.f32 %v2381_v52, %v14293_v2  ;;  %4490 = vmatpush1.bf16.msra.mxu0 %v12288_v55  ;;  %4603 = vmatpush1.bf16.msra.mxu1 %v12291_v34  ;;  %v12297_v6 = vld [vmem:[%s19439_s2 + $0x2a8] ss:$16 sps:$4 sm:$0xff]   ;;  %v12302_v34 = vld [vmem:[%s19439_s2 + $0x284] ss:$16 sps:$4 sm:$0xff]   ;;  %v12305_v55 = vld [vmem:[%s19439_s2 + $0x28c] ss:$16 sps:$4 sm:$0xff]  }
 0x1b1   : > { %v2270_v43 = vpop.f32.mrf.mxu0  ;;  %v2383_v5 = vpop.f32.mrf.mxu1  ;;  %4491 = vmatprep.subr.bf16.mxu0 %v12296_v46  ;;  %4604 = vmatprep.subr.bf16.mxu1 %v12299_v10  ;;  %v3769_v10 = vsel %vm13182_vm2, %v3767_v59, %v3768_v40  ;;  %v12882_v58 = vld [vmem:[%s13178_s17 + $0x28] sm:$0xf]  ;;  %v12308_v59 = vld [vmem:[%s19439_s2 + $0x464] ss:$16 sps:$4 sm:$0xff]  }
 0x1b2   : > { %v14602_v2 = vadd.f32 %v2270_v43, %v14302_v9  ;;  %v14605_v33 = vadd.f32 %v2383_v5, %v14305_v32  ;;  %v3766_v9 = vsel %vm13182_vm2, %v11684_v19, %v3765_v50  ;;  %v3772_v52 = vrot.slane %v12882_v58, 5  ;;  %v12311_v19 = vld [vmem:[%s19439_s2 + $0x46c] ss:$16 sps:$4 sm:$0xff]  }
 0x1b3   : > { %v2274_v29 = vpop.f32.mrf.mxu0  ;;  %v2387_v35 = vpop.f32.mrf.mxu1  ;;  %11731 = vmatmul.mubr.msk.bf16.gmra.mxu0 %vm529_vm3, %v19926_v25  ;;  %11739 = vmatmul.mubr.msk.bf16.gmra.mxu1 %vm529_vm3, %v19926_v25 }
 0x1b4   : > { %v14620_v32 = vadd.f32 %v2274_v29, %v14318_v14  ;;  %v14623_v46 = vadd.f32 %v2387_v35, %v14321_v20  ;;  %4002 = vmatprep.mubr.bf16.mxu0 %v19800_v27  ;;  %4115 = vmatprep.mubr.bf16.mxu1 %v19800_v27  ;;  %v12300_v14 = vld [vmem:[%s19439_s2 + $0x280] ss:$16 sps:$4 sm:$0xff]   ;;  %v12303_v20 = vld [vmem:[%s19439_s2 + $0x288] ss:$16 sps:$4 sm:$0xff]   ;;  %v12883_v29 = vld [vmem:[%s13178_s17 + $0x24] sm:$0xf] }
 0x1b5   : > { %v2276_v11 = vpop.f32.mrf.mxu0  ;;  %v2389_v43 = vpop.f32.mrf.mxu1  ;;  %4492 = vmatpush1.bf16.msra.mxu0 %v12294_v7  ;;  %4605 = vmatpush1.bf16.msra.mxu1 %v12297_v6  ;;  %v14648_v6 = vcombine.low %v3766_v9, %v3769_v10 }
 0x1b6   : > { %v14637_v50 = vadd.f32 %v2276_v11, %v14332_v12  ;;  %v14640_v40 = vadd.f32 %v2389_v43, %v14335_v39  ;;  %4493 = vmatprep.subr.bf16.mxu0 %v12302_v34  ;;  %4606 = vmatprep.subr.bf16.mxu1 %v12305_v55  ;;  %v11685_v12 = vrot.slane %v12883_v29, 9  ;;  %v3774_v34 = vrot.slane %v3772_v52, 4  ;;  %v12884_v55 = vld [vmem:[%s13178_s17 + $0x2c] sm:$0x1] }
 0x1b7   : > { %v2278_v5 = vpop.f32.mrf.mxu0  ;;  %v2391_v7 = vpop.f32.mrf.mxu1  ;;  %v3775_v58 = vrot.slane %v12884_v55, 5 }
 0x1b8   : > { %19927 = vst [vmem:[#allocation28_spill] sm:$0xff] %v14640_v40  ;;  %v14652_v35 = vadd.f32 %v2278_v5, %v14344_v24  ;;  %v14655_v39 = vadd.f32 %v2391_v7, %v14347_v51  ;;  %v3773_v51 = vsel %vm13182_vm2, %v11685_v12, %v3772_v52  ;;  %v12886_v12 = vld [vmem:[%s13178_s17 + $0x30] sm:$0xf] }
 0x1b9   : > { %v2280_v11 = vpop.f32.mrf.mxu0  ;;  %v2393_v43 = vpop.f32.mrf.mxu1  ;;  %4494 = vmatpush1.bf16.msra.mxu0 %v12300_v14  ;;  %4607 = vmatpush1.bf16.msra.mxu1 %v12303_v20  ;;  %v3776_v14 = vsel %vm13182_vm2, %v3774_v34, %v3775_v58  ;;  %v12885_v20 = vld [vmem:[%s13178_s17 + $0x34] sm:$0xf]  ;;  %v11686_v55 = vrot.slane %v12886_v12, 9 }
 0x1ba   : > { %v14659_v40 = vadd.f32 %v2280_v11, %v14350_v56  ;;  %v14662_v9 = vadd.f32 %v2393_v43, %v14353_v18  ;;  %5016 = vmatprep.subr.bf16.mxu0 %v12308_v59  ;;  %5129 = vmatprep.subr.bf16.mxu1 %v12311_v19  ;;  %v3779_v59 = vrot.slane %v12885_v20, 5  ;;  %v14687_v29 = vcombine.low %v3773_v51, %v3776_v14  ;;  %v12887_v43 = vld [vmem:[%s13178_s17 + $0x38] sm:$0x1] }
 0x1bb   : > { %v2284_v24 = vpop.f32.mrf.mxu0  ;;  %v2397_v10 = vpop.f32.mrf.mxu1  ;;  %11732 = vmatmul.mubr.msk.bf16.gmra.mxu0 %vm529_vm3, %v14648_v6  ;;  %11740 = vmatmul.mubr.msk.bf16.gmra.mxu1 %vm529_vm3, %v14648_v6 }
 0x1bc   : > { %v14671_v56 = vadd.f32 %v2284_v24, %v14360_v16  ;;  %v14674_v18 = vadd.f32 %v2397_v10, %v14363_v44  ;;  %4012 = vmatprep.mubr.bf16.mxu0 %v19800_v27  ;;  %4125 = vmatprep.mubr.bf16.mxu1 %v19800_v27  ;;  %v3781_v58 = vrot.slane %v3779_v59, 4 }
 0x1bd   : > { %v2286_v19 = vpop.f32.mrf.mxu0  ;;  %v2399_v5 = vpop.f32.mrf.mxu1 }
 0x1be   : > { %v14682_v52 = vadd.f32 %v2286_v19, %v14368_v63  ;;  %v14685_v16 = vadd.f32 %v2399_v5, %v14371_v62  ;;  %v3782_v63 = vrot.slane %v12887_v43, 5  ;;  %v12888_v19 = vld [vmem:[%s13178_s17 + $0x40] sm:$0xf]  ;;  %v12889_v43 = vld [vmem:[%s13178_s17 + $0x3c] sm:$0xf] }
 0x1bf   : > { %v2288_v44 = vpop.f32.mrf.mxu0  ;;  %v2401_v7 = vpop.f32.mrf.mxu1  ;;  %v3786_v5 = vrot.slane %v12888_v19, 5 }
 0x1c0   : > { %v14691_v11 = vadd.f32 %v2288_v44, %v14374_v45  ;;  %v14694_v34 = vadd.f32 %v2401_v7, %v14377_v22  ;;  %v3780_v45 = vsel %vm13182_vm2, %v11686_v55, %v3779_v59 }
 0x1c1   : > { %v2290_v24 = vpop.f32.mrf.mxu0  ;;  %v2403_v10 = vpop.f32.mrf.mxu1 }
 0x1c2   : > { %v14698_v62 = vadd.f32 %v2290_v24, %v14380_v23  ;;  %v14701_v51 = vadd.f32 %v2403_v10, %v14383_v13  ;;  %v3783_v13 = vsel %vm13182_vm2, %v3781_v58, %v3782_v63  ;;  %v11687_v24 = vrot.slane %v12889_v43, 9 }
 0x1c3   : > { %v2294_v14 = vpop.f32.mrf.mxu0  ;;  %v2407_v20 = vpop.f32.mrf.mxu1  ;;  %11733 = vmatmul.mubr.msk.bf16.gmra.mxu0 %vm529_vm3, %v14687_v29  ;;  %11741 = vmatmul.mubr.msk.bf16.gmra.mxu1 %vm529_vm3, %v14687_v29  ;;  %v14726_v55 = vcombine.low %v3780_v45, %v3783_v13  ;;  %v3788_v63 = vrot.slane %v3786_v5, 4 }
 0x1c4   : > { %v14710_v22 = vadd.f32 %v2294_v14, %v14390_v30  ;;  %v14713_v23 = vadd.f32 %v2407_v20, %v14393_v38  ;;  %4022 = vmatprep.mubr.bf16.mxu0 %v19800_v27  ;;  %4135 = vmatprep.mubr.bf16.mxu1 %v19800_v27  ;;  %v12890_v14 = vld [vmem:[%s13178_s17 + $0x44] sm:$0x1] }
 0x1c5   : > { %v2296_v44 = vpop.f32.mrf.mxu0  ;;  %v2409_v7 = vpop.f32.mrf.mxu1 }
 0x1c6   : > { %v14721_v59 = vadd.f32 %v2296_v44, %v14398_v15  ;;  %v14724_v30 = vadd.f32 %v2409_v7, %v14401_v61  ;;  %v3789_v15 = vrot.slane %v12890_v14, 5  ;;  %v12891_v7 = vld [vmem:[%s13178_s17 + $0x4c] sm:$0xf] }
 0x1c7   : > { %v2298_v38 = vpop.f32.mrf.mxu0  ;;  %v2411_v12 = vpop.f32.mrf.mxu1 }
 0x1c8   : > { %v14730_v10 = vadd.f32 %v2298_v38, %v14404_v0  ;;  %v14733_v58 = vadd.f32 %v2411_v12, %v14407_v1  ;;  %v3787_v0 = vsel %vm13182_vm2, %v11687_v24, %v3786_v5  ;;  %v3793_v38 = vrot.slane %v12891_v7, 5 }
 0x1c9   : > { %v2300_v20 = vpop.f32.mrf.mxu0  ;;  %v2413_v19 = vpop.f32.mrf.mxu1 }
 0x1ca   : > { %v14737_v61 = vadd.f32 %v2300_v20, %v14410_v36  ;;  %v14740_v45 = vadd.f32 %v2413_v19, %v14413_v54  ;;  %v3790_v54 = vsel %vm13182_vm2, %v3788_v63, %v3789_v15  ;;  %v12892_v20 = vld [vmem:[%s13178_s17 + $0x48] sm:$0xf]  ;;  %v3795_v15 = vrot.slane %v3793_v38, 4 }
 0x1cb   : > { %v2304_v13 = vpop.f32.mrf.mxu0  ;;  %v2417_v44 = vpop.f32.mrf.mxu1  ;;  %11734 = vmatmul.mubr.msk.bf16.gmra.mxu0 %vm529_vm3, %v14726_v55  ;;  %11742 = vmatmul.mubr.msk.bf16.gmra.mxu1 %vm529_vm3, %v14726_v55  ;;  %v14765_v14 = vcombine.low %v3787_v0, %v3790_v54  ;;  %v11688_v19 = vrot.slane %v12892_v20, 9 }
 0x1cc   : > { %v14749_v1 = vadd.f32 %v2304_v13, %v14420_v28  ;;  %v14752_v36 = vadd.f32 %v2417_v44, %v14423_v37  ;;  %4032 = vmatprep.mubr.bf16.mxu0 %v19800_v27  ;;  %4145 = vmatprep.mubr.bf16.mxu1 %v19800_v27  ;;  %v12893_v44 = vld [vmem:[%s13178_s17 + $0x50] sm:$0x1] }
 0x1cd   : > { %v2306_v12 = vpop.f32.mrf.mxu0  ;;  %v2419_v43 = vpop.f32.mrf.mxu1 }
 0x1ce   : > { %v14760_v5 = vadd.f32 %v2306_v12, %v14428_v48  ;;  %v14763_v28 = vadd.f32 %v2419_v43, %v14431_v47  ;;  %v3796_v48 = vrot.slane %v12893_v44, 5 }
 0x1cf   : > { %v2308_v37 = vpop.f32.mrf.mxu0  ;;  %v2421_v24 = vpop.f32.mrf.mxu1 }
 0x1d0   : > { %v14769_v13 = vadd.f32 %v2308_v37, %v14434_v3  ;;  %v14772_v63 = vadd.f32 %v2421_v24, %v14437_v41  ;;  %v3794_v3 = vsel %vm13182_vm2, %v11688_v19, %v3793_v38  ;;  %v12894_v37 = vld [vmem:[%s13178_s17 + $0x58] sm:$0xf] }
 0x1d1   : > { %v2310_v7 = vpop.f32.mrf.mxu0  ;;  %v2423_v12 = vpop.f32.mrf.mxu1  ;;  %v3800_v24 = vrot.slane %v12894_v37, 5 }
 0x1d2   : > { %v14776_v47 = vadd.f32 %v2310_v7, %v14440_v17  ;;  %v14779_v0 = vadd.f32 %v2423_v12, %v14443_v60  ;;  %v3797_v60 = vsel %vm13182_vm2, %v3795_v15, %v3796_v48  ;;  %v12895_v12 = vld [vmem:[%s13178_s17 + $0x54] sm:$0xf]  ;;  %v19936_v15 = vld [vmem:[#allocation36_spill] sm:$0xff] }
 0x1d3   : > { %v2314_v54 = vpop.f32.mrf.mxu0  ;;  %v2427_v43 = vpop.f32.mrf.mxu1  ;;  %11735 = vmatmul.mubr.msk.bf16.gmra.mxu0 %vm529_vm3, %v14765_v14  ;;  %11743 = vmatmul.mubr.msk.bf16.gmra.mxu1 %vm529_vm3, %v14765_v14  ;;  %v14804_v7 = vcombine.low %v3794_v3, %v3797_v60  ;;  %v3802_v37 = vrot.slane %v3800_v24, 4  ;;  %v19940_v3 = vld [vmem:[#allocation38_spill] sm:$0xff] }
 0x1d4   : > { %19928 = vst [vmem:[#allocation11_spill] sm:$0xff] %v14779_v0  ;;  %v14788_v41 = vadd.f32 %v2314_v54, %v14450_v4  ;;  %v14791_v17 = vadd.f32 %v2427_v43, %v14453_v53  ;;  %4042 = vmatprep.mubr.bf16.mxu0 %v19800_v27  ;;  %4155 = vmatprep.mubr.bf16.mxu1 %v19800_v27  ;;  %v11689_v54 = vrot.slane %v12895_v12, 9  ;;  %v19934_v43 = vld [vmem:[#allocation35_spill] sm:$0xff] }
 0x1d5   : > { %v2316_v20 = vpop.f32.mrf.mxu0  ;;  %v2429_v44 = vpop.f32.mrf.mxu1  ;;  %19933 = vst [vmem:[#allocation33_spill] sm:$0xff] %v14804_v7 }
 0x1d6   : > { %19929 = vst [vmem:[#allocation30_spill] sm:$0xff] %v14788_v41  ;;  %19930 = vst [vmem:[#allocation31_spill] sm:$0xff] %v14791_v17  ;;  %v14799_v38 = vadd.f32 %v2316_v20, %v14458_v8  ;;  %v14802_v4 = vadd.f32 %v2429_v44, %v14461_v26  ;;  %v12896_v41 = vld [vmem:[%s13178_s17 + $0x5c] sm:$0x1]  ;;  %v12897_v26 = vld [vmem:[%s13504_s18 + $0x10] sm:$0xf] }
 0x1d7   : > { %v2318_v53 = vpop.f32.mrf.mxu0  ;;  %v2431_v19 = vpop.f32.mrf.mxu1  ;;  %v3803_v8 = vrot.slane %v12896_v41, 5  ;;  %v4900_v44 = vrot.slane %v12897_v26, 5  ;;  %v3801_v41 = vsel %vm13182_vm2, %v11689_v54, %v3800_v24  ;;  %v19947_v24 = vld [vmem:[#allocation14_spill] sm:$0xff]  ;;  %s12997_s17 = smov 116  }
 0x1d8   : > { %19931 = vst [vmem:[#allocation32_spill] sm:$0xff] %v14799_v38  ;;  %19932 = vst [vmem:[#allocation10_spill] sm:$0xff] %v14802_v4  ;;  %v14808_v17 = vadd.f32 %v2318_v53, %v19934_v43  ;;  %v14811_v48 = vadd.f32 %v2431_v19, %v19936_v15  ;;  %v19938_v4 = vld [vmem:[#allocation37_spill] sm:$0xff]  ;;  %v12898_v19 = vld [vmem:[%s13504_s18 + $0xc] sm:$0xf] }
 0x1d9   : > { %v2320_v20 = vpop.f32.mrf.mxu0  ;;  %v2433_v38 = vpop.f32.mrf.mxu1  ;;  %v11796_v43 = vrot.slane %v12898_v19, 9  ;;  %v19942_v15 = vld [vmem:[#allocation39_spill] sm:$0xff]  ;;  %v3804_v26 = vsel %vm13182_vm2, %v3802_v37, %v3803_v8 }
 0x1da   : > { %19935 = vst [vmem:[#allocation34_spill] sm:$0xff] %v14808_v17  ;;  %19937 = vst [vmem:[#allocation40_spill] sm:$0xff] %v14811_v48  ;;  %v14816_v0 = vadd.f32 %v2320_v20, %v19938_v4  ;;  %v14819_v60 = vadd.f32 %v2433_v38, %v19940_v3  ;;  %v19944_v20 = vld [vmem:[#allocation12_spill] sm:$0xff]  ;;  %v12899_v19 = vld [vmem:[%s13504_s18 + $0x14] sm:$0x1]  ;;  %s13001_s18 = smov 4  }
 0x1db   : > { %v2324_v12 = vpop.f32.mrf.mxu0  ;;  %v2437_v53 = vpop.f32.mrf.mxu1  ;;  %11736 = vmatmul.mubr.msk.bf16.gmra.mxu0 %vm529_vm3, %v14804_v7  ;;  %11744 = vmatmul.mubr.msk.bf16.gmra.mxu1 %vm529_vm3, %v14804_v7  ;;  %v19950_v7 = vld [vmem:[#allocation16_spill] sm:$0xff] }
 0x1dc   : > { %19939 = vst [vmem:[#allocation35_spill] sm:$0xff] %v14816_v0  ;;  %19941 = vst [vmem:[#allocation36_spill] sm:$0xff] %v14819_v60  ;;  %v14829_v4 = vadd.f32 %v2324_v12, %v19942_v15  ;;  %v14832_v38 = vadd.f32 %v2437_v53, %v19944_v20  ;;  %4052 = vmatprep.mubr.bf16.mxu0 %v19800_v27  ;;  %4165 = vmatprep.mubr.bf16.mxu1 %v19800_v27  ;;  %v19946_v0 = vld [vmem:[#allocation13_spill] sm:$0xff]  ;;  %v4902_v12 = vrot.slane %v4900_v44, 4 }
 0x1dd   : > { %v2326_v3 = vpop.f32.mrf.mxu0  ;;  %v2439_v60 = vpop.f32.mrf.mxu1  ;;  %v4903_v15 = vrot.slane %v12899_v19, 5  ;;  %v19952_v19 = vld [vmem:[#allocation18_spill] sm:$0xff] }
 0x1de   : > { %19943 = vst [vmem:[#allocation37_spill] sm:$0xff] %v14829_v4  ;;  %19945 = vst [vmem:[#allocation38_spill] sm:$0xff] %v14832_v38  ;;  %v14839_v48 = vadd.f32 %v2326_v3, %v19946_v0  ;;  %v14842_v54 = vadd.f32 %v2439_v60, %v19947_v24  ;;  %v14845_v38 = vcombine.low %v3801_v41, %v3804_v26  ;;  %v19949_v4 = vld [vmem:[#allocation15_spill] sm:$0xff] }
 0x1df   : > { %v2328_v53 = vpop.f32.mrf.mxu0  ;;  %v2441_v20 = vpop.f32.mrf.mxu1  ;;  %v4901_v0 = vsel %vm13182_vm2, %v11796_v43, %v4900_v44  ;;  %v4904_v8 = vsel %vm13182_vm2, %v4902_v12, %v4903_v15  ;;  %v19953_v41 = vld [vmem:[#allocation19_spill] sm:$0xff]  ;;  %v19955_v44 = vld [vmem:[#allocation21_spill] sm:$0xff] }
 0x1e0   : > { %19948 = vst [vmem:[#allocation39_spill] sm:$0xff] %v14842_v54  ;;  %v14848_v17 = vadd.f32 %v2328_v53, %v19949_v4  ;;  %v14851_v37 = vadd.f32 %v2441_v20, %v19950_v7  ;;  %v14857_v24 = vcombine.low %v4901_v0, %v4904_v8  ;;  %v19957_v20 = vld [vmem:[#allocation22_spill] sm:$0xff]  ;;  %v19959_v8 = vld [vmem:[#allocation9_spill] sm:$0xff] }
 0x1e1   : > { %v2330_v60 = vpop.f32.mrf.mxu0  ;;  %v2443_v3 = vpop.f32.mrf.mxu1 }
 0x1e2   : > { %19951 = vst [vmem:[#allocation12_spill] sm:$0xff] %v14857_v24  ;;  %v14860_v54 = vadd.f32 %v2330_v60, %v19952_v19  ;;  %v14863_v26 = vadd.f32 %v2443_v3, %v19953_v41  ;;  %v19961_v41 = vld [vmem:[#allocation23_spill] sm:$0xff] }
 0x1e3   : > { %v2334_v4 = vpop.f32.mrf.mxu0  ;;  %v2447_v53 = vpop.f32.mrf.mxu1  ;;  %11737 = vmatmul.mubr.msk.bf16.gmra.mxu0 %vm529_vm3, %v14845_v38  ;;  %11745 = vmatmul.mubr.msk.bf16.gmra.mxu1 %vm529_vm3, %v14845_v38 }
 0x1e4   : > { %v14870_v7 = vadd.f32 %v2334_v4, %v19954_v31  ;;  %v14873_v43 = vadd.f32 %v2447_v53, %v19955_v44  ;;  %4511 = vmatprep.mubr.bf16.mxu0 %v19800_v27  ;;  %4624 = vmatprep.mubr.bf16.mxu1 %v19800_v27  ;;  %v19963_v31 = vld [vmem:[#allocation24_spill] sm:$0xff]  ;;  %v12306_v44 = vld [vmem:[%s19439_s2 + $0x460] ss:$16 sps:$4 sm:$0xff]  }
 0x1e5   : > { %v2336_v12 = vpop.f32.mrf.mxu0  ;;  %v2449_v15 = vpop.f32.mrf.mxu1 }
 0x1e6   : > { %19956 = vst [vmem:[#allocation13_spill] sm:$0xff] %v14873_v43  ;;  %v14878_v0 = vadd.f32 %v2336_v12, %v19957_v20  ;;  %v14881_v60 = vadd.f32 %v2449_v15, %v19959_v8  ;;  %v12309_v12 = vld [vmem:[%s19439_s2 + $0x468] ss:$16 sps:$4 sm:$0xff]   ;;  %v19965_v15 = vld [vmem:[#allocation29_spill] sm:$0xff] }
 0x1e7   : > { %v2338_v3 = vpop.f32.mrf.mxu0  ;;  %v2451_v19 = vpop.f32.mrf.mxu1 }
 0x1e8   : > { %19958 = vst [vmem:[#allocation14_spill] sm:$0xff] %v14878_v0  ;;  %19960 = vst [vmem:[#allocation15_spill] sm:$0xff] %v14881_v60  ;;  %v14884_v4 = vadd.f32 %v2338_v3, %v19961_v41  ;;  %v14887_v53 = vadd.f32 %v2451_v19, %v19963_v31  ;;  %v19967_v60 = vld [vmem:[#allocation25_spill] sm:$0xff]  ;;  %v12317_v19 = vld [vmem:[%s19439_s2 + $0x44c] ss:$16 sps:$4 sm:$0xff]  }
 0x1e9   : > { %v2340_v20 = vpop.f32.mrf.mxu0  ;;  %v2453_v24 = vpop.f32.mrf.mxu1  ;;  %v12314_v3 = vld [vmem:[%s19439_s2 + $0x444] ss:$16 sps:$4 sm:$0xff]  }
 0x1ea   : > { %19962 = vst [vmem:[#allocation16_spill] sm:$0xff] %v14884_v4  ;;  %19964 = vst [vmem:[#allocation18_spill] sm:$0xff] %v14887_v53  ;;  %v14896_v8 = vadd.f32 %v2340_v20, %v19965_v15  ;;  %v14899_v0 = vadd.f32 %v2453_v24, %v19967_v60  ;;  %v19969_v20 = vld [vmem:[#allocation26_spill] sm:$0xff]  ;;  %v19971_v24 = vld [vmem:[#allocation27_spill] sm:$0xff] }
 0x1eb   : > { %v2809_v41 = vpop.f32.mrf.mxu0  ;;  %v2922_v31 = vpop.f32.mrf.mxu1  ;;  %11780 = vmatmul.mubr.msk.bf16.vlgmr.msra.gmra.mxu0 %vm529_vm3, %v19926_v25  ;;  %11788 = vmatmul.mubr.msk.bf16.vlgmr.msra.gmra.mxu1 %vm529_vm3, %v19926_v25  ;;  %v12320_v25 = vld [vmem:[%s19439_s2 + $0x424] ss:$16 sps:$4 sm:$0xff]  }
 0x1ec   : > { %19966 = vst [vmem:[#allocation19_spill] sm:$0xff] %v14896_v8  ;;  %19968 = vst [vmem:[#allocation20_spill] sm:$0xff] %v14899_v0  ;;  %v14912_v15 = vadd.f32 %v2809_v41, %v19969_v20  ;;  %v14915_v60 = vadd.f32 %v2922_v31, %v19971_v24  ;;  %5017 = vmatpush1.bf16.msra.mxu0 %v12306_v44  ;;  %5130 = vmatpush1.bf16.msra.mxu1 %v12309_v12  ;;  %v12312_v0 = vld [vmem:[%s19439_s2 + $0x440] ss:$16 sps:$4 sm:$0xff]   ;;  %v12315_v8 = vld [vmem:[%s19439_s2 + $0x448] ss:$16 sps:$4 sm:$0xff]  }
 0x1ed   : > { %v2811_v53 = vpop.f32.mrf.mxu0  ;;  %v2924_v4 = vpop.f32.mrf.mxu1  ;;  %4521 = vmatprep.mubr.bf16.mxu0 %v19800_v27  ;;  %4634 = vmatprep.mubr.bf16.mxu1 %v19800_v27  ;;  %v12323_v44 = vld [vmem:[%s19439_s2 + $0x42c] ss:$16 sps:$4 sm:$0xff]  }
 0x1ee   : > { %19970 = vst [vmem:[#allocation21_spill] sm:$0xff] %v14912_v15  ;;  %19972 = vst [vmem:[#allocation22_spill] sm:$0xff] %v14915_v60  ;;  %v14932_v12 = vadd.f32 %v2811_v53, %v14582_v49  ;;  %v14935_v41 = vadd.f32 %v2924_v4, %v14585_v21  ;;  %5018 = vmatprep.subr.bf16.mxu0 %v12314_v3  ;;  %5131 = vmatprep.subr.bf16.mxu1 %v12317_v19  ;;  %v12318_v49 = vld [vmem:[%s19439_s2 + $0x420] ss:$16 sps:$4 sm:$0xff]   ;;  %v12321_v21 = vld [vmem:[%s19439_s2 + $0x428] ss:$16 sps:$4 sm:$0xff]  }
 0x1ef   : > { %v2813_v31 = vpop.f32.mrf.mxu0  ;;  %v2926_v20 = vpop.f32.mrf.mxu1  ;;  %v12329_v4 = vld [vmem:[%s19439_s2 + $0x40c] ss:$16 sps:$4 sm:$0xff]   ;;  %v12324_v19 = vld [vmem:[%s19439_s2 + $0x400] ss:$16 sps:$4 sm:$0xff]  }
 0x1f0   : > { %v14938_v24 = vadd.f32 %v2813_v31, %v14589_v42  ;;  %v14941_v60 = vadd.f32 %v2926_v20, %v14592_v57  ;;  %5019 = vmatpush1.bf16.msra.mxu0 %v12312_v0  ;;  %5132 = vmatpush1.bf16.msra.mxu1 %v12315_v8  ;;  %v12326_v0 = vld [vmem:[%s19439_s2 + $0x404] ss:$16 sps:$4 sm:$0xff]  }
 0x1f1   : > { %v2815_v15 = vpop.f32.mrf.mxu0  ;;  %v2928_v43 = vpop.f32.mrf.mxu1  ;;  %5020 = vmatprep.subr.bf16.mxu0 %v12320_v25  ;;  %5133 = vmatprep.subr.bf16.mxu1 %v12323_v44 }
 0x1f2   : > { %v14950_v42 = vadd.f32 %v2815_v15, %v14602_v2  ;;  %v14953_v57 = vadd.f32 %v2928_v43, %v14605_v33 }
 0x1f3   : > { %v2819_v53 = vpop.f32.mrf.mxu0  ;;  %v2932_v8 = vpop.f32.mrf.mxu1  ;;  %11781 = vmatmul.mubr.msk.bf16.gmra.mxu0 %vm529_vm3, %v14648_v6  ;;  %11789 = vmatmul.mubr.msk.bf16.gmra.mxu1 %vm529_vm3, %v14648_v6 }
 0x1f4   : > { %v14966_v2 = vadd.f32 %v2819_v53, %v14620_v32  ;;  %v14969_v33 = vadd.f32 %v2932_v8, %v14623_v46  ;;  %4531 = vmatprep.mubr.bf16.mxu0 %v19800_v27  ;;  %4644 = vmatprep.mubr.bf16.mxu1 %v19800_v27  ;;  %v12327_v32 = vld [vmem:[%s19439_s2 + $0x408] ss:$16 sps:$4 sm:$0xff]  }
 0x1f5   : > { %v2821_v43 = vpop.f32.mrf.mxu0  ;;  %v2934_v3 = vpop.f32.mrf.mxu1  ;;  %5021 = vmatpush1.bf16.msra.mxu0 %v12318_v49  ;;  %5134 = vmatpush1.bf16.msra.mxu1 %v12321_v21  ;;  %v19973_v46 = vld [vmem:[#allocation28_spill] sm:$0xff] }
 0x1f6   : > { %v14980_v15 = vadd.f32 %v2821_v43, %v14637_v50  ;;  %v14983_v25 = vadd.f32 %v2934_v3, %v19973_v46  ;;  %5022 = vmatprep.subr.bf16.mxu0 %v12326_v0  ;;  %5135 = vmatprep.subr.bf16.mxu1 %v12329_v4 }
 0x1f7   : > { %v2823_v44 = vpop.f32.mrf.mxu0  ;;  %v2936_v31 = vpop.f32.mrf.mxu1 }
 0x1f8   : > { %v14986_v20 = vadd.f32 %v2823_v44, %v14652_v35  ;;  %v14989_v49 = vadd.f32 %v2936_v31, %v14655_v39 }
 0x1f9   : > { %v2825_v21 = vpop.f32.mrf.mxu0  ;;  %v2938_v53 = vpop.f32.mrf.mxu1  ;;  %5023 = vmatpush1.bf16.msra.mxu0 %v12324_v19  ;;  %5136 = vmatpush1.bf16.msra.mxu1 %v12327_v32 }
 0x1fa   : > { %v14992_v50 = vadd.f32 %v2825_v21, %v14659_v40  ;;  %v14995_v8 = vadd.f32 %v2938_v53, %v14662_v9 }
 0x1fb   : > { %v2829_v0 = vpop.f32.mrf.mxu0  ;;  %v2942_v4 = vpop.f32.mrf.mxu1  ;;  %11782 = vmatmul.mubr.msk.bf16.gmra.mxu0 %vm529_vm3, %v14687_v29  ;;  %11790 = vmatmul.mubr.msk.bf16.gmra.mxu1 %vm529_vm3, %v14687_v29 }
 0x1fc   : > { %v15002_v35 = vadd.f32 %v2829_v0, %v14671_v56  ;;  %v15005_v39 = vadd.f32 %v2942_v4, %v14674_v18  ;;  %4541 = vmatprep.mubr.bf16.mxu0 %v19800_v27  ;;  %4654 = vmatprep.mubr.bf16.mxu1 %v19800_v27 }
 0x1fd   : > { %v2831_v40 = vpop.f32.mrf.mxu0  ;;  %v2944_v9 = vpop.f32.mrf.mxu1 }
 0x1fe   : > { %v15010_v43 = vadd.f32 %v2831_v40, %v14682_v52  ;;  %v15013_v3 = vadd.f32 %v2944_v9, %v14685_v16 }
 0x1ff   : > { %v2833_v19 = vpop.f32.mrf.mxu0  ;;  %v2946_v32 = vpop.f32.mrf.mxu1 }
 0x200   : > { %v15016_v56 = vadd.f32 %v2833_v19, %v14691_v11  ;;  %v15019_v18 = vadd.f32 %v2946_v32, %v14694_v34 }
 0x201   : > { %v2835_v46 = vpop.f32.mrf.mxu0  ;;  %v2948_v44 = vpop.f32.mrf.mxu1 }
 0x202   : > { %v15022_v31 = vadd.f32 %v2835_v46, %v14698_v62  ;;  %v15025_v21 = vadd.f32 %v2948_v44, %v14701_v51 }
 0x203   : > { %v2839_v52 = vpop.f32.mrf.mxu0  ;;  %v2952_v53 = vpop.f32.mrf.mxu1  ;;  %11783 = vmatmul.mubr.msk.bf16.gmra.mxu0 %vm529_vm3, %v14726_v55  ;;  %11791 = vmatmul.mubr.msk.bf16.gmra.mxu1 %vm529_vm3, %v14726_v55 }
 0x204   : > { %v15032_v16 = vadd.f32 %v2839_v52, %v14710_v22  ;;  %v15035_v11 = vadd.f32 %v2952_v53, %v14713_v23  ;;  %4551 = vmatprep.mubr.bf16.mxu0 %v19800_v27  ;;  %4664 = vmatprep.mubr.bf16.mxu1 %v19800_v27 }
 0x205   : > { %v2841_v34 = vpop.f32.mrf.mxu0  ;;  %v2954_v62 = vpop.f32.mrf.mxu1 }
 0x206   : > { %v15040_v51 = vadd.f32 %v2841_v34, %v14721_v59  ;;  %v15043_v0 = vadd.f32 %v2954_v62, %v14724_v30 }
 0x207   : > { %v2843_v4 = vpop.f32.mrf.mxu0  ;;  %v2956_v40 = vpop.f32.mrf.mxu1 }
 0x208   : > { %v15046_v22 = vadd.f32 %v2843_v4, %v14730_v10  ;;  %v15049_v23 = vadd.f32 %v2956_v40, %v14733_v58 }
 0x209   : > { %v2845_v9 = vpop.f32.mrf.mxu0  ;;  %v2958_v19 = vpop.f32.mrf.mxu1 }
 0x20a   : > { %v15052_v32 = vadd.f32 %v2845_v9, %v14737_v61  ;;  %v15055_v46 = vadd.f32 %v2958_v19, %v14740_v45  ;;  %v19978_v9 = vld [vmem:[#allocation11_spill] sm:$0xff] }
 0x20b   : > { %v2849_v59 = vpop.f32.mrf.mxu0  ;;  %v2962_v44 = vpop.f32.mrf.mxu1  ;;  %11784 = vmatmul.mubr.msk.bf16.gmra.mxu0 %vm529_vm3, %v14765_v14  ;;  %11792 = vmatmul.mubr.msk.bf16.gmra.mxu1 %vm529_vm3, %v14765_v14 }
 0x20c   : > { %v15062_v30 = vadd.f32 %v2849_v59, %v14749_v1  ;;  %v15065_v10 = vadd.f32 %v2962_v44, %v14752_v36  ;;  %4561 = vmatprep.mubr.bf16.mxu0 %v19800_v27  ;;  %4674 = vmatprep.mubr.bf16.mxu1 %v19800_v27 }
 0x20d   : > { %v2851_v58 = vpop.f32.mrf.mxu0  ;;  %v2964_v61 = vpop.f32.mrf.mxu1 }
 0x20e   : > { %v15070_v45 = vadd.f32 %v2851_v58, %v14760_v5  ;;  %v15073_v52 = vadd.f32 %v2964_v61, %v14763_v28  ;;  %v19980_v28 = vld [vmem:[#allocation33_spill] sm:$0xff] }
 0x20f   : > { %v2853_v53 = vpop.f32.mrf.mxu0  ;;  %v2966_v34 = vpop.f32.mrf.mxu1 }
 0x210   : > { %19974 = vst [vmem:[#allocation9_spill] sm:$0xff] %v15073_v52  ;;  %v15076_v1 = vadd.f32 %v2853_v53, %v14769_v13  ;;  %v15079_v36 = vadd.f32 %v2966_v34, %v14772_v63  ;;  %v19981_v13 = vld [vmem:[#allocation30_spill] sm:$0xff]  ;;  %v19983_v63 = vld [vmem:[#allocation31_spill] sm:$0xff]  ;;  %v19985_v53 = vld [vmem:[#allocation32_spill] sm:$0xff] }
 0x211   : > { %v2855_v62 = vpop.f32.mrf.mxu0  ;;  %v2968_v4 = vpop.f32.mrf.mxu1 }
 0x212   : > { %19975 = vst [vmem:[#allocation23_spill] sm:$0xff] %v15076_v1  ;;  %19976 = vst [vmem:[#allocation24_spill] sm:$0xff] %v15079_v36  ;;  %v15082_v40 = vadd.f32 %v2855_v62, %v14776_v47  ;;  %v15085_v19 = vadd.f32 %v2968_v4, %v19978_v9  ;;  %v19986_v62 = vld [vmem:[#allocation10_spill] sm:$0xff]  ;;  %v19991_v1 = vld [vmem:[#allocation36_spill] sm:$0xff] }
 0x213   : > { %v2859_v5 = vpop.f32.mrf.mxu0  ;;  %v2972_v59 = vpop.f32.mrf.mxu1  ;;  %11785 = vmatmul.mubr.msk.bf16.gmra.mxu0 %vm529_vm3, %v19980_v28  ;;  %11793 = vmatmul.mubr.msk.bf16.gmra.mxu1 %vm529_vm3, %v19980_v28 }
 0x214   : > { %19977 = vst [vmem:[#allocation29_spill] sm:$0xff] %v15082_v40  ;;  %19979 = vst [vmem:[#allocation25_spill] sm:$0xff] %v15085_v19  ;;  %v15092_v44 = vadd.f32 %v2859_v5, %v19981_v13  ;;  %v15095_v58 = vadd.f32 %v2972_v59, %v19983_v63  ;;  %4571 = vmatprep.mubr.bf16.mxu0 %v19800_v27  ;;  %4684 = vmatprep.mubr.bf16.mxu1 %v19800_v27  ;;  %v19987_v40 = vld [vmem:[#allocation34_spill] sm:$0xff]  ;;  %v19988_v13 = vld [vmem:[#allocation40_spill] sm:$0xff] }
 0x215   : > { %v2861_v47 = vpop.f32.mrf.mxu0  ;;  %v2974_v61 = vpop.f32.mrf.mxu1 }
 0x216   : > { %19982 = vst [vmem:[#allocation26_spill] sm:$0xff] %v15092_v44  ;;  %19984 = vst [vmem:[#allocation27_spill] sm:$0xff] %v15095_v58  ;;  %v15100_v34 = vadd.f32 %v2861_v47, %v19985_v53  ;;  %v15103_v4 = vadd.f32 %v2974_v61, %v19986_v62  ;;  %v19989_v44 = vld [vmem:[#allocation35_spill] sm:$0xff] }
 0x217   : > { %v2863_v9 = vpop.f32.mrf.mxu0  ;;  %v2976_v19 = vpop.f32.mrf.mxu1 }
 0x218   : > { %v15106_v5 = vadd.f32 %v2863_v9, %v19987_v40  ;;  %v15109_v59 = vadd.f32 %v2976_v19, %v19988_v13  ;;  %v19993_v40 = vld [vmem:[#allocation37_spill] sm:$0xff]  ;;  %v19994_v19 = vld [vmem:[#allocation38_spill] sm:$0xff]  ;;  %v19997_v9 = vld [vmem:[#allocation39_spill] sm:$0xff] }
 0x219   : > { %v2865_v63 = vpop.f32.mrf.mxu0  ;;  %v2978_v58 = vpop.f32.mrf.mxu1 }
 0x21a   : > { %v15112_v36 = vadd.f32 %v2865_v63, %v19989_v44  ;;  %v15115_v52 = vadd.f32 %v2978_v58, %v19991_v1 }
 0x21b   : > { %v2869_v47 = vpop.f32.mrf.mxu0  ;;  %v2982_v53 = vpop.f32.mrf.mxu1  ;;  %11786 = vmatmul.mubr.msk.bf16.gmra.mxu0 %vm529_vm3, %v14845_v38  ;;  %11794 = vmatmul.mubr.msk.bf16.gmra.mxu1 %vm529_vm3, %v14845_v38 }
 0x21c   : > { %19990 = vst [vmem:[#allocation28_spill] sm:$0xff] %v15112_v36  ;;  %19992 = vst [vmem:[#allocation11_spill] sm:$0xff] %v15115_v52  ;;  %v15122_v61 = vadd.f32 %v2869_v47, %v19993_v40  ;;  %v15125_v62 = vadd.f32 %v2982_v53, %v19994_v19  ;;  %4581 = vmatprep.mubr.bf16.mxu0 %v19800_v27  ;;  %4694 = vmatprep.mubr.bf16.mxu1 %v19800_v27 }
 0x21d   : > { %v2871_v1 = vpop.f32.mrf.mxu0  ;;  %v2984_v44 = vpop.f32.mrf.mxu1 }
 0x21e   : > { %19995 = vst [vmem:[#allocation33_spill] sm:$0xff] %v15125_v62  ;;  %v15130_v58 = vadd.f32 %v2871_v1, %v14839_v48  ;;  %v15133_v13 = vadd.f32 %v2984_v44, %v19997_v9  ;;  %v20003_v44 = vld [vmem:[#allocation17_spill] sm:$0xff]  ;;  %v20007_v9 = vld [vmem:[#allocation14_spill] sm:$0xff] }
 0x21f   : > { %v2873_v63 = vpop.f32.mrf.mxu0  ;;  %v2986_v52 = vpop.f32.mrf.mxu1 }
 0x220   : > { %19996 = vst [vmem:[#allocation30_spill] sm:$0xff] %v15130_v58  ;;  %19998 = vst [vmem:[#allocation31_spill] sm:$0xff] %v15133_v13  ;;  %v15136_v47 = vadd.f32 %v2873_v63, %v14848_v17  ;;  %v15139_v53 = vadd.f32 %v2986_v52, %v14851_v37  ;;  %v20005_v37 = vld [vmem:[#allocation13_spill] sm:$0xff]  ;;  %v20013_v13 = vld [vmem:[#allocation20_spill] sm:$0xff] }
 0x221   : > { %v2875_v40 = vpop.f32.mrf.mxu0  ;;  %v2988_v19 = vpop.f32.mrf.mxu1 }
 0x222   : > { %19999 = vst [vmem:[#allocation32_spill] sm:$0xff] %v15136_v47  ;;  %20000 = vst [vmem:[#allocation10_spill] sm:$0xff] %v15139_v53  ;;  %v15142_v36 = vadd.f32 %v2875_v40, %v14860_v54  ;;  %v15145_v62 = vadd.f32 %v2988_v19, %v14863_v26  ;;  %v20008_v40 = vld [vmem:[#allocation15_spill] sm:$0xff]  ;;  %v20009_v53 = vld [vmem:[#allocation16_spill] sm:$0xff] }
 0x223   : > { %v2879_v48 = vpop.f32.mrf.mxu0  ;;  %v2992_v1 = vpop.f32.mrf.mxu1  ;;  %11787 = vmatmul.mubr.msk.bf16.gmra.mxu0 %vm529_vm3, %v20003_v44  ;;  %11795 = vmatmul.mubr.msk.bf16.gmra.mxu1 %vm529_vm3, %v20003_v44 }
 0x224   : > { %20001 = vst [vmem:[#allocation34_spill] sm:$0xff] %v15142_v36  ;;  %20002 = vst [vmem:[#allocation40_spill] sm:$0xff] %v15145_v62  ;;  %v15152_v17 = vadd.f32 %v2879_v48, %v14870_v7  ;;  %v15155_v52 = vadd.f32 %v2992_v1, %v20005_v37  ;;  %5040 = vmatprep.mubr.bf16.mxu0 %v19800_v27  ;;  %5153 = vmatprep.mubr.bf16.mxu1 %v19800_v27  ;;  %v20010_v48 = vld [vmem:[#allocation18_spill] sm:$0xff] }
 0x225   : > { %v2881_v54 = vpop.f32.mrf.mxu0  ;;  %v2994_v26 = vpop.f32.mrf.mxu1 }
 0x226   : > { %20004 = vst [vmem:[#allocation35_spill] sm:$0xff] %v15152_v17  ;;  %20006 = vst [vmem:[#allocation36_spill] sm:$0xff] %v15155_v52  ;;  %v15160_v63 = vadd.f32 %v2881_v54, %v20007_v9  ;;  %v15163_v19 = vadd.f32 %v2994_v26, %v20008_v40  ;;  %v20011_v17 = vld [vmem:[#allocation19_spill] sm:$0xff] }
 0x227   : > { %v2883_v62 = vpop.f32.mrf.mxu0  ;;  %v2996_v36 = vpop.f32.mrf.mxu1 }
 0x228   : > { %v15166_v7 = vadd.f32 %v2883_v62, %v20009_v53  ;;  %v15169_v1 = vadd.f32 %v2996_v36, %v20010_v48  ;;  %v20015_v62 = vld [vmem:[#allocation21_spill] sm:$0xff]  ;;  %v20016_v36 = vld [vmem:[#allocation22_spill] sm:$0xff] }
 0x229   : > { %v2885_v37 = vpop.f32.mrf.mxu0  ;;  %v2998_v52 = vpop.f32.mrf.mxu1 }
 0x22a   : > { %v15172_v47 = vadd.f32 %v2885_v37, %v20011_v17  ;;  %v15175_v58 = vadd.f32 %v2998_v52, %v20013_v13 }
 0x22b   : > { %v3354_v54 = vpop.f32.mrf.mxu0  ;;  %v3467_v9 = vpop.f32.mrf.mxu1  ;;  %11830 = vmatmul.mubr.msk.bf16.vlgmr.msra.gmra.mxu0 %vm529_vm3, %v14648_v6  ;;  %11838 = vmatmul.mubr.msk.bf16.vlgmr.msra.gmra.mxu1 %vm529_vm3, %v14648_v6 }
 0x22c   : > { %20012 = vst [vmem:[#allocation37_spill] sm:$0xff] %v15172_v47  ;;  %20014 = vst [vmem:[#allocation38_spill] sm:$0xff] %v15175_v58  ;;  %v15182_v53 = vadd.f32 %v3354_v54, %v20015_v62  ;;  %v15185_v26 = vadd.f32 %v3467_v9, %v20016_v36  ;;  %5050 = vmatprep.mubr.bf16.mxu0 %v19800_v27  ;;  %5163 = vmatprep.mubr.bf16.mxu1 %v19800_v27 }
 0x22d   : > { %v3356_v13 = vpop.f32.mrf.mxu0  ;;  %v3469_v17 = vpop.f32.mrf.mxu1 }
 0x22e   : > { %v15190_v52 = vadd.f32 %v3356_v13, %v14932_v12  ;;  %v15193_v40 = vadd.f32 %v3469_v17, %v14935_v41 }
 0x22f   : > { %v3358_v48 = vpop.f32.mrf.mxu0  ;;  %v3471_v6 = vpop.f32.mrf.mxu1 }
 0x230   : > { %v15196_v37 = vadd.f32 %v3358_v48, %v14938_v24  ;;  %v15199_v54 = vadd.f32 %v3471_v6, %v14941_v60 }
 0x231   : > { %v3360_v9 = vpop.f32.mrf.mxu0  ;;  %v3473_v62 = vpop.f32.mrf.mxu1 }
 0x232   : > { %v15202_v36 = vadd.f32 %v3360_v9, %v14950_v42  ;;  %v15205_v58 = vadd.f32 %v3473_v62, %v14953_v57 }
 0x233   : > { %v3364_v12 = vpop.f32.mrf.mxu0  ;;  %v3477_v13 = vpop.f32.mrf.mxu1  ;;  %11831 = vmatmul.mubr.msk.bf16.gmra.mxu0 %vm529_vm3, %v14687_v29  ;;  %11839 = vmatmul.mubr.msk.bf16.gmra.mxu1 %vm529_vm3, %v14687_v29 }
 0x234   : > { %20017 = vst [vmem:[#allocation39_spill] sm:$0xff] %v15202_v36  ;;  %20018 = vst [vmem:[#allocation17_spill] sm:$0xff] %v15205_v58  ;;  %v15212_v41 = vadd.f32 %v3364_v12, %v14966_v2  ;;  %v15215_v60 = vadd.f32 %v3477_v13, %v14969_v33  ;;  %5060 = vmatprep.mubr.bf16.mxu0 %v19800_v27  ;;  %5173 = vmatprep.mubr.bf16.mxu1 %v19800_v27  ;;  %v20035_v58 = vld [vmem:[#allocation12_spill] sm:$0xff] }
 0x235   : > { %v3366_v24 = vpop.f32.mrf.mxu0  ;;  %v3479_v42 = vpop.f32.mrf.mxu1 }
 0x236   : > { %v15220_v57 = vadd.f32 %v3366_v24, %v14980_v15  ;;  %v15223_v17 = vadd.f32 %v3479_v42, %v14983_v25  ;;  %v12332_v24 = vld [vmem:[%s19441_s4 + $0xf8] sm:$0xff]  }
 0x237   : > { %v3368_v48 = vpop.f32.mrf.mxu0  ;;  %v3481_v29 = vpop.f32.mrf.mxu1  ;;  %v12333_v42 = vld [vmem:[%s19441_s4 + $0xb8] sm:$0xff]   ;;  %11954 = vmatprep.subr.bf16.mxu1 %v12332_v24  ;;  %v12337_v24 = vld [vmem:[%s19441_s4 + $0xb0] sm:$0xff]  }
 0x238   : > { %v15226_v2 = vadd.f32 %v3368_v48, %v14986_v20  ;;  %v15229_v33 = vadd.f32 %v3481_v29, %v14989_v49  ;;  %v12330_v49 = vld [vmem:[%s19441_s4 + $0x78] sm:$0xff]   ;;  %11955 = vmatpush3.bf16.msra.mxu1 %v12333_v42 }
 0x239   : > { %v3370_v6 = vpop.f32.mrf.mxu0  ;;  %v3483_v9 = vpop.f32.mrf.mxu1  ;;  %11890 = vmatprep.subr.bf16.mxu0 %v12330_v49 }
 0x23a   : > { %v15232_v62 = vadd.f32 %v3370_v6, %v14992_v50  ;;  %v15235_v12 = vadd.f32 %v3483_v9, %v14995_v8  ;;  %v12331_v50 = vld [vmem:[%s19441_s4 + $0x38] sm:$0xff]  }
 0x23b   : > { %v3374_v15 = vpop.f32.mrf.mxu0  ;;  %v3487_v13 = vpop.f32.mrf.mxu1  ;;  %11832 = vmatmul.mubr.msk.bf16.gmra.mxu0 %vm529_vm3, %v14726_v55  ;;  %11840 = vmatmul.mubr.msk.bf16.gmra.mxu1 %vm529_vm3, %v14726_v55 }
 0x23c   : > { %20019 = vst [vmem:[#allocation13_spill] sm:$0xff] %v15232_v62  ;;  %20020 = vst [vmem:[#allocation14_spill] sm:$0xff] %v15235_v12  ;;  %v15242_v25 = vadd.f32 %v3374_v15, %v15002_v35  ;;  %v15245_v20 = vadd.f32 %v3487_v13, %v15005_v39  ;;  %5070 = vmatprep.mubr.bf16.mxu0 %v19800_v27  ;;  %5183 = vmatprep.mubr.bf16.mxu1 %v19800_v27 }
 0x23d   : > { %v3376_v8 = vpop.f32.mrf.mxu0  ;;  %v3489_v55 = vpop.f32.mrf.mxu1  ;;  %11891 = vmatpush3.bf16.msra.mxu0 %v12331_v50 }
 0x23e   : > { %v15256_v35 = vadd.f32 %v3376_v8, %v15010_v43  ;;  %v15259_v39 = vadd.f32 %v3489_v55, %v15013_v3  ;;  %v12336_v55 = vld [vmem:[%s19441_s4 + $0xf0] sm:$0xff]  }
 0x23f   : > { %v3378_v48 = vpop.f32.mrf.mxu0  ;;  %v3491_v29 = vpop.f32.mrf.mxu1  ;;  %11956 = vmatprep.subr.bf16.mxu1 %v12336_v55  ;;  %v12341_v55 = vld [vmem:[%s19441_s4 + $0xa8] sm:$0xff]  }
 0x240   : > { %v15268_v6 = vadd.f32 %v3378_v48, %v15016_v56  ;;  %v15271_v43 = vadd.f32 %v3491_v29, %v15019_v18  ;;  %11957 = vmatpush3.bf16.msra.mxu1 %v12337_v24 }
 0x241   : > { %v3380_v3 = vpop.f32.mrf.mxu0  ;;  %v3493_v9 = vpop.f32.mrf.mxu1 }
 0x242   : > { %v15274_v15 = vadd.f32 %v3380_v3, %v15022_v31  ;;  %v15277_v13 = vadd.f32 %v3493_v9, %v15025_v21  ;;  %v12334_v31 = vld [vmem:[%s19441_s4 + $0x70] sm:$0xff]  }
 0x243   : > { %v3384_v49 = vpop.f32.mrf.mxu0  ;;  %v3497_v8 = vpop.f32.mrf.mxu1  ;;  %11833 = vmatmul.mubr.msk.bf16.gmra.mxu0 %vm529_vm3, %v14765_v14  ;;  %11841 = vmatmul.mubr.msk.bf16.gmra.mxu1 %vm529_vm3, %v14765_v14  ;;  %v12335_v21 = vld [vmem:[%s19441_s4 + $0x30] sm:$0xff]  }
 0x244   : > { %20021 = vst [vmem:[#allocation15_spill] sm:$0xff] %v15274_v15  ;;  %20022 = vst [vmem:[#allocation16_spill] sm:$0xff] %v15277_v13  ;;  %v15284_v56 = vadd.f32 %v3384_v49, %v15032_v16  ;;  %v15287_v18 = vadd.f32 %v3497_v8, %v15035_v11  ;;  %5080 = vmatprep.mubr.bf16.mxu0 %v19800_v27  ;;  %5193 = vmatprep.mubr.bf16.mxu1 %v19800_v27  ;;  %v20033_v15 = vld [vmem:[#allocation32_spill] sm:$0xff] }
 0x245   : > { %v3386_v50 = vpop.f32.mrf.mxu0  ;;  %v3499_v14 = vpop.f32.mrf.mxu1  ;;  %11892 = vmatprep.subr.bf16.mxu0 %v12334_v31 }
 0x246   : > { %v15298_v16 = vadd.f32 %v3386_v50, %v15040_v51  ;;  %v15301_v11 = vadd.f32 %v3499_v14, %v15043_v0  ;;  %11893 = vmatpush3.bf16.msra.mxu0 %v12335_v21  ;;  %v20025_v50 = vld [vmem:[#allocation9_spill] sm:$0xff]  ;;  %v12340_v14 = vld [vmem:[%s19441_s4 + $0xe8] sm:$0xff]  }
 0x247   : > { %v3388_v42 = vpop.f32.mrf.mxu0  ;;  %v3501_v48 = vpop.f32.mrf.mxu1  ;;  %11958 = vmatprep.subr.bf16.mxu1 %v12340_v14  ;;  %v12342_v14 = vld [vmem:[%s19441_s4 + $0x60] sm:$0xff]  }
 0x248   : > { %v15310_v29 = vadd.f32 %v3388_v42, %v15046_v22  ;;  %v15313_v51 = vadd.f32 %v3501_v48, %v15049_v23  ;;  %v20026_v48 = vld [vmem:[#allocation23_spill] sm:$0xff]  ;;  %11959 = vmatpush3.bf16.msra.mxu1 %v12341_v55  ;;  %v12343_v55 = vld [vmem:[%s19441_s4 + $0x20] sm:$0xff]  }
 0x249   : > { %v3390_v0 = vpop.f32.mrf.mxu0  ;;  %v3503_v3 = vpop.f32.mrf.mxu1 }
 0x24a   : > { %v15316_v9 = vadd.f32 %v3390_v0, %v15052_v32  ;;  %v15319_v49 = vadd.f32 %v3503_v3, %v15055_v46  ;;  %v12338_v32 = vld [vmem:[%s19441_s4 + $0x68] sm:$0xff]  }
 0x24b   : > { %v3394_v8 = vpop.f32.mrf.mxu0  ;;  %v3507_v31 = vpop.f32.mrf.mxu1  ;;  %11834 = vmatmul.mubr.msk.bf16.gmra.mxu0 %vm529_vm3, %v19980_v28  ;;  %11842 = vmatmul.mubr.msk.bf16.gmra.mxu1 %vm529_vm3, %v19980_v28  ;;  %v12339_v46 = vld [vmem:[%s19441_s4 + $0x28] sm:$0xff]  }
 0x24c   : > { %20023 = vst [vmem:[#allocation18_spill] sm:$0xff] %v15316_v9  ;;  %20024 = vst [vmem:[#allocation19_spill] sm:$0xff] %v15319_v49  ;;  %v15326_v22 = vadd.f32 %v3394_v8, %v15062_v30  ;;  %v15329_v23 = vadd.f32 %v3507_v31, %v15065_v10  ;;  %5090 = vmatprep.mubr.bf16.mxu0 %v19800_v27  ;;  %5203 = vmatprep.mubr.bf16.mxu1 %v19800_v27 }
 0x24d   : > { %v3396_v21 = vpop.f32.mrf.mxu0  ;;  %v3509_v28 = vpop.f32.mrf.mxu1  ;;  %11894 = vmatprep.subr.bf16.mxu0 %v12338_v32 }
 0x24e   : > { %v15340_v30 = vadd.f32 %v3396_v21, %v15070_v45  ;;  %v15343_v10 = vadd.f32 %v3509_v28, %v20025_v50  ;;  %11895 = vmatpush3.bf16.msra.mxu0 %v12339_v46  ;;  %v20027_v45 = vld [vmem:[#allocation24_spill] sm:$0xff]  ;;  %v20028_v46 = vld [vmem:[#allocation26_spill] sm:$0xff]  ;;  %v20029_v50 = vld [vmem:[#allocation27_spill] sm:$0xff] }
 0x24f   : > { %v3398_v24 = vpop.f32.mrf.mxu0  ;;  %v3511_v42 = vpop.f32.mrf.mxu1  ;;  %11896 = vmatprep.subr.bf16.mxu0 %v12342_v14 }
 0x250   : > { %v15352_v0 = vadd.f32 %v3398_v24, %v20026_v48  ;;  %v15355_v3 = vadd.f32 %v3511_v42, %v20027_v45 }
 0x251   : > { %v15357_v8 = vpop.f32.mrf.mxu0  ;;  %v15359_v31 = vpop.f32.mrf.mxu1 }
 0x252   : > { %11897 = vmatpush3.bf16.msra.mxu0 %v12343_v55  ;;  %v20030_v55 = vld [vmem:[#allocation33_spill] sm:$0xff] }
 0x253   : > { %v3404_v32 = vpop.f32.mrf.mxu0  ;;  %v3517_v21 = vpop.f32.mrf.mxu1  ;;  %11835 = vmatmul.mubr.msk.bf16.gmra.mxu0 %vm529_vm3, %v14845_v38  ;;  %11843 = vmatmul.mubr.msk.bf16.gmra.mxu1 %vm529_vm3, %v14845_v38 }
 0x254   : > { %v15366_v28 = vadd.f32 %v3404_v32, %v20028_v46  ;;  %v15369_v24 = vadd.f32 %v3517_v21, %v20029_v50  ;;  %5100 = vmatprep.mubr.bf16.mxu0 %v19800_v27  ;;  %5213 = vmatprep.mubr.bf16.mxu1 %v19800_v27  ;;  %v12344_v32 = vld [vmem:[%s19441_s4 + $0xe0] sm:$0xff]  }
 0x255   : > { %v3406_v42 = vpop.f32.mrf.mxu0  ;;  %v3519_v38 = vpop.f32.mrf.mxu1  ;;  %v12345_v21 = vld [vmem:[%s19441_s4 + $0xa0] sm:$0xff]   ;;  %11960 = vmatprep.subr.bf16.mxu1 %v12344_v32  ;;  %v12346_v32 = vld [vmem:[%s19441_s4 + $0x58] sm:$0xff]  }
 0x256   : > { %v15380_v48 = vadd.f32 %v3406_v42, %v15100_v34  ;;  %v15383_v45 = vadd.f32 %v3519_v38, %v15103_v4  ;;  %11961 = vmatpush3.bf16.msra.mxu1 %v12345_v21  ;;  %v12347_v21 = vld [vmem:[%s19441_s4 + $0x18] sm:$0xff]   ;;  %11898 = vmatprep.subr.bf16.mxu0 %v12346_v32 }
 0x257   : > { %v3408_v46 = vpop.f32.mrf.mxu0  ;;  %v3521_v50 = vpop.f32.mrf.mxu1  ;;  %11899 = vmatpush3.bf16.msra.mxu0 %v12347_v21  ;;  %v20036_v21 = vld [vmem:[#allocation35_spill] sm:$0xff] }
 0x258   : > { %v15392_v49 = vadd.f32 %v3408_v46, %v15106_v5  ;;  %v15395_v34 = vadd.f32 %v3521_v50, %v15109_v59  ;;  %v20031_v50 = vld [vmem:[#allocation30_spill] sm:$0xff] }
 0x259   : > { %v15397_v4 = vpop.f32.mrf.mxu0  ;;  %v15399_v14 = vpop.f32.mrf.mxu1 }
 0x25b   : > { %v3414_v42 = vpop.f32.mrf.mxu0  ;;  %v3527_v38 = vpop.f32.mrf.mxu1  ;;  %11836 = vmatmul.mubr.msk.bf16.gmra.mxu0 %vm529_vm3, %v20003_v44  ;;  %11844 = vmatmul.mubr.msk.bf16.gmra.mxu1 %vm529_vm3, %v20003_v44 }
 0x25c   : > { %v15406_v5 = vadd.f32 %v3414_v42, %v15122_v61  ;;  %v15409_v59 = vadd.f32 %v3527_v38, %v20030_v55  ;;  %5110 = vmatprep.mubr.bf16.mxu0 %v19800_v27  ;;  %5223 = vmatprep.mubr.bf16.mxu1 %v19800_v27  ;;  %v20032_v42 = vld [vmem:[#allocation31_spill] sm:$0xff]  ;;  %v12348_v27 = vld [vmem:[%s19441_s4 + $0xd8] sm:$0xff]  }
 0x25d   : > { %v3416_v46 = vpop.f32.mrf.mxu0  ;;  %v3529_v44 = vpop.f32.mrf.mxu1  ;;  %v12349_v55 = vld [vmem:[%s19441_s4 + $0x98] sm:$0xff]   ;;  %11962 = vmatprep.subr.bf16.mxu1 %v12348_v27  ;;  %v12350_v27 = vld [vmem:[%s19441_s4 + $0x50] sm:$0xff]  }
 0x25e   : > { %v15420_v61 = vadd.f32 %v3416_v46, %v20031_v50  ;;  %v15423_v38 = vadd.f32 %v3529_v44, %v20032_v42  ;;  %v20034_v46 = vld [vmem:[#allocation10_spill] sm:$0xff]  ;;  %11963 = vmatpush3.bf16.msra.mxu1 %v12349_v55  ;;  %v12351_v55 = vld [vmem:[%s19441_s4 + $0x10] sm:$0xff]   ;;  %11900 = vmatprep.subr.bf16.mxu0 %v12350_v27 }
 0x25f   : > { %v3418_v9 = vpop.f32.mrf.mxu0  ;;  %v3531_v13 = vpop.f32.mrf.mxu1  ;;  %11901 = vmatpush3.bf16.msra.mxu0 %v12351_v55 }
 0x260   : > { %v15432_v12 = vadd.f32 %v3418_v9, %v20033_v15  ;;  %v15435_v50 = vadd.f32 %v3531_v13, %v20034_v46  ;;  %v20037_v9 = vld [vmem:[#allocation36_spill] sm:$0xff] }
 0x261   : > { %v15437_v44 = vpop.f32.mrf.mxu0  ;;  %v15439_v32 = vpop.f32.mrf.mxu1 }
 0x263   : > { %v3424_v42 = vpop.f32.mrf.mxu0  ;;  %v3537_v62 = vpop.f32.mrf.mxu1  ;;  %11837 = vmatmul.mubr.msk.bf16.gmra.mxu0 %vm529_vm3, %v20035_v58  ;;  %11845 = vmatmul.mubr.msk.bf16.gmra.mxu1 %vm529_vm3, %v20035_v58 }
 0x264   : > { %v15446_v15 = vadd.f32 %v3424_v42, %v20036_v21  ;;  %v15449_v13 = vadd.f32 %v3537_v62, %v20037_v9  ;;  %v12352_v62 = vld [vmem:[%s19441_s4 + $0xd0] sm:$0xff]  }
 0x265   : > { %v3426_v46 = vpop.f32.mrf.mxu0  ;;  %v3539_v36 = vpop.f32.mrf.mxu1  ;;  %v12353_v42 = vld [vmem:[%s19441_s4 + $0x90] sm:$0xff]   ;;  %11964 = vmatprep.subr.bf16.mxu1 %v12352_v62 }
 0x266   : > { %20038 = vst [vmem:[#allocation20_spill] sm:$0xff] %v15449_v13  ;;  %v15458_v47 = vadd.f32 %v3426_v46, %v15160_v63  ;;  %v15461_v58 = vadd.f32 %v3539_v36, %v15163_v19  ;;  %11965 = vmatpush3.bf16.msra.mxu1 %v12353_v42 }
 0x267   : > { %v3428_v21 = vpop.f32.mrf.mxu0  ;;  %v3541_v9 = vpop.f32.mrf.mxu1 }
 0x268   : > { %20039 = vst [vmem:[#allocation21_spill] sm:$0xff] %v15458_v47  ;;  %20040 = vst [vmem:[#allocation22_spill] sm:$0xff] %v15461_v58  ;;  %v15470_v13 = vadd.f32 %v3428_v21, %v15166_v7  ;;  %v15473_v63 = vadd.f32 %v3541_v9, %v15169_v1 }
 0x269   : > { %v15475_v19 = vpop.f32.mrf.mxu0  ;;  %v15477_v36 = vpop.f32.mrf.mxu1 }
 0x26a   : > { %20041 = vst [vmem:[#allocation9_spill] sm:$0xff] %v15473_v63 }
 0x26b   : > { %v3984_v27 = vpop.f32.mrf.mxu0  ;;  %v4097_v46 = vpop.f32.mrf.mxu1 }
 0x26c   : > { %v15480_v58 = vadd.f32 %v3984_v27, %v15182_v53  ;;  %v15483_v47 = vadd.f32 %v4097_v46, %v15185_v26  ;;  %v12354_v53 = vld [vmem:[%s19441_s4 + $0x48] sm:$0xff]  }
 0x26d   : > { %v3986_v55 = vpop.f32.mrf.mxu0  ;;  %v4099_v7 = vpop.f32.mrf.mxu1  ;;  %v12355_v26 = vld [vmem:[%s19441_s4 + $0x8] sm:$0xff]   ;;  %11902 = vmatprep.subr.bf16.mxu0 %v12354_v53 }
 0x26e   : > { %v15486_v21 = vadd.f32 %v3986_v55, %v15190_v52  ;;  %v15489_v1 = vadd.f32 %v4099_v7, %v15193_v40  ;;  %11903 = vmatpush3.bf16.msra.mxu0 %v12355_v26  ;;  %v12358_v26 = vld [vmem:[%s19441_s4 + $0x40] sm:$0xff]  }
 0x26f   : > { %v3988_v62 = vpop.f32.mrf.mxu0  ;;  %v4101_v9 = vpop.f32.mrf.mxu1  ;;  %11904 = vmatprep.subr.bf16.mxu0 %v12358_v26 }
 0x270   : > { %v15492_v42 = vadd.f32 %v3988_v62, %v15196_v37  ;;  %v15495_v63 = vadd.f32 %v4101_v9, %v15199_v54  ;;  %v12356_v37 = vld [vmem:[%s19441_s4 + $0xc8] sm:$0xff]  }
 0x271   : > { %v15503_v52 = vpop.f32.mrf.mxu0  ;;  %v15505_v40 = vpop.f32.mrf.mxu1  ;;  %v12357_v54 = vld [vmem:[%s19441_s4 + $0x88] sm:$0xff]   ;;  %11966 = vmatprep.subr.bf16.mxu1 %v12356_v37 }
 0x272   : > { %20042 = vst [vmem:[#allocation23_spill] sm:$0xff] %v15503_v52  ;;  %20043 = vst [vmem:[#allocation24_spill] sm:$0xff] %v15505_v40  ;;  %11967 = vmatpush3.bf16.msra.mxu1 %v12357_v54  ;;  %v12359_v54 = vld [vmem:[%s19441_s4] sm:$0xff]  }
 0x273   : > { %v3994_v27 = vpop.f32.mrf.mxu0  ;;  %v4107_v46 = vpop.f32.mrf.mxu1  ;;  %11905 = vmatpush3.bf16.msra.mxu0 %v12359_v54 }
 0x274   : > { %v15514_v55 = vadd.f32 %v3994_v27, %v15212_v41  ;;  %v15517_v7 = vadd.f32 %v4107_v46, %v15215_v60  ;;  %v12360_v41 = vld [vmem:[%s19441_s4 + $0xc0] sm:$0xff]  }
 0x275   : > { %v3996_v62 = vpop.f32.mrf.mxu0  ;;  %v4109_v9 = vpop.f32.mrf.mxu1  ;;  %11968 = vmatprep.subr.bf16.mxu1 %v12360_v41 }
 0x276   : > { %v15520_v40 = vadd.f32 %v3996_v62, %v15220_v57  ;;  %v15523_v53 = vadd.f32 %v4109_v9, %v15223_v17  ;;  %v12361_v57 = vld [vmem:[%s19441_s4 + $0x80] sm:$0xff]  }
 0x277   : > { %v3998_v37 = vpop.f32.mrf.mxu0  ;;  %v4111_v60 = vpop.f32.mrf.mxu1  ;;  %11969 = vmatpush3.bf16.msra.mxu1 %v12361_v57 }
 0x278   : > { %20044 = vst [vmem:[#allocation26_spill] sm:$0xff] %v15520_v40  ;;  %20045 = vst [vmem:[#allocation27_spill] sm:$0xff] %v15523_v53  ;;  %v15538_v17 = vadd.f32 %v3998_v37, %v15226_v2  ;;  %v15541_v27 = vadd.f32 %v4111_v60, %v15229_v33 }
 0x279   : > { %v15543_v46 = vpop.f32.mrf.mxu0  ;;  %v15545_v62 = vpop.f32.mrf.mxu1 }
 0x27a   : > { %20046 = vst [vmem:[#allocation33_spill] sm:$0xff] %v15543_v46  ;;  %20047 = vst [vmem:[#allocation30_spill] sm:$0xff] %v15545_v62  ;;  %v20054_v62 = vld [vmem:[#allocation25_spill] sm:$0xff] }
 0x27b   : > { %v4004_v9 = vpop.f32.mrf.mxu0  ;;  %v4117_v52 = vpop.f32.mrf.mxu1 }
 0x27c   : > { %v15548_v53 = vadd.f32 %v4004_v9, %v15242_v25  ;;  %v15551_v40 = vadd.f32 %v4117_v52, %v15245_v20 }
 0x27d   : > { %v4006_v2 = vpop.f32.mrf.mxu0  ;;  %v4119_v37 = vpop.f32.mrf.mxu1 }
 0x27e   : > { %v15554_v33 = vadd.f32 %v4006_v2, %v15256_v35  ;;  %v15557_v26 = vadd.f32 %v4119_v37, %v15259_v39 }
 0x27f   : > { %v4008_v41 = vpop.f32.mrf.mxu0  ;;  %v4121_v60 = vpop.f32.mrf.mxu1 }
 0x280   : > { %v15560_v54 = vadd.f32 %v4008_v41, %v15268_v6  ;;  %v15563_v57 = vadd.f32 %v4121_v60, %v15271_v43 }
 0x281   : > { %v15565_v25 = vpop.f32.mrf.mxu0  ;;  %v15567_v20 = vpop.f32.mrf.mxu1 }
 0x282   : > { %20048 = vst [vmem:[#allocation31_spill] sm:$0xff] %v15565_v25  ;;  %20049 = vst [vmem:[#allocation32_spill] sm:$0xff] %v15567_v20 }
 0x283   : > { %v4014_v52 = vpop.f32.mrf.mxu0  ;;  %v4127_v9 = vpop.f32.mrf.mxu1 }
 0x284   : > { %v15570_v35 = vadd.f32 %v4014_v52, %v15284_v56  ;;  %v15573_v39 = vadd.f32 %v4127_v9, %v15287_v18 }
 0x285   : > { %v4016_v2 = vpop.f32.mrf.mxu0  ;;  %v4129_v37 = vpop.f32.mrf.mxu1 }
 0x286   : > { %v15576_v6 = vadd.f32 %v4016_v2, %v15298_v16  ;;  %v15579_v43 = vadd.f32 %v4129_v37, %v15301_v11 }
 0x287   : > { %v4018_v41 = vpop.f32.mrf.mxu0  ;;  %v4131_v60 = vpop.f32.mrf.mxu1 }
 0x288   : > { %v15582_v20 = vadd.f32 %v4018_v41, %v15310_v29  ;;  %v15585_v25 = vadd.f32 %v4131_v60, %v15313_v51 }
 0x289   : > { %v15587_v56 = vpop.f32.mrf.mxu0  ;;  %v15589_v18 = vpop.f32.mrf.mxu1 }
 0x28a   : > { %20050 = vst [vmem:[#allocation10_spill] sm:$0xff] %v15587_v56  ;;  %20051 = vst [vmem:[#allocation12_spill] sm:$0xff] %v15589_v18  ;;  %v20053_v56 = vld [vmem:[#allocation29_spill] sm:$0xff] }
 0x28b   : > { %v4024_v52 = vpop.f32.mrf.mxu0  ;;  %v4137_v9 = vpop.f32.mrf.mxu1  ;;  %v3647_v18 = vadd.f32 %v15357_v8, %v20053_v56 }
 0x28c   : > { %v15592_v16 = vadd.f32 %v4024_v52, %v15326_v22  ;;  %v15595_v11 = vadd.f32 %v4137_v9, %v15329_v23  ;;  %v3649_v22 = vadd.f32 %v15359_v31, %v20054_v62 }
 0x28d   : > { %v4026_v2 = vpop.f32.mrf.mxu0  ;;  %v4139_v37 = vpop.f32.mrf.mxu1 }
 0x28e   : > { %v15598_v29 = vadd.f32 %v4026_v2, %v15340_v30  ;;  %v15601_v51 = vadd.f32 %v4139_v37, %v15343_v10 }
 0x28f   : > { %v4028_v41 = vpop.f32.mrf.mxu0  ;;  %v4141_v60 = vpop.f32.mrf.mxu1 }
 0x290   : > { %20052 = vst [vmem:[#allocation35_spill] sm:$0xff] %v15601_v51  ;;  %v15608_v52 = vadd.f32 %v4028_v41, %v15352_v0  ;;  %v15611_v23 = vadd.f32 %v4141_v60, %v15355_v3  ;;  %v20057_v41 = vld [vmem:[#allocation28_spill] sm:$0xff] }
 0x291   : > { %v4030_v9 = vpop.f32.mrf.mxu0  ;;  %v4143_v30 = vpop.f32.mrf.mxu1  ;;  %v3655_v60 = vadd.f32 %v15397_v4, %v20057_v41 }
 0x292   : > { %v15613_v2 = vadd.f32 %v4030_v9, %v3647_v18  ;;  %v15615_v10 = vadd.f32 %v4143_v30, %v3649_v22  ;;  %v20058_v22 = vld [vmem:[#allocation11_spill] sm:$0xff] }
 0x293   : > { %v4034_v37 = vpop.f32.mrf.mxu0  ;;  %v4147_v46 = vpop.f32.mrf.mxu1 }
 0x294   : > { %20055 = vst [vmem:[#allocation36_spill] sm:$0xff] %v15613_v2  ;;  %20056 = vst [vmem:[#allocation29_spill] sm:$0xff] %v15615_v10  ;;  %v15618_v51 = vadd.f32 %v4034_v37, %v15366_v28  ;;  %v15621_v8 = vadd.f32 %v4147_v46, %v15369_v24  ;;  %v3657_v28 = vadd.f32 %v15399_v14, %v20058_v22 }
 0x295   : > { %v4036_v31 = vpop.f32.mrf.mxu0  ;;  %v4149_v0 = vpop.f32.mrf.mxu1 }
 0x296   : > { %v15624_v62 = vadd.f32 %v4036_v31, %v15380_v48  ;;  %v15627_v3 = vadd.f32 %v4149_v0, %v15383_v45 }
 0x297   : > { %v4038_v56 = vpop.f32.mrf.mxu0  ;;  %v4151_v18 = vpop.f32.mrf.mxu1 }
 0x298   : > { %v15634_v9 = vadd.f32 %v4038_v56, %v15392_v49  ;;  %v15637_v24 = vadd.f32 %v4151_v18, %v15395_v34 }
 0x299   : > { %v4040_v46 = vpop.f32.mrf.mxu0  ;;  %v4153_v48 = vpop.f32.mrf.mxu1 }
 0x29a   : > { %v15639_v30 = vadd.f32 %v4040_v46, %v3655_v60  ;;  %v15641_v45 = vadd.f32 %v4153_v48, %v3657_v28  ;;  %v20061_v60 = vld [vmem:[#allocation34_spill] sm:$0xff]  ;;  %v20062_v28 = vld [vmem:[#allocation40_spill] sm:$0xff] }
 0x29b   : > { %v4044_v37 = vpop.f32.mrf.mxu0  ;;  %v4157_v31 = vpop.f32.mrf.mxu1  ;;  %v3663_v22 = vadd.f32 %v15437_v44, %v20061_v60  ;;  %v20065_v44 = vld [vmem:[#allocation20_spill] sm:$0xff] }
 0x29c   : > { %20059 = vst [vmem:[#allocation25_spill] sm:$0xff] %v15639_v30  ;;  %20060 = vst [vmem:[#allocation28_spill] sm:$0xff] %v15641_v45  ;;  %v15644_v0 = vadd.f32 %v4044_v37, %v15406_v5  ;;  %v15647_v4 = vadd.f32 %v4157_v31, %v15409_v59  ;;  %v3665_v5 = vadd.f32 %v15439_v32, %v20062_v28 }
 0x29d   : > { %v4046_v14 = vpop.f32.mrf.mxu0  ;;  %v4159_v49 = vpop.f32.mrf.mxu1 }
 0x29e   : > { %v15650_v56 = vadd.f32 %v4046_v14, %v15420_v61  ;;  %v15653_v34 = vadd.f32 %v4159_v49, %v15423_v38 }
 0x29f   : > { %v4048_v18 = vpop.f32.mrf.mxu0  ;;  %v4161_v41 = vpop.f32.mrf.mxu1 }
 0x2a0   : > { %v15660_v46 = vadd.f32 %v4048_v18, %v15432_v12  ;;  %v15663_v59 = vadd.f32 %v4161_v41, %v15435_v50  ;;  %v20066_v18 = vld [vmem:[#allocation21_spill] sm:$0xff]  ;;  %v20067_v50 = vld [vmem:[#allocation22_spill] sm:$0xff] }
 0x2a1   : > { %v4050_v48 = vpop.f32.mrf.mxu0  ;;  %v4163_v61 = vpop.f32.mrf.mxu1 }
 0x2a2   : > { %v15665_v37 = vadd.f32 %v4050_v48, %v3663_v22  ;;  %v15667_v38 = vadd.f32 %v4163_v61, %v3665_v5  ;;  %v20068_v5 = vld [vmem:[#allocation37_spill] sm:$0xff] }
 0x2a3   : > { %v4054_v31 = vpop.f32.mrf.mxu0  ;;  %v4167_v14 = vpop.f32.mrf.mxu1  ;;  %v3671_v61 = vadd.f32 %v15475_v19, %v20068_v5 }
 0x2a4   : > { %20063 = vst [vmem:[#allocation11_spill] sm:$0xff] %v15665_v37  ;;  %20064 = vst [vmem:[#allocation34_spill] sm:$0xff] %v15667_v38  ;;  %v15670_v49 = vadd.f32 %v4054_v31, %v15446_v15  ;;  %v15673_v60 = vadd.f32 %v4167_v14, %v20065_v44  ;;  %v20069_v38 = vld [vmem:[#allocation38_spill] sm:$0xff]  ;;  %v20070_v14 = vld [vmem:[#allocation9_spill] sm:$0xff] }
 0x2a5   : > { %v4056_v32 = vpop.f32.mrf.mxu0  ;;  %v4169_v12 = vpop.f32.mrf.mxu1  ;;  %v3673_v15 = vadd.f32 %v15477_v36, %v20069_v38 }
 0x2a6   : > { %v15676_v28 = vadd.f32 %v4056_v32, %v20066_v18  ;;  %v15679_v41 = vadd.f32 %v4169_v12, %v20067_v50 }
 0x2a7   : > { %v4058_v22 = vpop.f32.mrf.mxu0  ;;  %v4171_v48 = vpop.f32.mrf.mxu1 }
 0x2a8   : > { %v15686_v31 = vadd.f32 %v4058_v22, %v15470_v13  ;;  %v15689_v44 = vadd.f32 %v4171_v48, %v20070_v14 }
 0x2a9   : > { %v4060_v37 = vpop.f32.mrf.mxu0  ;;  %v4173_v32 = vpop.f32.mrf.mxu1 }
 0x2aa   : > { %v15691_v18 = vadd.f32 %v4060_v37, %v3671_v61  ;;  %v15693_v12 = vadd.f32 %v4173_v32, %v3673_v15 }
 0x2ab   : > { %v4513_v50 = vpop.f32.mrf.mxu0  ;;  %v4626_v45 = vpop.f32.mrf.mxu1 }
 0x2ac   : > { %20071 = vst [vmem:[#allocation40_spill] sm:$0xff] %v15691_v18  ;;  %20072 = vst [vmem:[#allocation20_spill] sm:$0xff] %v15693_v12  ;;  %v15696_v30 = vadd.f32 %v4513_v50, %v15480_v58  ;;  %v15699_v19 = vadd.f32 %v4626_v45, %v15483_v47  ;;  %v20073_v50 = vld [vmem:[#allocation26_spill] sm:$0xff] }
 0x2ad   : > { %v4515_v36 = vpop.f32.mrf.mxu0  ;;  %v4628_v13 = vpop.f32.mrf.mxu1 }
 0x2ae   : > { %v15702_v38 = vadd.f32 %v4515_v36, %v15486_v21  ;;  %v15705_v22 = vadd.f32 %v4628_v13, %v15489_v1  ;;  %v20074_v36 = vld [vmem:[#allocation27_spill] sm:$0xff] }
 0x2af   : > { %v4517_v37 = vpop.f32.mrf.mxu0  ;;  %v4630_v48 = vpop.f32.mrf.mxu1 }
 0x2b0   : > { %v15708_v5 = vadd.f32 %v4517_v37, %v15492_v42  ;;  %v15711_v61 = vadd.f32 %v4630_v48, %v15495_v63 }
 0x2b1   : > { %v15713_v58 = vpop.f32.mrf.mxu0  ;;  %v15715_v47 = vpop.f32.mrf.mxu1 }
 0x2b3   : > { %v4523_v45 = vpop.f32.mrf.mxu0  ;;  %v4636_v15 = vpop.f32.mrf.mxu1 }
 0x2b4   : > { %v15718_v21 = vadd.f32 %v4523_v45, %v15514_v55  ;;  %v15721_v1 = vadd.f32 %v4636_v15, %v15517_v7 }
 0x2b5   : > { %v4525_v14 = vpop.f32.mrf.mxu0  ;;  %v4638_v32 = vpop.f32.mrf.mxu1 }
 0x2b6   : > { %v15724_v42 = vadd.f32 %v4525_v14, %v20073_v50  ;;  %v15727_v63 = vadd.f32 %v4638_v32, %v20074_v36 }
 0x2b7   : > { %v4527_v13 = vpop.f32.mrf.mxu0  ;;  %v4640_v37 = vpop.f32.mrf.mxu1 }
 0x2b8   : > { %v15730_v48 = vadd.f32 %v4527_v13, %v15538_v17  ;;  %v15733_v12 = vadd.f32 %v4640_v37, %v15541_v27 }
 0x2b9   : > { %v15735_v55 = vpop.f32.mrf.mxu0  ;;  %v15737_v7 = vpop.f32.mrf.mxu1 }
 0x2bb   : > { %v4533_v45 = vpop.f32.mrf.mxu0  ;;  %v4646_v15 = vpop.f32.mrf.mxu1 }
 0x2bc   : > { %v15740_v14 = vadd.f32 %v4533_v45, %v15548_v53  ;;  %v15743_v32 = vadd.f32 %v4646_v15, %v15551_v40 }
 0x2bd   : > { %v4535_v50 = vpop.f32.mrf.mxu0  ;;  %v4648_v36 = vpop.f32.mrf.mxu1 }
 0x2be   : > { %v15746_v17 = vadd.f32 %v4535_v50, %v15554_v33  ;;  %v15749_v27 = vadd.f32 %v4648_v36, %v15557_v26 }
 0x2bf   : > { %v4537_v13 = vpop.f32.mrf.mxu0  ;;  %v4650_v37 = vpop.f32.mrf.mxu1 }
 0x2c0   : > { %v15752_v18 = vadd.f32 %v4537_v13, %v15560_v54  ;;  %v15755_v10 = vadd.f32 %v4650_v37, %v15563_v57 }
 0x2c1   : > { %v15757_v53 = vpop.f32.mrf.mxu0  ;;  %v15759_v40 = vpop.f32.mrf.mxu1 }
 0x2c2   : > { %20075 = vst [vmem:[#allocation21_spill] sm:$0xff] %v15755_v10 }
 0x2c3   : > { %v4543_v45 = vpop.f32.mrf.mxu0  ;;  %v4656_v15 = vpop.f32.mrf.mxu1 }
 0x2c4   : > { %v15762_v33 = vadd.f32 %v4543_v45, %v15570_v35  ;;  %v15765_v26 = vadd.f32 %v4656_v15, %v15573_v39 }
 0x2c5   : > { %v4545_v50 = vpop.f32.mrf.mxu0  ;;  %v4658_v36 = vpop.f32.mrf.mxu1 }
 0x2c6   : > { %v15768_v54 = vadd.f32 %v4545_v50, %v15576_v6  ;;  %v15771_v57 = vadd.f32 %v4658_v36, %v15579_v43 }
 0x2c7   : > { %v4547_v13 = vpop.f32.mrf.mxu0  ;;  %v4660_v37 = vpop.f32.mrf.mxu1 }
 0x2c8   : > { %20076 = vst [vmem:[#allocation22_spill] sm:$0xff] %v15771_v57  ;;  %v15774_v2 = vadd.f32 %v4547_v13, %v15582_v20  ;;  %v15777_v10 = vadd.f32 %v4660_v37, %v15585_v25  ;;  %v20079_v13 = vld [vmem:[#allocation35_spill] sm:$0xff] }
 0x2c9   : > { %v15779_v35 = vpop.f32.mrf.mxu0  ;;  %v15781_v39 = vpop.f32.mrf.mxu1 }
 0x2ca   : > { %20077 = vst [vmem:[#allocation37_spill] sm:$0xff] %v15774_v2  ;;  %20078 = vst [vmem:[#allocation38_spill] sm:$0xff] %v15777_v10 }
 0x2cb   : > { %v4553_v45 = vpop.f32.mrf.mxu0  ;;  %v4666_v15 = vpop.f32.mrf.mxu1 }
 0x2cc   : > { %v15784_v6 = vadd.f32 %v4553_v45, %v15592_v16  ;;  %v15787_v43 = vadd.f32 %v4666_v15, %v15595_v11 }
 0x2cd   : > { %v4555_v50 = vpop.f32.mrf.mxu0  ;;  %v4668_v36 = vpop.f32.mrf.mxu1 }
 0x2ce   : > { %v15790_v20 = vadd.f32 %v4555_v50, %v15598_v29  ;;  %v15793_v25 = vadd.f32 %v4668_v36, %v20079_v13 }
 0x2cf   : > { %v4557_v37 = vpop.f32.mrf.mxu0  ;;  %v4670_v10 = vpop.f32.mrf.mxu1 }
 0x2d0   : > { %v15796_v2 = vadd.f32 %v4557_v37, %v15608_v52  ;;  %v15799_v57 = vadd.f32 %v4670_v10, %v15611_v23 }
 0x2d1   : > { %v15801_v16 = vpop.f32.mrf.mxu0  ;;  %v15803_v11 = vpop.f32.mrf.mxu1 }
 0x2d2   : > { %20080 = vst [vmem:[#allocation9_spill] sm:$0xff] %v15796_v2  ;;  %20081 = vst [vmem:[#allocation26_spill] sm:$0xff] %v15799_v57 }
 0x2d3   : > { %v4563_v45 = vpop.f32.mrf.mxu0  ;;  %v4676_v15 = vpop.f32.mrf.mxu1 }
 0x2d4   : > { %v15806_v29 = vadd.f32 %v4563_v45, %v15618_v51  ;;  %v15809_v50 = vadd.f32 %v4676_v15, %v15621_v8 }
 0x2d5   : > { %v4565_v36 = vpop.f32.mrf.mxu0  ;;  %v4678_v13 = vpop.f32.mrf.mxu1 }
 0x2d6   : > { %v15812_v52 = vadd.f32 %v4565_v36, %v15624_v62  ;;  %v15815_v23 = vadd.f32 %v4678_v13, %v15627_v3 }
 0x2d7   : > { %v4567_v10 = vpop.f32.mrf.mxu0  ;;  %v4680_v37 = vpop.f32.mrf.mxu1 }
 0x2d8   : > { %20082 = vst [vmem:[#allocation27_spill] sm:$0xff] %v15815_v23  ;;  %v15818_v57 = vadd.f32 %v4567_v10, %v15634_v9  ;;  %v15821_v2 = vadd.f32 %v4680_v37, %v15637_v24  ;;  %v20113_v23 = vld [vmem:[#allocation32_spill] sm:$0xff] }
 0x2d9   : > { %v15823_v51 = vpop.f32.mrf.mxu0  ;;  %v15825_v8 = vpop.f32.mrf.mxu1 }
 0x2da   : > { %20083 = vst [vmem:[#allocation35_spill] sm:$0xff] %v15818_v57  ;;  %20084 = vst [vmem:[#allocation41_spill] sm:$0xff] %v15821_v2  ;;  %v5492_v2 = vlaneseq }
 0x2db   : > { %v4573_v45 = vpop.f32.mrf.mxu0  ;;  %v4686_v15 = vpop.f32.mrf.mxu1 }
 0x2dc   : > { %v15828_v62 = vadd.f32 %v4573_v45, %v15644_v0  ;;  %v15831_v3 = vadd.f32 %v4686_v15, %v15647_v4 }
 0x2dd   : > { %v4575_v36 = vpop.f32.mrf.mxu0  ;;  %v4688_v13 = vpop.f32.mrf.mxu1 }
 0x2de   : > { %20085 = vst [vmem:[#allocation42_spill] sm:$0xff] %v15828_v62  ;;  %20086 = vst [vmem:[#allocation43_spill] sm:$0xff] %v15831_v3  ;;  %v15834_v9 = vadd.f32 %v4575_v36, %v15650_v56  ;;  %v15837_v24 = vadd.f32 %v4688_v13, %v15653_v34  ;;  %v15849_v56 = vshrl.u32 %v5492_v2, 7  ;;  %v20107_v62 = vld [vmem:[#allocation33_spill] sm:$0xff] }
 0x2df   : > { %v4577_v10 = vpop.f32.mrf.mxu0  ;;  %v4690_v37 = vpop.f32.mrf.mxu1 }
 0x2e0   : > { %20087 = vst [vmem:[#allocation44_spill] sm:$0xff] %v15834_v9  ;;  %20088 = vst [vmem:[#allocation45_spill] sm:$0xff] %v15837_v24  ;;  %v15840_v57 = vadd.f32 %v4577_v10, %v15660_v46  ;;  %v15843_v0 = vadd.f32 %v4690_v37, %v15663_v59  ;;  %v5502_v2 = vsub.s32 2, %v15849_v56  ;;  %v20105_v24 = vld [vmem:[#allocation24_spill] sm:$0xff] }
 0x2e1   : > { %v15845_v45 = vpop.f32.mrf.mxu0  ;;  %v15847_v4 = vpop.f32.mrf.mxu1  ;;  %20093 = vst [vmem:[#allocation50_spill] sm:$0xff] %v15849_v56 }
 0x2e2   : > { %20089 = vst [vmem:[#allocation46_spill] sm:$0xff] %v15840_v57  ;;  %20090 = vst [vmem:[#allocation47_spill] sm:$0xff] %v15843_v0  ;;  %v5494_v57 = vsub.s32 0, %v15849_v56 }
 0x2e3   : > { %20091 = vst [vmem:[#allocation48_spill] sm:$0xff] %v15845_v45  ;;  %20092 = vst [vmem:[#allocation49_spill] sm:$0xff] %v15847_v4  ;;  %v4583_v15 = vpop.f32.mrf.mxu0  ;;  %v4696_v3 = vpop.f32.mrf.mxu1  ;;  %v20109_v4 = vld [vmem:[#allocation30_spill] sm:$0xff] }
 0x2e4   : > { %v15852_v34 = vadd.f32 %v4583_v15, %v15670_v49  ;;  %v15855_v36 = vadd.f32 %v4696_v3, %v15673_v60  ;;  %v5498_v15 = vsub.s32 1, %v15849_v56 }
 0x2e5   : > { %v4585_v13 = vpop.f32.mrf.mxu0  ;;  %v4698_v46 = vpop.f32.mrf.mxu1 }
 0x2e6   : > { %20094 = vst [vmem:[#allocation51_spill] sm:$0xff] %v15852_v34  ;;  %20095 = vst [vmem:[#allocation52_spill] sm:$0xff] %v15855_v36  ;;  %v15858_v10 = vadd.f32 %v4585_v13, %v15676_v28  ;;  %v15861_v59 = vadd.f32 %v4698_v46, %v15679_v41  ;;  %v5490_v28 = vld [vmem:[%s19440_s3] sm:$0xf]  ;;  %v5506_v13 = vsub.s32 3, %v15849_v56  ;;  %v20102_v34 = vld [vmem:[#allocation39_spill] sm:$0xff] }
 0x2e7   : > { %v4587_v37 = vpop.f32.mrf.mxu0  ;;  %v4700_v0 = vpop.f32.mrf.mxu1  ;;  %v20104_v56 = vld [vmem:[#allocation17_spill] sm:$0xff] }
 0x2e8   : > { %20096 = vst [vmem:[#allocation53_spill] sm:$0xff] %v15858_v10  ;;  %20097 = vst [vmem:[#allocation54_spill] sm:$0xff] %v15861_v59  ;;  %v15866_v49 = vadd.f32 %v4587_v37, %v15686_v31  ;;  %v15869_v60 = vadd.f32 %v4700_v0, %v15689_v44  ;;  %v15880_v59 = vrot.slane %v5490_v28, %v5494_v57 }
 0x2e9   : > { %v15874_v3 = vpop.f32.mrf.mxu0  ;;  %v15876_v41 = vpop.f32.mrf.mxu1  ;;  %v15882_v37 = vrot.slane %v5490_v28, %v5502_v2  ;;  %v15888_v36 = vrot.slane %v5490_v28, %v5506_v13  ;;  %v4247_v57 = vadd.f32 %v20105_v24, %v20104_v56  ;;  %v20108_v13 = vld [vmem:[#allocation14_spill] sm:$0xff] }
 0x2ea   : > { %20098 = vst [vmem:[#allocation55_spill] sm:$0xff] %v15866_v49  ;;  %20099 = vst [vmem:[#allocation56_spill] sm:$0xff] %v15869_v60  ;;  %v15886_v49 = vrot.slane %v5490_v28, %v5498_v15  ;;  %v4255_v45 = vadd.f32 %v20109_v4, %v20108_v13 }
 0x2eb   : > { %20100 = vst [vmem:[#allocation57_spill] sm:$0xff] %v15874_v3  ;;  %20101 = vst [vmem:[#allocation58_spill] sm:$0xff] %v15876_v41  ;;  %v5042_v46 = vpop.f32.mrf.mxu0  ;;  %v5155_v31 = vpop.f32.mrf.mxu1  ;;  %v20103_v41 = vld [vmem:[#allocation23_spill] sm:$0xff]  ;;  %v4776_v24 = vadd.f32 %v15715_v47, %v4247_v57 }
 0x2ec   : > { %v5298_v44 = vadd.f32 %v5042_v46, %v15696_v30  ;;  %v5300_v0 = vadd.f32 %v5155_v31, %v15699_v19  ;;  %v4245_v3 = vadd.f32 %v20103_v41, %v20102_v34  ;;  %v20106_v31 = vld [vmem:[#allocation13_spill] sm:$0xff] }
 0x2ed   : > { %v5044_v60 = vpop.f32.mrf.mxu0  ;;  %v5157_v10 = vpop.f32.mrf.mxu1  ;;  %v4253_v28 = vadd.f32 %v20107_v62, %v20106_v31  ;;  %v20112_v31 = vld [vmem:[#allocation16_spill] sm:$0xff] }
 0x2ee   : > { %v5299_v9 = vadd.f32 %v5044_v60, %v15702_v38  ;;  %v5301_v2 = vadd.f32 %v5157_v10, %v15705_v22  ;;  %v5512_v30 = vadd.f32 %v15880_v59, %v5298_v44  ;;  %v5514_v19 = vadd.f32 %v15882_v37, %v5300_v0  ;;  %v20110_v44 = vld [vmem:[#allocation15_spill] sm:$0xff] }
 0x2ef   : > { %v5046_v46 = vpop.f32.mrf.mxu0  ;;  %v5159_v15 = vpop.f32.mrf.mxu1  ;;  %v4774_v34 = vadd.f32 %v15713_v58, %v4245_v3  ;;  %v20111_v0 = vld [vmem:[#allocation31_spill] sm:$0xff]  ;;  %v4263_v4 = vadd.f32 %v20113_v23, %v20112_v31 }
 0x2f0   : > { %v5513_v38 = vadd.f32 %v15886_v49, %v5299_v9  ;;  %v5515_v22 = vadd.f32 %v15888_v36, %v5301_v2  ;;  %v5302_v56 = vadd.f32 %v5046_v46, %v15708_v5  ;;  %v5304_v10 = vadd.f32 %v5159_v15, %v15711_v61 }
 0x2f1   : > { %v5048_v60 = vpop.f32.mrf.mxu0  ;;  %v5161_v41 = vpop.f32.mrf.mxu1  ;;  %v4261_v62 = vadd.f32 %v20111_v0, %v20110_v44  ;;  %v5576_v3 = vmax.f32 %v5512_v30, 0.0  ;;  %v5578_v47 = vmax.f32 %v5514_v19, 0.0 }
 0x2f2   : > { %v5303_v13 = vadd.f32 %v5048_v60, %v4774_v34  ;;  %v5305_v58 = vadd.f32 %v5161_v41, %v4776_v24  ;;  %v5516_v9 = vadd.f32 %v15880_v59, %v5302_v56  ;;  %v5518_v57 = vadd.f32 %v15882_v37, %v5304_v10 }
 0x2f3   : > { %v5052_v2 = vpop.f32.mrf.mxu0  ;;  %v5165_v5 = vpop.f32.mrf.mxu1  ;;  %v5577_v0 = vmax.f32 %v5513_v38, 0.0  ;;  %v5579_v23 = vmax.f32 %v5515_v22, 0.0  ;;  %v4782_v38 = vadd.f32 %v15735_v55, %v4253_v28  ;;  %v4784_v22 = vadd.f32 %v15737_v7, %v4255_v45 }
 0x2f4   : > { %v5517_v61 = vadd.f32 %v15886_v49, %v5303_v13  ;;  %v5519_v46 = vadd.f32 %v15888_v36, %v5305_v58  ;;  %v5306_v15 = vadd.f32 %v5052_v2, %v15718_v21  ;;  %v5308_v44 = vadd.f32 %v5165_v5, %v15721_v1 }
 0x2f5   : > { %v5580_v34 = vmax.f32 %v5516_v9, 0.0  ;;  %v5582_v24 = vmax.f32 %v5518_v57, 0.0  ;;  %v5054_v30 = vpop.f32.mrf.mxu0  ;;  %v5167_v19 = vpop.f32.mrf.mxu1  ;;  %v4790_v7 = vadd.f32 %v15757_v53, %v4261_v62 }
 0x2f6   : > { %v5581_v60 = vmax.f32 %v5517_v61, 0.0  ;;  %v5583_v56 = vmax.f32 %v5519_v46, 0.0  ;;  %v5520_v10 = vadd.f32 %v15880_v59, %v5306_v15  ;;  %v5522_v41 = vadd.f32 %v15882_v37, %v5308_v44 }
 0x2f7   : > { %v5640_v31 = vpack.c.bf16 %v5580_v34, %v5576_v3  ;;  %v5642_v13 = vpack.c.bf16 %v5582_v24, %v5578_v47  ;;  %v5307_v58 = vadd.f32 %v5054_v30, %v15724_v42  ;;  %v5309_v21 = vadd.f32 %v5167_v19, %v15727_v63  ;;  %v5056_v2 = vpop.f32.mrf.mxu0  ;;  %v5169_v1 = vpop.f32.mrf.mxu1 }
 0x2f8   : > { %v5310_v9 = vadd.f32 %v5056_v2, %v15730_v48  ;;  %v5312_v57 = vadd.f32 %v5169_v1, %v15733_v12  ;;  %v5641_v46 = vpack.c.bf16 %v5581_v60, %v5577_v0  ;;  %v5643_v42 = vpack.c.bf16 %v5583_v56, %v5579_v23 }
 0x2f9   : > { %v5521_v5 = vadd.f32 %v15886_v49, %v5307_v58  ;;  %v5523_v61 = vadd.f32 %v15888_v36, %v5309_v21  ;;  %v5058_v3 = vpop.f32.mrf.mxu0  ;;  %v5171_v47 = vpop.f32.mrf.mxu1  ;;  %v4792_v48 = vadd.f32 %v15759_v40, %v4263_v4  ;;  %v5584_v45 = vmax.f32 %v5520_v10, 0.0 }
 0x2fa   : > { %v5524_v63 = vadd.f32 %v15880_v59, %v5310_v9  ;;  %v5526_v15 = vadd.f32 %v15882_v37, %v5312_v57  ;;  %v5311_v44 = vadd.f32 %v5058_v3, %v4782_v38  ;;  %v5313_v55 = vadd.f32 %v5171_v47, %v4784_v22  ;;  %5967 = vmatprep.mubr.bf16.mxu0 %v5641_v46  ;;  %v20114_v22 = vld [vmem:[#allocation21_spill] sm:$0xff]  ;;  %v20117_v47 = vld [vmem:[#allocation19_spill] sm:$0xff]  ;;  %v20118_v46 = vld [vmem:[#allocation12_spill] sm:$0xff] }
 0x2fb   : > { %v5586_v12 = vmax.f32 %v5522_v41, 0.0  ;;  %6064 = vmatprep.mubr.bf16.mxu1 %v5643_v42  ;;  %v5062_v28 = vpop.f32.mrf.mxu0  ;;  %v5175_v34 = vpop.f32.mrf.mxu1  ;;  %5968 = vmatmul.mubr.bf16.vlgmr.msra.gmra.mxu0 %v5640_v31  ;;  %v5585_v19 = vmax.f32 %v5521_v5, 0.0  ;;  %v5587_v60 = vmax.f32 %v5523_v61, 0.0  ;;  %v20115_v5 = vld [vmem:[#allocation18_spill] sm:$0xff]  ;;  %v4271_v42 = vadd.f32 %v20118_v46, %v20117_v47 }
 0x2fc   : > { %v5588_v24 = vmax.f32 %v5524_v63, 0.0  ;;  %v5590_v30 = vmax.f32 %v5526_v15, 0.0  ;;  %v5525_v0 = vadd.f32 %v15886_v49, %v5311_v44  ;;  %v5527_v23 = vadd.f32 %v15888_v36, %v5313_v55  ;;  %6065 = vmatmul.mubr.bf16.vlgmr.msra.gmra.mxu1 %v5642_v13  ;;  %v20116_v61 = vld [vmem:[#allocation10_spill] sm:$0xff] }
 0x2fd   : > { %v5314_v53 = vadd.f32 %v5062_v28, %v15740_v14  ;;  %v5316_v40 = vadd.f32 %v5175_v34, %v15743_v32  ;;  %v5064_v62 = vpop.f32.mrf.mxu0  ;;  %v5177_v4 = vpop.f32.mrf.mxu1  ;;  %v4269_v3 = vadd.f32 %v20116_v61, %v20115_v5  ;;  %v4800_v28 = vadd.f32 %v15781_v39, %v4271_v42 }
 0x2fe   : > { %v5644_v56 = vpack.c.bf16 %v5588_v24, %v5584_v45  ;;  %v5646_v10 = vpack.c.bf16 %v5590_v30, %v5586_v12  ;;  %v5589_v41 = vmax.f32 %v5525_v0, 0.0  ;;  %v5591_v58 = vmax.f32 %v5527_v23, 0.0 }
 0x2ff   : > { %v5528_v21 = vadd.f32 %v15880_v59, %v5314_v53  ;;  %v5530_v2 = vadd.f32 %v15882_v37, %v5316_v40  ;;  %v5315_v1 = vadd.f32 %v5064_v62, %v15746_v17  ;;  %v5317_v31 = vadd.f32 %v5177_v4, %v15749_v27  ;;  %v5066_v13 = vpop.f32.mrf.mxu0  ;;  %v5179_v38 = vpop.f32.mrf.mxu1 }
 0x300   : > { %v5318_v14 = vadd.f32 %v5066_v13, %v15752_v18  ;;  %v5320_v32 = vadd.f32 %v5179_v38, %v20114_v22  ;;  %v5645_v9 = vpack.c.bf16 %v5589_v41, %v5585_v19  ;;  %v5647_v57 = vpack.c.bf16 %v5591_v58, %v5587_v60  ;;  %v20121_v22 = vld [vmem:[#allocation38_spill] sm:$0xff] }
 0x301   : > { %v5529_v63 = vadd.f32 %v15886_v49, %v5315_v1  ;;  %v5531_v17 = vadd.f32 %v15888_v36, %v5317_v31  ;;  %v5068_v15 = vpop.f32.mrf.mxu0  ;;  %v5181_v27 = vpop.f32.mrf.mxu1  ;;  %v4798_v12 = vadd.f32 %v15779_v35, %v4269_v3  ;;  %v5592_v34 = vmax.f32 %v5528_v21, 0.0 }
 0x302   : > { %v5532_v44 = vadd.f32 %v15880_v59, %v5318_v14  ;;  %v5534_v18 = vadd.f32 %v15882_v37, %v5320_v32  ;;  %v5319_v55 = vadd.f32 %v5068_v15, %v4790_v7  ;;  %v5321_v45 = vadd.f32 %v5181_v27, %v4792_v48  ;;  %5975 = vmatprep.mubr.bf16.mxu0 %v5645_v9  ;;  %v20120_v14 = vld [vmem:[#allocation37_spill] sm:$0xff] }
 0x303   : > { %v5594_v24 = vmax.f32 %v5530_v2, 0.0  ;;  %6072 = vmatprep.mubr.bf16.mxu1 %v5647_v57  ;;  %v5072_v30 = vpop.f32.mrf.mxu0  ;;  %v5185_v0 = vpop.f32.mrf.mxu1  ;;  %5976 = vmatmul.mubr.bf16.gmra.mxu0 %v5644_v56  ;;  %v5593_v7 = vmax.f32 %v5529_v63, 0.0  ;;  %v5595_v48 = vmax.f32 %v5531_v17, 0.0  ;;  %v20119_v56 = vld [vmem:[#allocation22_spill] sm:$0xff]  ;;  %v20122_v63 = vld [vmem:[#allocation36_spill] sm:$0xff]  ;;  %v20123_v15 = vld [vmem:[#allocation29_spill] sm:$0xff] }
 0x304   : > { %v5596_v23 = vmax.f32 %v5532_v44, 0.0  ;;  %v5598_v19 = vmax.f32 %v5534_v18, 0.0  ;;  %v5533_v60 = vadd.f32 %v15886_v49, %v5319_v55  ;;  %v5535_v53 = vadd.f32 %v15888_v36, %v5321_v45  ;;  %6073 = vmatmul.mubr.bf16.gmra.mxu1 %v5646_v10 }
 0x305   : > { %v5322_v40 = vadd.f32 %v5072_v30, %v15762_v33  ;;  %v5324_v35 = vadd.f32 %v5185_v0, %v15765_v26  ;;  %v5074_v39 = vpop.f32.mrf.mxu0  ;;  %v5187_v62 = vpop.f32.mrf.mxu1  ;;  %v4806_v17 = vadd.f32 %v15801_v16, %v20122_v63  ;;  %v4808_v27 = vadd.f32 %v15803_v11, %v20123_v15 }
 0x306   : > { %v5648_v4 = vpack.c.bf16 %v5596_v23, %v5592_v34  ;;  %v5650_v41 = vpack.c.bf16 %v5598_v19, %v5594_v24  ;;  %v5597_v58 = vmax.f32 %v5533_v60, 0.0  ;;  %v5599_v21 = vmax.f32 %v5535_v53, 0.0 }
 0x307   : > { %v5536_v2 = vadd.f32 %v15880_v59, %v5322_v40  ;;  %v5538_v1 = vadd.f32 %v15882_v37, %v5324_v35  ;;  %v5323_v31 = vadd.f32 %v5074_v39, %v15768_v54  ;;  %v5325_v10 = vadd.f32 %v5187_v62, %v20119_v56  ;;  %v5076_v13 = vpop.f32.mrf.mxu0  ;;  %v5189_v38 = vpop.f32.mrf.mxu1 }
 0x308   : > { %v5326_v33 = vadd.f32 %v5076_v13, %v20120_v14  ;;  %v5328_v26 = vadd.f32 %v5189_v38, %v20121_v22  ;;  %v5649_v32 = vpack.c.bf16 %v5597_v58, %v5593_v7  ;;  %v5651_v9 = vpack.c.bf16 %v5599_v21, %v5595_v48  ;;  %v20124_v58 = vld [vmem:[#allocation9_spill] sm:$0xff]  ;;  %v20125_v21 = vld [vmem:[#allocation26_spill] sm:$0xff] }
 0x309   : > { %v5537_v57 = vadd.f32 %v15886_v49, %v5323_v31  ;;  %v5539_v5 = vadd.f32 %v15888_v36, %v5325_v10  ;;  %v5078_v61 = vpop.f32.mrf.mxu0  ;;  %v5191_v3 = vpop.f32.mrf.mxu1  ;;  %v5600_v44 = vmax.f32 %v5536_v2, 0.0  ;;  %v5602_v18 = vmax.f32 %v5538_v1, 0.0 }
 0x30a   : > { %v5540_v47 = vadd.f32 %v15880_v59, %v5326_v33  ;;  %v5542_v54 = vadd.f32 %v15882_v37, %v5328_v26  ;;  %v5327_v46 = vadd.f32 %v5078_v61, %v4798_v12  ;;  %v5329_v42 = vadd.f32 %v5191_v3, %v4800_v28  ;;  %5983 = vmatprep.mubr.bf16.mxu0 %v5649_v32  ;;  %v20126_v33 = vld [vmem:[#allocation25_spill] sm:$0xff]  ;;  %v20127_v26 = vld [vmem:[#allocation28_spill] sm:$0xff] }
 0x30b   : > { %6080 = vmatprep.mubr.bf16.mxu1 %v5651_v9  ;;  %v5082_v55 = vpop.f32.mrf.mxu0  ;;  %v5195_v45 = vpop.f32.mrf.mxu1  ;;  %5984 = vmatmul.mubr.bf16.gmra.mxu0 %v5648_v4  ;;  %v5601_v12 = vmax.f32 %v5537_v57, 0.0  ;;  %v5603_v28 = vmax.f32 %v5539_v5, 0.0  ;;  %v4814_v22 = vadd.f32 %v15823_v51, %v20126_v33  ;;  %v4816_v32 = vadd.f32 %v15825_v8, %v20127_v26 }
 0x30c   : > { %v5604_v34 = vmax.f32 %v5540_v47, 0.0  ;;  %v5606_v24 = vmax.f32 %v5542_v54, 0.0  ;;  %v5541_v30 = vadd.f32 %v15886_v49, %v5327_v46  ;;  %v5543_v0 = vadd.f32 %v15888_v36, %v5329_v42  ;;  %6081 = vmatmul.mubr.bf16.gmra.mxu1 %v5650_v41 }
 0x30d   : > { %v5330_v16 = vadd.f32 %v5082_v55, %v15784_v6  ;;  %v5332_v23 = vadd.f32 %v5195_v45, %v15787_v43  ;;  %v5084_v11 = vpop.f32.mrf.mxu0  ;;  %v5197_v19 = vpop.f32.mrf.mxu1 }
 0x30e   : > { %v5652_v60 = vpack.c.bf16 %v5604_v34, %v5600_v44  ;;  %v5654_v53 = vpack.c.bf16 %v5606_v24, %v5602_v18  ;;  %v5605_v7 = vmax.f32 %v5541_v30, 0.0  ;;  %v5607_v48 = vmax.f32 %v5543_v0, 0.0  ;;  %v20128_v30 = vld [vmem:[#allocation27_spill] sm:$0xff] }
 0x30f   : > { %v5544_v40 = vadd.f32 %v15880_v59, %v5330_v16  ;;  %v5546_v35 = vadd.f32 %v15882_v37, %v5332_v23  ;;  %v5331_v39 = vadd.f32 %v5084_v11, %v15790_v20  ;;  %v5333_v62 = vadd.f32 %v5197_v19, %v15793_v25  ;;  %v5086_v4 = vpop.f32.mrf.mxu0  ;;  %v5199_v41 = vpop.f32.mrf.mxu1  ;;  %v20129_v16 = vld [vmem:[#allocation35_spill] sm:$0xff]  ;;  %v20130_v23 = vld [vmem:[#allocation41_spill] sm:$0xff] }
 0x310   : > { %v5334_v6 = vadd.f32 %v5086_v4, %v20124_v58  ;;  %v5336_v43 = vadd.f32 %v5199_v41, %v20125_v21  ;;  %v5653_v2 = vpack.c.bf16 %v5605_v7, %v5601_v12  ;;  %v5655_v1 = vpack.c.bf16 %v5607_v48, %v5603_v28  ;;  %v20132_v4 = vld [vmem:[#allocation48_spill] sm:$0xff]  ;;  %v20133_v58 = vld [vmem:[#allocation34_spill] sm:$0xff] }
 0x311   : > { %v5545_v31 = vadd.f32 %v15886_v49, %v5331_v39  ;;  %v5547_v56 = vadd.f32 %v15888_v36, %v5333_v62  ;;  %v5088_v10 = vpop.f32.mrf.mxu0  ;;  %v5201_v13 = vpop.f32.mrf.mxu1  ;;  %v5608_v9 = vmax.f32 %v5544_v40, 0.0  ;;  %v5610_v57 = vmax.f32 %v5546_v35, 0.0  ;;  %v20131_v62 = vld [vmem:[#allocation11_spill] sm:$0xff] }
 0x312   : > { %v5548_v38 = vadd.f32 %v15880_v59, %v5334_v6  ;;  %v5550_v20 = vadd.f32 %v15882_v37, %v5336_v43  ;;  %v5335_v14 = vadd.f32 %v5088_v10, %v4806_v17  ;;  %v5337_v25 = vadd.f32 %v5201_v13, %v4808_v27  ;;  %5991 = vmatprep.mubr.bf16.mxu0 %v5653_v2  ;;  %v20134_v6 = vld [vmem:[#allocation49_spill] sm:$0xff] }
 0x313   : > { %6088 = vmatprep.mubr.bf16.mxu1 %v5655_v1  ;;  %v5092_v5 = vpop.f32.mrf.mxu0  ;;  %v5205_v61 = vpop.f32.mrf.mxu1  ;;  %5992 = vmatmul.mubr.bf16.gmra.mxu0 %v5652_v60  ;;  %v5609_v42 = vmax.f32 %v5545_v31, 0.0  ;;  %v5611_v63 = vmax.f32 %v5547_v56, 0.0  ;;  %v4822_v41 = vadd.f32 %v20132_v4, %v20131_v62  ;;  %v4824_v21 = vadd.f32 %v20134_v6, %v20133_v58  ;;  %v20145_v6 = vld [vmem:[#allocation51_spill] sm:$0xff] }
 0x314   : > { %v5612_v3 = vmax.f32 %v5548_v38, 0.0  ;;  %v5614_v47 = vmax.f32 %v5550_v20, 0.0  ;;  %v5549_v54 = vadd.f32 %v15886_v49, %v5335_v14  ;;  %v5551_v46 = vadd.f32 %v15888_v36, %v5337_v25  ;;  %6089 = vmatmul.mubr.bf16.gmra.mxu1 %v5654_v53  ;;  %v20135_v25 = vld [vmem:[#allocation42_spill] sm:$0xff] }
 0x315   : > { %v5338_v51 = vadd.f32 %v5092_v5, %v15806_v29  ;;  %v5340_v17 = vadd.f32 %v5205_v61, %v15809_v50  ;;  %v5094_v8 = vpop.f32.mrf.mxu0  ;;  %v5207_v15 = vpop.f32.mrf.mxu1 }
 0x316   : > { %v5656_v27 = vpack.c.bf16 %v5612_v3, %v5608_v9  ;;  %v5658_v44 = vpack.c.bf16 %v5614_v47, %v5610_v57  ;;  %v5613_v18 = vmax.f32 %v5549_v54, 0.0  ;;  %v5615_v55 = vmax.f32 %v5551_v46, 0.0  ;;  %v20137_v46 = vld [vmem:[#allocation44_spill] sm:$0xff] }
 0x317   : > { %v5552_v45 = vadd.f32 %v15880_v59, %v5338_v51  ;;  %v5554_v34 = vadd.f32 %v15882_v37, %v5340_v17  ;;  %v5339_v24 = vadd.f32 %v5094_v8, %v15812_v52  ;;  %v5341_v0 = vadd.f32 %v5207_v15, %v20128_v30  ;;  %v5096_v12 = vpop.f32.mrf.mxu0  ;;  %v5209_v28 = vpop.f32.mrf.mxu1  ;;  %v20139_v15 = vld [vmem:[#allocation46_spill] sm:$0xff] }
 0x318   : > { %v5342_v29 = vadd.f32 %v5096_v12, %v20129_v16  ;;  %v5344_v50 = vadd.f32 %v5209_v28, %v20130_v23  ;;  %v5657_v11 = vpack.c.bf16 %v5613_v18, %v5609_v42  ;;  %v5659_v19 = vpack.c.bf16 %v5615_v55, %v5611_v63  ;;  %v20138_v63 = vld [vmem:[#allocation45_spill] sm:$0xff]  ;;  %v20141_v23 = vld [vmem:[#allocation40_spill] sm:$0xff] }
 0x319   : > { %v5553_v60 = vadd.f32 %v15886_v49, %v5339_v24  ;;  %v5555_v53 = vadd.f32 %v15888_v36, %v5341_v0  ;;  %v5098_v7 = vpop.f32.mrf.mxu0  ;;  %v5211_v48 = vpop.f32.mrf.mxu1  ;;  %v5616_v43 = vmax.f32 %v5552_v45, 0.0  ;;  %v5618_v2 = vmax.f32 %v5554_v34, 0.0 }
 0x31a   : > { %v5556_v40 = vadd.f32 %v15880_v59, %v5342_v29  ;;  %v5558_v52 = vadd.f32 %v15882_v37, %v5344_v50  ;;  %v5343_v35 = vadd.f32 %v5098_v7, %v4814_v22  ;;  %v5345_v39 = vadd.f32 %v5211_v48, %v4816_v32  ;;  %5999 = vmatprep.mubr.bf16.mxu0 %v5657_v11  ;;  %v20136_v22 = vld [vmem:[#allocation43_spill] sm:$0xff]  ;;  %v20142_v50 = vld [vmem:[#allocation57_spill] sm:$0xff] }
 0x31b   : > { %6096 = vmatprep.mubr.bf16.mxu1 %v5659_v19  ;;  %v5102_v1 = vpop.f32.mrf.mxu0  ;;  %v5215_v31 = vpop.f32.mrf.mxu1  ;;  %6000 = vmatmul.mubr.bf16.gmra.mxu0 %v5656_v27  ;;  %v5617_v20 = vmax.f32 %v5553_v60, 0.0  ;;  %v5619_v14 = vmax.f32 %v5555_v53, 0.0  ;;  %v4830_v11 = vadd.f32 %v20142_v50, %v20141_v23  ;;  %v20143_v19 = vld [vmem:[#allocation20_spill] sm:$0xff]  ;;  %v20144_v60 = vld [vmem:[#allocation58_spill] sm:$0xff] }
 0x31c   : > { %v5620_v56 = vmax.f32 %v5556_v40, 0.0  ;;  %v5622_v10 = vmax.f32 %v5558_v52, 0.0  ;;  %v5557_v13 = vadd.f32 %v15886_v49, %v5343_v35  ;;  %v5559_v38 = vadd.f32 %v15888_v36, %v5345_v39  ;;  %6097 = vmatmul.mubr.bf16.gmra.mxu1 %v5658_v44  ;;  %v20140_v44 = vld [vmem:[#allocation47_spill] sm:$0xff] }
 0x31d   : > { %v5346_v33 = vadd.f32 %v5102_v1, %v20135_v25  ;;  %v5348_v26 = vadd.f32 %v5215_v31, %v20136_v22  ;;  %v5104_v32 = vpop.f32.mrf.mxu0  ;;  %v5217_v9 = vpop.f32.mrf.mxu1  ;;  %v4832_v53 = vadd.f32 %v20144_v60, %v20143_v19  ;;  %v20147_v25 = vld [vmem:[#allocation53_spill] sm:$0xff]  ;;  %v20148_v22 = vld [vmem:[#allocation54_spill] sm:$0xff] }
 0x31e   : > { %v5660_v57 = vpack.c.bf16 %v5620_v56, %v5616_v43  ;;  %v5662_v5 = vpack.c.bf16 %v5622_v10, %v5618_v2  ;;  %v5621_v61 = vmax.f32 %v5557_v13, 0.0  ;;  %v5623_v3 = vmax.f32 %v5559_v38, 0.0  ;;  %v20146_v43 = vld [vmem:[#allocation52_spill] sm:$0xff] }
 0x31f   : > { %v5560_v47 = vadd.f32 %v15880_v59, %v5346_v33  ;;  %v5562_v54 = vadd.f32 %v15882_v37, %v5348_v26  ;;  %v5347_v42 = vadd.f32 %v5104_v32, %v20137_v46  ;;  %v5349_v51 = vadd.f32 %v5217_v9, %v20138_v63  ;;  %v5106_v17 = vpop.f32.mrf.mxu0  ;;  %v5219_v8 = vpop.f32.mrf.mxu1 }
 0x320   : > { %v5350_v27 = vadd.f32 %v5106_v17, %v20139_v15  ;;  %v5352_v18 = vadd.f32 %v5219_v8, %v20140_v44  ;;  %v5661_v55 = vpack.c.bf16 %v5621_v61, %v5617_v20  ;;  %v5663_v45 = vpack.c.bf16 %v5623_v3, %v5619_v14  ;;  %v20150_v61 = vld [vmem:[#allocation56_spill] sm:$0xff] }
 0x321   : > { %v5561_v34 = vadd.f32 %v15886_v49, %v5347_v42  ;;  %v5563_v24 = vadd.f32 %v15888_v36, %v5349_v51  ;;  %v5108_v30 = vpop.f32.mrf.mxu0  ;;  %v5221_v0 = vpop.f32.mrf.mxu1  ;;  %v5624_v7 = vmax.f32 %v5560_v47, 0.0  ;;  %v5626_v48 = vmax.f32 %v5562_v54, 0.0 }
 0x322   : > { %v5564_v12 = vadd.f32 %v15880_v59, %v5350_v27  ;;  %v5566_v28 = vadd.f32 %v15882_v37, %v5352_v18  ;;  %v5351_v16 = vadd.f32 %v5108_v30, %v4822_v41  ;;  %v5353_v29 = vadd.f32 %v5221_v0, %v4824_v21  ;;  %6007 = vmatprep.mubr.bf16.mxu0 %v5661_v55 }
 0x323   : > { %6104 = vmatprep.mubr.bf16.mxu1 %v5663_v45  ;;  %v5112_v40 = vpop.f32.mrf.mxu0  ;;  %v5225_v52 = vpop.f32.mrf.mxu1  ;;  %6008 = vmatmul.mubr.bf16.gmra.mxu0 %v5660_v57  ;;  %v5625_v41 = vmax.f32 %v5561_v34, 0.0  ;;  %v5627_v58 = vmax.f32 %v5563_v24, 0.0  ;;  %v20149_v57 = vld [vmem:[#allocation55_spill] sm:$0xff] }
 0x324   : > { %v5628_v35 = vmax.f32 %v5564_v12, 0.0  ;;  %v5630_v39 = vmax.f32 %v5566_v28, 0.0  ;;  %v5565_v62 = vadd.f32 %v15886_v49, %v5351_v16  ;;  %v5567_v4 = vadd.f32 %v15888_v36, %v5353_v29  ;;  %6105 = vmatmul.mubr.bf16.gmra.mxu1 %v5662_v5 }
 0x325   : > { %v5354_v21 = vadd.f32 %v5112_v40, %v20145_v6  ;;  %v5356_v2 = vadd.f32 %v5225_v52, %v20146_v43  ;;  %v5114_v1 = vpop.f32.mrf.mxu0  ;;  %v5227_v31 = vpop.f32.mrf.mxu1 }
 0x326   : > { %v5664_v56 = vpack.c.bf16 %v5628_v35, %v5624_v7  ;;  %v5666_v10 = vpack.c.bf16 %v5630_v39, %v5626_v48  ;;  %v5629_v13 = vmax.f32 %v5565_v62, 0.0  ;;  %v5631_v38 = vmax.f32 %v5567_v4, 0.0 }
 0x327   : > { %v5568_v20 = vadd.f32 %v15880_v59, %v5354_v21  ;;  %v5570_v14 = vadd.f32 %v15882_v37, %v5356_v2  ;;  %v5355_v33 = vadd.f32 %v5114_v1, %v20147_v25  ;;  %v5357_v26 = vadd.f32 %v5227_v31, %v20148_v22  ;;  %v5116_v32 = vpop.f32.mrf.mxu0  ;;  %v5229_v9 = vpop.f32.mrf.mxu1 }
 0x328   : > { %v5358_v5 = vadd.f32 %v5116_v32, %v20149_v57  ;;  %v5360_v3 = vadd.f32 %v5229_v9, %v20150_v61  ;;  %v5665_v47 = vpack.c.bf16 %v5629_v13, %v5625_v41  ;;  %v5667_v54 = vpack.c.bf16 %v5631_v38, %v5627_v58 }
 0x329   : > { %v5569_v46 = vadd.f32 %v15886_v49, %v5355_v33  ;;  %v5571_v42 = vadd.f32 %v15888_v36, %v5357_v26  ;;  %v5118_v63 = vpop.f32.mrf.mxu0  ;;  %v5231_v51 = vpop.f32.mrf.mxu1  ;;  %v5632_v44 = vmax.f32 %v5568_v20, 0.0  ;;  %v5634_v18 = vmax.f32 %v5570_v14, 0.0 }
 0x32a   : > { %v5572_v17 = vadd.f32 %v15880_v59, %v5358_v5  ;;  %v5574_v8 = vadd.f32 %v15882_v37, %v5360_v3  ;;  %v5359_v15 = vadd.f32 %v5118_v63, %v4830_v11  ;;  %v5361_v27 = vadd.f32 %v5231_v51, %v4832_v53  ;;  %6015 = vmatprep.mubr.bf16.mxu0 %v5665_v47 }
 0x32b   : > { %6112 = vmatprep.mubr.bf16.mxu1 %v5667_v54  ;;  %6016 = vmatmul.mubr.bf16.gmra.mxu0 %v5664_v56  ;;  %v5633_v30 = vmax.f32 %v5569_v46, 0.0  ;;  %v5635_v0 = vmax.f32 %v5571_v42, 0.0 }
 0x32c   : > { %v5636_v55 = vmax.f32 %v5572_v17, 0.0  ;;  %v5638_v45 = vmax.f32 %v5574_v8, 0.0  ;;  %v5573_v34 = vadd.f32 %v15886_v49, %v5359_v15  ;;  %v5575_v24 = vadd.f32 %v15888_v36, %v5361_v27  ;;  %6113 = vmatmul.mubr.bf16.gmra.mxu1 %v5666_v10  ;;  %v16043_v36 = vld [vmem:[%s19442_s5] ss:$0 sm:$0xff] }
 0x32e   : > { %v5668_v12 = vpack.c.bf16 %v5636_v55, %v5632_v44  ;;  %v5670_v59 = vpack.c.bf16 %v5638_v45, %v5634_v18  ;;  %v5637_v28 = vmax.f32 %v5573_v34, 0.0  ;;  %v5639_v37 = vmax.f32 %v5575_v24, 0.0 }
 0x330   : > { %v5669_v16 = vpack.c.bf16 %v5637_v28, %v5633_v30  ;;  %v5671_v29 = vpack.c.bf16 %v5639_v37, %v5635_v0 }
 0x332   : > { %6023 = vmatprep.mubr.bf16.mxu0 %v5669_v16  ;;  %6120 = vmatprep.mubr.bf16.mxu1 %v5671_v29 }
 0x333   : > { %6024 = vmatmul.mubr.bf16.gmra.mxu0 %v5668_v12 }
 0x334   : > { %6121 = vmatmul.mubr.bf16.gmra.mxu1 %v5670_v59 }
 0x3bb   : > { %v11906_v23 = vpop.f32.mrf.mxu0 }
 0x3bc   : > { %v11970_v50 = vpop.f32.mrf.mxu1 }
 0x3bd   : > { %v11907_v49 = vpop.f32.mrf.mxu0 }
 0x3be   : > { %v11971_v11 = vpop.f32.mrf.mxu1  ;;  %v11908_v19 = vadd.f32 %v11907_v49, %v11906_v23 }
 0x3bf   : > { %v11909_v60 = vpop.f32.mrf.mxu0  ;;  %v11972_v48 = vadd.f32 %v11971_v11, %v11970_v50 }
 0x3c0   : > { %v11973_v53 = vpop.f32.mrf.mxu1  ;;  %v5970_v7 = vadd.f32 %v11908_v19, %v16043_v36 }
 0x3c1   : > { %v11910_v40 = vpop.f32.mrf.mxu0 }
 0x3c2   : > { %v11974_v52 = vpop.f32.mrf.mxu1  ;;  %v16046_v35 = vadd.f32 %v11972_v48, %v5970_v7  ;;  %v11911_v39 = vadd.f32 %v11910_v40, %v11909_v60 }
 0x3c3   : > { %v11912_v62 = vpop.f32.mrf.mxu0  ;;  %v11975_v58 = vadd.f32 %v11974_v52, %v11973_v53 }
 0x3c4   : > { %20151 = vst [vmem:[#allocation39_spill] sm:$0xff] %v16046_v35  ;;  %v11976_v4 = vpop.f32.mrf.mxu1  ;;  %v5973_v41 = vadd.f32 %v11911_v39, %v16043_v36  ;;  %6145 = vrot.lane.b32.xlu0 %v16046_v35, %s12995_s29 }
 0x3c5   : > { %v11913_v6 = vpop.f32.mrf.mxu0 }
 0x3c6   : > { %v11977_v21 = vpop.f32.mrf.mxu1  ;;  %v16051_v43 = vadd.f32 %v11975_v58, %v5973_v41  ;;  %v11914_v2 = vadd.f32 %v11913_v6, %v11912_v62 }
 0x3c7   : > { %v11915_v1 = vpop.f32.mrf.mxu0  ;;  %v11978_v25 = vadd.f32 %v11977_v21, %v11976_v4 }
 0x3c8   : > { %20152 = vst [vmem:[#allocation23_spill] sm:$0xff] %v16051_v43  ;;  %v11979_v31 = vpop.f32.mrf.mxu1  ;;  %6195 = vrot.lane.b32.xlu1 %v16051_v43, %s12996_s16  ;;  %6193 = vrot.lane.b32.xlu0 %v16046_v35, %s12996_s16  ;;  %v5978_v13 = vadd.f32 %v11914_v2, %v16043_v36 }
 0x3c9   : > { %v11916_v56 = vpop.f32.mrf.mxu0 }
 0x3ca   : > { %v11980_v10 = vpop.f32.mrf.mxu1  ;;  %v11917_v38 = vadd.f32 %v11916_v56, %v11915_v1  ;;  %v16062_v26 = vadd.f32 %v11978_v25, %v5978_v13 }
 0x3cb   : > { %v11918_v20 = vpop.f32.mrf.mxu0  ;;  %v11981_v5 = vadd.f32 %v11980_v10, %v11979_v31 }
 0x3cc   : > { %v11982_v14 = vpop.f32.mrf.mxu1  ;;  %6243 = vrot.lane.b32.xlu1 %v16051_v43, %s12997_s17  ;;  %6241 = vrot.lane.b32.xlu0 %v16046_v35, %s12997_s17  ;;  %20153 = vst [vmem:[#allocation17_spill] sm:$0xff] %v16062_v26  ;;  %v5981_v32 = vadd.f32 %v11917_v38, %v16043_v36 }
 0x3cd   : > { %v11919_v33 = vpop.f32.mrf.mxu0 }
 0x3ce   : > { %v11983_v22 = vpop.f32.mrf.mxu1  ;;  %v16069_v47 = vadd.f32 %v11981_v5, %v5981_v32  ;;  %v11920_v54 = vadd.f32 %v11919_v33, %v11918_v20 }
 0x3cf   : > { %v11921_v9 = vpop.f32.mrf.mxu0  ;;  %v11984_v44 = vadd.f32 %v11983_v22, %v11982_v14 }
 0x3d0   : > { %v11985_v57 = vpop.f32.mrf.mxu1  ;;  %6149 = vrot.lane.b32.xlu1 %v16062_v26, %s12995_s29  ;;  %6147 = vrot.lane.b32.xlu0 %v16051_v43, %s12995_s29  ;;  %20154 = vst [vmem:[#allocation24_spill] sm:$0xff] %v16069_v47  ;;  %v5986_v17 = vadd.f32 %v11920_v54, %v16043_v36 }
 0x3d1   : > { %v11922_v61 = vpop.f32.mrf.mxu0 }
 0x3d2   : > { %v11986_v3 = vpop.f32.mrf.mxu1  ;;  %v11923_v8 = vadd.f32 %v11922_v61, %v11921_v9  ;;  %v16080_v45 = vadd.f32 %v11984_v44, %v5986_v17 }
 0x3d3   : > { %v11924_v46 = vpop.f32.mrf.mxu0  ;;  %v11987_v0 = vadd.f32 %v11986_v3, %v11985_v57 }
 0x3d4   : > { %v11988_v42 = vpop.f32.mrf.mxu1  ;;  %6151 = vrot.lane.b32.xlu1 %v16069_v47, %s12995_s29  ;;  %6197 = vrot.lane.b32.xlu0 %v16062_v26, %s12996_s16  ;;  %20155 = vst [vmem:[#allocation13_spill] sm:$0xff] %v16080_v45  ;;  %v5989_v34 = vadd.f32 %v11923_v8, %v16043_v36 }
 0x3d5   : > { %v11925_v63 = vpop.f32.mrf.mxu0 }
 0x3d6   : > { %v11989_v51 = vpop.f32.mrf.mxu1  ;;  %v16087_v28 = vadd.f32 %v11987_v0, %v5989_v34  ;;  %v11926_v37 = vadd.f32 %v11925_v63, %v11924_v46 }
 0x3d7   : > { %v11927_v15 = vpop.f32.mrf.mxu0  ;;  %v11990_v19 = vadd.f32 %v11989_v51, %v11988_v42 }
 0x3d8   : > { %v11991_v27 = vpop.f32.mrf.mxu1  ;;  %6199 = vrot.lane.b32.xlu1 %v16069_v47, %s12996_s16  ;;  %6245 = vrot.lane.b32.xlu0 %v16062_v26, %s12997_s17  ;;  %20156 = vst [vmem:[#allocation33_spill] sm:$0xff] %v16087_v28  ;;  %v5994_v50 = vadd.f32 %v11926_v37, %v16043_v36 }
 0x3d9   : > { %v11928_v18 = vpop.f32.mrf.mxu0 }
 0x3da   : > { %v11992_v55 = vpop.f32.mrf.mxu1  ;;  %v11929_v49 = vadd.f32 %v11928_v18, %v11927_v15  ;;  %v16098_v53 = vadd.f32 %v11990_v19, %v5994_v50 }
 0x3db   : > { %v11930_v24 = vpop.f32.mrf.mxu0  ;;  %v11993_v40 = vadd.f32 %v11992_v55, %v11991_v27 }
 0x3dc   : > { %v11994_v30 = vpop.f32.mrf.mxu1  ;;  %6247 = vrot.lane.b32.xlu1 %v16069_v47, %s12997_s17  ;;  %6153 = vrot.lane.b32.xlu0 %v16080_v45, %s12995_s29  ;;  %20157 = vst [vmem:[#allocation14_spill] sm:$0xff] %v16098_v53  ;;  %v5997_v7 = vadd.f32 %v11929_v49, %v16043_v36 }
 0x3dd   : > { %v11931_v12 = vpop.f32.mrf.mxu0 }
 0x3de   : > { %v11995_v59 = vpop.f32.mrf.mxu1  ;;  %v16105_v39 = vadd.f32 %v11993_v40, %v5997_v7  ;;  %v11932_v62 = vadd.f32 %v11931_v12, %v11930_v24 }
 0x3df   : > { %v11933_v16 = vpop.f32.mrf.mxu0  ;;  %v11996_v2 = vadd.f32 %v11995_v59, %v11994_v30 }
 0x3e0   : > { %6155 = vrot.lane.b32.xlu1 %v16087_v28, %s12995_s29  ;;  %6201 = vrot.lane.b32.xlu0 %v16080_v45, %s12996_s16  ;;  %v11997_v29 = vpop.f32.mrf.mxu1  ;;  %20158 = vst [vmem:[#allocation30_spill] sm:$0xff] %v16105_v39  ;;  %v6002_v58 = vadd.f32 %v11932_v62, %v16043_v36  ;;  %v12999_v62 = vmov 1934713408  }
 0x3e1   : > { %v11934_v23 = vpop.f32.mrf.mxu0 }
 0x3e2   : > { %v11998_v60 = vpop.f32.mrf.mxu1  ;;  %v11935_v6 = vadd.f32 %v11934_v23, %v11933_v16  ;;  %v16116_v31 = vadd.f32 %v11996_v2, %v6002_v58 }
 0x3e3   : > { %v11936_v11 = vpop.f32.mrf.mxu0  ;;  %v11999_v13 = vadd.f32 %v11998_v60, %v11997_v29 }
 0x3e4   : > { %6203 = vrot.lane.b32.xlu1 %v16087_v28, %s12996_s16  ;;  %6249 = vrot.lane.b32.xlu0 %v16080_v45, %s12997_s17  ;;  %v12000_v52 = vpop.f32.mrf.mxu1  ;;  %20159 = vst [vmem:[#allocation15_spill] sm:$0xff] %v16116_v31  ;;  %v6005_v56 = vadd.f32 %v11935_v6, %v16043_v36 }
 0x3e5   : > { %v11937_v48 = vpop.f32.mrf.mxu0 }
 0x3e6   : > { %v12001_v41 = vpop.f32.mrf.mxu1  ;;  %v16123_v20 = vadd.f32 %v11999_v13, %v6005_v56  ;;  %v11938_v14 = vadd.f32 %v11937_v48, %v11936_v11 }
 0x3e7   : > { %v11939_v4 = vpop.f32.mrf.mxu0  ;;  %v12002_v57 = vadd.f32 %v12001_v41, %v12000_v52 }
 0x3e8   : > { %6251 = vrot.lane.b32.xlu1 %v16087_v28, %s12997_s17  ;;  %6157 = vrot.lane.b32.xlu0 %v16098_v53, %s12995_s29  ;;  %v12003_v1 = vpop.f32.mrf.mxu1  ;;  %20160 = vst [vmem:[#allocation31_spill] sm:$0xff] %v16123_v20  ;;  %v6010_v22 = vadd.f32 %v11938_v14, %v16043_v36 }
 0x3e9   : > { %v11940_v21 = vpop.f32.mrf.mxu0 }
 0x3ea   : > { %v12004_v38 = vpop.f32.mrf.mxu1  ;;  %v11941_v32 = vadd.f32 %v11940_v21, %v11939_v4  ;;  %v16134_v61 = vadd.f32 %v12002_v57, %v6010_v22  ;;  %v6324_v4 = vunpack.c.l.s4 %v12999_v62  ;;  %v20167_v21 = vld [vmem:[#allocation50_spill] sm:$0xff] }
 0x3eb   : > { %v11942_v10 = vpop.f32.mrf.mxu0  ;;  %v12005_v46 = vadd.f32 %v12004_v38, %v12003_v1 }
 0x3ec   : > { %6159 = vrot.lane.b32.xlu1 %v16105_v39, %s12995_s29  ;;  %6205 = vrot.lane.b32.xlu0 %v16098_v53, %s12996_s16  ;;  %v12006_v33 = vpop.f32.mrf.mxu1  ;;  %20161 = vst [vmem:[#allocation16_spill] sm:$0xff] %v16134_v61  ;;  %v6013_v3 = vadd.f32 %v11941_v32, %v16043_v36  ;;  %v6325_v6 = vunpack.c.0.s8 %v6324_v4 }
 0x3ed   : > { %v11943_v25 = vpop.f32.mrf.mxu0 }
 0x3ee   : > { %v12007_v5 = vpop.f32.mrf.mxu1  ;;  %v16141_v63 = vadd.f32 %v12005_v46, %v6013_v3  ;;  %v11944_v51 = vadd.f32 %v11943_v25, %v11942_v10  ;;  %v16197_v25 = vsub.s32 %v6325_v6, %v20167_v21 }
 0x3ef   : > { %v11945_v9 = vpop.f32.mrf.mxu0  ;;  %v12008_v18 = vadd.f32 %v12007_v5, %v12006_v33 }
 0x3f0   : > { %6207 = vrot.lane.b32.xlu1 %v16105_v39, %s12996_s16  ;;  %6253 = vrot.lane.b32.xlu0 %v16098_v53, %s12997_s17  ;;  %v12009_v42 = vpop.f32.mrf.mxu1  ;;  %20162 = vst [vmem:[#allocation32_spill] sm:$0xff] %v16141_v63  ;;  %v6018_v15 = vadd.f32 %v11944_v51, %v16043_v36 }
 0x3f1   : > { %v11946_v54 = vpop.f32.mrf.mxu0 }
 0x3f2   : > { %v12010_v8 = vpop.f32.mrf.mxu1  ;;  %v11947_v27 = vadd.f32 %v11946_v54, %v11945_v9  ;;  %v16152_v34 = vadd.f32 %v12008_v18, %v6018_v15 }
 0x3f3   : > { %v11948_v17 = vpop.f32.mrf.mxu0  ;;  %v12011_v0 = vadd.f32 %v12010_v8, %v12009_v42 }
 0x3f4   : > { %6255 = vrot.lane.b32.xlu1 %v16105_v39, %s12997_s17  ;;  %6161 = vrot.lane.b32.xlu0 %v16116_v31, %s12995_s29  ;;  %v12012_v55 = vpop.f32.mrf.mxu1  ;;  %20163 = vst [vmem:[#allocation21_spill] sm:$0xff] %v16152_v34  ;;  %v6021_v24 = vadd.f32 %v11947_v27, %v16043_v36 }
 0x3f5   : > { %v11949_v44 = vpop.f32.mrf.mxu0 }
 0x3f6   : > { %v12013_v12 = vpop.f32.mrf.mxu1  ;;  %v16159_v59 = vadd.f32 %v12011_v0, %v6021_v24  ;;  %v11950_v37 = vadd.f32 %v11949_v44, %v11948_v17 }
 0x3f7   : > { %v11951_v30 = vpop.f32.mrf.mxu0  ;;  %v12014_v49 = vadd.f32 %v12013_v12, %v12012_v55  ;;  %v19461_v12 = vmov 0.0  }
 0x3f8   : > { %6163 = vrot.lane.b32.xlu1 %v16123_v20, %s12995_s29  ;;  %6209 = vrot.lane.b32.xlu0 %v16116_v31, %s12996_s16  ;;  %20164 = vst [vmem:[#allocation18_spill] sm:$0xff] %v16159_v59  ;;  %v12015_v29 = vpop.f32.mrf.mxu1  ;;  %v6026_v23 = vadd.f32 %v11950_v37, %v16043_v36 }
 0x3f9   : > { %v11952_v16 = vpop.f32.mrf.mxu0 }
 0x3fa   : > { %v11953_v50 = vadd.f32 %v11952_v16, %v11951_v30  ;;  %v12016_v11 = vpop.f32.mrf.mxu1  ;;  %v16170_v19 = vadd.f32 %v12014_v49, %v6026_v23 }
 0x3fb   : > { %v12017_v7 = vadd.f32 %v12016_v11, %v12015_v29 }
 0x3fc   : > { %6211 = vrot.lane.b32.xlu1 %v16123_v20, %s12996_s16  ;;  %6257 = vrot.lane.b32.xlu0 %v16116_v31, %s12997_s17  ;;  %20165 = vst [vmem:[#allocation10_spill] sm:$0xff] %v16170_v19  ;;  %v6029_v60 = vadd.f32 %v11953_v50, %v16043_v36  ;;  %v12998_v36 = vmov 1983009808  }
 0x3fd   : > { %v6292_v40 = vunpack.c.l.s4 %v12998_v36 }
 0x3fe   : > { %v16177_v48 = vadd.f32 %v12017_v7, %v6029_v60 }
 0x3ff   : > { %v6293_v41 = vunpack.c.0.s8 %v6292_v40 }
 0x400   : > { %6259 = vrot.lane.b32.xlu1 %v16123_v20, %s12997_s17  ;;  %6165 = vrot.lane.b32.xlu0 %v16134_v61, %s12995_s29  ;;  %20166 = vst [vmem:[#allocation19_spill] sm:$0xff] %v16177_v48 }
 0x401   : > { %v16190_v2 = vsub.s32 %v6293_v41, %v20167_v21 }
 0x404   : > { %6167 = vrot.lane.b32.xlu1 %v16141_v63, %s12995_s29  ;;  %6213 = vrot.lane.b32.xlu0 %v16134_v61, %s12996_s16 }
 0x408   : > { %6215 = vrot.lane.b32.xlu1 %v16141_v63, %s12996_s16  ;;  %6261 = vrot.lane.b32.xlu0 %v16134_v61, %s12997_s17 }
 0x40c   : > { %6263 = vrot.lane.b32.xlu1 %v16141_v63, %s12997_s17  ;;  %6169 = vrot.lane.b32.xlu0 %v16152_v34, %s12995_s29 }
 0x410   : > { %6171 = vrot.lane.b32.xlu1 %v16159_v59, %s12995_s29  ;;  %6217 = vrot.lane.b32.xlu0 %v16152_v34, %s12996_s16 }
 0x414   : > { %6219 = vrot.lane.b32.xlu1 %v16159_v59, %s12996_s16  ;;  %6265 = vrot.lane.b32.xlu0 %v16152_v34, %s12997_s17 }
 0x418   : > { %6267 = vrot.lane.b32.xlu1 %v16159_v59, %s12997_s17  ;;  %6173 = vrot.lane.b32.xlu0 %v16170_v19, %s12995_s29 }
 0x41c   : > { %6175 = vrot.lane.b32.xlu1 %v16177_v48, %s12995_s29  ;;  %6221 = vrot.lane.b32.xlu0 %v16170_v19, %s12996_s16  ;;  %s11883_s29 = sshll.u32 %s11268_s20, 7 }
 0x420   : > { %6223 = vrot.lane.b32.xlu1 %v16177_v48, %s12996_s16  ;;  %6269 = vrot.lane.b32.xlu0 %v16170_v19, %s12997_s17 }
 0x424   : > { %6271 = vrot.lane.b32.xlu1 %v16177_v48, %s12997_s17 }
 0x436   : > { %v6146_v52 = vpop.permute.xlu0 %6145 }
 0x43a   : > { %v6194_v58 = vpop.permute.xlu0 %6193  ;;  %v16192_v1 = vpop.permute.xlu1 %6195 }
 0x43b   : > { %v6289_v56 = vcombine.low %v16046_v35, %v6194_v58  ;;  %v6290_v10 = vcombine.high %v16046_v35, %v6194_v58  ;;  %v6357_v57 = vcombine.low %v16051_v43, %v16192_v1 }
 0x43d   : > { %v6297_v33 = vrot.slane %v6289_v56, %v16190_v2  ;;  %v6304_v22 = vrot.slane %v6290_v10, %v16190_v2  ;;  %v16220_v24 = vrot.slane %v6357_v57, %v16190_v2 }
 0x43e   : > { %v6242_v13 = vpop.permute.xlu0 %6241  ;;  %v6244_v3 = vpop.permute.xlu1 %6243 }
 0x43f   : > { %v6305_v38 = vcombine.low %v6146_v52, %v6242_v13  ;;  %v6306_v14 = vcombine.high %v6146_v52, %v6242_v13 }
 0x441   : > { %v6313_v32 = vrot.slane %v6305_v38, %v16190_v2  ;;  %v6320_v9 = vrot.slane %v6306_v14, %v16190_v2 }
 0x442   : > { %v6148_v5 = vpop.permute.xlu0 %6147 }
 0x443   : > { %v6321_v54 = vcombine.low %v6297_v33, %v6313_v32  ;;  %v6322_v46 = vcombine.high %v6297_v33, %v6313_v32  ;;  %v6337_v42 = vcombine.low %v6304_v22, %v6320_v9  ;;  %v6338_v51 = vcombine.high %v6304_v22, %v6320_v9 }
 0x444   : > { %v6373_v17 = vcombine.low %v6148_v5, %v6244_v3  ;;  %v6374_v8 = vcombine.high %v6148_v5, %v6244_v3 }
 0x445   : > { %v16206_v15 = vrot.slane %v6321_v54, %v16197_v25  ;;  %v16209_v27 = vrot.slane %v6322_v46, %v16197_v25  ;;  %v16212_v44 = vrot.slane %v6337_v42, %v16197_v25  ;;  %v16215_v18 = vrot.slane %v6338_v51, %v16197_v25 }
 0x446   : > { %v16223_v30 = vrot.slane %v6373_v17, %v16190_v2  ;;  %v16226_v0 = vrot.slane %v6374_v8, %v16190_v2 }
 0x447   : > { %v16230_v37 = vcombine.high %v16206_v15, %v19461_v12  ;;  %v16234_v16 = vcombine.high %v16209_v27, %v19461_v12  ;;  %v16238_v29 = vcombine.high %v16212_v44, %v19461_v12  ;;  %v16242_v23 = vcombine.high %v16215_v18, %v19461_v12 }
 0x448   : > { %v7378_v50 = vsel %vm7377_vm7, %v16206_v15, -inf  ;;  %v7392_v49 = vsel %vm7377_vm7, %v16209_v27, -inf  ;;  %v7406_v11 = vsel %vm7377_vm7, %v16212_v44, -inf  ;;  %v7420_v60 = vsel %vm7377_vm7, %v16215_v18, -inf }
 0x449   : > { %v7379_v7 = vrot.slane %v7378_v50, 4  ;;  %v7385_v36 = vsel %vm7377_vm7, %v16230_v37, -inf  ;;  %v7393_v40 = vrot.slane %v7392_v49, 4  ;;  %v7399_v52 = vsel %vm7377_vm7, %v16234_v16, -inf }
 0x44a   : > { %v7386_v62 = vrot.slane %v7385_v36, 4  ;;  %v7400_v4 = vrot.slane %v7399_v52, 4  ;;  %v7407_v41 = vrot.slane %v7406_v11, 4  ;;  %v7413_v58 = vsel %vm7377_vm7, %v16238_v29, -inf }
 0x44b   : > { %v7380_v6 = vmax.f32 %v7378_v50, %v7379_v7  ;;  %v7394_v21 = vmax.f32 %v7392_v49, %v7393_v40  ;;  %v7414_v56 = vrot.slane %v7413_v58, 4  ;;  %v7421_v10 = vrot.slane %v7420_v60, 4 }
 0x44c   : > { %v7387_v13 = vmax.f32 %v7385_v36, %v7386_v62  ;;  %v7401_v38 = vmax.f32 %v7399_v52, %v7400_v4  ;;  %v7408_v14 = vmax.f32 %v7406_v11, %v7407_v41  ;;  %v7427_v33 = vsel %vm7377_vm7, %v16242_v23, -inf }
 0x44d   : > { %v7381_v22 = vrot.slane %v7380_v6, 2  ;;  %v7395_v32 = vrot.slane %v7394_v21, 2  ;;  %v7415_v9 = vmax.f32 %v7413_v58, %v7414_v56  ;;  %v7422_v57 = vmax.f32 %v7420_v60, %v7421_v10 }
 0x44e   : > { %v7388_v5 = vrot.slane %v7387_v13, 2  ;;  %v7402_v3 = vrot.slane %v7401_v38, 2  ;;  %v7409_v54 = vrot.slane %v7408_v14, 2  ;;  %v7428_v46 = vrot.slane %v7427_v33, 4 }
 0x44f   : > { %v7382_v42 = vmax.f32 %v7380_v6, %v7381_v22  ;;  %v7396_v51 = vmax.f32 %v7394_v21, %v7395_v32  ;;  %v7416_v17 = vrot.slane %v7415_v9, 2  ;;  %v7423_v8 = vrot.slane %v7422_v57, 2 }
 0x450   : > { %v7389_v50 = vmax.f32 %v7387_v13, %v7388_v5  ;;  %v7403_v49 = vmax.f32 %v7401_v38, %v7402_v3  ;;  %v7410_v7 = vmax.f32 %v7408_v14, %v7409_v54  ;;  %v7429_v36 = vmax.f32 %v7427_v33, %v7428_v46 }
 0x451   : > { %v7383_v11 = vrot.slane %v7382_v42, 1  ;;  %v7397_v40 = vrot.slane %v7396_v51, 1  ;;  %v7417_v52 = vmax.f32 %v7415_v9, %v7416_v17  ;;  %v7424_v62 = vmax.f32 %v7422_v57, %v7423_v8 }
 0x452   : > { %v7390_v4 = vrot.slane %v7389_v50, 1  ;;  %v7404_v41 = vrot.slane %v7403_v49, 1  ;;  %v7411_v58 = vrot.slane %v7410_v7, 1  ;;  %v7430_v60 = vrot.slane %v7429_v36, 2 }
 0x453   : > { %v7384_v56 = vmax.f32 %v7382_v42, %v7383_v11  ;;  %v7398_v10 = vmax.f32 %v7396_v51, %v7397_v40  ;;  %v7418_v12 = vrot.slane %v7417_v52, 1  ;;  %v7425_v55 = vrot.slane %v7424_v62, 1 }
 0x454   : > { %v7391_v6 = vmax.f32 %v7389_v50, %v7390_v4  ;;  %v7405_v21 = vmax.f32 %v7403_v49, %v7404_v41  ;;  %v7412_v22 = vmax.f32 %v7410_v7, %v7411_v58  ;;  %v7431_v32 = vmax.f32 %v7429_v36, %v7430_v60 }
 0x455   : > { %v7419_v13 = vmax.f32 %v7417_v52, %v7418_v12  ;;  %v7426_v38 = vmax.f32 %v7424_v62, %v7425_v55  ;;  %v8274_v14 = vsub.f32 %v16206_v15, %v7384_v56  ;;  %v8276_v33 = vsub.f32 %v16209_v27, %v7398_v10 }
 0x456   : > { %v7432_v9 = vrot.slane %v7431_v32, 1  ;;  %v8275_v57 = vsub.f32 %v16230_v37, %v7391_v6  ;;  %v8277_v5 = vsub.f32 %v16234_v16, %v7405_v21  ;;  %v8278_v3 = vsub.f32 %v16212_v44, %v7412_v22 }
 0x457   : > { %v8279_v54 = vsub.f32 %v16238_v29, %v7419_v13  ;;  %v8280_v46 = vsub.f32 %v16215_v18, %v7426_v38  ;;  %v8402_v42 = vmul.f32 1.442695, %v8274_v14  ;;  %v8406_v51 = vmul.f32 1.442695, %v8276_v33 }
 0x458   : > { %v20168_v55 = vcombine.high %v16051_v43, %v16192_v1  ;;  %v7433_v12 = vmax.f32 %v7431_v32, %v7432_v9  ;;  %v8404_v27 = vmul.f32 1.442695, %v8275_v57  ;;  %v8408_v17 = vmul.f32 1.442695, %v8277_v5 }
 0x459   : > { %12362 = vpow2.f32 %v8402_v42  ;;  %v8410_v37 = vmul.f32 1.442695, %v8278_v3  ;;  %v8412_v8 = vmul.f32 1.442695, %v8279_v54  ;;  %v6389_v44 = vcombine.low %v16220_v24, %v16223_v30  ;;  %v16320_v3 = vpop.permute.xlu0 %6197 }
 0x45a   : > { %v6372_v15 = vrot.slane %v20168_v55, %v16190_v2  ;;  %v8281_v16 = vsub.f32 %v16242_v23, %v7433_v12  ;;  %12364 = vpow2.f32 %v8404_v27  ;;  %v6390_v18 = vcombine.high %v16220_v24, %v16223_v30  ;;  %v16322_v55 = vpop.permute.xlu1 %6149 }
 0x45b   : > { %12366 = vpow2.f32 %v8406_v51  ;;  %v8414_v1 = vmul.f32 1.442695, %v8280_v46  ;;  %v16278_v50 = vrot.slane %v6389_v44, %v16197_v25  ;;  %v20169_v30 = vmov 0.0  }
 0x45c   : > { %v6405_v29 = vcombine.low %v6372_v15, %v16226_v0  ;;  %v6406_v49 = vcombine.high %v6372_v15, %v16226_v0  ;;  %12368 = vpow2.f32 %v8408_v17  ;;  %v8416_v7 = vmul.f32 1.442695, %v8281_v16 }
 0x45d   : > { %v16282_v36 = vrot.slane %v6390_v18, %v16197_v25  ;;  %12370 = vpow2.f32 %v8410_v37  ;;  %v16292_v11 = vcombine.high %v16278_v50, %v20169_v30  ;;  %v7434_v40 = vsel %vm7377_vm7, %v16278_v50, -inf }
 0x45e   : > { %v16285_v23 = vrot.slane %v6405_v29, %v16197_v25  ;;  %v16288_v24 = vrot.slane %v6406_v49, %v16197_v25  ;;  %12372 = vpow2.f32 %v8412_v8  ;;  %v7435_v62 = vrot.slane %v7434_v40, 4 }
 0x45f   : > { %v16298_v0 = vcombine.high %v16282_v36, %v20169_v30  ;;  %12374 = vpow2.f32 %v8414_v1  ;;  %v7441_v4 = vsel %vm7377_vm7, %v16292_v11, -inf  ;;  %v7448_v41 = vsel %vm7377_vm7, %v16282_v36, -inf }
 0x460   : > { %v16302_v52 = vcombine.high %v16285_v23, %v20169_v30  ;;  %12376 = vpow2.f32 %v8416_v7  ;;  %v7436_v58 = vmax.f32 %v7434_v40, %v7435_v62  ;;  %v7442_v60 = vrot.slane %v7441_v4, 4 }
 0x461   : > { %v7449_v56 = vrot.slane %v7448_v41, 4  ;;  %v7455_v10 = vsel %vm7377_vm7, %v16298_v0, -inf  ;;  %v7462_v6 = vsel %vm7377_vm7, %v16285_v23, -inf  ;;  %v7476_v22 = vsel %vm7377_vm7, %v16288_v24, -inf }
 0x462   : > { %v7469_v21 = vsel %vm7377_vm7, %v16302_v52, -inf  ;;  %v7437_v32 = vrot.slane %v7436_v58, 2  ;;  %v7443_v13 = vmax.f32 %v7441_v4, %v7442_v60  ;;  %v7456_v14 = vrot.slane %v7455_v10, 4 }
 0x463   : > { %v7450_v38 = vmax.f32 %v7448_v41, %v7449_v56  ;;  %v16318_v33 = vcombine.high %v16288_v24, %v20169_v30  ;;  %v7463_v9 = vrot.slane %v7462_v6, 4  ;;  %v7470_v57 = vrot.slane %v7469_v21, 4 }
 0x464   : > { %v7477_v5 = vrot.slane %v7476_v22, 4  ;;  %v7438_v54 = vmax.f32 %v7436_v58, %v7437_v32  ;;  %v7444_v46 = vrot.slane %v7443_v13, 2  ;;  %v7457_v51 = vmax.f32 %v7455_v10, %v7456_v14 }
 0x465   : > { %v7451_v42 = vrot.slane %v7450_v38, 2  ;;  %v7464_v16 = vmax.f32 %v7462_v6, %v7463_v9  ;;  %v7471_v18 = vmax.f32 %v7469_v21, %v7470_v57  ;;  %v7483_v29 = vsel %vm7377_vm7, %v16318_v33, -inf }
 0x466   : > { %v16324_v15 = vpop.eup %12362  ;;  %v7445_v12 = vmax.f32 %v7443_v13, %v7444_v46  ;;  %v7458_v17 = vrot.slane %v7457_v51, 2  ;;  %v7439_v40 = vrot.slane %v7438_v54, 1  ;;  %v7478_v62 = vmax.f32 %v7476_v22, %v7477_v5  ;;  %v16352_v5 = vpop.permute.xlu1 %6151 }
 0x467   : > { %20170 = vst [vmem:[#allocation12_spill] sm:$0xff] %v16324_v15  ;;  %v7452_v27 = vmax.f32 %v7450_v38, %v7451_v42  ;;  %v16328_v8 = vpop.eup %12364  ;;  %v8658_v44 = vsel %vm7377_vm7, %v16324_v15, 0.0  ;;  %v7465_v9 = vrot.slane %v7464_v16, 2  ;;  %v7472_v57 = vrot.slane %v7471_v18, 2 }
 0x468   : > { %20171 = vst [vmem:[#allocation22_spill] sm:$0xff] %v16328_v8  ;;  %v16334_v1 = vpop.eup %12366  ;;  %v8659_v49 = vrot.slane %v8658_v44, 4  ;;  %v8665_v7 = vsel %vm7377_vm7, %v16328_v8, 0.0  ;;  %v7446_v60 = vrot.slane %v7445_v12, 1  ;;  %v7459_v56 = vmax.f32 %v7457_v51, %v7458_v17 }
 0x469   : > { %20172 = vst [vmem:[#allocation37_spill] sm:$0xff] %v16334_v1  ;;  %v16338_v4 = vpop.eup %12368  ;;  %v8666_v41 = vrot.slane %v8665_v7, 4  ;;  %v8672_v58 = vsel %vm7377_vm7, %v16334_v1, 0.0  ;;  %v7453_v13 = vrot.slane %v7452_v27, 1  ;;  %v7440_v37 = vmax.f32 %v7438_v54, %v7439_v40 }
 0x46a   : > { %20173 = vst [vmem:[#allocation38_spill] sm:$0xff] %v16338_v4  ;;  %v16342_v10 = vpop.eup %12370  ;;  %v16344_v6 = vadd.f32 %v8659_v49, %v8658_v44  ;;  %v8673_v21 = vrot.slane %v8672_v58, 4  ;;  %v8679_v32 = vsel %vm7377_vm7, %v16338_v4, 0.0  ;;  %v7479_v44 = vrot.slane %v7478_v62, 2 }
 0x46b   : > { %20174 = vst [vmem:[#allocation36_spill] sm:$0xff] %v16342_v10  ;;  %v16348_v38 = vpop.eup %12372  ;;  %v8680_v22 = vrot.slane %v8679_v32, 4  ;;  %v8686_v14 = vsel %vm7377_vm7, %v16342_v10, 0.0  ;;  %v7447_v43 = vmax.f32 %v7445_v12, %v7446_v60  ;;  %v7460_v35 = vrot.slane %v7459_v56, 1 }
 0x46c   : > { %20175 = vst [vmem:[#allocation29_spill] sm:$0xff] %v16348_v38  ;;  %v16354_v46 = vpop.eup %12374  ;;  %v16356_v42 = vadd.f32 %v8673_v21, %v8672_v58  ;;  %v8687_v51 = vrot.slane %v8686_v14, 4  ;;  %v8693_v17 = vsel %vm7377_vm7, %v16348_v38, 0.0  ;;  %v7484_v4 = vrot.slane %v7483_v29, 4 }
 0x46d   : > { %20176 = vst [vmem:[#allocation9_spill] sm:$0xff] %v16354_v46  ;;  %v16360_v49 = vpop.eup %12376  ;;  %v16363_v1 = vadd.f32 %v8666_v41, %v8665_v7  ;;  %v8700_v8 = vsel %vm7377_vm7, %v16354_v46, 0.0  ;;  %v7454_v58 = vmax.f32 %v7452_v27, %v7453_v13  ;;  %v16367_v21 = vadd.f32 %v8680_v22, %v8679_v32  ;;  %v16373_v41 = vpop.permute.xlu1 %6199 }
 0x46e   : > { %20177 = vst [vmem:[#allocation26_spill] sm:$0xff] %v16360_v49  ;;  %v8694_v15 = vrot.slane %v8693_v17, 4  ;;  %v7461_v48 = vmax.f32 %v7459_v56, %v7460_v35  ;;  %v7466_v38 = vmax.f32 %v7464_v16, %v7465_v9  ;;  %v16370_v59 = vadd.f32 %v8687_v51, %v8686_v14  ;;  %v6246_v16 = vpop.permute.xlu0 %6245 }
 0x46f   : > { %v7473_v54 = vmax.f32 %v7471_v18, %v7472_v57  ;;  %v7480_v12 = vmax.f32 %v7478_v62, %v7479_v44  ;;  %v8701_v40 = vrot.slane %v8700_v8, 4  ;;  %v7485_v10 = vmax.f32 %v7483_v29, %v7484_v4 }
 0x470   : > { %v7467_v60 = vrot.slane %v7466_v38, 1  ;;  %v8282_v7 = vsub.f32 %v16278_v50, %v7440_v37  ;;  %v8707_v27 = vsel %vm7377_vm7, %v16360_v49, 0.0  ;;  %v8283_v35 = vsub.f32 %v16292_v11, %v7447_v43 }
 0x471   : > { %v7474_v32 = vrot.slane %v7473_v54, 1  ;;  %v7481_v13 = vrot.slane %v7480_v12, 1  ;;  %v7486_v22 = vrot.slane %v7485_v10, 2  ;;  %v8284_v18 = vsub.f32 %v16282_v36, %v7454_v58 }
 0x472   : > { %v7468_v56 = vmax.f32 %v7466_v38, %v7467_v60  ;;  %v8285_v62 = vsub.f32 %v16298_v0, %v7461_v48  ;;  %v8418_v4 = vmul.f32 1.442695, %v8282_v7  ;;  %v8420_v50 = vmul.f32 1.442695, %v8283_v35  ;;  %v6248_v0 = vpop.permute.xlu1 %6247 }
 0x473   : > { %v7475_v14 = vmax.f32 %v7473_v54, %v7474_v32  ;;  %v7482_v29 = vmax.f32 %v7480_v12, %v7481_v13  ;;  %v7487_v37 = vmax.f32 %v7485_v10, %v7486_v22  ;;  %v8422_v57 = vmul.f32 1.442695, %v8284_v18  ;;  %v16387_v54 = vpop.permute.xlu0 %6153 }
 0x474   : > { %v8286_v9 = vsub.f32 %v16285_v23, %v7468_v56  ;;  %v8424_v51 = vmul.f32 1.442695, %v8285_v62  ;;  %v16381_v44 = vadd.f32 %v8694_v15, %v8693_v17  ;;  %12378 = vpow2.f32 %v8418_v4 }
 0x475   : > { %v8287_v43 = vsub.f32 %v16302_v52, %v7475_v14  ;;  %v8288_v11 = vsub.f32 %v16288_v24, %v7482_v29  ;;  %v7488_v38 = vrot.slane %v7487_v37, 1  ;;  %12380 = vpow2.f32 %v8420_v50 }
 0x476   : > { %20178 = vst [vmem:[#allocation25_spill] sm:$0xff] %v16381_v44  ;;  %v8426_v36 = vmul.f32 1.442695, %v8286_v9  ;;  %v6426_v48 = vcombine.high %v16062_v26, %v16320_v3  ;;  %v8708_v58 = vrot.slane %v8707_v27, 4  ;;  %12382 = vpow2.f32 %v8422_v57 }
 0x477   : > { %v8428_v10 = vmul.f32 1.442695, %v8287_v43  ;;  %v8430_v23 = vmul.f32 1.442695, %v8288_v11  ;;  %v16389_v15 = vadd.f32 %v8701_v40, %v8700_v8  ;;  %v7489_v17 = vmax.f32 %v7487_v37, %v7488_v38  ;;  %v16409_v29 = vpop.permute.xlu0 %6201 }
 0x478   : > { %12384 = vpow2.f32 %v8424_v51  ;;  %v6493_v24 = vcombine.low %v16069_v47, %v16373_v41  ;;  %v6441_v52 = vcombine.low %v16322_v55, %v6246_v16  ;;  %v6442_v12 = vcombine.high %v16322_v55, %v6246_v16 }
 0x479   : > { %20179 = vst [vmem:[#allocation28_spill] sm:$0xff] %v16389_v15  ;;  %12386 = vpow2.f32 %v8426_v36  ;;  %v6509_v60 = vcombine.low %v16352_v5, %v6248_v0  ;;  %v8289_v7 = vsub.f32 %v16318_v33, %v7489_v17  ;;  %v20180_v8 = vcombine.low %v16062_v26, %v16320_v3 }
 0x47a   : > { %12388 = vpow2.f32 %v8428_v10  ;;  %v6440_v32 = vrot.slane %v6426_v48, %v16190_v2  ;;  %v6494_v13 = vcombine.high %v16069_v47, %v16373_v41  ;;  %v6449_v35 = vrot.slane %v6441_v52, %v16190_v2 }
 0x47b   : > { %v6433_v40 = vrot.slane %v20180_v8, %v16190_v2  ;;  %12390 = vpow2.f32 %v8430_v23  ;;  %v6456_v55 = vrot.slane %v6442_v12, %v16190_v2  ;;  %v8432_v16 = vmul.f32 1.442695, %v8289_v7 }
 0x47c   : > { %v6501_v56 = vrot.slane %v6493_v24, %v16190_v2  ;;  %v6510_v33 = vcombine.high %v16352_v5, %v6248_v0  ;;  %v6517_v22 = vrot.slane %v6509_v60, %v16190_v2  ;;  %v16412_v41 = vadd.f32 %v8708_v58, %v8707_v27 }
 0x47d   : > { %v6457_v18 = vcombine.low %v6433_v40, %v6449_v35  ;;  %v6458_v3 = vcombine.high %v6433_v40, %v6449_v35  ;;  %v6473_v62 = vcombine.low %v6440_v32, %v6456_v55  ;;  %v6474_v14 = vcombine.high %v6440_v32, %v6456_v55 }
 0x47e   : > { %20181 = vst [vmem:[#allocation27_spill] sm:$0xff] %v16412_v41  ;;  %v6525_v50 = vcombine.low %v6501_v56, %v6517_v22  ;;  %v6526_v37 = vcombine.high %v6501_v56, %v6517_v22  ;;  %v16416_v57 = vrot.slane %v6494_v13, %v16190_v2  ;;  %12392 = vpow2.f32 %v8432_v16 }
 0x47f   : > { %v16419_v5 = vrot.slane %v6457_v18, %v16197_v25  ;;  %v16422_v51 = vrot.slane %v6458_v3, %v16197_v25  ;;  %v16425_v43 = vrot.slane %v6510_v33, %v16190_v2  ;;  %v16432_v38 = vrot.slane %v6473_v62, %v16197_v25 }
 0x480   : > { %v16435_v36 = vrot.slane %v6474_v14, %v16197_v25  ;;  %v16442_v0 = vrot.slane %v6525_v50, %v16197_v25  ;;  %v16455_v24 = vrot.slane %v6526_v37, %v16197_v25 }
 0x481   : > { %v16439_v48 = vcombine.high %v16419_v5, %v20169_v30  ;;  %v16444_v58 = vpop.eup %12378  ;;  %v16448_v10 = vcombine.high %v16422_v51, %v20169_v30  ;;  %v7490_v23 = vsel %vm7377_vm7, %v16419_v5, -inf  ;;  %v7504_v17 = vsel %vm7377_vm7, %v16422_v51, -inf }
 0x482   : > { %20182 = vst [vmem:[#allocation35_spill] sm:$0xff] %v16444_v58  ;;  %v16457_v52 = vpop.eup %12380  ;;  %v8714_v12 = vsel %vm7377_vm7, %v16444_v58, 0.0  ;;  %v7491_v60 = vrot.slane %v7490_v23, 4  ;;  %v7505_v8 = vrot.slane %v7504_v17, 4  ;;  %v16475_v33 = vcombine.high %v16432_v38, %v20169_v30 }
 0x483   : > { %20183 = vst [vmem:[#allocation41_spill] sm:$0xff] %v16457_v52  ;;  %v7497_v7 = vsel %vm7377_vm7, %v16439_v48, -inf  ;;  %v16463_v40 = vpop.eup %12382  ;;  %v8715_v32 = vrot.slane %v8714_v12, 4  ;;  %v8721_v13 = vsel %vm7377_vm7, %v16457_v52, 0.0  ;;  %v16499_v47 = vcombine.high %v16435_v36, %v20169_v30 }
 0x484   : > { %20184 = vst [vmem:[#allocation11_spill] sm:$0xff] %v16463_v40  ;;  %v7498_v35 = vrot.slane %v7497_v7, 4  ;;  %v8728_v56 = vsel %vm7377_vm7, %v16463_v40, 0.0  ;;  %v7492_v22 = vmax.f32 %v7490_v23, %v7491_v60  ;;  %v8722_v62 = vrot.slane %v8721_v13, 4 }
 0x485   : > { %v16469_v16 = vpop.eup %12384  ;;  %v8729_v14 = vrot.slane %v8728_v56, 4  ;;  %v7506_v11 = vmax.f32 %v7504_v17, %v7505_v8  ;;  %v7511_v23 = vsel %vm7377_vm7, %v16448_v10, -inf  ;;  %v16491_v27 = vadd.f32 %v8715_v32, %v8714_v12 }
 0x486   : > { %20185 = vst [vmem:[#allocation48_spill] sm:$0xff] %v16469_v16  ;;  %v16479_v3 = vpop.eup %12386  ;;  %v8735_v50 = vsel %vm7377_vm7, %v16469_v16, 0.0  ;;  %v7499_v37 = vmax.f32 %v7497_v7, %v7498_v35  ;;  %v7493_v19 = vrot.slane %v7492_v22, 2  ;;  %v7518_v17 = vsel %vm7377_vm7, %v16432_v38, -inf }
 0x487   : > { %20186 = vst [vmem:[#allocation34_spill] sm:$0xff] %v16479_v3  ;;  %v16483_v9 = vpop.eup %12388  ;;  %v8742_v4 = vsel %vm7377_vm7, %v16479_v3, 0.0  ;;  %20189 = vst [vmem:[#allocation43_spill] sm:$0xff] %v16491_v27  ;;  %v16493_v18 = vadd.f32 %v8729_v14, %v8728_v56  ;;  %v8736_v55 = vrot.slane %v8735_v50, 4  ;;  %v16503_v8 = vadd.f32 %v8722_v62, %v8721_v13 }
 0x488   : > { %20187 = vst [vmem:[#allocation49_spill] sm:$0xff] %v16483_v9  ;;  %v16489_v60 = vpop.eup %12390  ;;  %v8749_v7 = vsel %vm7377_vm7, %v16483_v9, 0.0  ;;  %v8743_v35 = vrot.slane %v8742_v4, 4  ;;  %v7494_v26 = vmax.f32 %v7492_v22, %v7493_v19  ;;  %v7500_v32 = vrot.slane %v7499_v37, 2 }
 0x489   : > { %20188 = vst [vmem:[#allocation42_spill] sm:$0xff] %v16489_v60  ;;  %20190 = vst [vmem:[#allocation44_spill] sm:$0xff] %v16493_v18  ;;  %v16507_v12 = vsel %vm7377_vm7, %v16489_v60, 0.0  ;;  %v7532_v56 = vsel %vm7377_vm7, %v16435_v36, -inf  ;;  %v8750_v14 = vrot.slane %v8749_v7, 4  ;;  %v7507_v3 = vrot.slane %v7506_v11, 2 }
 0x48a   : > { %20191 = vst [vmem:[#allocation45_spill] sm:$0xff] %v16503_v8  ;;  %v7495_v9 = vrot.slane %v7494_v26, 1  ;;  %v7512_v16 = vrot.slane %v7511_v23, 4  ;;  %v16513_v22 = vadd.f32 %v8736_v55, %v8735_v50  ;;  %v7501_v13 = vmax.f32 %v7499_v37, %v7500_v32 }
 0x48b   : > { %v16515_v62 = vpop.eup %12392  ;;  %v16517_v52 = vadd.f32 %v8743_v35, %v8742_v4  ;;  %v7508_v58 = vmax.f32 %v7506_v11, %v7507_v3  ;;  %v7519_v41 = vrot.slane %v7518_v17, 4  ;;  %v7525_v15 = vsel %vm7377_vm7, %v16475_v33, -inf }
 0x48c   : > { %20192 = vst [vmem:[#allocation46_spill] sm:$0xff] %v16513_v22  ;;  %20193 = vst [vmem:[#allocation47_spill] sm:$0xff] %v16515_v62  ;;  %v7513_v8 = vmax.f32 %v7511_v23, %v7512_v16  ;;  %v7496_v49 = vmax.f32 %v7494_v26, %v7495_v9  ;;  %v7502_v46 = vrot.slane %v7501_v13, 1  ;;  %v16522_v40 = vadd.f32 %v8750_v14, %v8749_v7 }
 0x48d   : > { %20194 = vst [vmem:[#allocation40_spill] sm:$0xff] %v16517_v52  ;;  %v7509_v19 = vrot.slane %v7508_v58, 1  ;;  %v7526_v50 = vrot.slane %v7525_v15, 4  ;;  %v7520_v32 = vmax.f32 %v7518_v17, %v7519_v41  ;;  %v7533_v22 = vrot.slane %v7532_v56, 4  ;;  %v6250_v52 = vpop.permute.xlu0 %6249 }
 0x48e   : > { %20195 = vst [vmem:[#allocation57_spill] sm:$0xff] %v16522_v40  ;;  %v7514_v55 = vrot.slane %v7513_v8, 2  ;;  %v7503_v37 = vmax.f32 %v7501_v13, %v7502_v46  ;;  %v7539_v4 = vsel %vm7377_vm7, %v16499_v47, -inf  ;;  %v8290_v23 = vsub.f32 %v16419_v5, %v7496_v49 }
 0x48f   : > { %v7510_v35 = vmax.f32 %v7508_v58, %v7509_v19  ;;  %v7527_v16 = vmax.f32 %v7525_v15, %v7526_v50  ;;  %v7540_v26 = vrot.slane %v7539_v4, 4  ;;  %v7521_v9 = vrot.slane %v7520_v32, 2 }
 0x490   : > { %v7515_v11 = vmax.f32 %v7513_v8, %v7514_v55  ;;  %v7534_v3 = vmax.f32 %v7532_v56, %v7533_v22  ;;  %v8291_v7 = vsub.f32 %v16439_v48, %v7503_v37  ;;  %v8434_v13 = vmul.f32 1.442695, %v8290_v23 }
 0x491   : > { %v7528_v60 = vrot.slane %v7527_v16, 2  ;;  %v7541_v40 = vmax.f32 %v7539_v4, %v7540_v26  ;;  %v8292_v46 = vsub.f32 %v16422_v51, %v7510_v35  ;;  %v7522_v41 = vmax.f32 %v7520_v32, %v7521_v9 }
 0x492   : > { %v7516_v14 = vrot.slane %v7515_v11, 1  ;;  %v7535_v17 = vrot.slane %v7534_v3, 2  ;;  %v8436_v18 = vmul.f32 1.442695, %v8291_v7  ;;  %12394 = vpow2.f32 %v8434_v13 }
 0x493   : > { %v7529_v58 = vmax.f32 %v7527_v16, %v7528_v60  ;;  %v7542_v8 = vrot.slane %v7541_v40, 2  ;;  %v8438_v15 = vmul.f32 1.442695, %v8292_v46  ;;  %v7523_v19 = vrot.slane %v7522_v41, 1 }
 0x494   : > { %v7517_v27 = vmax.f32 %v7515_v11, %v7516_v14  ;;  %v7536_v55 = vmax.f32 %v7534_v3, %v7535_v17  ;;  %v20196_v49 = vcombine.low %v16416_v57, %v16425_v43  ;;  %12396 = vpow2.f32 %v8436_v18 }
 0x495   : > { %v7530_v48 = vrot.slane %v7529_v58, 1  ;;  %v7543_v56 = vmax.f32 %v7541_v40, %v7542_v8  ;;  %v16538_v22 = vsel %vm7377_vm7, %v16515_v62, 0.0  ;;  %v7524_v60 = vmax.f32 %v7522_v41, %v7523_v19 }
 0x496   : > { %v16533_v5 = vrot.slane %v20196_v49, %v16197_v25  ;;  %v8293_v51 = vsub.f32 %v16448_v10, %v7517_v27  ;;  %v7537_v50 = vrot.slane %v7536_v55, 1  ;;  %12398 = vpow2.f32 %v8438_v15 }
 0x497   : > { %v7531_v37 = vmax.f32 %v7529_v58, %v7530_v48  ;;  %v7544_v32 = vrot.slane %v7543_v56, 1  ;;  %v16542_v35 = vcombine.high %v16442_v0, %v20169_v30  ;;  %v8294_v40 = vsub.f32 %v16432_v38, %v7524_v60 }
 0x498   : > { %v8440_v4 = vmul.f32 1.442695, %v8293_v51  ;;  %v7538_v11 = vmax.f32 %v7536_v55, %v7537_v50  ;;  %v20197_v27 = vcombine.high %v16416_v57, %v16425_v43  ;;  %v16553_v18 = vcombine.high %v16455_v24, %v20169_v30 }
 0x499   : > { %v7545_v16 = vmax.f32 %v7543_v56, %v7544_v32  ;;  %v8295_v26 = vsub.f32 %v16475_v33, %v7531_v37  ;;  %v16558_v9 = vcombine.high %v16533_v5, %v20169_v30  ;;  %v8442_v3 = vmul.f32 1.442695, %v8294_v40 }
 0x49a   : > { %v16549_v10 = vrot.slane %v20197_v27, %v16197_v25  ;;  %12400 = vpow2.f32 %v8440_v4  ;;  %v8296_v38 = vsub.f32 %v16435_v36, %v7538_v11  ;;  %v7546_v57 = vsel %vm7377_vm7, %v16442_v0, -inf }
 0x49b   : > { %v7553_v43 = vsel %vm7377_vm7, %v16542_v35, -inf  ;;  %v8297_v23 = vsub.f32 %v16499_v47, %v7545_v16  ;;  %v8444_v7 = vmul.f32 1.442695, %v8295_v26  ;;  %v7547_v14 = vrot.slane %v7546_v57, 4 }
 0x49c   : > { %v7554_v46 = vrot.slane %v7553_v43, 4  ;;  %12402 = vpow2.f32 %v8442_v3  ;;  %v8446_v33 = vmul.f32 1.442695, %v8296_v38  ;;  %v7560_v41 = vsel %vm7377_vm7, %v16455_v24, -inf }
 0x49d   : > { %v7567_v36 = vsel %vm7377_vm7, %v16553_v18, -inf  ;;  %12404 = vpow2.f32 %v8444_v7  ;;  %v8448_v17 = vmul.f32 1.442695, %v8297_v23  ;;  %v7548_v13 = vmax.f32 %v7546_v57, %v7547_v14 }
 0x49e   : > { %v7555_v58 = vmax.f32 %v7553_v43, %v7554_v46  ;;  %12406 = vpow2.f32 %v8446_v33  ;;  %v7561_v8 = vrot.slane %v7560_v41, 4  ;;  %v7568_v15 = vrot.slane %v7567_v36, 4 }
 0x49f   : > { %v7574_v47 = vsel %vm7377_vm7, %v16533_v5, -inf  ;;  %v20198_v19 = vrot.slane %v16507_v12, 4  ;;  %v7549_v49 = vrot.slane %v7548_v13, 2  ;;  %v8764_v51 = vrot.slane %v16538_v22, 4  ;;  %v16580_v32 = vpop.eup %12394 }
 0x4a0   : > { %v7556_v48 = vrot.slane %v7555_v58, 2  ;;  %v7575_v56 = vrot.slane %v7574_v47, 4  ;;  %v7562_v60 = vmax.f32 %v7560_v41, %v7561_v8  ;;  %v7569_v50 = vmax.f32 %v7567_v36, %v7568_v15  ;;  %20200 = vst [vmem:[#allocation58_spill] sm:$0xff] %v16580_v32 }
 0x4a1   : > { %v16575_v55 = vadd.f32 %v20198_v19, %v16507_v12  ;;  %v7581_v37 = vsel %vm7377_vm7, %v16558_v9, -inf  ;;  %12408 = vpow2.f32 %v8448_v17  ;;  %v7550_v4 = vmax.f32 %v7548_v13, %v7549_v49  ;;  %v16584_v12 = vpop.eup %12396 }
 0x4a2   : > { %v7557_v11 = vmax.f32 %v7555_v58, %v7556_v48  ;;  %v7588_v40 = vsel %vm7377_vm7, %v16549_v10, -inf  ;;  %20201 = vst [vmem:[#allocation51_spill] sm:$0xff] %v16584_v12  ;;  %v8770_v27 = vsel %vm7377_vm7, %v16580_v32, 0.0  ;;  %v7563_v16 = vrot.slane %v7562_v60, 2 }
 0x4a3   : > { %20199 = vst [vmem:[#allocation20_spill] sm:$0xff] %v16575_v55  ;;  %v7570_v26 = vrot.slane %v7569_v50, 2  ;;  %v7576_v38 = vmax.f32 %v7574_v47, %v7575_v56  ;;  %v16588_v3 = vpop.eup %12398  ;;  %v8771_v57 = vrot.slane %v8770_v27, 4  ;;  %v8777_v43 = vsel %vm7377_vm7, %v16584_v12, 0.0 }
 0x4a4   : > { %20202 = vst [vmem:[#allocation52_spill] sm:$0xff] %v16588_v3  ;;  %v7551_v23 = vrot.slane %v7550_v4, 1  ;;  %v7582_v7 = vrot.slane %v7581_v37, 4  ;;  %v8784_v14 = vsel %vm7377_vm7, %v16588_v3, 0.0  ;;  %v7558_v46 = vrot.slane %v7557_v11, 1 }
 0x4a5   : > { %v7564_v33 = vmax.f32 %v7562_v60, %v7563_v16  ;;  %v7571_v41 = vmax.f32 %v7569_v50, %v7570_v26  ;;  %v8785_v17 = vrot.slane %v8784_v14, 4  ;;  %v16597_v13 = vcombine.high %v16549_v10, %v20169_v30 }
 0x4a6   : > { %v7589_v58 = vrot.slane %v7588_v40, 4  ;;  %v16603_v47 = vadd.f32 %v8764_v51, %v16538_v22  ;;  %v8778_v19 = vrot.slane %v8777_v43, 4  ;;  %v7577_v49 = vrot.slane %v7576_v38, 2 }
 0x4a7   : > { %v16599_v8 = vpop.eup %12400  ;;  %v16605_v48 = vadd.f32 %v8771_v57, %v8770_v27  ;;  %v7552_v60 = vmax.f32 %v7550_v4, %v7551_v23  ;;  %v7583_v50 = vmax.f32 %v7581_v37, %v7582_v7  ;;  %v7559_v16 = vmax.f32 %v7557_v11, %v7558_v46  ;;  %v16615_v27 = vpop.permute.xlu1 %6155 }
 0x4a8   : > { %20203 = vst [vmem:[#allocation53_spill] sm:$0xff] %v16599_v8  ;;  %20204 = vst [vmem:[#allocation54_spill] sm:$0xff] %v16603_v47  ;;  %v8791_v56 = vsel %vm7377_vm7, %v16599_v8, 0.0  ;;  %v7565_v26 = vrot.slane %v7564_v33, 1  ;;  %v7572_v36 = vrot.slane %v7571_v41, 1  ;;  %v7578_v3 = vmax.f32 %v7576_v38, %v7577_v49 }
 0x4a9   : > { %20205 = vst [vmem:[#allocation55_spill] sm:$0xff] %v16605_v48  ;;  %v16609_v12 = vpop.eup %12402  ;;  %v16611_v32 = vadd.f32 %v8785_v17, %v8784_v14  ;;  %v7584_v15 = vrot.slane %v7583_v50, 2  ;;  %v7590_v22 = vmax.f32 %v7588_v40, %v7589_v58  ;;  %v7595_v51 = vsel %vm7377_vm7, %v16597_v13, -inf }
 0x4aa   : > { %20206 = vst [vmem:[#allocation56_spill] sm:$0xff] %v16609_v12  ;;  %v16617_v57 = vpop.eup %12404  ;;  %v8792_v8 = vrot.slane %v8791_v56, 4  ;;  %v8798_v37 = vsel %vm7377_vm7, %v16609_v12, 0.0  ;;  %v7579_v4 = vrot.slane %v7578_v3, 1  ;;  %v7596_v11 = vrot.slane %v7595_v51, 4 }
 0x4ab   : > { %20207 = vst [vmem:[#allocation50_spill] sm:$0xff] %v16611_v32  ;;  %20208 = vst [vmem:[#allocation59_spill] sm:$0xff] %v16617_v57  ;;  %v16621_v38 = vpop.eup %12406  ;;  %v16623_v23 = vadd.f32 %v8778_v19, %v8777_v43  ;;  %v8799_v7 = vrot.slane %v8798_v37, 4  ;;  %v7585_v14 = vmax.f32 %v7583_v50, %v7584_v15  ;;  %v7591_v40 = vrot.slane %v7590_v22, 2 }
 0x4ac   : > { %20209 = vst [vmem:[#allocation60_spill] sm:$0xff] %v16621_v38  ;;  %v8805_v17 = vsel %vm7377_vm7, %v16617_v57, 0.0  ;;  %v7566_v58 = vmax.f32 %v7564_v33, %v7565_v26  ;;  %v7597_v49 = vmax.f32 %v7595_v51, %v7596_v11  ;;  %v8812_v62 = vsel %vm7377_vm7, %v16621_v38, 0.0  ;;  %v6204_v51 = vpop.permute.xlu1 %6203 }
 0x4ad   : > { %20210 = vst [vmem:[#allocation61_spill] sm:$0xff] %v16623_v23  ;;  %v7573_v12 = vmax.f32 %v7571_v41, %v7572_v36  ;;  %v7580_v47 = vmax.f32 %v7578_v3, %v7579_v4  ;;  %v7586_v55 = vrot.slane %v7585_v14, 1  ;;  %v16633_v15 = vadd.f32 %v8792_v8, %v8791_v56 }
 0x4ae   : > { %v16630_v44 = vpop.eup %12408  ;;  %v7592_v19 = vmax.f32 %v7590_v22, %v7591_v40  ;;  %v7598_v50 = vrot.slane %v7597_v49, 2  ;;  %v16635_v46 = vadd.f32 %v8799_v7, %v8798_v37  ;;  %v8806_v57 = vrot.slane %v8805_v17, 4 }
 0x4af   : > { %20211 = vst [vmem:[#allocation62_spill] sm:$0xff] %v16630_v44  ;;  %20212 = vst [vmem:[#allocation63_spill] sm:$0xff] %v16633_v15  ;;  %v7587_v33 = vmax.f32 %v7585_v14, %v7586_v55  ;;  %v8298_v26 = vsub.f32 %v16442_v0, %v7552_v60  ;;  %v8813_v11 = vrot.slane %v8812_v62, 4  ;;  %v8299_v36 = vsub.f32 %v16542_v35, %v7559_v16  ;;  %v16647_v35 = vpop.permute.xlu0 %6157 }
 0x4b0   : > { %20213 = vst [vmem:[#allocation64_spill] sm:$0xff] %v16635_v46  ;;  %v7593_v41 = vrot.slane %v7592_v19, 1  ;;  %v7599_v3 = vmax.f32 %v7597_v49, %v7598_v50  ;;  %v8819_v4 = vsel %vm7377_vm7, %v16630_v44, 0.0  ;;  %v8300_v8 = vsub.f32 %v16455_v24, %v7566_v58 }
 0x4b1   : > { %v8301_v56 = vsub.f32 %v16553_v18, %v7573_v12  ;;  %v8302_v22 = vsub.f32 %v16533_v5, %v7580_v47  ;;  %v8303_v55 = vsub.f32 %v16558_v9, %v7587_v33  ;;  %v8450_v0 = vmul.f32 1.442695, %v8298_v26  ;;  %v6252_v47 = vpop.permute.xlu1 %6251 }
 0x4b2   : > { %v7594_v37 = vmax.f32 %v7592_v19, %v7593_v41  ;;  %v7600_v7 = vrot.slane %v7599_v3, 1  ;;  %v16645_v60 = vadd.f32 %v8806_v57, %v8805_v17  ;;  %v8452_v14 = vmul.f32 1.442695, %v8299_v36 }
 0x4b3   : > { %v8454_v40 = vmul.f32 1.442695, %v8300_v8  ;;  %v8456_v49 = vmul.f32 1.442695, %v8301_v56  ;;  %12410 = vpow2.f32 %v8450_v0  ;;  %v8458_v24 = vmul.f32 1.442695, %v8302_v22  ;;  %v16668_v8 = vpop.permute.xlu0 %6205 }
 0x4b4   : > { %20214 = vst [vmem:[#allocation65_spill] sm:$0xff] %v16645_v60  ;;  %v7601_v16 = vmax.f32 %v7599_v3, %v7600_v7  ;;  %v8304_v50 = vsub.f32 %v16549_v10, %v7594_v37  ;;  %v8820_v5 = vrot.slane %v8819_v4, 4  ;;  %12412 = vpow2.f32 %v8452_v14 }
 0x4b5   : > { %v8460_v12 = vmul.f32 1.442695, %v8303_v55  ;;  %v16651_v9 = vadd.f32 %v8813_v11, %v8812_v62  ;;  %12414 = vpow2.f32 %v8454_v40  ;;  %v20216_v58 = vcombine.low %v16080_v45, %v16409_v29 }
 0x4b6   : > { %v8305_v57 = vsub.f32 %v16597_v13, %v7601_v16  ;;  %v8462_v17 = vmul.f32 1.442695, %v8304_v50  ;;  %12416 = vpow2.f32 %v8456_v49  ;;  %v6577_v19 = vcombine.low %v16387_v54, %v6250_v52 }
 0x4b7   : > { %20215 = vst [vmem:[#allocation66_spill] sm:$0xff] %v16651_v9  ;;  %v6569_v10 = vrot.slane %v20216_v58, %v16190_v2  ;;  %v6578_v33 = vcombine.high %v16387_v54, %v6250_v52  ;;  %12418 = vpow2.f32 %v8458_v24  ;;  %v20217_v62 = vcombine.high %v16080_v45, %v16409_v29 }
 0x4b8   : > { %v6629_v13 = vcombine.low %v16087_v28, %v6204_v51  ;;  %v6645_v11 = vcombine.low %v16615_v27, %v6252_v47  ;;  %12420 = vpow2.f32 %v8460_v12  ;;  %v8464_v41 = vmul.f32 1.442695, %v8305_v57 }
 0x4b9   : > { %v6576_v26 = vrot.slane %v20217_v62, %v16190_v2  ;;  %v6585_v3 = vrot.slane %v6577_v19, %v16190_v2  ;;  %v6592_v36 = vrot.slane %v6578_v33, %v16190_v2  ;;  %12422 = vpow2.f32 %v8462_v17 }
 0x4ba   : > { %v6630_v54 = vcombine.high %v16087_v28, %v6204_v51  ;;  %v6646_v52 = vcombine.high %v16615_v27, %v6252_v47  ;;  %v6653_v29 = vrot.slane %v6645_v11, %v16190_v2  ;;  %v16673_v56 = vadd.f32 %v8820_v5, %v8819_v4 }
 0x4bb   : > { %v6593_v22 = vcombine.low %v6569_v10, %v6585_v3  ;;  %v6594_v37 = vcombine.high %v6569_v10, %v6585_v3  ;;  %v6609_v7 = vcombine.low %v6576_v26, %v6592_v36  ;;  %v6637_v0 = vrot.slane %v6629_v13, %v16190_v2 }
 0x4bc   : > { %20218 = vst [vmem:[#allocation67_spill] sm:$0xff] %v16673_v56  ;;  %v6610_v14 = vcombine.high %v6576_v26, %v6592_v36  ;;  %v6697_v40 = vcombine.low %v16098_v53, %v16668_v8  ;;  %12424 = vpow2.f32 %v8464_v41  ;;  %v16689_v49 = vrot.slane %v6630_v54, %v16190_v2 }
 0x4bd   : > { %v16680_v51 = vrot.slane %v6593_v22, %v16197_v25  ;;  %v16683_v27 = vrot.slane %v6594_v37, %v16197_v25  ;;  %v16686_v4 = vrot.slane %v6609_v7, %v16197_v25  ;;  %v16692_v16 = vrot.slane %v6646_v52, %v16190_v2 }
 0x4be   : > { %v6661_v50 = vcombine.low %v6637_v0, %v6653_v29  ;;  %v6662_v57 = vcombine.high %v6637_v0, %v6653_v29  ;;  %v16707_v17 = vrot.slane %v6610_v14, %v16197_v25  ;;  %v16712_v19 = vrot.slane %v6697_v40, %v16190_v2 }
 0x4bf   : > { %v16698_v5 = vcombine.high %v16680_v51, %v20169_v30  ;;  %v16702_v12 = vcombine.high %v16683_v27, %v20169_v30  ;;  %v7602_v47 = vsel %vm7377_vm7, %v16680_v51, -inf  ;;  %v7616_v10 = vsel %vm7377_vm7, %v16683_v27, -inf }
 0x4c0   : > { %v7603_v58 = vrot.slane %v7602_v47, 4  ;;  %v16714_v33 = vpop.eup %12410  ;;  %v7617_v26 = vrot.slane %v7616_v10, 4  ;;  %v7630_v11 = vsel %vm7377_vm7, %v16686_v4, -inf  ;;  %v16727_v52 = vrot.slane %v6661_v50, %v16197_v25 }
 0x4c1   : > { %20219 = vst [vmem:[#allocation68_spill] sm:$0xff] %v16714_v33  ;;  %v7609_v62 = vsel %vm7377_vm7, %v16698_v5, -inf  ;;  %v7623_v13 = vsel %vm7377_vm7, %v16702_v12, -inf  ;;  %v16722_v41 = vpop.eup %12412  ;;  %v8826_v3 = vsel %vm7377_vm7, %v16714_v33, 0.0  ;;  %v16734_v0 = vrot.slane %v6662_v57, %v16197_v25 }
 0x4c2   : > { %20220 = vst [vmem:[#allocation69_spill] sm:$0xff] %v16722_v41  ;;  %v7604_v36 = vmax.f32 %v7602_v47, %v7603_v58  ;;  %v7610_v54 = vrot.slane %v7609_v62, 4  ;;  %v16729_v29 = vpop.eup %12414  ;;  %v8827_v22 = vrot.slane %v8826_v3, 4  ;;  %v8833_v37 = vsel %vm7377_vm7, %v16722_v41, 0.0 }
 0x4c3   : > { %20221 = vst [vmem:[#allocation70_spill] sm:$0xff] %v16729_v29  ;;  %v7618_v7 = vmax.f32 %v7616_v10, %v7617_v26  ;;  %v16736_v14 = vpop.eup %12416  ;;  %v8840_v40 = vsel %vm7377_vm7, %v16729_v29, 0.0  ;;  %v7624_v58 = vrot.slane %v7623_v13, 4  ;;  %v7631_v55 = vrot.slane %v7630_v11, 4 }
 0x4c4   : > { %20222 = vst [vmem:[#allocation71_spill] sm:$0xff] %v16736_v14  ;;  %v7605_v47 = vrot.slane %v7604_v36, 2  ;;  %v16740_v50 = vpop.eup %12418  ;;  %v16742_v18 = vadd.f32 %v8827_v22, %v8826_v3  ;;  %v8834_v43 = vrot.slane %v8833_v37, 4  ;;  %v8841_v24 = vrot.slane %v8840_v40, 4 }
 0x4c5   : > { %20223 = vst [vmem:[#allocation72_spill] sm:$0xff] %v16740_v50  ;;  %v8847_v10 = vsel %vm7377_vm7, %v16736_v14, 0.0  ;;  %v16746_v26 = vpop.eup %12420  ;;  %v8854_v28 = vsel %vm7377_vm7, %v16740_v50, 0.0  ;;  %v7611_v29 = vmax.f32 %v7609_v62, %v7610_v54  ;;  %v7619_v22 = vrot.slane %v7618_v7, 2 }
 0x4c6   : > { %20224 = vst [vmem:[#allocation73_spill] sm:$0xff] %v16742_v18  ;;  %20225 = vst [vmem:[#allocation74_spill] sm:$0xff] %v16746_v26  ;;  %v8848_v57 = vrot.slane %v8847_v10, 4  ;;  %v7606_v45 = vmax.f32 %v7604_v36, %v7605_v47  ;;  %v16750_v41 = vpop.eup %12422  ;;  %v16752_v33 = vadd.f32 %v8841_v24, %v8840_v40  ;;  %v8855_v44 = vrot.slane %v8854_v28, 4 }
 0x4c7   : > { %20226 = vst [vmem:[#allocation75_spill] sm:$0xff] %v16750_v41  ;;  %v16756_v3 = vsel %vm7377_vm7, %v16746_v26, 0.0  ;;  %v16760_v14 = vsel %vm7377_vm7, %v16750_v41, 0.0  ;;  %v16764_v38 = vcombine.high %v16686_v4, %v20169_v30  ;;  %v7632_v62 = vmax.f32 %v7630_v11, %v7631_v55 }
 0x4c8   : > { %20227 = vst [vmem:[#allocation76_spill] sm:$0xff] %v16752_v33  ;;  %v7607_v36 = vrot.slane %v7606_v45, 1  ;;  %v16767_v24 = vadd.f32 %v8834_v43, %v8833_v37  ;;  %v16771_v40 = vcombine.high %v16707_v17, %v20169_v30  ;;  %v16778_v50 = vadd.f32 %v8848_v57, %v8847_v10 }
 0x4c9   : > { %v16775_v26 = vpop.eup %12424  ;;  %v8862_v56 = vrot.slane %v16756_v3, 4  ;;  %v7612_v55 = vrot.slane %v7611_v29, 2  ;;  %v16781_v11 = vadd.f32 %v8855_v44, %v8854_v28  ;;  %v7620_v37 = vmax.f32 %v7618_v7, %v7619_v22 }
 0x4ca   : > { %20228 = vst [vmem:[#allocation77_spill] sm:$0xff] %v16767_v24  ;;  %20229 = vst [vmem:[#allocation78_spill] sm:$0xff] %v16775_v26  ;;  %v7625_v54 = vmax.f32 %v7623_v13, %v7624_v58  ;;  %v7608_v24 = vmax.f32 %v7606_v45, %v7607_v36  ;;  %v7633_v9 = vrot.slane %v7632_v62, 2  ;;  %v7637_v47 = vsel %vm7377_vm7, %v16764_v38, -inf }
 0x4cb   : > { %20230 = vst [vmem:[#allocation79_spill] sm:$0xff] %v16778_v50  ;;  %v7613_v18 = vmax.f32 %v7611_v29, %v7612_v55  ;;  %v16788_v41 = vsel %vm7377_vm7, %v16775_v26, 0.0  ;;  %v7621_v10 = vrot.slane %v7620_v37, 1  ;;  %v7638_v50 = vrot.slane %v7637_v47, 4 }
 0x4cc   : > { %v7626_v57 = vrot.slane %v7625_v54, 2  ;;  %v7634_v28 = vmax.f32 %v7632_v62, %v7633_v9  ;;  %v7644_v44 = vsel %vm7377_vm7, %v16707_v17, -inf  ;;  %v7651_v45 = vsel %vm7377_vm7, %v16771_v40, -inf }
 0x4cd   : > { %v7614_v33 = vrot.slane %v7613_v18, 1  ;;  %v7622_v13 = vmax.f32 %v7620_v37, %v7621_v10  ;;  %v7639_v7 = vmax.f32 %v7637_v47, %v7638_v50  ;;  %v7645_v58 = vrot.slane %v7644_v44, 4 }
 0x4ce   : > { %v7627_v29 = vmax.f32 %v7625_v54, %v7626_v57  ;;  %v7635_v36 = vrot.slane %v7634_v28, 1  ;;  %v7652_v55 = vrot.slane %v7651_v45, 4  ;;  %v8306_v43 = vsub.f32 %v16680_v51, %v7608_v24 }
 0x4cf   : > { %v7615_v22 = vmax.f32 %v7613_v18, %v7614_v33  ;;  %v7640_v60 = vrot.slane %v7639_v7, 2  ;;  %v7646_v46 = vmax.f32 %v7644_v44, %v7645_v58  ;;  %v8308_v9 = vsub.f32 %v16683_v27, %v7622_v13 }
 0x4d0   : > { %v7628_v26 = vrot.slane %v7627_v29, 1  ;;  %v7636_v62 = vmax.f32 %v7634_v28, %v7635_v36  ;;  %v7653_v15 = vmax.f32 %v7651_v45, %v7652_v55  ;;  %v8466_v23 = vmul.f32 1.442695, %v8306_v43 }
 0x4d1   : > { %v8307_v32 = vsub.f32 %v16698_v5, %v7615_v22  ;;  %v7641_v37 = vmax.f32 %v7639_v7, %v7640_v60  ;;  %v7647_v54 = vrot.slane %v7646_v46, 2  ;;  %v8470_v50 = vmul.f32 1.442695, %v8308_v9 }
 0x4d2   : > { %v7629_v48 = vmax.f32 %v7627_v29, %v7628_v26  ;;  %v7654_v47 = vrot.slane %v7653_v15, 2  ;;  %v8310_v18 = vsub.f32 %v16686_v4, %v7636_v62  ;;  %12426 = vpow2.f32 %v8466_v23 }
 0x4d3   : > { %v8468_v33 = vmul.f32 1.442695, %v8307_v32  ;;  %v7642_v51 = vrot.slane %v7641_v37, 1  ;;  %v7648_v24 = vmax.f32 %v7646_v46, %v7647_v54  ;;  %12428 = vpow2.f32 %v8470_v50 }
 0x4d4   : > { %v8309_v10 = vsub.f32 %v16702_v12, %v7629_v48  ;;  %v7655_v27 = vmax.f32 %v7653_v15, %v7654_v47  ;;  %v8474_v57 = vmul.f32 1.442695, %v8310_v18  ;;  %v6678_v5 = vcombine.high %v16689_v49, %v16692_v16 }
 0x4d5   : > { %12430 = vpow2.f32 %v8468_v33  ;;  %v16802_v60 = vadd.f32 %v8862_v56, %v16756_v3  ;;  %v7643_v26 = vmax.f32 %v7641_v37, %v7642_v51  ;;  %v7649_v43 = vrot.slane %v7648_v24, 1 }
 0x4d6   : > { %v8472_v28 = vmul.f32 1.442695, %v8309_v10  ;;  %v8876_v23 = vrot.slane %v16788_v41, 4  ;;  %v7656_v32 = vrot.slane %v7655_v27, 1  ;;  %12432 = vpow2.f32 %v8474_v57 }
 0x4d7   : > { %v16807_v48 = vcombine.high %v16727_v52, %v20169_v30  ;;  %v7650_v46 = vmax.f32 %v7648_v24, %v7649_v43  ;;  %v8311_v15 = vsub.f32 %v16764_v38, %v7643_v26  ;;  %v16812_v4 = vcombine.high %v16734_v0, %v20169_v30 }
 0x4d8   : > { %12434 = vpow2.f32 %v8472_v28  ;;  %v7657_v56 = vmax.f32 %v7655_v27, %v7656_v32  ;;  %v20231_v12 = vcombine.low %v16689_v49, %v16692_v16  ;;  %v16821_v44 = vrot.slane %v6678_v5, %v16197_v25 }
 0x4d9   : > { %v7658_v45 = vsel %vm7377_vm7, %v16727_v52, -inf  ;;  %v8312_v38 = vsub.f32 %v16707_v17, %v7650_v46  ;;  %v8476_v13 = vmul.f32 1.442695, %v8311_v15  ;;  %v7665_v7 = vsel %vm7377_vm7, %v16807_v48, -inf }
 0x4da   : > { %v16818_v3 = vrot.slane %v20231_v12, %v16197_v25  ;;  %v7659_v29 = vrot.slane %v7658_v45, 4  ;;  %v8313_v58 = vsub.f32 %v16771_v40, %v7657_v56  ;;  %v7666_v22 = vrot.slane %v7665_v7, 4 }
 0x4db   : > { %v7672_v49 = vsel %vm7377_vm7, %v16734_v0, -inf  ;;  %v7679_v16 = vsel %vm7377_vm7, %v16812_v4, -inf  ;;  %12436 = vpow2.f32 %v8476_v13  ;;  %v8478_v36 = vmul.f32 1.442695, %v8312_v38 }
 0x4dc   : > { %v7660_v55 = vmax.f32 %v7658_v45, %v7659_v29  ;;  %v7673_v9 = vrot.slane %v7672_v49, 4  ;;  %v8480_v62 = vmul.f32 1.442695, %v8313_v58  ;;  %v7667_v17 = vmax.f32 %v7665_v7, %v7666_v22 }
 0x4dd   : > { %v7680_v37 = vrot.slane %v7679_v16, 4  ;;  %v7686_v54 = vsel %vm7377_vm7, %v16818_v3, -inf  ;;  %12438 = vpow2.f32 %v8478_v36  ;;  %v16837_v40 = vcombine.high %v16818_v3, %v20169_v30 }
 0x4de   : > { %v7661_v50 = vrot.slane %v7660_v55, 2  ;;  %v7674_v47 = vmax.f32 %v7672_v49, %v7673_v9  ;;  %12440 = vpow2.f32 %v8480_v62  ;;  %v7668_v18 = vrot.slane %v7667_v17, 2 }
 0x4df   : > { %v7681_v33 = vmax.f32 %v7679_v16, %v7680_v37  ;;  %v7687_v51 = vrot.slane %v7686_v54, 4  ;;  %v16839_v24 = vpop.eup %12426  ;;  %v20233_v27 = vrot.slane %v16760_v14, 4  ;;  %v16853_v32 = vcombine.high %v16821_v44, %v20169_v30 }
 0x4e0   : > { %20232 = vst [vmem:[#allocation80_spill] sm:$0xff] %v16839_v24  ;;  %v7662_v5 = vmax.f32 %v7660_v55, %v7661_v50  ;;  %v7675_v26 = vrot.slane %v7674_v47, 2  ;;  %v16847_v43 = vpop.eup %12428  ;;  %v8882_v28 = vsel %vm7377_vm7, %v16839_v24, 0.0  ;;  %v7669_v46 = vmax.f32 %v7667_v17, %v7668_v18 }
 0x4e1   : > { %v16845_v57 = vadd.f32 %v20233_v27, %v16760_v14  ;;  %20235 = vst [vmem:[#allocation82_spill] sm:$0xff] %v16847_v43  ;;  %v7682_v15 = vrot.slane %v7681_v33, 2  ;;  %v8883_v12 = vrot.slane %v8882_v28, 4  ;;  %v8896_v14 = vsel %vm7377_vm7, %v16847_v43, 0.0 }
 0x4e2   : > { %v16855_v56 = vpop.eup %12430  ;;  %v7676_v45 = vmax.f32 %v7674_v47, %v7675_v26  ;;  %v7693_v38 = vsel %vm7377_vm7, %v16837_v40, -inf  ;;  %v8897_v29 = vrot.slane %v8896_v14, 4  ;;  %v7688_v58 = vmax.f32 %v7686_v54, %v7687_v51 }
 0x4e3   : > { %20234 = vst [vmem:[#allocation81_spill] sm:$0xff] %v16845_v57  ;;  %20236 = vst [vmem:[#allocation83_spill] sm:$0xff] %v16855_v56  ;;  %v8889_v13 = vsel %vm7377_vm7, %v16855_v56, 0.0  ;;  %v7683_v7 = vmax.f32 %v7681_v33, %v7682_v15  ;;  %v16863_v22 = vpop.eup %12432  ;;  %v8884_v49 = vadd.f32 %v8883_v12, %v8882_v28  ;;  %v7663_v36 = vrot.slane %v7662_v5, 1 }
 0x4e4   : > { %20237 = vst [vmem:[#allocation84_spill] sm:$0xff] %v16863_v22  ;;  %v8890_v16 = vrot.slane %v8889_v13, 4  ;;  %v7670_v55 = vrot.slane %v7669_v46, 1  ;;  %v8898_v62 = vadd.f32 %v8897_v29, %v8896_v14  ;;  %v8910_v17 = vsel %vm7377_vm7, %v16863_v22, 0.0 }
 0x4e5   : > { %v16865_v9 = vpop.eup %12434  ;;  %v7677_v37 = vrot.slane %v7676_v45, 1  ;;  %v7694_v50 = vrot.slane %v7693_v38, 4  ;;  %v8885_v47 = vrot.slane %v8884_v49, 2  ;;  %v7684_v33 = vrot.slane %v7683_v7, 1 }
 0x4e6   : > { %20238 = vst [vmem:[#allocation85_spill] sm:$0xff] %v16865_v9  ;;  %v8903_v18 = vsel %vm7377_vm7, %v16865_v9, 0.0  ;;  %v7700_v54 = vsel %vm7377_vm7, %v16821_v44, -inf  ;;  %v16877_v27 = vadd.f32 %v8876_v23, %v16788_v41  ;;  %v16879_v26 = vadd.f32 %v8890_v16, %v8889_v13 }
 0x4e7   : > { %v8911_v28 = vrot.slane %v8910_v17, 4  ;;  %v8899_v15 = vrot.slane %v8898_v62, 2  ;;  %v7664_v12 = vmax.f32 %v7662_v5, %v7663_v36  ;;  %v7671_v14 = vmax.f32 %v7669_v46, %v7670_v55  ;;  %v16892_v36 = vpop.permute.xlu1 %6159 }
 0x4e8   : > { %20239 = vst [vmem:[#allocation86_spill] sm:$0xff] %v16879_v26  ;;  %v7689_v29 = vrot.slane %v7688_v58, 2  ;;  %v16881_v10 = vpop.eup %12436  ;;  %v8904_v22 = vrot.slane %v8903_v18, 4  ;;  %v7678_v9 = vmax.f32 %v7676_v45, %v7677_v37  ;;  %v7695_v43 = vmax.f32 %v7693_v38, %v7694_v50 }
 0x4e9   : > { %20240 = vst [vmem:[#allocation87_spill] sm:$0xff] %v16881_v10  ;;  %v7701_v56 = vrot.slane %v7700_v54, 4  ;;  %v16883_v24 = vadd.f32 %v8885_v47, %v8884_v49  ;;  %v7685_v51 = vmax.f32 %v7683_v7, %v7684_v33  ;;  %v7707_v41 = vsel %vm7377_vm7, %v16853_v32, -inf }
 0x4ea   : > { %v7690_v57 = vmax.f32 %v7688_v58, %v7689_v29  ;;  %v16887_v23 = vpop.eup %12438  ;;  %v16890_v5 = vadd.f32 %v8911_v28, %v8910_v17  ;;  %v7696_v46 = vrot.slane %v7695_v43, 2  ;;  %v8917_v38 = vsel %vm7377_vm7, %v16881_v10, 0.0 }
 0x4eb   : > { %20241 = vst [vmem:[#allocation88_spill] sm:$0xff] %v16883_v24  ;;  %20242 = vst [vmem:[#allocation89_spill] sm:$0xff] %v16887_v23  ;;  %v7702_v16 = vmax.f32 %v7700_v54, %v7701_v56  ;;  %v16894_v45 = vpop.eup %12440  ;;  %v8924_v7 = vsel %vm7377_vm7, %v16887_v23, 0.0  ;;  %v7708_v49 = vrot.slane %v7707_v41, 4  ;;  %v16900_v55 = vadd.f32 %v8899_v15, %v8898_v62 }
 0x4ec   : > { %20243 = vst [vmem:[#allocation90_spill] sm:$0xff] %v16894_v45  ;;  %v7691_v58 = vrot.slane %v7690_v57, 1  ;;  %v8925_v37 = vrot.slane %v8924_v7, 4  ;;  %v8931_v17 = vsel %vm7377_vm7, %v16894_v45, 0.0  ;;  %v7697_v50 = vmax.f32 %v7695_v43, %v7696_v46 }
 0x4ed   : > { %20244 = vst [vmem:[#allocation91_spill] sm:$0xff] %v16900_v55  ;;  %v16904_v56 = vadd.f32 %v8904_v22, %v8903_v18  ;;  %v7703_v33 = vrot.slane %v7702_v16, 2  ;;  %v7709_v54 = vmax.f32 %v7707_v41, %v7708_v49  ;;  %v8913_v28 = vrot.slane %v16890_v5, 2  ;;  %v6254_v18 = vpop.permute.xlu0 %6253 }
 0x4ee   : > { %v7692_v47 = vmax.f32 %v7690_v57, %v7691_v58  ;;  %v8918_v29 = vrot.slane %v8917_v38, 4  ;;  %v7698_v13 = vrot.slane %v7697_v50, 1  ;;  %v8314_v23 = vsub.f32 %v16727_v52, %v7664_v12  ;;  %v6208_v57 = vpop.permute.xlu1 %6207 }
 0x4ef   : > { %v8932_v10 = vrot.slane %v8931_v17, 4  ;;  %v7704_v26 = vmax.f32 %v7702_v16, %v7703_v33  ;;  %v7710_v62 = vrot.slane %v7709_v54, 2  ;;  %v8315_v15 = vsub.f32 %v16807_v48, %v7671_v14 }
 0x4f0   : > { %v8926_v55 = vadd.f32 %v8925_v37, %v8924_v7  ;;  %v7699_v24 = vmax.f32 %v7697_v50, %v7698_v13  ;;  %v8316_v43 = vsub.f32 %v16734_v0, %v7678_v9  ;;  %v8317_v22 = vsub.f32 %v16812_v4, %v7685_v51 }
 0x4f1   : > { %v7705_v46 = vrot.slane %v7704_v26, 1  ;;  %v7711_v58 = vmax.f32 %v7709_v54, %v7710_v62  ;;  %v8318_v49 = vsub.f32 %v16818_v3, %v7692_v47  ;;  %v16913_v52 = vadd.f32 %v8918_v29, %v8917_v38 }
 0x4f2   : > { %v8319_v12 = vsub.f32 %v16837_v40, %v7699_v24  ;;  %v8482_v16 = vmul.f32 1.442695, %v8314_v23  ;;  %v8484_v48 = vmul.f32 1.442695, %v8315_v15  ;;  %v8486_v7 = vmul.f32 1.442695, %v8316_v43  ;;  %v6256_v38 = vpop.permute.xlu1 %6255 }
 0x4f3   : > { %20245 = vst [vmem:[#allocation92_spill] sm:$0xff] %v16913_v52  ;;  %v7706_v14 = vmax.f32 %v7704_v26, %v7705_v46  ;;  %v7712_v13 = vrot.slane %v7711_v58, 1  ;;  %v8488_v0 = vmul.f32 1.442695, %v8317_v22  ;;  %v8927_v9 = vrot.slane %v8926_v55, 2 }
 0x4f4   : > { %v16916_v4 = vadd.f32 %v8932_v10, %v8931_v17  ;;  %12442 = vpow2.f32 %v8482_v16  ;;  %v8490_v51 = vmul.f32 1.442695, %v8318_v49  ;;  %v8492_v3 = vmul.f32 1.442695, %v8319_v12  ;;  %v16925_v10 = vpop.permute.xlu0 %6161 }
 0x4f5   : > { %v7713_v37 = vmax.f32 %v7711_v58, %v7712_v13  ;;  %v8320_v50 = vsub.f32 %v16821_v44, %v7706_v14  ;;  %12444 = vpow2.f32 %v8484_v48  ;;  %v20247_v40 = vcombine.high %v16098_v53, %v16668_v8 }
 0x4f6   : > { %20246 = vst [vmem:[#allocation93_spill] sm:$0xff] %v16916_v4  ;;  %12446 = vpow2.f32 %v8486_v7  ;;  %v6713_v26 = vcombine.low %v16647_v35, %v6254_v18  ;;  %v6714_v23 = vcombine.high %v16647_v35, %v6254_v18  ;;  %v6765_v44 = vcombine.low %v16105_v39, %v6208_v57 }
 0x4f7   : > { %v6712_v24 = vrot.slane %v20247_v40, %v16190_v2  ;;  %v8321_v17 = vsub.f32 %v16853_v32, %v7713_v37  ;;  %12448 = vpow2.f32 %v8488_v0  ;;  %v8494_v47 = vmul.f32 1.442695, %v8320_v50 }
 0x4f8   : > { %12450 = vpow2.f32 %v8490_v51  ;;  %v6766_v33 = vcombine.high %v16105_v39, %v6208_v57  ;;  %v6721_v54 = vrot.slane %v6713_v26, %v16190_v2  ;;  %v6728_v8 = vrot.slane %v6714_v23, %v16190_v2 }
 0x4f9   : > { %12452 = vpow2.f32 %v8492_v3  ;;  %v8496_v29 = vmul.f32 1.442695, %v8321_v17  ;;  %v6781_v35 = vcombine.low %v16892_v36, %v6256_v38  ;;  %v6782_v62 = vcombine.high %v16892_v36, %v6256_v38 }
 0x4fa   : > { %12454 = vpow2.f32 %v8494_v47  ;;  %v6729_v32 = vcombine.low %v16712_v19, %v6721_v54  ;;  %v6730_v15 = vcombine.high %v16712_v19, %v6721_v54  ;;  %v6745_v43 = vcombine.low %v6712_v24, %v6728_v8  ;;  %v16952_v19 = vpop.permute.xlu0 %6209 }
 0x4fb   : > { %v16937_v22 = vadd.f32 %v8913_v28, %v16890_v5  ;;  %v16940_v18 = vadd.f32 %v8927_v9, %v8926_v55  ;;  %12456 = vpow2.f32 %v8496_v29  ;;  %v16955_v5 = vrot.slane %v6765_v44, %v16190_v2 }
 0x4fc   : > { %v16944_v58 = vrot.slane %v6729_v32, %v16197_v25  ;;  %v16947_v36 = vrot.slane %v6730_v15, %v16197_v25  ;;  %v16950_v49 = vrot.slane %v6745_v43, %v16197_v25  ;;  %v16958_v55 = vrot.slane %v6766_v33, %v16190_v2 }
 0x4fd   : > { %20248 = vst [vmem:[#allocation94_spill] sm:$0xff] %v16937_v22  ;;  %20249 = vst [vmem:[#allocation95_spill] sm:$0xff] %v16940_v18  ;;  %v6746_v28 = vcombine.high %v6712_v24, %v6728_v8  ;;  %v16961_v12 = vrot.slane %v6781_v35, %v16190_v2  ;;  %v16974_v13 = vrot.slane %v6782_v62, %v16190_v2 }
 0x4fe   : > { %v16965_v16 = vcombine.high %v16944_v58, %v20169_v30  ;;  %v16969_v48 = vcombine.high %v16947_v36, %v20169_v30  ;;  %v7714_v14 = vsel %vm7377_vm7, %v16944_v58, -inf  ;;  %v7728_v0 = vsel %vm7377_vm7, %v16947_v36, -inf }
 0x4ff   : > { %v7715_v7 = vrot.slane %v7714_v14, 4  ;;  %v7742_v9 = vsel %vm7377_vm7, %v16950_v49, -inf  ;;  %v16984_v37 = vcombine.high %v16950_v49, %v20169_v30  ;;  %v7729_v3 = vrot.slane %v7728_v0, 4 }
 0x500   : > { %v7721_v50 = vsel %vm7377_vm7, %v16965_v16, -inf  ;;  %v7735_v40 = vsel %vm7377_vm7, %v16969_v48, -inf  ;;  %v16993_v26 = vrot.slane %v6746_v28, %v16197_v25  ;;  %v7743_v54 = vrot.slane %v7742_v9, 4 }
 0x501   : > { %v16990_v24 = vpop.eup %12442  ;;  %v7716_v23 = vmax.f32 %v7714_v14, %v7715_v7  ;;  %v7722_v38 = vrot.slane %v7721_v50, 4  ;;  %v7730_v33 = vmax.f32 %v7728_v0, %v7729_v3  ;;  %v7736_v15 = vrot.slane %v7735_v40, 4 }
 0x502   : > { %20250 = vst [vmem:[#allocation96_spill] sm:$0xff] %v16990_v24  ;;  %v16997_v47 = vpop.eup %12444  ;;  %v8938_v44 = vsel %vm7377_vm7, %v16990_v24, 0.0  ;;  %v7749_v0 = vsel %vm7377_vm7, %v16984_v37, -inf }
 0x503   : > { %20251 = vst [vmem:[#allocation97_spill] sm:$0xff] %v16997_v47  ;;  %v17003_v29 = vpop.eup %12446  ;;  %v8939_v35 = vrot.slane %v8938_v44, 4  ;;  %v8945_v62 = vsel %vm7377_vm7, %v16997_v47, 0.0  ;;  %v7717_v32 = vrot.slane %v7716_v23, 2  ;;  %v7723_v7 = vmax.f32 %v7721_v50, %v7722_v38 }
 0x504   : > { %20252 = vst [vmem:[#allocation98_spill] sm:$0xff] %v17003_v29  ;;  %v17007_v43 = vpop.eup %12448  ;;  %v8946_v28 = vrot.slane %v8945_v62, 4  ;;  %v8952_v14 = vsel %vm7377_vm7, %v17003_v29, 0.0  ;;  %v7731_v51 = vrot.slane %v7730_v33, 2 }
 0x505   : > { %20253 = vst [vmem:[#allocation99_spill] sm:$0xff] %v17007_v43  ;;  %v17013_v3 = vpop.eup %12450  ;;  %v8940_v46 = vadd.f32 %v8939_v35, %v8938_v44  ;;  %v8953_v57 = vrot.slane %v8952_v14, 4  ;;  %v8959_v41 = vsel %vm7377_vm7, %v17007_v43, 0.0  ;;  %v7718_v50 = vmax.f32 %v7716_v23, %v7717_v32 }
 0x506   : > { %20254 = vst [vmem:[#allocation100_spill] sm:$0xff] %v17013_v3  ;;  %v17017_v8 = vpop.eup %12452  ;;  %v17019_v17 = vadd.f32 %v8946_v28, %v8945_v62  ;;  %v8960_v39 = vrot.slane %v8959_v41, 4  ;;  %v8966_v53 = vsel %vm7377_vm7, %v17013_v3, 0.0  ;;  %v7724_v28 = vrot.slane %v7723_v7, 2 }
 0x507   : > { %20255 = vst [vmem:[#allocation101_spill] sm:$0xff] %v17017_v8  ;;  %v17023_v38 = vpop.eup %12454  ;;  %v8941_v29 = vrot.slane %v8940_v46, 2  ;;  %v8954_v47 = vadd.f32 %v8953_v57, %v8952_v14  ;;  %v8967_v24 = vrot.slane %v8966_v53, 4  ;;  %v8973_v44 = vsel %vm7377_vm7, %v17017_v8, 0.0 }
 0x508   : > { %20256 = vst [vmem:[#allocation102_spill] sm:$0xff] %v17019_v17  ;;  %20257 = vst [vmem:[#allocation103_spill] sm:$0xff] %v17023_v38  ;;  %v17027_v35 = vadd.f32 %v8960_v39, %v8959_v41  ;;  %v8974_v43 = vrot.slane %v8973_v44, 4  ;;  %v8980_v62 = vsel %vm7377_vm7, %v17023_v38, 0.0  ;;  %v17031_v45 = vpop.eup %12456  ;;  %v7737_v23 = vmax.f32 %v7735_v40, %v7736_v15 }
 0x509   : > { %20259 = vst [vmem:[#allocation105_spill] sm:$0xff] %v17031_v45  ;;  %v8955_v4 = vrot.slane %v8954_v47, 2  ;;  %v17033_v3 = vadd.f32 %v8967_v24, %v8966_v53  ;;  %v17039_v32 = vcombine.high %v16993_v26, %v20169_v30  ;;  %v7719_v39 = vrot.slane %v7718_v50, 1 }
 0x50a   : > { %20258 = vst [vmem:[#allocation104_spill] sm:$0xff] %v17027_v35  ;;  %v7744_v41 = vmax.f32 %v7742_v9, %v7743_v54  ;;  %v7750_v14 = vrot.slane %v7749_v0, 4  ;;  %v17041_v8 = vadd.f32 %v8941_v29, %v8940_v46  ;;  %v8981_v52 = vrot.slane %v8980_v62, 4 }
 0x50b   : > { %v17045_v53 = vadd.f32 %v8974_v43, %v8973_v44  ;;  %v8987_v40 = vsel %vm7377_vm7, %v17031_v45, 0.0  ;;  %v7725_v24 = vmax.f32 %v7723_v7, %v7724_v28  ;;  %v7732_v15 = vmax.f32 %v7730_v33, %v7731_v51 }
 0x50c   : > { %20260 = vst [vmem:[#allocation106_spill] sm:$0xff] %v17041_v8  ;;  %v17049_v57 = vadd.f32 %v8955_v4, %v8954_v47  ;;  %v7720_v9 = vmax.f32 %v7718_v50, %v7719_v39  ;;  %v7738_v54 = vrot.slane %v7737_v23, 2  ;;  %v7745_v8 = vrot.slane %v7744_v41, 2 }
 0x50d   : > { %20261 = vst [vmem:[#allocation107_spill] sm:$0xff] %v17045_v53  ;;  %v7726_v46 = vrot.slane %v7725_v24, 1  ;;  %v7733_v29 = vrot.slane %v7732_v15, 1  ;;  %v7751_v38 = vmax.f32 %v7749_v0, %v7750_v14  ;;  %v17052_v17 = vadd.f32 %v8981_v52, %v8980_v62 }
 0x50e   : > { %20262 = vst [vmem:[#allocation108_spill] sm:$0xff] %v17049_v57  ;;  %v8988_v18 = vrot.slane %v8987_v40, 4  ;;  %v7739_v43 = vmax.f32 %v7737_v23, %v7738_v54  ;;  %v7756_v44 = vsel %vm7377_vm7, %v16993_v26, -inf  ;;  %v7746_v51 = vmax.f32 %v7744_v41, %v7745_v8 }
 0x50f   : > { %v7727_v45 = vmax.f32 %v7725_v24, %v7726_v46  ;;  %v7734_v7 = vmax.f32 %v7732_v15, %v7733_v29  ;;  %v7752_v4 = vrot.slane %v7751_v38, 2  ;;  %v7757_v33 = vrot.slane %v7756_v44, 4 }
 0x510   : > { %v7740_v47 = vrot.slane %v7739_v43, 1  ;;  %v7763_v50 = vsel %vm7377_vm7, %v17039_v32, -inf  ;;  %v8322_v28 = vsub.f32 %v16944_v58, %v7720_v9  ;;  %v7747_v39 = vrot.slane %v7746_v51, 1 }
 0x511   : > { %v7753_v0 = vmax.f32 %v7751_v38, %v7752_v4  ;;  %v7764_v52 = vrot.slane %v7763_v50, 4  ;;  %v8323_v62 = vsub.f32 %v16965_v16, %v7727_v45  ;;  %v7758_v14 = vmax.f32 %v7756_v44, %v7757_v33 }
 0x512   : > { %v7741_v23 = vmax.f32 %v7739_v43, %v7740_v47  ;;  %v8324_v54 = vsub.f32 %v16947_v36, %v7734_v7  ;;  %v8498_v24 = vmul.f32 1.442695, %v8322_v28  ;;  %v7748_v15 = vmax.f32 %v7746_v51, %v7747_v39 }
 0x513   : > { %v7754_v8 = vrot.slane %v7753_v0, 1  ;;  %v7765_v41 = vmax.f32 %v7763_v50, %v7764_v52  ;;  %v8500_v46 = vmul.f32 1.442695, %v8323_v62  ;;  %v7759_v29 = vrot.slane %v7758_v14, 2 }
 0x514   : > { %v8325_v22 = vsub.f32 %v16969_v48, %v7741_v23  ;;  %12458 = vpow2.f32 %v8498_v24  ;;  %v8502_v35 = vmul.f32 1.442695, %v8324_v54  ;;  %v8326_v38 = vsub.f32 %v16950_v49, %v7748_v15 }
 0x515   : > { %v7755_v58 = vmax.f32 %v7753_v0, %v7754_v8  ;;  %v7766_v9 = vrot.slane %v7765_v41, 2  ;;  %12460 = vpow2.f32 %v8500_v46  ;;  %v7760_v45 = vmax.f32 %v7758_v14, %v7759_v29 }
 0x516   : > { %12462 = vpow2.f32 %v8502_v35  ;;  %v8504_v16 = vmul.f32 1.442695, %v8325_v22  ;;  %v20263_v36 = vcombine.low %v16955_v5, %v16961_v12  ;;  %v8506_v48 = vmul.f32 1.442695, %v8326_v38 }
 0x517   : > { %v7767_v44 = vmax.f32 %v7765_v41, %v7766_v9  ;;  %v8327_v7 = vsub.f32 %v16984_v37, %v7755_v58  ;;  %v20264_v51 = vcombine.high %v16955_v5, %v16961_v12  ;;  %v7761_v35 = vrot.slane %v7760_v45, 1 }
 0x518   : > { %v17067_v43 = vrot.slane %v20263_v36, %v16197_v25  ;;  %12464 = vpow2.f32 %v8504_v16  ;;  %v20265_v22 = vcombine.low %v16958_v55, %v16974_v13  ;;  %v17088_v12 = vadd.f32 %v8988_v18, %v8987_v40 }
 0x519   : > { %v17074_v4 = vrot.slane %v20264_v51, %v16197_v25  ;;  %v7768_v33 = vrot.slane %v7767_v44, 1  ;;  %12466 = vpow2.f32 %v8506_v48  ;;  %v8508_v37 = vmul.f32 1.442695, %v8327_v7 }
 0x51a   : > { %v17081_v47 = vrot.slane %v20265_v22, %v16197_v25  ;;  %v17085_v50 = vcombine.high %v17067_v43, %v20169_v30  ;;  %20266 = vst [vmem:[#allocation109_spill] sm:$0xff] %v17088_v12  ;;  %v7762_v28 = vmax.f32 %v7760_v45, %v7761_v35  ;;  %v7770_v52 = vsel %vm7377_vm7, %v17067_v43, -inf }
 0x51b   : > { %v17092_v39 = vcombine.high %v17074_v4, %v20169_v30  ;;  %v7769_v0 = vmax.f32 %v7767_v44, %v7768_v33  ;;  %12468 = vpow2.f32 %v8508_v37  ;;  %v6814_v14 = vcombine.high %v16958_v55, %v16974_v13 }
 0x51c   : > { %v7777_v62 = vsel %vm7377_vm7, %v17085_v50, -inf  ;;  %v8328_v23 = vsub.f32 %v16993_v26, %v7762_v28  ;;  %v7771_v18 = vrot.slane %v7770_v52, 4  ;;  %v7784_v24 = vsel %vm7377_vm7, %v17074_v4, -inf }
 0x51d   : > { %v7778_v40 = vrot.slane %v7777_v62, 4  ;;  %v8329_v54 = vsub.f32 %v17039_v32, %v7769_v0  ;;  %v7791_v15 = vsel %vm7377_vm7, %v17092_v39, -inf  ;;  %v7798_v8 = vsel %vm7377_vm7, %v17081_v47, -inf }
 0x51e   : > { %v8510_v41 = vmul.f32 1.442695, %v8328_v23  ;;  %v7772_v46 = vmax.f32 %v7770_v52, %v7771_v18  ;;  %v7785_v26 = vrot.slane %v7784_v24, 4  ;;  %v17110_v55 = vcombine.high %v17081_v47, %v20169_v30 }
 0x51f   : > { %v7779_v29 = vmax.f32 %v7777_v62, %v7778_v40  ;;  %v8512_v58 = vmul.f32 1.442695, %v8329_v54  ;;  %v7792_v13 = vrot.slane %v7791_v15, 4  ;;  %v7799_v32 = vrot.slane %v7798_v8, 4 }
 0x520   : > { %12470 = vpow2.f32 %v8510_v41  ;;  %v7773_v9 = vrot.slane %v7772_v46, 2  ;;  %v7786_v45 = vmax.f32 %v7784_v24, %v7785_v26  ;;  %v17115_v36 = vrot.slane %v6814_v14, %v16197_v25 }
 0x521   : > { %v7780_v38 = vrot.slane %v7779_v29, 2  ;;  %v17112_v16 = vpop.eup %12458  ;;  %12472 = vpow2.f32 %v8512_v58  ;;  %v7793_v44 = vmax.f32 %v7791_v15, %v7792_v13  ;;  %v7800_v7 = vmax.f32 %v7798_v8, %v7799_v32 }
 0x522   : > { %20267 = vst [vmem:[#allocation110_spill] sm:$0xff] %v17112_v16  ;;  %v17117_v48 = vpop.eup %12460  ;;  %v8994_v51 = vsel %vm7377_vm7, %v17112_v16, 0.0  ;;  %v7774_v35 = vmax.f32 %v7772_v46, %v7773_v9  ;;  %v7787_v33 = vrot.slane %v7786_v45, 2  ;;  %v7805_v62 = vsel %vm7377_vm7, %v17110_v55, -inf }
 0x523   : > { %20268 = vst [vmem:[#allocation111_spill] sm:$0xff] %v17117_v48  ;;  %v7781_v22 = vmax.f32 %v7779_v29, %v7780_v38  ;;  %v17121_v37 = vpop.eup %12462  ;;  %v8995_v28 = vrot.slane %v8994_v51, 4  ;;  %v9001_v0 = vsel %vm7377_vm7, %v17117_v48, 0.0  ;;  %v7794_v52 = vrot.slane %v7793_v44, 2 }
 0x524   : > { %20269 = vst [vmem:[#allocation112_spill] sm:$0xff] %v17121_v37  ;;  %v9002_v23 = vrot.slane %v9001_v0, 4  ;;  %v9008_v14 = vsel %vm7377_vm7, %v17121_v37, 0.0  ;;  %v7775_v18 = vrot.slane %v7774_v35, 1  ;;  %v7788_v8 = vmax.f32 %v7786_v45, %v7787_v33 }
 0x525   : > { %v7782_v40 = vrot.slane %v7781_v22, 1  ;;  %v17129_v54 = vpop.eup %12464  ;;  %v8996_v24 = vadd.f32 %v8995_v28, %v8994_v51  ;;  %v9009_v15 = vrot.slane %v9008_v14, 4  ;;  %v7795_v41 = vmax.f32 %v7793_v44, %v7794_v52 }
 0x526   : > { %20270 = vst [vmem:[#allocation113_spill] sm:$0xff] %v17129_v54  ;;  %v17131_v46 = vpop.eup %12466  ;;  %v17133_v29 = vadd.f32 %v9002_v23, %v9001_v0  ;;  %v9015_v26 = vsel %vm7377_vm7, %v17129_v54, 0.0  ;;  %v7801_v58 = vrot.slane %v7800_v7, 2  ;;  %v7806_v13 = vrot.slane %v7805_v62, 4 }
 0x527   : > { %20271 = vst [vmem:[#allocation114_spill] sm:$0xff] %v17131_v46  ;;  %v8997_v32 = vrot.slane %v8996_v24, 2  ;;  %v9010_v9 = vadd.f32 %v9009_v15, %v9008_v14  ;;  %v9016_v38 = vrot.slane %v9015_v26, 4  ;;  %v9022_v49 = vsel %vm7377_vm7, %v17131_v46, 0.0 }
 0x528   : > { %20272 = vst [vmem:[#allocation115_spill] sm:$0xff] %v17133_v29  ;;  %v17139_v5 = vpop.eup %12468  ;;  %v20274_v45 = vrot.slane %v17033_v3, 2  ;;  %v17148_v51 = vcombine.high %v17115_v36, %v20169_v30  ;;  %v7789_v33 = vrot.slane %v7788_v8, 1  ;;  %v7796_v28 = vrot.slane %v7795_v41, 1 }
 0x529   : > { %20273 = vst [vmem:[#allocation116_spill] sm:$0xff] %v17139_v5  ;;  %v20276_v0 = vrot.slane %v17052_v17, 2  ;;  %v7776_v14 = vmax.f32 %v7774_v35, %v7775_v18  ;;  %v7783_v15 = vmax.f32 %v7781_v22, %v7782_v40  ;;  %v17156_v46 = vadd.f32 %v8997_v32, %v8996_v24  ;;  %v17167_v22 = vpop.permute.xlu1 %6163 }
 0x52a   : > { %v17144_v44 = vadd.f32 %v20274_v45, %v17033_v3  ;;  %v9011_v45 = vrot.slane %v9010_v9, 2  ;;  %v9023_v54 = vrot.slane %v9022_v49, 4  ;;  %v17159_v37 = vadd.f32 %v9016_v38, %v9015_v26  ;;  %v6258_v3 = vpop.permute.xlu0 %6257 }
 0x52b   : > { %v17153_v52 = vadd.f32 %v20276_v0, %v17052_v17  ;;  %20278 = vst [vmem:[#allocation119_spill] sm:$0xff] %v17156_v46  ;;  %v9029_v48 = vsel %vm7377_vm7, %v17139_v5, 0.0  ;;  %v7802_v16 = vmax.f32 %v7800_v7, %v7801_v58  ;;  %v7807_v53 = vmax.f32 %v7805_v62, %v7806_v13 }
 0x52c   : > { %20275 = vst [vmem:[#allocation117_spill] sm:$0xff] %v17144_v44  ;;  %20279 = vst [vmem:[#allocation120_spill] sm:$0xff] %v17159_v37  ;;  %v7790_v44 = vmax.f32 %v7788_v8, %v7789_v33  ;;  %v7797_v17 = vmax.f32 %v7795_v41, %v7796_v28  ;;  %v7812_v0 = vsel %vm7377_vm7, %v17115_v36, -inf  ;;  %v7819_v35 = vsel %vm7377_vm7, %v17148_v51, -inf }
 0x52d   : > { %20277 = vst [vmem:[#allocation118_spill] sm:$0xff] %v17153_v52  ;;  %v17169_v18 = vpop.eup %12470  ;;  %v7803_v40 = vrot.slane %v7802_v16, 1  ;;  %v7808_v24 = vrot.slane %v7807_v53, 2  ;;  %v7813_v26 = vrot.slane %v7812_v0, 4  ;;  %v7820_v32 = vrot.slane %v7819_v35, 4 }
 0x52e   : > { %20280 = vst [vmem:[#allocation121_spill] sm:$0xff] %v17169_v18  ;;  %v17171_v38 = vpop.eup %12472  ;;  %v17173_v7 = vadd.f32 %v9011_v45, %v9010_v9  ;;  %v9024_v62 = vadd.f32 %v9023_v54, %v9022_v49  ;;  %v9030_v8 = vrot.slane %v9029_v48, 4  ;;  %v9036_v41 = vsel %vm7377_vm7, %v17169_v18, 0.0 }
 0x52f   : > { %20281 = vst [vmem:[#allocation122_spill] sm:$0xff] %v17171_v38  ;;  %v7804_v13 = vmax.f32 %v7802_v16, %v7803_v40  ;;  %v7809_v33 = vmax.f32 %v7807_v53, %v7808_v24  ;;  %v8330_v28 = vsub.f32 %v17067_v43, %v7776_v14  ;;  %v9037_v23 = vrot.slane %v9036_v41, 4  ;;  %v6212_v43 = vpop.permute.xlu1 %6211 }
 0x530   : > { %20282 = vst [vmem:[#allocation123_spill] sm:$0xff] %v17173_v7  ;;  %v7814_v5 = vmax.f32 %v7812_v0, %v7813_v26  ;;  %v7821_v29 = vmax.f32 %v7819_v35, %v7820_v32  ;;  %v8331_v46 = vsub.f32 %v17085_v50, %v7783_v15  ;;  %v9043_v9 = vsel %vm7377_vm7, %v17171_v38, 0.0 }
 0x531   : > { %v7810_v49 = vrot.slane %v7809_v33, 1  ;;  %v8332_v54 = vsub.f32 %v17074_v4, %v7790_v44  ;;  %v8333_v45 = vsub.f32 %v17092_v39, %v7797_v17  ;;  %v9025_v18 = vrot.slane %v9024_v62, 2  ;;  %v17188_v44 = vpop.permute.xlu0 %6165 }
 0x532   : > { %v7815_v58 = vrot.slane %v7814_v5, 2  ;;  %v7822_v16 = vrot.slane %v7821_v29, 2  ;;  %v8334_v53 = vsub.f32 %v17081_v47, %v7804_v13  ;;  %v17185_v14 = vadd.f32 %v9030_v8, %v9029_v48 }
 0x533   : > { %v7811_v0 = vmax.f32 %v7809_v33, %v7810_v49  ;;  %v8514_v35 = vmul.f32 1.442695, %v8330_v28  ;;  %v8516_v40 = vmul.f32 1.442695, %v8331_v46  ;;  %v9044_v50 = vrot.slane %v9043_v9, 4 }
 0x534   : > { %20283 = vst [vmem:[#allocation124_spill] sm:$0xff] %v17185_v14  ;;  %v7816_v15 = vmax.f32 %v7814_v5, %v7815_v58  ;;  %v7823_v24 = vmax.f32 %v7821_v29, %v7822_v16  ;;  %v8518_v26 = vmul.f32 1.442695, %v8332_v54  ;;  %v9038_v32 = vadd.f32 %v9037_v23, %v9036_v41 }
 0x535   : > { %v8335_v4 = vsub.f32 %v17110_v55, %v7811_v0  ;;  %12474 = vpow2.f32 %v8514_v35  ;;  %v8520_v39 = vmul.f32 1.442695, %v8333_v45  ;;  %v8522_v47 = vmul.f32 1.442695, %v8334_v53  ;;  %v6260_v55 = vpop.permute.xlu1 %6259  ;;  %v17208_v45 = vpop.permute.xlu0 %6213 }
 0x536   : > { %v7817_v17 = vrot.slane %v7816_v15, 1  ;;  %v7824_v38 = vrot.slane %v7823_v24, 1  ;;  %12476 = vpow2.f32 %v8516_v40  ;;  %v17190_v48 = vadd.f32 %v9025_v18, %v9024_v62 }
 0x537   : > { %12478 = vpow2.f32 %v8518_v26  ;;  %v8524_v46 = vmul.f32 1.442695, %v8335_v4  ;;  %v17193_v5 = vadd.f32 %v9044_v50, %v9043_v9  ;;  %v9039_v41 = vrot.slane %v9038_v32, 2 }
 0x538   : > { %20284 = vst [vmem:[#allocation125_spill] sm:$0xff] %v17190_v48  ;;  %v7818_v29 = vmax.f32 %v7816_v15, %v7817_v17  ;;  %v7825_v23 = vmax.f32 %v7823_v24, %v7824_v38  ;;  %12480 = vpow2.f32 %v8520_v39  ;;  %v6834_v58 = vcombine.high %v16116_v31, %v16952_v19 }
 0x539   : > { %20285 = vst [vmem:[#allocation126_spill] sm:$0xff] %v17193_v5  ;;  %12482 = vpow2.f32 %v8522_v47  ;;  %v6849_v13 = vcombine.low %v16925_v10, %v6258_v3  ;;  %v20286_v33 = vcombine.low %v16116_v31, %v16952_v19  ;;  %v6901_v38 = vcombine.low %v16123_v20, %v6212_v43 }
 0x53a   : > { %v8336_v18 = vsub.f32 %v17115_v36, %v7818_v29  ;;  %v8337_v62 = vsub.f32 %v17148_v51, %v7825_v23  ;;  %12484 = vpow2.f32 %v8524_v46  ;;  %v6850_v9 = vcombine.high %v16925_v10, %v6258_v3 }
 0x53b   : > { %v6841_v28 = vrot.slane %v20286_v33, %v16190_v2  ;;  %v6857_v49 = vrot.slane %v6849_v13, %v16190_v2  ;;  %v6917_v54 = vcombine.low %v17167_v22, %v6260_v55  ;;  %v6902_v51 = vcombine.high %v16123_v20, %v6212_v43 }
 0x53c   : > { %v8526_v16 = vmul.f32 1.442695, %v8336_v18  ;;  %v8528_v36 = vmul.f32 1.442695, %v8337_v62  ;;  %v6918_v53 = vcombine.high %v17167_v22, %v6260_v55  ;;  %v6864_v19 = vrot.slane %v6850_v9, %v16190_v2 }
 0x53d   : > { %v6865_v35 = vcombine.low %v6841_v28, %v6857_v49  ;;  %v6866_v40 = vcombine.high %v6841_v28, %v6857_v49  ;;  %v6848_v10 = vrot.slane %v6834_v58, %v16190_v2  ;;  %v17216_v3 = vrot.slane %v6917_v54, %v16190_v2 }
 0x53e   : > { %12486 = vpow2.f32 %v8526_v16  ;;  %v6969_v50 = vcombine.low %v16134_v61, %v17208_v45  ;;  %v17220_v15 = vadd.f32 %v9039_v41, %v9038_v32  ;;  %v17229_v24 = vrot.slane %v6901_v38, %v16190_v2 }
 0x53f   : > { %12488 = vpow2.f32 %v8528_v36  ;;  %v17223_v22 = vrot.slane %v6865_v35, %v16197_v25  ;;  %v17226_v43 = vrot.slane %v6866_v40, %v16197_v25  ;;  %v17232_v26 = vrot.slane %v6902_v51, %v16190_v2 }
 0x540   : > { %20287 = vst [vmem:[#allocation127_spill] sm:$0xff] %v17220_v15  ;;  %v6881_v4 = vcombine.low %v6848_v10, %v6864_v19  ;;  %v17235_v39 = vrot.slane %v6918_v53, %v16190_v2  ;;  %v6882_v17 = vcombine.high %v6848_v10, %v6864_v19  ;;  %v6933_v41 = vcombine.low %v17229_v24, %v17216_v3 }
 0x541   : > { %v17239_v32 = vcombine.high %v17223_v22, %v20169_v30  ;;  %v7826_v47 = vsel %vm7377_vm7, %v17223_v22, -inf  ;;  %v7840_v55 = vsel %vm7377_vm7, %v17226_v43, -inf  ;;  %v17252_v58 = vrot.slane %v6969_v50, %v16190_v2 }
 0x542   : > { %v17245_v29 = vpop.eup %12474  ;;  %v7827_v23 = vrot.slane %v7826_v47, 4  ;;  %v7841_v33 = vrot.slane %v7840_v55, 4  ;;  %v17267_v54 = vrot.slane %v6881_v4, %v16197_v25  ;;  %v17274_v19 = vrot.slane %v6882_v17, %v16197_v25 }
 0x543   : > { %20288 = vst [vmem:[#allocation128_spill] sm:$0xff] %v17245_v29  ;;  %v17254_v13 = vpop.eup %12476  ;;  %v9050_v18 = vsel %vm7377_vm7, %v17245_v29, 0.0  ;;  %v7833_v62 = vsel %vm7377_vm7, %v17239_v32, -inf  ;;  %v17292_v5 = vcombine.high %v17226_v43, %v20169_v30 }
 0x544   : > { %20289 = vst [vmem:[#allocation129_spill] sm:$0xff] %v17254_v13  ;;  %v17262_v38 = vpop.eup %12478  ;;  %v9051_v9 = vrot.slane %v9050_v18, 4  ;;  %v9057_v49 = vsel %vm7377_vm7, %v17254_v13, 0.0  ;;  %v7828_v16 = vmax.f32 %v7826_v47, %v7827_v23  ;;  %v7834_v35 = vrot.slane %v7833_v62, 4 }
 0x545   : > { %20290 = vst [vmem:[#allocation130_spill] sm:$0xff] %v17262_v38  ;;  %v17269_v36 = vpop.eup %12480  ;;  %v9058_v51 = vrot.slane %v9057_v49, 4  ;;  %v9064_v53 = vsel %vm7377_vm7, %v17262_v38, 0.0  ;;  %v7842_v28 = vmax.f32 %v7840_v55, %v7841_v33  ;;  %v17300_v33 = vcombine.high %v17267_v54, %v20169_v30 }
 0x546   : > { %20291 = vst [vmem:[#allocation131_spill] sm:$0xff] %v17269_v36  ;;  %v17276_v40 = vpop.eup %12482  ;;  %v9052_v10 = vadd.f32 %v9051_v9, %v9050_v18  ;;  %v9065_v50 = vrot.slane %v9064_v53, 4  ;;  %v9071_v0 = vsel %vm7377_vm7, %v17269_v36, 0.0  ;;  %v7829_v4 = vrot.slane %v7828_v16, 2 }
 0x547   : > { %20292 = vst [vmem:[#allocation132_spill] sm:$0xff] %v17276_v40  ;;  %v17280_v8 = vpop.eup %12484  ;;  %v9072_v47 = vrot.slane %v9071_v0, 4  ;;  %v9078_v23 = vsel %vm7377_vm7, %v17276_v40, 0.0  ;;  %v7835_v46 = vmax.f32 %v7833_v62, %v7834_v35  ;;  %v17284_v20 = vadd.f32 %v9058_v51, %v9057_v49 }
 0x548   : > { %20293 = vst [vmem:[#allocation133_spill] sm:$0xff] %v17280_v8  ;;  %v9066_v17 = vadd.f32 %v9065_v50, %v9064_v53  ;;  %v9079_v31 = vrot.slane %v9078_v23, 4  ;;  %v9085_v18 = vsel %vm7377_vm7, %v17280_v8, 0.0  ;;  %v9053_v9 = vrot.slane %v9052_v10, 2 }
 0x549   : > { %20294 = vst [vmem:[#allocation134_spill] sm:$0xff] %v17284_v20  ;;  %v17288_v38 = vadd.f32 %v9072_v47, %v9071_v0  ;;  %v9086_v36 = vrot.slane %v9085_v18, 4  ;;  %v7830_v13 = vmax.f32 %v7828_v16, %v7829_v4  ;;  %v7836_v40 = vrot.slane %v7835_v46, 2 }
 0x54a   : > { %v9067_v29 = vrot.slane %v9066_v17, 2  ;;  %v17304_v0 = vcombine.high %v17274_v19, %v20169_v30  ;;  %v7843_v49 = vrot.slane %v7842_v28, 2  ;;  %v17307_v16 = vrot.slane %v6933_v41, %v16197_v25 }
 0x54b   : > { %20295 = vst [vmem:[#allocation135_spill] sm:$0xff] %v17288_v38  ;;  %v17296_v62 = vpop.eup %12486  ;;  %v17311_v53 = vadd.f32 %v9079_v31, %v9078_v23  ;;  %v7831_v50 = vrot.slane %v7830_v13, 1  ;;  %v7837_v4 = vmax.f32 %v7835_v46, %v7836_v40  ;;  %v17315_v47 = vadd.f32 %v9053_v9, %v9052_v10 }
 0x54c   : > { %20296 = vst [vmem:[#allocation136_spill] sm:$0xff] %v17296_v62  ;;  %v17309_v51 = vpop.eup %12488  ;;  %v9092_v35 = vsel %vm7377_vm7, %v17296_v62, 0.0  ;;  %v17319_v15 = vadd.f32 %v9086_v36, %v9085_v18  ;;  %v17321_v14 = vadd.f32 %v9067_v29, %v9066_v17  ;;  %v7844_v37 = vmax.f32 %v7842_v28, %v7843_v49 }
 0x54d   : > { %20297 = vst [vmem:[#allocation137_spill] sm:$0xff] %v17309_v51  ;;  %20298 = vst [vmem:[#allocation138_spill] sm:$0xff] %v17315_v47  ;;  %v9093_v41 = vrot.slane %v9092_v35, 4  ;;  %v7838_v48 = vrot.slane %v7837_v4, 1  ;;  %v9099_v31 = vsel %vm7377_vm7, %v17309_v51, 0.0  ;;  %v7847_v23 = vsel %vm7377_vm7, %v17292_v5, -inf }
 0x54e   : > { %20299 = vst [vmem:[#allocation139_spill] sm:$0xff] %v17319_v15  ;;  %20300 = vst [vmem:[#allocation140_spill] sm:$0xff] %v17321_v14  ;;  %v7854_v46 = vsel %vm7377_vm7, %v17267_v54, -inf  ;;  %v7861_v40 = vsel %vm7377_vm7, %v17300_v33, -inf  ;;  %v7832_v10 = vmax.f32 %v7830_v13, %v7831_v50  ;;  %v7845_v29 = vrot.slane %v7844_v37, 1 }
 0x54f   : > { %v7848_v17 = vrot.slane %v7847_v23, 4  ;;  %v7839_v18 = vmax.f32 %v7837_v4, %v7838_v48  ;;  %v7855_v9 = vrot.slane %v7854_v46, 4  ;;  %v7862_v28 = vrot.slane %v7861_v40, 4 }
 0x550   : > { %v7868_v49 = vsel %vm7377_vm7, %v17274_v19, -inf  ;;  %v9100_v8 = vrot.slane %v9099_v31, 4  ;;  %v7846_v55 = vmax.f32 %v7844_v37, %v7845_v29  ;;  %v17334_v38 = vadd.f32 %v9093_v41, %v9092_v35 }
 0x551   : > { %v7849_v51 = vmax.f32 %v7847_v23, %v7848_v17  ;;  %v7869_v62 = vrot.slane %v7868_v49, 4  ;;  %v7856_v14 = vmax.f32 %v7854_v46, %v7855_v9  ;;  %v7863_v47 = vmax.f32 %v7861_v40, %v7862_v28 }
 0x552   : > { %v7875_v36 = vsel %vm7377_vm7, %v17304_v0, -inf  ;;  %v8338_v48 = vsub.f32 %v17223_v22, %v7832_v10  ;;  %v8339_v12 = vsub.f32 %v17239_v32, %v7839_v18  ;;  %v8340_v37 = vsub.f32 %v17226_v43, %v7846_v55 }
 0x553   : > { %v7850_v13 = vrot.slane %v7849_v51, 2  ;;  %v7870_v50 = vmax.f32 %v7868_v49, %v7869_v62  ;;  %v7876_v20 = vrot.slane %v7875_v36, 4  ;;  %v7857_v4 = vrot.slane %v7856_v14, 2 }
 0x554   : > { %v7864_v7 = vrot.slane %v7863_v47, 2  ;;  %v8530_v41 = vmul.f32 1.442695, %v8338_v48  ;;  %v8532_v17 = vmul.f32 1.442695, %v8339_v12  ;;  %v20301_v32 = vcombine.high %v17229_v24, %v17216_v3 }
 0x555   : > { %v7851_v23 = vmax.f32 %v7849_v51, %v7850_v13  ;;  %v7871_v29 = vrot.slane %v7870_v50, 2  ;;  %v7877_v35 = vmax.f32 %v7875_v36, %v7876_v20  ;;  %v7858_v46 = vmax.f32 %v7856_v14, %v7857_v4 }
 0x556   : > { %v7865_v40 = vmax.f32 %v7863_v47, %v7864_v7  ;;  %v8534_v9 = vmul.f32 1.442695, %v8340_v37  ;;  %12490 = vpow2.f32 %v8530_v41  ;;  %v17345_v43 = vrot.slane %v20301_v32, %v16197_v25 }
 0x557   : > { %v7852_v28 = vrot.slane %v7851_v23, 1  ;;  %v7872_v52 = vmax.f32 %v7870_v50, %v7871_v29  ;;  %v7878_v62 = vrot.slane %v7877_v35, 2  ;;  %v7859_v49 = vrot.slane %v7858_v46, 1 }
 0x558   : > { %v7866_v22 = vrot.slane %v7865_v40, 1  ;;  %12492 = vpow2.f32 %v8532_v17  ;;  %v17347_v7 = vadd.f32 %v9100_v8, %v9099_v31  ;;  %v20303_v47 = vcombine.low %v17232_v26, %v17235_v39 }
 0x559   : > { %v7853_v55 = vmax.f32 %v7851_v23, %v7852_v28  ;;  %v7873_v20 = vrot.slane %v7872_v52, 1  ;;  %v7879_v51 = vmax.f32 %v7877_v35, %v7878_v62  ;;  %12494 = vpow2.f32 %v8534_v9 }
 0x55a   : > { %20302 = vst [vmem:[#allocation141_spill] sm:$0xff] %v17347_v7  ;;  %v7860_v12 = vmax.f32 %v7858_v46, %v7859_v49  ;;  %v7867_v14 = vmax.f32 %v7865_v40, %v7866_v22  ;;  %v17353_v36 = vrot.slane %v20303_v47, %v16197_v25  ;;  %v9095_v10 = vrot.slane %v17334_v38, 2 }
 0x55b   : > { %v7874_v18 = vmax.f32 %v7872_v52, %v7873_v20  ;;  %v7880_v3 = vrot.slane %v7879_v51, 1  ;;  %v8341_v24 = vsub.f32 %v17292_v5, %v7853_v55  ;;  %v17361_v8 = vcombine.high %v17307_v16, %v20169_v30 }
 0x55c   : > { %v8342_v13 = vsub.f32 %v17267_v54, %v7860_v12  ;;  %v8343_v50 = vsub.f32 %v17300_v33, %v7867_v14  ;;  %v17365_v31 = vcombine.high %v17345_v43, %v20169_v30  ;;  %v6950_v52 = vcombine.high %v17232_v26, %v17235_v39 }
 0x55d   : > { %v7881_v48 = vmax.f32 %v7879_v51, %v7880_v3  ;;  %v8344_v4 = vsub.f32 %v17274_v19, %v7874_v18  ;;  %v8536_v37 = vmul.f32 1.442695, %v8341_v24  ;;  %v17372_v54 = vcombine.high %v17353_v36, %v20169_v30 }
 0x55e   : > { %v8538_v5 = vmul.f32 1.442695, %v8342_v13  ;;  %v8540_v23 = vmul.f32 1.442695, %v8343_v50  ;;  %v7882_v33 = vsel %vm7377_vm7, %v17307_v16, -inf  ;;  %v7889_v19 = vsel %vm7377_vm7, %v17361_v8, -inf }
 0x55f   : > { %v8345_v29 = vsub.f32 %v17304_v0, %v7881_v48  ;;  %12496 = vpow2.f32 %v8536_v37  ;;  %v8542_v35 = vmul.f32 1.442695, %v8344_v4  ;;  %v7883_v41 = vrot.slane %v7882_v33, 4 }
 0x560   : > { %12498 = vpow2.f32 %v8538_v5  ;;  %v7896_v26 = vsel %vm7377_vm7, %v17345_v43, -inf  ;;  %v7903_v39 = vsel %vm7377_vm7, %v17365_v31, -inf  ;;  %v7890_v17 = vrot.slane %v7889_v19, 4 }
 0x561   : > { %12500 = vpow2.f32 %v8540_v23  ;;  %v8544_v46 = vmul.f32 1.442695, %v8345_v29  ;;  %v7884_v40 = vmax.f32 %v7882_v33, %v7883_v41  ;;  %v7897_v9 = vrot.slane %v7896_v26, 4 }
 0x562   : > { %12502 = vpow2.f32 %v8542_v35  ;;  %v7904_v0 = vrot.slane %v7903_v39, 4  ;;  %v7910_v28 = vsel %vm7377_vm7, %v17353_v36, -inf  ;;  %v7891_v49 = vmax.f32 %v7889_v19, %v7890_v17 }
 0x563   : > { %12504 = vpow2.f32 %v8544_v46  ;;  %v7885_v62 = vrot.slane %v7884_v40, 2  ;;  %v7911_v22 = vrot.slane %v7910_v28, 4  ;;  %v17385_v32 = vpop.eup %12490  ;;  %v17388_v55 = vrot.slane %v6950_v52, %v16197_v25 }
 0x564   : > { %20304 = vst [vmem:[#allocation142_spill] sm:$0xff] %v17385_v32  ;;  %v7898_v20 = vmax.f32 %v7896_v26, %v7897_v9  ;;  %v7905_v51 = vmax.f32 %v7903_v39, %v7904_v0  ;;  %v7917_v12 = vsel %vm7377_vm7, %v17372_v54, -inf  ;;  %v9106_v47 = vsel %vm7377_vm7, %v17385_v32, 0.0 }
 0x565   : > { %v17392_v14 = vpop.eup %12492  ;;  %v7886_v18 = vmax.f32 %v7884_v40, %v7885_v62  ;;  %v7892_v3 = vrot.slane %v7891_v49, 2  ;;  %v7912_v24 = vmax.f32 %v7910_v28, %v7911_v22  ;;  %v9107_v50 = vrot.slane %v9106_v47, 4 }
 0x566   : > { %20305 = vst [vmem:[#allocation143_spill] sm:$0xff] %v17392_v14  ;;  %v17396_v13 = vpop.eup %12494  ;;  %v9113_v48 = vsel %vm7377_vm7, %v17392_v14, 0.0  ;;  %v7899_v4 = vrot.slane %v7898_v20, 2  ;;  %v7906_v37 = vrot.slane %v7905_v51, 2  ;;  %v20307_v26 = vrot.slane %v17311_v53, 2 }
 0x567   : > { %20306 = vst [vmem:[#allocation144_spill] sm:$0xff] %v17396_v13  ;;  %v9114_v52 = vrot.slane %v9113_v48, 4  ;;  %v9120_v5 = vsel %vm7377_vm7, %v17396_v13, 0.0  ;;  %v7887_v23 = vrot.slane %v7886_v18, 1  ;;  %v7893_v33 = vmax.f32 %v7891_v49, %v7892_v3 }
 0x568   : > { %v9108_v29 = vadd.f32 %v9107_v50, %v9106_v47  ;;  %v9121_v35 = vrot.slane %v9120_v5, 4  ;;  %v7900_v41 = vmax.f32 %v7898_v20, %v7899_v4  ;;  %v7907_v19 = vmax.f32 %v7905_v51, %v7906_v37 }
 0x569   : > { %v17405_v39 = vadd.f32 %v20307_v26, %v17311_v53  ;;  %v17408_v40 = vadd.f32 %v9114_v52, %v9113_v48  ;;  %v7913_v17 = vrot.slane %v7912_v24, 2  ;;  %v7894_v28 = vrot.slane %v7893_v33, 1 }
 0x56a   : > { %v9122_v0 = vadd.f32 %v9121_v35, %v9120_v5  ;;  %v7924_v62 = vsel %vm7377_vm7, %v17388_v55, -inf  ;;  %v17416_v49 = vadd.f32 %v9095_v10, %v17334_v38  ;;  %v17420_v53 = vcombine.high %v17388_v55, %v20169_v30 }
 0x56b   : > { %20308 = vst [vmem:[#allocation145_spill] sm:$0xff] %v17405_v39  ;;  %20309 = vst [vmem:[#allocation146_spill] sm:$0xff] %v17408_v40  ;;  %v7914_v22 = vmax.f32 %v7912_v24, %v7913_v17  ;;  %v7918_v20 = vrot.slane %v7917_v12, 4  ;;  %v9109_v47 = vrot.slane %v9108_v29, 2  ;;  %v7888_v3 = vmax.f32 %v7886_v18, %v7887_v23 }
 0x56c   : > { %20310 = vst [vmem:[#allocation147_spill] sm:$0xff] %v17416_v49  ;;  %v17422_v51 = vpop.eup %12496  ;;  %v7901_v50 = vrot.slane %v7900_v41, 1  ;;  %v7908_v48 = vrot.slane %v7907_v19, 1  ;;  %v7925_v52 = vrot.slane %v7924_v62, 4  ;;  %v9123_v35 = vrot.slane %v9122_v0, 2 }
 0x56d   : > { %20311 = vst [vmem:[#allocation148_spill] sm:$0xff] %v17422_v51  ;;  %v17424_v4 = vpop.eup %12498  ;;  %v9127_v38 = vsel %vm7377_vm7, %v17422_v51, 0.0  ;;  %v7919_v10 = vmax.f32 %v7917_v12, %v7918_v20  ;;  %v7895_v17 = vmax.f32 %v7893_v33, %v7894_v28  ;;  %v7915_v37 = vrot.slane %v7914_v22, 1  ;;  %v17445_v33 = vpop.permute.xlu1 %6167 }
 0x56e   : > { %20312 = vst [vmem:[#allocation149_spill] sm:$0xff] %v17424_v4  ;;  %v17429_v5 = vpop.eup %12500  ;;  %v9128_v24 = vrot.slane %v9127_v38, 4  ;;  %v9134_v26 = vsel %vm7377_vm7, %v17424_v4, 0.0  ;;  %v7926_v51 = vmax.f32 %v7924_v62, %v7925_v52  ;;  %v7931_v4 = vsel %vm7377_vm7, %v17420_v53, -inf }
 0x56f   : > { %20313 = vst [vmem:[#allocation150_spill] sm:$0xff] %v17429_v5  ;;  %v17433_v18 = vpop.eup %12502  ;;  %v9135_v23 = vrot.slane %v9134_v26, 4  ;;  %v9141_v9 = vsel %vm7377_vm7, %v17429_v5, 0.0  ;;  %v7920_v46 = vrot.slane %v7919_v10, 2  ;;  %v17447_v28 = vadd.f32 %v9109_v47, %v9108_v29  ;;  %v6262_v47 = vpop.permute.xlu0 %6261 }
 0x570   : > { %20314 = vst [vmem:[#allocation151_spill] sm:$0xff] %v17433_v18  ;;  %v17437_v13 = vpop.eup %12504  ;;  %v17439_v12 = vadd.f32 %v9128_v24, %v9127_v38  ;;  %v9148_v20 = vsel %vm7377_vm7, %v17433_v18, 0.0  ;;  %v9142_v14 = vrot.slane %v9141_v9, 4  ;;  %v7902_v32 = vmax.f32 %v7900_v41, %v7901_v50 }
 0x571   : > { %20315 = vst [vmem:[#allocation152_spill] sm:$0xff] %v17437_v13  ;;  %v7921_v5 = vmax.f32 %v7919_v10, %v7920_v46  ;;  %v9136_v40 = vadd.f32 %v9135_v23, %v9134_v26  ;;  %v9155_v7 = vsel %vm7377_vm7, %v17437_v13, 0.0  ;;  %v7909_v38 = vmax.f32 %v7907_v19, %v7908_v48 }
 0x572   : > { %v7927_v24 = vrot.slane %v7926_v51, 2  ;;  %v9149_v49 = vrot.slane %v9148_v20, 4  ;;  %v7916_v15 = vmax.f32 %v7914_v22, %v7915_v37  ;;  %v7932_v62 = vrot.slane %v7931_v4, 4  ;;  %v6216_v37 = vpop.permute.xlu1 %6215 }
 0x573   : > { %v7922_v18 = vrot.slane %v7921_v5, 1  ;;  %v17451_v52 = vadd.f32 %v9123_v35, %v9122_v0  ;;  %v8346_v29 = vsub.f32 %v17307_v16, %v7888_v3  ;;  %v17455_v41 = vadd.f32 %v9142_v14, %v9141_v9 }
 0x574   : > { %v7928_v57 = vmax.f32 %v7926_v51, %v7927_v24  ;;  %v9156_v46 = vrot.slane %v9155_v7, 4  ;;  %v7933_v10 = vmax.f32 %v7931_v4, %v7932_v62  ;;  %v9137_v26 = vrot.slane %v9136_v40, 2 }
 0x575   : > { %20316 = vst [vmem:[#allocation153_spill] sm:$0xff] %v17455_v41  ;;  %v7923_v50 = vmax.f32 %v7921_v5, %v7922_v18  ;;  %v8347_v48 = vsub.f32 %v17361_v8, %v7895_v17  ;;  %v8348_v22 = vsub.f32 %v17345_v43, %v7902_v32  ;;  %v9150_v0 = vadd.f32 %v9149_v49, %v9148_v20  ;;  %v17466_v49 = vpop.permute.xlu0 %6169 }
 0x576   : > { %v7929_v19 = vrot.slane %v7928_v57, 1  ;;  %v7934_v35 = vrot.slane %v7933_v10, 2  ;;  %v8349_v23 = vsub.f32 %v17365_v31, %v7909_v38  ;;  %v8350_v51 = vsub.f32 %v17353_v36, %v7916_v15  ;;  %v6264_v20 = vpop.permute.xlu1 %6263 }
 0x577   : > { %v8351_v14 = vsub.f32 %v17372_v54, %v7923_v50  ;;  %v8546_v9 = vmul.f32 1.442695, %v8346_v29  ;;  %v8548_v3 = vmul.f32 1.442695, %v8347_v48  ;;  %v8550_v18 = vmul.f32 1.442695, %v8348_v22 }
 0x578   : > { %v7930_v16 = vmax.f32 %v7928_v57, %v7929_v19  ;;  %v7935_v5 = vmax.f32 %v7933_v10, %v7934_v35  ;;  %v8552_v24 = vmul.f32 1.442695, %v8349_v23  ;;  %v17463_v8 = vadd.f32 %v9156_v46, %v9155_v7 }
 0x579   : > { %12506 = vpow2.f32 %v8546_v9  ;;  %v8554_v32 = vmul.f32 1.442695, %v8350_v51  ;;  %v17468_v31 = vadd.f32 %v9137_v26, %v9136_v40  ;;  %v8556_v15 = vmul.f32 1.442695, %v8351_v14  ;;  %v17484_v19 = vpop.permute.xlu0 %6217 }
 0x57a   : > { %20317 = vst [vmem:[#allocation154_spill] sm:$0xff] %v17463_v8  ;;  %v8352_v43 = vsub.f32 %v17388_v55, %v7930_v16  ;;  %v7936_v57 = vrot.slane %v7935_v5, 1  ;;  %12508 = vpow2.f32 %v8548_v3  ;;  %v6985_v54 = vcombine.low %v17188_v44, %v6262_v47 }
 0x57b   : > { %12510 = vpow2.f32 %v8550_v18  ;;  %v6986_v17 = vcombine.high %v17188_v44, %v6262_v47  ;;  %v9151_v7 = vrot.slane %v9150_v0, 2  ;;  %v20318_v55 = vcombine.high %v16134_v61, %v17208_v45 }
 0x57c   : > { %v8558_v36 = vmul.f32 1.442695, %v8352_v43  ;;  %v7937_v38 = vmax.f32 %v7935_v5, %v7936_v57  ;;  %12512 = vpow2.f32 %v8552_v24  ;;  %v7037_v40 = vcombine.low %v16141_v63, %v6216_v37 }
 0x57d   : > { %v6984_v62 = vrot.slane %v20318_v55, %v16190_v2  ;;  %12514 = vpow2.f32 %v8554_v32  ;;  %v6993_v29 = vrot.slane %v6985_v54, %v16190_v2  ;;  %v7000_v46 = vrot.slane %v6986_v17, %v16190_v2 }
 0x57e   : > { %v8353_v50 = vsub.f32 %v17420_v53, %v7937_v38  ;;  %12516 = vpow2.f32 %v8556_v15  ;;  %v7038_v44 = vcombine.high %v16141_v63, %v6216_v37  ;;  %v7053_v47 = vcombine.low %v17445_v33, %v6264_v20 }
 0x57f   : > { %12518 = vpow2.f32 %v8558_v36  ;;  %v7001_v10 = vcombine.low %v17252_v58, %v6993_v29  ;;  %v7002_v45 = vcombine.high %v17252_v58, %v6993_v29  ;;  %v7017_v26 = vcombine.low %v6984_v62, %v7000_v46 }
 0x580   : > { %v17486_v48 = vadd.f32 %v9151_v7, %v9150_v0  ;;  %v8560_v35 = vmul.f32 1.442695, %v8353_v50  ;;  %v7054_v53 = vcombine.high %v17445_v33, %v6264_v20  ;;  %v17491_v23 = vrot.slane %v7037_v40, %v16190_v2 }
 0x581   : > { %v17494_v37 = vrot.slane %v7001_v10, %v16197_v25  ;;  %v17497_v51 = vrot.slane %v7002_v45, %v16197_v25  ;;  %v17500_v58 = vrot.slane %v7017_v26, %v16197_v25  ;;  %v17503_v0 = vrot.slane %v7038_v44, %v16190_v2 }
 0x582   : > { %20319 = vst [vmem:[#allocation155_spill] sm:$0xff] %v17486_v48  ;;  %v7018_v16 = vcombine.high %v6984_v62, %v7000_v46  ;;  %v17506_v14 = vrot.slane %v7053_v47, %v16190_v2  ;;  %12520 = vpow2.f32 %v8560_v35  ;;  %v17525_v32 = vrot.slane %v7054_v53, %v16190_v2 }
 0x583   : > { %v17512_v9 = vcombine.high %v17494_v37, %v20169_v30  ;;  %v17516_v3 = vcombine.high %v17497_v51, %v20169_v30  ;;  %v7938_v5 = vsel %vm7377_vm7, %v17494_v37, -inf  ;;  %v7952_v24 = vsel %vm7377_vm7, %v17497_v51, -inf }
 0x584   : > { %v7939_v18 = vrot.slane %v7938_v5, 4  ;;  %v7966_v43 = vsel %vm7377_vm7, %v17500_v58, -inf  ;;  %v17529_v57 = vcombine.high %v17500_v58, %v20169_v30  ;;  %v7953_v36 = vrot.slane %v7952_v24, 4 }
 0x585   : > { %v7945_v15 = vsel %vm7377_vm7, %v17512_v9, -inf  ;;  %v7959_v54 = vsel %vm7377_vm7, %v17516_v3, -inf  ;;  %v17538_v20 = vrot.slane %v7018_v16, %v16197_v25  ;;  %v7967_v46 = vrot.slane %v7966_v43, 4 }
 0x586   : > { %v17535_v17 = vpop.eup %12506  ;;  %v7940_v7 = vmax.f32 %v7938_v5, %v7939_v18  ;;  %v7946_v38 = vrot.slane %v7945_v15, 4  ;;  %v7960_v29 = vrot.slane %v7959_v54, 4  ;;  %v7954_v5 = vmax.f32 %v7952_v24, %v7953_v36 }
 0x587   : > { %20320 = vst [vmem:[#allocation156_spill] sm:$0xff] %v17535_v17  ;;  %v17542_v62 = vpop.eup %12508  ;;  %v9162_v40 = vsel %vm7377_vm7, %v17535_v17, 0.0  ;;  %v7973_v18 = vsel %vm7377_vm7, %v17529_v57, -inf }
 0x588   : > { %20321 = vst [vmem:[#allocation157_spill] sm:$0xff] %v17542_v62  ;;  %v17548_v44 = vpop.eup %12510  ;;  %v9163_v47 = vrot.slane %v9162_v40, 4  ;;  %v9169_v10 = vsel %vm7377_vm7, %v17542_v62, 0.0  ;;  %v7941_v45 = vrot.slane %v7940_v7, 2  ;;  %v7947_v26 = vmax.f32 %v7945_v15, %v7946_v38 }
 0x589   : > { %20322 = vst [vmem:[#allocation158_spill] sm:$0xff] %v17548_v44  ;;  %v17552_v35 = vpop.eup %12512  ;;  %v9170_v53 = vrot.slane %v9169_v10, 4  ;;  %v9176_v16 = vsel %vm7377_vm7, %v17548_v44, 0.0  ;;  %v7961_v17 = vmax.f32 %v7959_v54, %v7960_v29 }
 0x58a   : > { %20323 = vst [vmem:[#allocation159_spill] sm:$0xff] %v17552_v35  ;;  %v17558_v22 = vpop.eup %12514  ;;  %v9164_v4 = vadd.f32 %v9163_v47, %v9162_v40  ;;  %v9177_v39 = vrot.slane %v9176_v16, 4  ;;  %v9183_v55 = vsel %vm7377_vm7, %v17552_v35, 0.0  ;;  %v7942_v33 = vmax.f32 %v7940_v7, %v7941_v45 }
 0x58b   : > { %20324 = vst [vmem:[#allocation160_spill] sm:$0xff] %v17558_v22  ;;  %v17562_v50 = vpop.eup %12516  ;;  %v17564_v15 = vadd.f32 %v9170_v53, %v9169_v10  ;;  %v9184_v38 = vrot.slane %v9183_v55, 4  ;;  %v9190_v63 = vsel %vm7377_vm7, %v17558_v22, 0.0  ;;  %v7948_v24 = vrot.slane %v7947_v26, 2 }
 0x58c   : > { %20325 = vst [vmem:[#allocation161_spill] sm:$0xff] %v17562_v50  ;;  %v17568_v36 = vpop.eup %12518  ;;  %v9165_v61 = vrot.slane %v9164_v4, 2  ;;  %v9178_v44 = vadd.f32 %v9177_v39, %v9176_v16  ;;  %v9191_v62 = vrot.slane %v9190_v63, 4  ;;  %v9197_v40 = vsel %vm7377_vm7, %v17562_v50, 0.0 }
 0x58d   : > { %20326 = vst [vmem:[#allocation162_spill] sm:$0xff] %v17564_v15  ;;  %20327 = vst [vmem:[#allocation163_spill] sm:$0xff] %v17568_v36  ;;  %v17572_v47 = vadd.f32 %v9184_v38, %v9183_v55  ;;  %v9198_v7 = vrot.slane %v9197_v40, 4  ;;  %v9204_v10 = vsel %vm7377_vm7, %v17568_v36, 0.0  ;;  %v7968_v45 = vmax.f32 %v7966_v43, %v7967_v46 }
 0x58e   : > { %v9179_v53 = vrot.slane %v9178_v44, 2  ;;  %v17576_v35 = vadd.f32 %v9191_v62, %v9190_v63  ;;  %v7955_v22 = vrot.slane %v7954_v5, 2  ;;  %v9205_v13 = vrot.slane %v9204_v10, 4 }
 0x58f   : > { %20328 = vst [vmem:[#allocation164_spill] sm:$0xff] %v17572_v47  ;;  %v7943_v8 = vrot.slane %v7942_v33, 1  ;;  %v7949_v48 = vmax.f32 %v7947_v26, %v7948_v24  ;;  %v7974_v39 = vrot.slane %v7973_v18, 4  ;;  %v17578_v16 = vpop.eup %12520  ;;  %v17580_v41 = vadd.f32 %v9165_v61, %v9164_v4 }
 0x590   : > { %20329 = vst [vmem:[#allocation165_spill] sm:$0xff] %v17578_v16  ;;  %v17585_v38 = vcombine.high %v17538_v20, %v20169_v30  ;;  %v7070_v63 = vcombine.high %v17491_v23, %v17506_v14  ;;  %v17589_v43 = vadd.f32 %v9179_v53, %v9178_v44  ;;  %v17592_v62 = vadd.f32 %v9198_v7, %v9197_v40 }
 0x591   : > { %v7950_v29 = vrot.slane %v7949_v48, 1  ;;  %v9193_v46 = vrot.slane %v17576_v35, 2  ;;  %v7944_v61 = vmax.f32 %v7942_v33, %v7943_v8  ;;  %v7956_v4 = vmax.f32 %v7954_v5, %v7955_v22 }
 0x592   : > { %20330 = vst [vmem:[#allocation166_spill] sm:$0xff] %v17589_v43  ;;  %20331 = vst [vmem:[#allocation167_spill] sm:$0xff] %v17592_v62  ;;  %v7962_v26 = vrot.slane %v7961_v17, 2  ;;  %v17595_v24 = vadd.f32 %v9205_v13, %v9204_v10  ;;  %v17599_v55 = vsel %vm7377_vm7, %v17578_v16, 0.0  ;;  %v7969_v36 = vrot.slane %v7968_v45, 2 }
 0x593   : > { %v7975_v50 = vmax.f32 %v7973_v18, %v7974_v39  ;;  %v7951_v44 = vmax.f32 %v7949_v48, %v7950_v29  ;;  %v7957_v53 = vrot.slane %v7956_v4, 1  ;;  %v7980_v40 = vsel %vm7377_vm7, %v17538_v20, -inf }
 0x594   : > { %v7963_v43 = vmax.f32 %v7961_v17, %v7962_v26  ;;  %v7970_v54 = vmax.f32 %v7968_v45, %v7969_v36  ;;  %v7981_v22 = vrot.slane %v7980_v40, 4  ;;  %v7987_v5 = vsel %vm7377_vm7, %v17585_v38, -inf }
 0x595   : > { %v7976_v8 = vrot.slane %v7975_v50, 2  ;;  %v7958_v33 = vmax.f32 %v7956_v4, %v7957_v53  ;;  %v8354_v10 = vsub.f32 %v17494_v37, %v7944_v61  ;;  %v7988_v39 = vrot.slane %v7987_v5, 4 }
 0x596   : > { %v7964_v13 = vrot.slane %v7963_v43, 1  ;;  %v7971_v16 = vrot.slane %v7970_v54, 1  ;;  %v7982_v48 = vmax.f32 %v7980_v40, %v7981_v22  ;;  %v8355_v29 = vsub.f32 %v17512_v9, %v7951_v44 }
 0x597   : > { %v7977_v18 = vmax.f32 %v7975_v50, %v7976_v8  ;;  %v8356_v26 = vsub.f32 %v17497_v51, %v7958_v33  ;;  %v8562_v7 = vmul.f32 1.442695, %v8354_v10  ;;  %v7989_v4 = vmax.f32 %v7987_v5, %v7988_v39 }
 0x598   : > { %v7965_v17 = vmax.f32 %v7963_v43, %v7964_v13  ;;  %v7972_v36 = vmax.f32 %v7970_v54, %v7971_v16  ;;  %v7983_v62 = vrot.slane %v7982_v48, 2  ;;  %v8564_v47 = vmul.f32 1.442695, %v8355_v29 }
 0x599   : > { %v7978_v45 = vrot.slane %v7977_v18, 1  ;;  %12522 = vpow2.f32 %v8562_v7  ;;  %v8566_v15 = vmul.f32 1.442695, %v8356_v26  ;;  %v7990_v50 = vrot.slane %v7989_v4, 2 }
 0x59a   : > { %v8357_v53 = vsub.f32 %v17516_v3, %v7965_v17  ;;  %v7984_v61 = vmax.f32 %v7982_v48, %v7983_v62  ;;  %v8358_v40 = vsub.f32 %v17500_v58, %v7972_v36  ;;  %12524 = vpow2.f32 %v8564_v47 }
 0x59b   : > { %v7979_v37 = vmax.f32 %v7977_v18, %v7978_v45  ;;  %v20332_v51 = vcombine.low %v17491_v23, %v17506_v14  ;;  %v17618_v16 = vrot.slane %v7070_v63, %v16197_v25  ;;  %v7991_v54 = vmax.f32 %v7989_v4, %v7990_v50 }
 0x59c   : > { %v8568_v43 = vmul.f32 1.442695, %v8357_v53  ;;  %v7985_v3 = vrot.slane %v7984_v61, 1  ;;  %12526 = vpow2.f32 %v8566_v15  ;;  %v9212_v62 = vrot.slane %v17599_v55, 4 }
 0x59d   : > { %v17615_v9 = vrot.slane %v20332_v51, %v16197_v25  ;;  %v8359_v44 = vsub.f32 %v17529_v57, %v7979_v37  ;;  %v8570_v58 = vmul.f32 1.442695, %v8358_v40  ;;  %v7085_v47 = vcombine.low %v17503_v0, %v17525_v32 }
 0x59e   : > { %12528 = vpow2.f32 %v8568_v43  ;;  %v7986_v7 = vmax.f32 %v7984_v61, %v7985_v3  ;;  %v7992_v8 = vrot.slane %v7991_v54, 1  ;;  %v17629_v63 = vadd.f32 %v9193_v46, %v17576_v35 }
 0x59f   : > { %v8572_v23 = vmul.f32 1.442695, %v8359_v44  ;;  %v17626_v14 = vcombine.high %v17615_v9, %v20169_v30  ;;  %12530 = vpow2.f32 %v8570_v58  ;;  %v17632_v57 = vrot.slane %v7085_v47, %v16197_v25 }
 0x5a0   : > { %20333 = vst [vmem:[#allocation168_spill] sm:$0xff] %v17629_v63  ;;  %v17636_v15 = vcombine.high %v17618_v16, %v20169_v30  ;;  %v7993_v22 = vmax.f32 %v7991_v54, %v7992_v8  ;;  %v8360_v33 = vsub.f32 %v17538_v20, %v7986_v7  ;;  %v7086_v13 = vcombine.high %v17503_v0, %v17525_v32 }
 0x5a1   : > { %v7994_v5 = vsel %vm7377_vm7, %v17615_v9, -inf  ;;  %12532 = vpow2.f32 %v8572_v23  ;;  %v17645_v35 = vcombine.high %v17632_v57, %v20169_v30  ;;  %v8001_v10 = vsel %vm7377_vm7, %v17626_v14, -inf }
 0x5a2   : > { %v7995_v46 = vrot.slane %v7994_v5, 4  ;;  %v8361_v18 = vsub.f32 %v17585_v38, %v7993_v22  ;;  %v8574_v48 = vmul.f32 1.442695, %v8360_v33  ;;  %v8002_v39 = vrot.slane %v8001_v10, 4 }
 0x5a3   : > { %v8008_v20 = vsel %vm7377_vm7, %v17618_v16, -inf  ;;  %v8015_v17 = vsel %vm7377_vm7, %v17636_v15, -inf  ;;  %v8022_v29 = vsel %vm7377_vm7, %v17632_v57, -inf  ;;  %v8029_v37 = vsel %vm7377_vm7, %v17645_v35, -inf }
 0x5a4   : > { %v7996_v0 = vmax.f32 %v7994_v5, %v7995_v46  ;;  %v8009_v32 = vrot.slane %v8008_v20, 4  ;;  %12534 = vpow2.f32 %v8574_v48  ;;  %v8576_v26 = vmul.f32 1.442695, %v8361_v18 }
 0x5a5   : > { %v8003_v36 = vmax.f32 %v8001_v10, %v8002_v39  ;;  %v8016_v45 = vrot.slane %v8015_v17, 4  ;;  %v8023_v38 = vrot.slane %v8022_v29, 4  ;;  %v9207_v50 = vrot.slane %v17595_v24, 2 }
 0x5a6   : > { %v7997_v4 = vrot.slane %v7996_v0, 2  ;;  %v8010_v53 = vmax.f32 %v8008_v20, %v8009_v32  ;;  %v17658_v61 = vpop.eup %12522  ;;  %12536 = vpow2.f32 %v8576_v26  ;;  %v17666_v47 = vadd.f32 %v9212_v62, %v17599_v55 }
 0x5a7   : > { %20334 = vst [vmem:[#allocation169_spill] sm:$0xff] %v17658_v61  ;;  %v8004_v40 = vrot.slane %v8003_v36, 2  ;;  %v8017_v43 = vmax.f32 %v8015_v17, %v8016_v45  ;;  %v9218_v51 = vsel %vm7377_vm7, %v17658_v61, 0.0  ;;  %v8024_v44 = vmax.f32 %v8022_v29, %v8023_v38  ;;  %v17663_v58 = vpop.eup %12524  ;;  %v17706_v61 = vpop.permute.xlu1 %6171 }
 0x5a8   : > { %v7998_v3 = vmax.f32 %v7996_v0, %v7997_v4  ;;  %v8011_v54 = vrot.slane %v8010_v53, 2  ;;  %20335 = vst [vmem:[#allocation170_spill] sm:$0xff] %v17663_v58  ;;  %20336 = vst [vmem:[#allocation171_spill] sm:$0xff] %v17666_v47  ;;  %v9219_v7 = vrot.slane %v9218_v51, 4  ;;  %v8030_v23 = vrot.slane %v8029_v37, 4 }
 0x5a9   : > { %v8005_v8 = vmax.f32 %v8003_v36, %v8004_v40  ;;  %v17668_v22 = vpop.eup %12526  ;;  %v9225_v33 = vsel %vm7377_vm7, %v17663_v58, 0.0  ;;  %v17673_v5 = vrot.slane %v7086_v13, %v16197_v25  ;;  %v8018_v10 = vrot.slane %v8017_v43, 2 }
 0x5aa   : > { %20337 = vst [vmem:[#allocation172_spill] sm:$0xff] %v17668_v22  ;;  %v8012_v46 = vmax.f32 %v8010_v53, %v8011_v54  ;;  %v9220_v48 = vadd.f32 %v9219_v7, %v9218_v51  ;;  %v9226_v39 = vrot.slane %v9225_v33, 4  ;;  %v9232_v55 = vsel %vm7377_vm7, %v17668_v22, 0.0 }
 0x5ab   : > { %v17675_v18 = vpop.eup %12528  ;;  %v7999_v62 = vrot.slane %v7998_v3, 1  ;;  %v9233_v20 = vrot.slane %v9232_v55, 4  ;;  %v8006_v32 = vrot.slane %v8005_v8, 1  ;;  %v8025_v17 = vrot.slane %v8024_v44, 2 }
 0x5ac   : > { %20338 = vst [vmem:[#allocation173_spill] sm:$0xff] %v17675_v18  ;;  %v9239_v0 = vsel %vm7377_vm7, %v17675_v18, 0.0  ;;  %v17681_v29 = vpop.eup %12530  ;;  %v9221_v13 = vrot.slane %v9220_v48, 2  ;;  %v8013_v36 = vrot.slane %v8012_v46, 1  ;;  %v8031_v45 = vmax.f32 %v8029_v37, %v8030_v23 }
 0x5ad   : > { %20339 = vst [vmem:[#allocation174_spill] sm:$0xff] %v17681_v29  ;;  %v9240_v26 = vrot.slane %v9239_v0, 4  ;;  %v17684_v4 = vadd.f32 %v9207_v50, %v17595_v24  ;;  %v17686_v53 = vadd.f32 %v9226_v39, %v9225_v33  ;;  %v9246_v38 = vsel %vm7377_vm7, %v17681_v29, 0.0 }
 0x5ae   : > { %v8019_v40 = vmax.f32 %v8017_v43, %v8018_v10  ;;  %v17690_v51 = vpop.eup %12532  ;;  %v9234_v7 = vadd.f32 %v9233_v20, %v9232_v55  ;;  %v9247_v18 = vrot.slane %v9246_v38, 4  ;;  %v17695_v22 = vcombine.high %v17673_v5, %v20169_v30 }
 0x5af   : > { %20340 = vst [vmem:[#allocation175_spill] sm:$0xff] %v17684_v4  ;;  %20341 = vst [vmem:[#allocation176_spill] sm:$0xff] %v17686_v53  ;;  %v17697_v37 = vadd.f32 %v9240_v26, %v9239_v0  ;;  %v8000_v24 = vmax.f32 %v7998_v3, %v7999_v62  ;;  %v8007_v50 = vmax.f32 %v8005_v8, %v8006_v32  ;;  %v8032_v43 = vrot.slane %v8031_v45, 2  ;;  %v6266_v53 = vpop.permute.xlu0 %6265 }
 0x5b0   : > { %20342 = vst [vmem:[#allocation177_spill] sm:$0xff] %v17690_v51  ;;  %v8026_v23 = vmax.f32 %v8024_v44, %v8025_v17  ;;  %v17699_v33 = vadd.f32 %v9221_v13, %v9220_v48  ;;  %v8014_v39 = vmax.f32 %v8012_v46, %v8013_v36  ;;  %v8020_v29 = vrot.slane %v8019_v40, 1 }
 0x5b1   : > { %20343 = vst [vmem:[#allocation178_spill] sm:$0xff] %v17697_v37  ;;  %v17701_v10 = vpop.eup %12534  ;;  %v9248_v55 = vadd.f32 %v9247_v18, %v9246_v38  ;;  %v8036_v58 = vsel %vm7377_vm7, %v17673_v5, -inf  ;;  %v9235_v0 = vrot.slane %v9234_v7, 2  ;;  %v9253_v3 = vsel %vm7377_vm7, %v17690_v51, 0.0 }
 0x5b2   : > { %20344 = vst [vmem:[#allocation179_spill] sm:$0xff] %v17699_v33  ;;  %20345 = vst [vmem:[#allocation180_spill] sm:$0xff] %v17701_v10  ;;  %v8027_v20 = vrot.slane %v8026_v23, 1  ;;  %v9260_v44 = vsel %vm7377_vm7, %v17701_v10, 0.0  ;;  %v8033_v8 = vmax.f32 %v8031_v45, %v8032_v43  ;;  %v8037_v18 = vrot.slane %v8036_v58, 4 }
 0x5b3   : > { %v17712_v46 = vpop.eup %12536  ;;  %v9261_v62 = vrot.slane %v9260_v44, 4  ;;  %v8043_v32 = vsel %vm7377_vm7, %v17695_v22, -inf  ;;  %v8021_v13 = vmax.f32 %v8019_v40, %v8020_v29  ;;  %v9249_v38 = vrot.slane %v9248_v55, 2 }
 0x5b4   : > { %20346 = vst [vmem:[#allocation181_spill] sm:$0xff] %v17712_v46  ;;  %v9267_v17 = vsel %vm7377_vm7, %v17712_v46, 0.0  ;;  %v8028_v26 = vmax.f32 %v8026_v23, %v8027_v20  ;;  %v8034_v36 = vrot.slane %v8033_v8, 1  ;;  %v9254_v54 = vrot.slane %v9253_v3, 4  ;;  %v6220_v46 = vpop.permute.xlu1 %6219 }
 0x5b5   : > { %v8038_v51 = vmax.f32 %v8036_v58, %v8037_v18  ;;  %v8044_v10 = vrot.slane %v8043_v32, 4  ;;  %v8362_v43 = vsub.f32 %v17615_v9, %v8000_v24  ;;  %v8363_v48 = vsub.f32 %v17626_v14, %v8007_v50 }
 0x5b6   : > { %v8035_v45 = vmax.f32 %v8033_v8, %v8034_v36  ;;  %v8364_v37 = vsub.f32 %v17618_v16, %v8014_v39  ;;  %v9262_v33 = vadd.f32 %v9261_v62, %v9260_v44  ;;  %v9268_v47 = vrot.slane %v9267_v17, 4 }
 0x5b7   : > { %v8039_v4 = vrot.slane %v8038_v51, 2  ;;  %v8045_v63 = vmax.f32 %v8043_v32, %v8044_v10  ;;  %v8365_v29 = vsub.f32 %v17636_v15, %v8021_v13  ;;  %v8366_v40 = vsub.f32 %v17632_v57, %v8028_v26  ;;  %v20353_v32 = vld [vmem:[#allocation18_spill] sm:$0xff] }
 0x5b8   : > { %v8367_v58 = vsub.f32 %v17645_v35, %v8035_v45  ;;  %v8578_v23 = vmul.f32 1.442695, %v8362_v43  ;;  %v17725_v20 = vadd.f32 %v9235_v0, %v9234_v7  ;;  %v17727_v9 = vadd.f32 %v9254_v54, %v9253_v3  ;;  %v17733_v7 = vpop.permute.xlu0 %6173 }
 0x5b9   : > { %v8040_v14 = vmax.f32 %v8038_v51, %v8039_v4  ;;  %v8046_v24 = vrot.slane %v8045_v63, 2  ;;  %v8580_v16 = vmul.f32 1.442695, %v8363_v48  ;;  %v8582_v50 = vmul.f32 1.442695, %v8364_v37  ;;  %v6268_v37 = vpop.permute.xlu1 %6267 }
 0x5ba   : > { %20347 = vst [vmem:[#allocation182_spill] sm:$0xff] %v17725_v20  ;;  %20348 = vst [vmem:[#allocation183_spill] sm:$0xff] %v17727_v9  ;;  %12538 = vpow2.f32 %v8578_v23  ;;  %v8584_v39 = vmul.f32 1.442695, %v8365_v29  ;;  %v17729_v44 = vadd.f32 %v9249_v38, %v9248_v55  ;;  %v8586_v15 = vmul.f32 1.442695, %v8366_v40 }
 0x5bb   : > { %v8041_v10 = vrot.slane %v8040_v14, 1  ;;  %v8047_v8 = vmax.f32 %v8045_v63, %v8046_v24  ;;  %v9263_v62 = vrot.slane %v9262_v33, 2  ;;  %v17731_v57 = vadd.f32 %v9268_v47, %v9267_v17 }
 0x5bc   : > { %20349 = vst [vmem:[#allocation184_spill] sm:$0xff] %v17729_v44  ;;  %12540 = vpow2.f32 %v8580_v16  ;;  %v8588_v35 = vmul.f32 1.442695, %v8367_v58  ;;  %v20351_v4 = vcombine.low %v16152_v34, %v17484_v19  ;;  %v20352_v63 = vcombine.high %v16152_v34, %v17484_v19  ;;  %v17753_v40 = vpop.permute.xlu0 %6221 }
 0x5bd   : > { %20350 = vst [vmem:[#allocation185_spill] sm:$0xff] %v17731_v57  ;;  %v8042_v54 = vmax.f32 %v8040_v14, %v8041_v10  ;;  %v8048_v0 = vrot.slane %v8047_v8, 1  ;;  %12542 = vpow2.f32 %v8582_v50  ;;  %v7121_v55 = vcombine.low %v17466_v49, %v6266_v53 }
 0x5be   : > { %v7113_v51 = vrot.slane %v20351_v4, %v16190_v2  ;;  %12544 = vpow2.f32 %v8584_v39  ;;  %v7120_v47 = vrot.slane %v20352_v63, %v16190_v2  ;;  %v7122_v3 = vcombine.high %v17466_v49, %v6266_v53 }
 0x5bf   : > { %v8049_v48 = vmax.f32 %v8047_v8, %v8048_v0  ;;  %v8368_v18 = vsub.f32 %v17673_v5, %v8042_v54  ;;  %12546 = vpow2.f32 %v8586_v15  ;;  %v7173_v17 = vcombine.low %v20353_v32, %v6220_v46 }
 0x5c0   : > { %12548 = vpow2.f32 %v8588_v35  ;;  %v7129_v13 = vrot.slane %v7121_v55, %v16190_v2  ;;  %v7136_v26 = vrot.slane %v7122_v3, %v16190_v2  ;;  %v7189_v36 = vcombine.low %v17706_v61, %v6268_v37 }
 0x5c1   : > { %v8369_v19 = vsub.f32 %v17695_v22, %v8049_v48  ;;  %v8590_v38 = vmul.f32 1.442695, %v8368_v18  ;;  %v7174_v45 = vcombine.high %v20353_v32, %v6220_v46  ;;  %v7190_v49 = vcombine.high %v17706_v61, %v6268_v37 }
 0x5c2   : > { %v7137_v53 = vcombine.low %v7113_v51, %v7129_v13  ;;  %v7138_v43 = vcombine.high %v7113_v51, %v7129_v13  ;;  %v7153_v5 = vcombine.low %v7120_v47, %v7136_v26  ;;  %v7154_v29 = vcombine.high %v7120_v47, %v7136_v26 }
 0x5c3   : > { %12550 = vpow2.f32 %v8590_v38  ;;  %v8592_v23 = vmul.f32 1.442695, %v8369_v19  ;;  %v17757_v14 = vrot.slane %v7189_v36, %v16190_v2  ;;  %v17759_v24 = vadd.f32 %v9263_v62, %v9262_v33  ;;  %v20355_v33 = vld [vmem:[#allocation10_spill] sm:$0xff] }
 0x5c4   : > { %v17763_v46 = vrot.slane %v7137_v53, %v16197_v25  ;;  %v17766_v61 = vrot.slane %v7138_v43, %v16197_v25  ;;  %v17769_v16 = vrot.slane %v7173_v17, %v16190_v2  ;;  %v17772_v50 = vrot.slane %v7174_v45, %v16190_v2 }
 0x5c5   : > { %20354 = vst [vmem:[#allocation186_spill] sm:$0xff] %v17759_v24  ;;  %v17775_v39 = vrot.slane %v7190_v49, %v16190_v2  ;;  %12552 = vpow2.f32 %v8592_v23  ;;  %v17780_v8 = vrot.slane %v7153_v5, %v16197_v25  ;;  %v17783_v15 = vrot.slane %v7154_v29, %v16197_v25 }
 0x5c6   : > { %v17787_v62 = vcombine.high %v17763_v46, %v20169_v30  ;;  %v17793_v54 = vcombine.high %v17766_v61, %v20169_v30  ;;  %v8050_v0 = vsel %vm7377_vm7, %v17763_v46, -inf  ;;  %v8064_v4 = vsel %vm7377_vm7, %v17766_v61, -inf }
 0x5c7   : > { %v17789_v35 = vpop.eup %12538  ;;  %v8051_v63 = vrot.slane %v8050_v0, 4  ;;  %v8065_v55 = vrot.slane %v8064_v4, 4  ;;  %v8078_v45 = vsel %vm7377_vm7, %v17780_v8, -inf }
 0x5c8   : > { %20356 = vst [vmem:[#allocation187_spill] sm:$0xff] %v17789_v35  ;;  %v9274_v37 = vsel %vm7377_vm7, %v17789_v35, 0.0  ;;  %v8057_v47 = vsel %vm7377_vm7, %v17787_v62, -inf  ;;  %v8071_v29 = vsel %vm7377_vm7, %v17793_v54, -inf }
 0x5c9   : > { %v17805_v3 = vpop.eup %12540  ;;  %v9275_v48 = vrot.slane %v9274_v37, 4  ;;  %v8058_v18 = vrot.slane %v8057_v47, 4  ;;  %v8052_v19 = vmax.f32 %v8050_v0, %v8051_v63  ;;  %v8066_v38 = vmax.f32 %v8064_v4, %v8065_v55 }
 0x5ca   : > { %20357 = vst [vmem:[#allocation188_spill] sm:$0xff] %v17805_v3  ;;  %v17811_v26 = vpop.eup %12542  ;;  %v9281_v36 = vsel %vm7377_vm7, %v17805_v3, 0.0 }
 0x5cb   : > { %20358 = vst [vmem:[#allocation189_spill] sm:$0xff] %v17811_v26  ;;  %v17817_v49 = vpop.eup %12544  ;;  %v9276_v53 = vadd.f32 %v9275_v48, %v9274_v37  ;;  %v9282_v43 = vrot.slane %v9281_v36, 4  ;;  %v9288_v5 = vsel %vm7377_vm7, %v17811_v26, 0.0  ;;  %v8053_v4 = vrot.slane %v8052_v19, 2 }
 0x5cc   : > { %20359 = vst [vmem:[#allocation190_spill] sm:$0xff] %v17817_v49  ;;  %v17823_v23 = vpop.eup %12546  ;;  %v9289_v22 = vrot.slane %v9288_v5, 4  ;;  %v9295_v0 = vsel %vm7377_vm7, %v17817_v49, 0.0  ;;  %v8059_v63 = vmax.f32 %v8057_v47, %v8058_v18  ;;  %v8067_v48 = vrot.slane %v8066_v38, 2 }
 0x5cd   : > { %20360 = vst [vmem:[#allocation191_spill] sm:$0xff] %v17823_v23  ;;  %v17827_v55 = vpop.eup %12548  ;;  %v9277_v58 = vrot.slane %v9276_v53, 2  ;;  %v9296_v10 = vrot.slane %v9295_v0, 4  ;;  %v9302_v37 = vsel %vm7377_vm7, %v17823_v23, 0.0  ;;  %v8054_v32 = vmax.f32 %v8052_v19, %v8053_v4 }
 0x5ce   : > { %20361 = vst [vmem:[#allocation192_spill] sm:$0xff] %v17827_v55  ;;  %v9290_v13 = vadd.f32 %v9289_v22, %v9288_v5  ;;  %v9303_v17 = vrot.slane %v9302_v37, 4  ;;  %v9309_v51 = vsel %vm7377_vm7, %v17827_v55, 0.0  ;;  %v17833_v34 = vadd.f32 %v9282_v43, %v9281_v36 }
 0x5cf   : > { %v17835_v26 = vadd.f32 %v9296_v10, %v9295_v0  ;;  %v9310_v49 = vrot.slane %v9309_v51, 4  ;;  %v17839_v47 = vcombine.high %v17780_v8, %v20169_v30  ;;  %v8060_v22 = vrot.slane %v8059_v63, 2 }
 0x5d0   : > { %20362 = vst [vmem:[#allocation193_spill] sm:$0xff] %v17833_v34  ;;  %v17841_v18 = vpop.eup %12550  ;;  %v9291_v3 = vrot.slane %v9290_v13, 2  ;;  %v17843_v23 = vadd.f32 %v9303_v17, %v9302_v37  ;;  %v8072_v5 = vrot.slane %v8071_v29, 4  ;;  %v8055_v19 = vrot.slane %v8054_v32, 1 }
 0x5d1   : > { %20363 = vst [vmem:[#allocation194_spill] sm:$0xff] %v17835_v26  ;;  %20364 = vst [vmem:[#allocation195_spill] sm:$0xff] %v17841_v18  ;;  %v9316_v55 = vsel %vm7377_vm7, %v17841_v18, 0.0  ;;  %v8068_v36 = vmax.f32 %v8066_v38, %v8067_v48  ;;  %v8079_v43 = vrot.slane %v8078_v45, 4  ;;  %v17847_v10 = vadd.f32 %v9277_v58, %v9276_v53 }
 0x5d2   : > { %v17849_v0 = vadd.f32 %v9310_v49, %v9309_v51  ;;  %v17853_v4 = vcombine.high %v17783_v15, %v20169_v30  ;;  %v8092_v17 = vsel %vm7377_vm7, %v17783_v15, -inf  ;;  %v17857_v37 = vpop.eup %12552  ;;  %v8061_v24 = vmax.f32 %v8059_v63, %v8060_v22 }
 0x5d3   : > { %20365 = vst [vmem:[#allocation196_spill] sm:$0xff] %v17847_v10  ;;  %20367 = vst [vmem:[#allocation198_spill] sm:$0xff] %v17857_v37  ;;  %v8069_v38 = vrot.slane %v8068_v36, 1  ;;  %v17861_v48 = vadd.f32 %v9291_v3, %v9290_v13  ;;  %v9317_v51 = vrot.slane %v9316_v55, 4  ;;  %v8073_v49 = vmax.f32 %v8071_v29, %v8072_v5 }
 0x5d4   : > { %20366 = vst [vmem:[#allocation197_spill] sm:$0xff] %v17849_v0  ;;  %v8056_v53 = vmax.f32 %v8054_v32, %v8055_v19  ;;  %v8062_v10 = vrot.slane %v8061_v24, 1  ;;  %v8080_v57 = vmax.f32 %v8078_v45, %v8079_v43  ;;  %v8085_v9 = vsel %vm7377_vm7, %v17839_v47, -inf }
 0x5d5   : > { %20368 = vst [vmem:[#allocation199_spill] sm:$0xff] %v17861_v48  ;;  %v8070_v20 = vmax.f32 %v8068_v36, %v8069_v38  ;;  %v8074_v35 = vrot.slane %v8073_v49, 2  ;;  %v8086_v34 = vrot.slane %v8085_v9, 4  ;;  %v8093_v22 = vrot.slane %v8092_v17, 4 }
 0x5d6   : > { %v8063_v18 = vmax.f32 %v8061_v24, %v8062_v10  ;;  %v8081_v63 = vrot.slane %v8080_v57, 2  ;;  %v8099_v3 = vsel %vm7377_vm7, %v17853_v4, -inf  ;;  %v17869_v13 = vadd.f32 %v9317_v51, %v9316_v55 }
 0x5d7   : > { %v17873_v32 = vsel %vm7377_vm7, %v17857_v37, 0.0  ;;  %v8075_v45 = vmax.f32 %v8073_v49, %v8074_v35  ;;  %v8087_v29 = vmax.f32 %v8085_v9, %v8086_v34  ;;  %v8094_v19 = vmax.f32 %v8092_v17, %v8093_v22 }
 0x5d8   : > { %v8082_v5 = vmax.f32 %v8080_v57, %v8081_v63  ;;  %v8100_v43 = vrot.slane %v8099_v3, 4  ;;  %v8370_v36 = vsub.f32 %v17763_v46, %v8056_v53  ;;  %v8371_v10 = vsub.f32 %v17787_v62, %v8063_v18 }
 0x5d9   : > { %v8076_v38 = vrot.slane %v8075_v45, 1  ;;  %v8088_v24 = vrot.slane %v8087_v29, 2  ;;  %v8372_v44 = vsub.f32 %v17766_v61, %v8070_v20  ;;  %v8095_v55 = vrot.slane %v8094_v19, 2 }
 0x5da   : > { %v8083_v58 = vrot.slane %v8082_v5, 1  ;;  %v8101_v51 = vmax.f32 %v8099_v3, %v8100_v43  ;;  %v8594_v0 = vmul.f32 1.442695, %v8370_v36  ;;  %v8596_v48 = vmul.f32 1.442695, %v8371_v10 }
 0x5db   : > { %v8077_v26 = vmax.f32 %v8075_v45, %v8076_v38  ;;  %v8089_v37 = vmax.f32 %v8087_v29, %v8088_v24  ;;  %v8598_v35 = vmul.f32 1.442695, %v8372_v44  ;;  %v8096_v9 = vmax.f32 %v8094_v19, %v8095_v55 }
 0x5dc   : > { %v8084_v34 = vmax.f32 %v8082_v5, %v8083_v58  ;;  %v8102_v57 = vrot.slane %v8101_v51, 2  ;;  %12554 = vpow2.f32 %v8594_v0  ;;  %v20369_v20 = vcombine.low %v17769_v16, %v17757_v14 }
 0x5dd   : > { %v8090_v17 = vrot.slane %v8089_v37, 1  ;;  %v8373_v46 = vsub.f32 %v17793_v54, %v8077_v26  ;;  %12556 = vpow2.f32 %v8596_v48  ;;  %v8097_v62 = vrot.slane %v8096_v9, 1 }
 0x5de   : > { %v17883_v61 = vrot.slane %v20369_v20, %v16197_v25  ;;  %v8103_v18 = vmax.f32 %v8101_v51, %v8102_v57  ;;  %v8374_v49 = vsub.f32 %v17780_v8, %v8084_v34  ;;  %12558 = vpow2.f32 %v8598_v35 }
 0x5df   : > { %v9324_v44 = vrot.slane %v17873_v32, 4  ;;  %v8091_v58 = vmax.f32 %v8089_v37, %v8090_v17  ;;  %v8600_v53 = vmul.f32 1.442695, %v8373_v46  ;;  %v20370_v54 = vcombine.high %v17769_v16, %v17757_v14 }
 0x5e0   : > { %v8098_v0 = vmax.f32 %v8096_v9, %v8097_v62  ;;  %v8104_v48 = vrot.slane %v8103_v18, 1  ;;  %v8602_v63 = vmul.f32 1.442695, %v8374_v49  ;;  %v20371_v22 = vcombine.low %v17772_v50, %v17775_v39 }
 0x5e1   : > { %v17891_v26 = vrot.slane %v20370_v54, %v16197_v25  ;;  %v9319_v8 = vrot.slane %v17869_v13, 2  ;;  %v8375_v37 = vsub.f32 %v17839_v47, %v8091_v58  ;;  %12560 = vpow2.f32 %v8600_v53 }
 0x5e2   : > { %v17897_v3 = vrot.slane %v20371_v22, %v16197_v25  ;;  %v17903_v45 = vcombine.high %v17883_v61, %v20169_v30  ;;  %v8105_v14 = vmax.f32 %v8103_v18, %v8104_v48  ;;  %v8376_v16 = vsub.f32 %v17783_v15, %v8098_v0 }
 0x5e3   : > { %12562 = vpow2.f32 %v8602_v63  ;;  %v17908_v29 = vcombine.high %v17891_v26, %v20169_v30  ;;  %v8604_v5 = vmul.f32 1.442695, %v8375_v37  ;;  %v7222_v19 = vcombine.high %v17772_v50, %v17775_v39 }
 0x5e4   : > { %v17914_v47 = vcombine.high %v17897_v3, %v20169_v30  ;;  %v8106_v43 = vsel %vm7377_vm7, %v17883_v61, -inf  ;;  %v8377_v36 = vsub.f32 %v17853_v4, %v8105_v14  ;;  %v8606_v38 = vmul.f32 1.442695, %v8376_v16 }
 0x5e5   : > { %v8107_v15 = vrot.slane %v8106_v43, 4  ;;  %v8113_v24 = vsel %vm7377_vm7, %v17903_v45, -inf  ;;  %12564 = vpow2.f32 %v8604_v5  ;;  %v8120_v55 = vsel %vm7377_vm7, %v17891_v26, -inf }
 0x5e6   : > { %v8114_v10 = vrot.slane %v8113_v24, 4  ;;  %v8127_v50 = vsel %vm7377_vm7, %v17908_v29, -inf  ;;  %12566 = vpow2.f32 %v8606_v38  ;;  %v8608_v39 = vmul.f32 1.442695, %v8377_v36 }
 0x5e7   : > { %v8108_v51 = vmax.f32 %v8106_v43, %v8107_v15  ;;  %v8121_v35 = vrot.slane %v8120_v55, 4  ;;  %v17926_v34 = vadd.f32 %v9324_v44, %v17873_v32  ;;  %v8128_v9 = vrot.slane %v8127_v50, 4 }
 0x5e8   : > { %v8115_v4 = vmax.f32 %v8113_v24, %v8114_v10  ;;  %v8134_v57 = vsel %vm7377_vm7, %v17897_v3, -inf  ;;  %v17931_v17 = vrot.slane %v7222_v19, %v16197_v25  ;;  %12568 = vpow2.f32 %v8608_v39 }
 0x5e9   : > { %20372 = vst [vmem:[#allocation200_spill] sm:$0xff] %v17926_v34  ;;  %v8109_v46 = vrot.slane %v8108_v51, 2  ;;  %v8122_v20 = vmax.f32 %v8120_v55, %v8121_v35  ;;  %v8135_v62 = vrot.slane %v8134_v57, 4  ;;  %v17933_v18 = vpop.eup %12554  ;;  %v8129_v58 = vmax.f32 %v8127_v50, %v8128_v9 }
 0x5ea   : > { %20373 = vst [vmem:[#allocation201_spill] sm:$0xff] %v17933_v18  ;;  %v8116_v49 = vrot.slane %v8115_v4, 2  ;;  %v8141_v32 = vsel %vm7377_vm7, %v17914_v47, -inf  ;;  %v17937_v44 = vpop.eup %12556  ;;  %v9330_v53 = vsel %vm7377_vm7, %v17933_v18, 0.0  ;;  %v20376_v5 = vrot.slane %v17843_v23, 2 }
 0x5eb   : > { %20374 = vst [vmem:[#allocation202_spill] sm:$0xff] %v17937_v44  ;;  %v8110_v54 = vmax.f32 %v8108_v51, %v8109_v46  ;;  %v8123_v0 = vrot.slane %v8122_v20, 2  ;;  %v8136_v48 = vmax.f32 %v8134_v57, %v8135_v62  ;;  %v17941_v63 = vpop.eup %12558  ;;  %v9331_v22 = vrot.slane %v9330_v53, 4 }
 0x5ec   : > { %20375 = vst [vmem:[#allocation203_spill] sm:$0xff] %v17941_v63  ;;  %v9337_v37 = vsel %vm7377_vm7, %v17937_v44, 0.0  ;;  %v8117_v14 = vmax.f32 %v8115_v4, %v8116_v49  ;;  %v8130_v16 = vrot.slane %v8129_v58, 2  ;;  %v17948_v19 = vadd.f32 %v20376_v5, %v17843_v23 }
 0x5ed   : > { %v17951_v43 = vadd.f32 %v9319_v8, %v17869_v13  ;;  %v9338_v36 = vrot.slane %v9337_v37, 4  ;;  %v9344_v38 = vsel %vm7377_vm7, %v17941_v63, 0.0  ;;  %v9332_v24 = vadd.f32 %v9331_v22, %v9330_v53 }
 0x5ee   : > { %20377 = vst [vmem:[#allocation204_spill] sm:$0xff] %v17948_v19  ;;  %v9345_v10 = vrot.slane %v9344_v38, 4  ;;  %v8124_v55 = vmax.f32 %v8122_v20, %v8123_v0  ;;  %v17956_v50 = vpop.eup %12560  ;;  %v8131_v39 = vmax.f32 %v8129_v58, %v8130_v16  ;;  %v8137_v51 = vrot.slane %v8136_v48, 2 }
 0x5ef   : > { %20378 = vst [vmem:[#allocation205_spill] sm:$0xff] %v17951_v43  ;;  %20379 = vst [vmem:[#allocation206_spill] sm:$0xff] %v17956_v50  ;;  %v8142_v35 = vrot.slane %v8141_v32, 4  ;;  %v8148_v23 = vsel %vm7377_vm7, %v17931_v17, -inf  ;;  %v9351_v8 = vsel %vm7377_vm7, %v17956_v50, 0.0  ;;  %v8111_v9 = vrot.slane %v8110_v54, 1 }
 0x5f0   : > { %v17960_v4 = vpop.eup %12562  ;;  %v9346_v13 = vadd.f32 %v9345_v10, %v9344_v38  ;;  %v8118_v57 = vrot.slane %v8117_v14, 1  ;;  %v17964_v46 = vadd.f32 %v9338_v36, %v9337_v37  ;;  %v9352_v62 = vrot.slane %v9351_v8, 4 }
 0x5f1   : > { %20380 = vst [vmem:[#allocation207_spill] sm:$0xff] %v17960_v4  ;;  %v9358_v20 = vsel %vm7377_vm7, %v17960_v4, 0.0  ;;  %v17970_v49 = vcombine.high %v17931_v17, %v20169_v30  ;;  %v9333_v58 = vrot.slane %v9332_v24, 2  ;;  %v8125_v22 = vrot.slane %v8124_v55, 1 }
 0x5f2   : > { %v9347_v53 = vrot.slane %v9346_v13, 2  ;;  %v9359_v0 = vrot.slane %v9358_v20, 4  ;;  %v17972_v16 = vpop.eup %12564  ;;  %v8132_v5 = vrot.slane %v8131_v39, 1  ;;  %v8138_v38 = vmax.f32 %v8136_v48, %v8137_v51 }
 0x5f3   : > { %20381 = vst [vmem:[#allocation208_spill] sm:$0xff] %v17972_v16  ;;  %v8143_v10 = vmax.f32 %v8141_v32, %v8142_v35  ;;  %v8149_v15 = vrot.slane %v8148_v23, 4  ;;  %v17974_v37 = vpop.eup %12566  ;;  %v9365_v4 = vsel %vm7377_vm7, %v17972_v16, 0.0  ;;  %v8112_v50 = vmax.f32 %v8110_v54, %v8111_v9 }
 0x5f4   : > { %20382 = vst [vmem:[#allocation209_spill] sm:$0xff] %v17974_v37  ;;  %v9360_v36 = vadd.f32 %v9359_v0, %v9358_v20  ;;  %v8119_v63 = vmax.f32 %v8117_v14, %v8118_v57  ;;  %v17979_v18 = vadd.f32 %v9352_v62, %v9351_v8  ;;  %v9372_v34 = vsel %vm7377_vm7, %v17974_v37, 0.0 }
 0x5f5   : > { %v8139_v43 = vrot.slane %v8138_v38, 1  ;;  %v9366_v19 = vrot.slane %v9365_v4, 4  ;;  %v8126_v48 = vmax.f32 %v8124_v55, %v8125_v22  ;;  %v8144_v32 = vrot.slane %v8143_v10, 2  ;;  %v17983_v35 = vpop.eup %12568 }
 0x5f6   : > { %v8150_v51 = vmax.f32 %v8148_v23, %v8149_v15  ;;  %20383 = vst [vmem:[#allocation210_spill] sm:$0xff] %v17983_v35  ;;  %v17985_v20 = vadd.f32 %v9333_v58, %v9332_v24  ;;  %v17987_v0 = vadd.f32 %v9347_v53, %v9346_v13  ;;  %v8133_v54 = vmax.f32 %v8131_v39, %v8132_v5 }
 0x5f7   : > { %v8155_v14 = vsel %vm7377_vm7, %v17970_v49, -inf  ;;  %v9361_v8 = vrot.slane %v9360_v36, 2  ;;  %v9373_v9 = vrot.slane %v9372_v34, 4  ;;  %v8140_v57 = vmax.f32 %v8138_v38, %v8139_v43 }
 0x5f8   : > { %v8145_v62 = vmax.f32 %v8143_v10, %v8144_v32  ;;  %v8151_v37 = vrot.slane %v8150_v51, 2  ;;  %v8156_v55 = vrot.slane %v8155_v14, 4  ;;  %v8378_v15 = vsub.f32 %v17883_v61, %v8112_v50 }
 0x5f9   : > { %v17993_v23 = vadd.f32 %v9366_v19, %v9365_v4  ;;  %v17997_v24 = vsel %vm7377_vm7, %v17983_v35, 0.0  ;;  %v8379_v13 = vsub.f32 %v17903_v45, %v8119_v63  ;;  %v8380_v43 = vsub.f32 %v17891_v26, %v8126_v48 }
 0x5fa   : > { %v8146_v39 = vrot.slane %v8145_v62, 1  ;;  %v8152_v58 = vmax.f32 %v8150_v51, %v8151_v37  ;;  %v8157_v53 = vmax.f32 %v8155_v14, %v8156_v55  ;;  %v8381_v22 = vsub.f32 %v17908_v29, %v8133_v54 }
 0x5fb   : > { %20384 = vst [vmem:[#allocation211_spill] sm:$0xff] %v17993_v23  ;;  %v18002_v5 = vadd.f32 %v9361_v8, %v9360_v36  ;;  %v9374_v38 = vadd.f32 %v9373_v9, %v9372_v34  ;;  %v8382_v61 = vsub.f32 %v17897_v3, %v8140_v57  ;;  %v8610_v4 = vmul.f32 1.442695, %v8378_v15 }
 0x5fc   : > { %v8147_v10 = vmax.f32 %v8145_v62, %v8146_v39  ;;  %v8153_v19 = vrot.slane %v8152_v58, 1  ;;  %v8158_v50 = vrot.slane %v8157_v53, 2  ;;  %v8612_v32 = vmul.f32 1.442695, %v8379_v13 }
 0x5fd   : > { %v9380_v44 = vrot.slane %v17997_v24, 4  ;;  %v8614_v63 = vmul.f32 1.442695, %v8380_v43  ;;  %v8616_v37 = vmul.f32 1.442695, %v8381_v22  ;;  %12570 = vpow2.f32 %v8610_v4  ;;  %v20389_v4 = vld [vmem:[#allocation28_spill] sm:$0xff] }
 0x5fe   : > { %v8383_v45 = vsub.f32 %v17914_v47, %v8147_v10  ;;  %v8154_v51 = vmax.f32 %v8152_v58, %v8153_v19  ;;  %v8159_v26 = vmax.f32 %v8157_v53, %v8158_v50  ;;  %v8618_v29 = vmul.f32 1.442695, %v8382_v61  ;;  %v20388_v19 = vld [vmem:[#allocation25_spill] sm:$0xff] }
 0x5ff   : > { %12572 = vpow2.f32 %v8612_v32  ;;  %v20385_v3 = vrot.slane %v16344_v6, 2  ;;  %v9375_v54 = vrot.slane %v9374_v38, 2  ;;  %v8668_v9 = vrot.slane %v16363_v1, 2 }
 0x600   : > { %v8620_v34 = vmul.f32 1.442695, %v8383_v45  ;;  %v8160_v14 = vrot.slane %v8159_v26, 1  ;;  %v8384_v8 = vsub.f32 %v17931_v17, %v8154_v51  ;;  %12574 = vpow2.f32 %v8614_v63  ;;  %v20391_v51 = vld [vmem:[#allocation27_spill] sm:$0xff] }
 0x601   : > { %v8662_v48 = vadd.f32 %v20385_v3, %v16344_v6  ;;  %12576 = vpow2.f32 %v8616_v37  ;;  %v20386_v57 = vrot.slane %v16356_v42, 2  ;;  %v8682_v39 = vrot.slane %v16367_v21, 2  ;;  %v18017_v6 = vpop.permute.xlu1 %6175 }
 0x602   : > { %v8161_v55 = vmax.f32 %v8159_v26, %v8160_v14  ;;  %12578 = vpow2.f32 %v8618_v29  ;;  %v8622_v15 = vmul.f32 1.442695, %v8384_v8  ;;  %v8669_v17 = vadd.f32 %v8668_v9, %v16363_v1 }
 0x603   : > { %v8663_v47 = vrot.slane %v8662_v48, 1  ;;  %v8676_v62 = vadd.f32 %v20386_v57, %v16356_v42  ;;  %12580 = vpow2.f32 %v8620_v34  ;;  %v8683_v43 = vadd.f32 %v8682_v39, %v16367_v21  ;;  %v6270_v34 = vpop.permute.xlu0 %6269 }
 0x604   : > { %v8385_v53 = vsub.f32 %v17970_v49, %v8161_v55  ;;  %12582 = vpow2.f32 %v8622_v15  ;;  %v20387_v42 = vrot.slane %v16370_v59, 2  ;;  %v8670_v10 = vrot.slane %v8669_v17, 1 }
 0x605   : > { %v8664_v13 = vadd.f32 %v8663_v47, %v8662_v48  ;;  %v8677_v58 = vrot.slane %v8676_v62, 1  ;;  %v8696_v50 = vrot.slane %v20388_v19, 2  ;;  %v20390_v32 = vrot.slane %v20389_v4, 2  ;;  %v6224_v9 = vpop.permute.xlu1 %6223 }
 0x606   : > { %v8690_v22 = vadd.f32 %v20387_v42, %v16370_v59  ;;  %v8624_v63 = vmul.f32 1.442695, %v8385_v53  ;;  %v8684_v1 = vrot.slane %v8683_v43, 1  ;;  %v8710_v49 = vrot.slane %v20391_v51, 2 }
 0x607   : > { %v8678_v61 = vadd.f32 %v8677_v58, %v8676_v62  ;;  %v8704_v45 = vadd.f32 %v20390_v32, %v20389_v4  ;;  %v8671_v26 = vadd.f32 %v8670_v10, %v8669_v17  ;;  %v8697_v21 = vadd.f32 %v8696_v50, %v20388_v19  ;;  %v20397_v58 = vld [vmem:[#allocation19_spill] sm:$0xff] }
 0x608   : > { %v8691_v37 = vrot.slane %v8690_v22, 1  ;;  %12584 = vrcp.f32 %v8664_v13  ;;  %v8685_v59 = vadd.f32 %v8684_v1, %v8683_v43  ;;  %v8711_v48 = vadd.f32 %v8710_v49, %v20391_v51 }
 0x609   : > { %v8705_v29 = vrot.slane %v8704_v45, 1  ;;  %12586 = vpow2.f32 %v8624_v63  ;;  %v18032_v14 = vadd.f32 %v9375_v54, %v9374_v38  ;;  %v18035_v8 = vadd.f32 %v9380_v44, %v17997_v24 }
 0x60a   : > { %v8692_v3 = vadd.f32 %v8691_v37, %v8690_v22  ;;  %v8698_v47 = vrot.slane %v8697_v21, 1  ;;  %12588 = vrcp.f32 %v8671_v26  ;;  %v8712_v62 = vrot.slane %v8711_v48, 1  ;;  %v18038_v15 = vpop.eup %12570 }
 0x60b   : > { %20392 = vst [vmem:[#allocation25_spill] sm:$0xff] %v18032_v14  ;;  %20393 = vst [vmem:[#allocation28_spill] sm:$0xff] %v18035_v8  ;;  %v8706_v57 = vadd.f32 %v8705_v29, %v8704_v45  ;;  %12590 = vrcp.f32 %v8678_v61  ;;  %v7257_v55 = vcombine.low %v17733_v7, %v6270_v34  ;;  %v7242_v39 = vcombine.high %v20355_v33, %v17753_v40 }
 0x60c   : > { %20394 = vst [vmem:[#allocation27_spill] sm:$0xff] %v18038_v15  ;;  %v20395_v38 = vcombine.low %v20355_v33, %v17753_v40  ;;  %v8699_v44 = vadd.f32 %v8698_v47, %v8697_v21  ;;  %12592 = vrcp.f32 %v8685_v59  ;;  %v18046_v24 = vpop.eup %12572  ;;  %v9386_v13 = vsel %vm7377_vm7, %v18038_v15, 0.0 }
 0x60d   : > { %20396 = vst [vmem:[#allocation212_spill] sm:$0xff] %v18046_v24  ;;  %v8713_v17 = vadd.f32 %v8712_v62, %v8711_v48  ;;  %12594 = vrcp.f32 %v8692_v3  ;;  %v7309_v53 = vcombine.low %v20397_v58, %v6224_v9  ;;  %v18051_v43 = vpop.eup %12574  ;;  %v9387_v42 = vrot.slane %v9386_v13, 4 }
 0x60e   : > { %v7249_v54 = vrot.slane %v20395_v38, %v16190_v2  ;;  %20398 = vst [vmem:[#allocation213_spill] sm:$0xff] %v18051_v43  ;;  %v9393_v22 = vsel %vm7377_vm7, %v18046_v24, 0.0  ;;  %12596 = vrcp.f32 %v8699_v44  ;;  %v7265_v40 = vrot.slane %v7257_v55, %v16190_v2  ;;  %v18056_v10 = vpop.eup %12576 }
 0x60f   : > { %20399 = vst [vmem:[#allocation214_spill] sm:$0xff] %v18056_v10  ;;  %v9394_v61 = vrot.slane %v9393_v22, 4  ;;  %v9400_v19 = vsel %vm7377_vm7, %v18051_v43, 0.0  ;;  %12598 = vrcp.f32 %v8706_v57  ;;  %v7258_v50 = vcombine.high %v17733_v7, %v6270_v34  ;;  %v18061_v4 = vpop.eup %12578 }
 0x610   : > { %20400 = vst [vmem:[#allocation215_spill] sm:$0xff] %v18061_v4  ;;  %v9388_v32 = vadd.f32 %v9387_v42, %v9386_v13  ;;  %v9401_v45 = vrot.slane %v9400_v19, 4  ;;  %v9407_v63 = vsel %vm7377_vm7, %v18056_v10, 0.0  ;;  %12600 = vrcp.f32 %v8713_v17  ;;  %v18065_v1 = vpop.eup %12580 }
 0x611   : > { %20401 = vst [vmem:[#allocation216_spill] sm:$0xff] %v18065_v1  ;;  %v18067_v37 = vadd.f32 %v9394_v61, %v9393_v22  ;;  %v9408_v51 = vrot.slane %v9407_v63, 4  ;;  %v9414_v49 = vsel %vm7377_vm7, %v18061_v4, 0.0  ;;  %v7310_v26 = vcombine.high %v20397_v58, %v6224_v9  ;;  %v18072_v21 = vpop.eup %12582 }
 0x612   : > { %20403 = vst [vmem:[#allocation218_spill] sm:$0xff] %v18072_v21  ;;  %v9402_v7 = vadd.f32 %v9401_v45, %v9400_v19  ;;  %v9415_v29 = vrot.slane %v9414_v49, 4  ;;  %v9421_v34 = vsel %vm7377_vm7, %v18065_v1, 0.0  ;;  %v7273_v59 = vcombine.low %v7249_v54, %v7265_v40 }
 0x613   : > { %20402 = vst [vmem:[#allocation217_spill] sm:$0xff] %v18067_v37  ;;  %v9389_v48 = vrot.slane %v9388_v32, 2  ;;  %v9428_v47 = vsel %vm7377_vm7, %v18072_v21, 0.0  ;;  %v7272_v57 = vrot.slane %v7258_v50, %v16190_v2  ;;  %v18080_v55 = vadd.f32 %v9408_v51, %v9407_v63 }
 0x614   : > { %v9403_v62 = vrot.slane %v9402_v7, 2  ;;  %v9422_v9 = vrot.slane %v9421_v34, 4  ;;  %v9429_v38 = vrot.slane %v9428_v47, 4  ;;  %v18082_v13 = vadd.f32 %v9415_v29, %v9414_v49 }
 0x615   : > { %20404 = vst [vmem:[#allocation219_spill] sm:$0xff] %v18080_v55  ;;  %v12585_v44 = vpop.eup %12584  ;;  %v7256_v17 = vrot.slane %v7242_v39, %v16190_v2  ;;  %v18086_v42 = vrot.slane %v7309_v53, %v16190_v2  ;;  %v7274_v22 = vcombine.high %v7249_v54, %v7265_v40  ;;  %v18094_v50 = vrot.slane %v7310_v26, %v16190_v2  ;;  %v20407_v39 = vld [vmem:[#allocation12_spill] sm:$0xff]  ;;  %v20409_v26 = vld [vmem:[#allocation22_spill] sm:$0xff] }
 0x616   : > { %v18088_v61 = vpop.eup %12586  ;;  %v18091_v45 = vadd.f32 %v9429_v38, %v9428_v47  ;;  %v18097_v63 = vrot.slane %v7273_v59, %v16197_v25  ;;  %v18099_v49 = vadd.f32 %v9389_v48, %v9388_v32  ;;  %v9682_v29 = vmul.f32 %v12585_v44, %v20407_v39  ;;  %v20410_v32 = vld [vmem:[#allocation37_spill] sm:$0xff] }
 0x617   : > { %20405 = vst [vmem:[#allocation220_spill] sm:$0xff] %v18088_v61  ;;  %v12589_v51 = vpop.eup %12588  ;;  %v18103_v53 = vrot.slane %v7274_v22, %v16197_v25  ;;  %v7289_v54 = vcombine.low %v7256_v17, %v7272_v57  ;;  %v18105_v3 = vadd.f32 %v9403_v62, %v9402_v7  ;;  %v18108_v38 = vadd.f32 %v9422_v9, %v9421_v34  ;;  %v20411_v34 = vld [vmem:[#allocation38_spill] sm:$0xff]  ;;  %v20413_v47 = vld [vmem:[#allocation29_spill] sm:$0xff] }
 0x618   : > { %20406 = vst [vmem:[#allocation221_spill] sm:$0xff] %v18099_v49  ;;  %v12591_v40 = vpop.eup %12590  ;;  %v9683_v19 = vmul.f32 %v12589_v51, %v20409_v26  ;;  %v7290_v58 = vcombine.high %v7256_v17, %v7272_v57  ;;  %v18119_v7 = vsel %vm7377_vm7, %v18088_v61, 0.0  ;;  %v18124_v9 = vcombine.high %v18097_v63, %v20169_v30  ;;  %v20412_v26 = vld [vmem:[#allocation36_spill] sm:$0xff] }
 0x619   : > { %20408 = vst [vmem:[#allocation12_spill] sm:$0xff] %v18105_v3  ;;  %v12593_v59 = vpop.eup %12592  ;;  %v9684_v48 = vmul.f32 %v12591_v40, %v20410_v32  ;;  %v18114_v44 = vrot.slane %v7289_v54, %v16197_v25  ;;  %v18132_v54 = vcombine.high %v18103_v53, %v20169_v30  ;;  %v8176_v61 = vsel %vm7377_vm7, %v18103_v53, -inf }
 0x61a   : > { %v12595_v22 = vpop.eup %12594  ;;  %v9685_v62 = vmul.f32 %v12593_v59, %v20411_v34  ;;  %v18128_v17 = vrot.slane %v7290_v58, %v16197_v25  ;;  %v8162_v34 = vsel %vm7377_vm7, %v18097_v63, -inf  ;;  %v8177_v21 = vrot.slane %v8176_v61, 4 }
 0x61b   : > { %v12597_v51 = vpop.eup %12596  ;;  %v9686_v40 = vmul.f32 %v12595_v22, %v20412_v26  ;;  %v9810_v57 = vcombine.low %v9682_v29, %v9684_v48  ;;  %v18137_v59 = vcombine.high %v18114_v44, %v20169_v30  ;;  %v20414_v29 = vld [vmem:[#allocation9_spill] sm:$0xff]  ;;  %v8163_v33 = vrot.slane %v8162_v34, 4 }
 0x61c   : > { %v12599_v32 = vpop.eup %12598  ;;  %v9687_v39 = vmul.f32 %v12597_v51, %v20413_v47  ;;  %v9818_v36 = vcombine.low %v9683_v19, %v9685_v62  ;;  %v18147_v26 = vcombine.high %v18128_v17, %v20169_v30  ;;  %v20415_v47 = vld [vmem:[#allocation26_spill] sm:$0xff]  ;;  %v8169_v51 = vsel %vm7377_vm7, %v18124_v9, -inf }
 0x61d   : > { %v12601_v22 = vpop.eup %12600  ;;  %v9688_v48 = vmul.f32 %v12599_v32, %v20414_v29  ;;  %v18143_v58 = vrot.slane %v9810_v57, %v16190_v2  ;;  %v8164_v29 = vmax.f32 %v8162_v34, %v8163_v33  ;;  %v8170_v57 = vrot.slane %v8169_v51, 4 }
 0x61e   : > { %v9689_v19 = vmul.f32 %v12601_v22, %v20415_v47  ;;  %v18151_v62 = vrot.slane %v9818_v36, %v16190_v2  ;;  %v8183_v22 = vsel %vm7377_vm7, %v18132_v54, -inf  ;;  %v8190_v36 = vsel %vm7377_vm7, %v18114_v44, -inf }
 0x61f   : > { %v9826_v32 = vcombine.low %v9686_v40, %v9688_v48  ;;  %v8165_v10 = vrot.slane %v8164_v29, 2  ;;  %v8171_v43 = vmax.f32 %v8169_v51, %v8170_v57  ;;  %v8178_v24 = vmax.f32 %v8176_v61, %v8177_v21 }
 0x620   : > { %v9834_v1 = vcombine.low %v9687_v39, %v9689_v19  ;;  %v9842_v4 = vcombine.low %v18143_v58, %v18151_v62  ;;  %v8184_v40 = vrot.slane %v8183_v22, 4  ;;  %v8191_v34 = vrot.slane %v8190_v36, 4 }
 0x621   : > { %v18164_v47 = vrot.slane %v9826_v32, %v16190_v2  ;;  %v8166_v48 = vmax.f32 %v8164_v29, %v8165_v10  ;;  %v8172_v19 = vrot.slane %v8171_v43, 2  ;;  %v8179_v15 = vrot.slane %v8178_v24, 2 }
 0x622   : > { %v18167_v33 = vrot.slane %v9834_v1, %v16190_v2  ;;  %v18170_v39 = vrot.slane %v9842_v4, %v16197_v25  ;;  %v8197_v35 = vsel %vm7377_vm7, %v18137_v59, -inf  ;;  %v8185_v16 = vmax.f32 %v8183_v22, %v8184_v40 }
 0x623   : > { %v8192_v51 = vmax.f32 %v8190_v36, %v8191_v34  ;;  %v8198_v21 = vrot.slane %v8197_v35, 4  ;;  %v8167_v61 = vrot.slane %v8166_v48, 1  ;;  %v8173_v1 = vmax.f32 %v8171_v43, %v8172_v19 }
 0x624   : > { %20416 = vst [vmem:[#allocation22_spill] sm:$0xff] %v18170_v39  ;;  %v9858_v32 = vcombine.low %v18164_v47, %v18167_v33  ;;  %v8180_v57 = vmax.f32 %v8178_v24, %v8179_v15  ;;  %v8204_v4 = vsel %vm7377_vm7, %v18128_v17, -inf  ;;  %v8186_v10 = vrot.slane %v8185_v16, 2 }
 0x625   : > { %v8193_v29 = vrot.slane %v8192_v51, 2  ;;  %v8199_v3 = vmax.f32 %v8197_v35, %v8198_v21  ;;  %v8168_v37 = vmax.f32 %v8166_v48, %v8167_v61  ;;  %v8174_v49 = vrot.slane %v8173_v1, 1 }
 0x626   : > { %v18179_v55 = vrot.slane %v9858_v32, %v16197_v25  ;;  %v8181_v8 = vrot.slane %v8180_v57, 1  ;;  %v8205_v14 = vrot.slane %v8204_v4, 4  ;;  %v8187_v36 = vmax.f32 %v8185_v16, %v8186_v10 }
 0x627   : > { %v8194_v40 = vmax.f32 %v8192_v51, %v8193_v29  ;;  %v8200_v43 = vrot.slane %v8199_v3, 2  ;;  %v8175_v15 = vmax.f32 %v8173_v1, %v8174_v49  ;;  %v8211_v19 = vsel %vm7377_vm7, %v18147_v26, -inf }
 0x628   : > { %20417 = vst [vmem:[#allocation37_spill] sm:$0xff] %v18179_v55  ;;  %v9875_v22 = vcombine.high %v18170_v39, %v18179_v55  ;;  %v8182_v24 = vmax.f32 %v8180_v57, %v8181_v8  ;;  %v8206_v34 = vmax.f32 %v8204_v4, %v8205_v14  ;;  %v8188_v35 = vrot.slane %v8187_v36, 1 }
 0x629   : > { %v8195_v48 = vrot.slane %v8194_v40, 1  ;;  %v8201_v32 = vmax.f32 %v8199_v3, %v8200_v43  ;;  %v8212_v21 = vrot.slane %v8211_v19, 4  ;;  %v8386_v23 = vsub.f32 %v18097_v63, %v8168_v37  ;;  %v20418_v37 = vld [vmem:[#allocation43_spill] sm:$0xff] }
 0x62a   : > { %10914 = vrot.lane.b32.xlu0 %v9875_v22, %s13001_s18  ;;  %v8207_v61 = vrot.slane %v8206_v34, 2  ;;  %v8387_v16 = vsub.f32 %v18124_v9, %v8175_v15  ;;  %v8388_v51 = vsub.f32 %v18103_v53, %v8182_v24  ;;  %v8189_v49 = vmax.f32 %v8187_v36, %v8188_v35  ;;  %v20420_v9 = vld [vmem:[#allocation45_spill] sm:$0xff] }
 0x62b   : > { %v8196_v8 = vmax.f32 %v8194_v40, %v8195_v48  ;;  %v8202_v14 = vrot.slane %v8201_v32, 1  ;;  %v8213_v1 = vmax.f32 %v8211_v19, %v8212_v21  ;;  %v8626_v4 = vmul.f32 1.442695, %v8386_v23  ;;  %v20421_v21 = vld [vmem:[#allocation44_spill] sm:$0xff] }
 0x62c   : > { %v8208_v57 = vmax.f32 %v8206_v34, %v8207_v61  ;;  %v8628_v10 = vmul.f32 1.442695, %v8387_v16  ;;  %v8630_v29 = vmul.f32 1.442695, %v8388_v51  ;;  %v8389_v3 = vsub.f32 %v18132_v54, %v8189_v49 }
 0x62d   : > { %v8203_v22 = vmax.f32 %v8201_v32, %v8202_v14  ;;  %v8214_v39 = vrot.slane %v8213_v1, 2  ;;  %v8390_v43 = vsub.f32 %v18114_v44, %v8196_v8  ;;  %12602 = vpow2.f32 %v8626_v4  ;;  %v20424_v14 = vld [vmem:[#allocation40_spill] sm:$0xff]  ;;  %v20426_v4 = vld [vmem:[#allocation57_spill] sm:$0xff] }
 0x62e   : > { %v8209_v55 = vrot.slane %v8208_v57, 1  ;;  %v20419_v63 = vrot.slane %v20418_v37, 2  ;;  %v8724_v36 = vrot.slane %v20420_v9, 2  ;;  %12604 = vpow2.f32 %v8628_v10 }
 0x62f   : > { %v8215_v40 = vmax.f32 %v8213_v1, %v8214_v39  ;;  %v8391_v15 = vsub.f32 %v18137_v59, %v8203_v22  ;;  %v8632_v23 = vmul.f32 1.442695, %v8389_v3  ;;  %12606 = vpow2.f32 %v8630_v29  ;;  %v20427_v3 = vld [vmem:[#allocation20_spill] sm:$0xff] }
 0x630   : > { %v8718_v53 = vadd.f32 %v20419_v63, %v20418_v37  ;;  %v8210_v24 = vmax.f32 %v8208_v57, %v8209_v55  ;;  %v8634_v34 = vmul.f32 1.442695, %v8390_v43  ;;  %v8725_v35 = vadd.f32 %v8724_v36, %v20420_v9  ;;  %v20423_v55 = vld [vmem:[#allocation46_spill] sm:$0xff] }
 0x631   : > { %v8216_v54 = vrot.slane %v8215_v40, 1  ;;  %12608 = vpow2.f32 %v8632_v23  ;;  %v8636_v44 = vmul.f32 1.442695, %v8391_v15  ;;  %v20422_v39 = vrot.slane %v20421_v21, 2  ;;  %v20429_v23 = vld [vmem:[#allocation54_spill] sm:$0xff] }
 0x632   : > { %v8719_v19 = vrot.slane %v8718_v53, 1  ;;  %v8392_v48 = vsub.f32 %v18128_v17, %v8210_v24  ;;  %12610 = vpow2.f32 %v8634_v34  ;;  %v8726_v16 = vrot.slane %v8725_v35, 1 }
 0x633   : > { %v8732_v61 = vadd.f32 %v20422_v39, %v20421_v21  ;;  %v8217_v59 = vmax.f32 %v8215_v40, %v8216_v54  ;;  %12612 = vpow2.f32 %v8636_v44  ;;  %v8738_v51 = vrot.slane %v20423_v55, 2  ;;  %v6272_v54 = vpop.permute.xlu1 %6271 }
 0x634   : > { %v8720_v32 = vadd.f32 %v8719_v19, %v8718_v53  ;;  %v8638_v49 = vmul.f32 1.442695, %v8392_v48  ;;  %v20425_v1 = vrot.slane %v20424_v14, 2  ;;  %v8752_v10 = vrot.slane %v20426_v4, 2 }
 0x635   : > { %v8733_v8 = vrot.slane %v8732_v61, 1  ;;  %v8393_v17 = vsub.f32 %v18147_v26, %v8217_v59  ;;  %v8727_v29 = vadd.f32 %v8726_v16, %v8725_v35  ;;  %v8739_v22 = vadd.f32 %v8738_v51, %v20423_v55 }
 0x636   : > { %v8746_v57 = vadd.f32 %v20425_v1, %v20424_v14  ;;  %v20428_v43 = vrot.slane %v20427_v3, 2  ;;  %12614 = vpow2.f32 %v8638_v49  ;;  %v8753_v9 = vadd.f32 %v8752_v10, %v20426_v4 }
 0x637   : > { %v8734_v63 = vadd.f32 %v8733_v8, %v8732_v61  ;;  %v8640_v36 = vmul.f32 1.442695, %v8393_v17  ;;  %v8740_v40 = vrot.slane %v8739_v22, 1  ;;  %v8766_v24 = vrot.slane %v20429_v23, 2 }
 0x638   : > { %v8760_v37 = vadd.f32 %v20428_v43, %v20427_v3  ;;  %v8747_v53 = vrot.slane %v8746_v57, 1  ;;  %v9436_v34 = vrot.slane %v18119_v7, 4  ;;  %v8754_v26 = vrot.slane %v8753_v9, 1 }
 0x639   : > { %12616 = vrcp.f32 %v8720_v32  ;;  %v9843_v19 = vcombine.high %v18143_v58, %v18151_v62  ;;  %v8741_v44 = vadd.f32 %v8740_v40, %v8739_v22  ;;  %v8767_v48 = vadd.f32 %v8766_v24, %v20429_v23 }
 0x63a   : > { %v8761_v15 = vrot.slane %v8760_v37, 1  ;;  %12618 = vpow2.f32 %v8640_v36  ;;  %v8748_v35 = vadd.f32 %v8747_v53, %v8746_v57  ;;  %v8755_v21 = vadd.f32 %v8754_v26, %v8753_v9  ;;  %v18222_v59 = vpop.eup %12602 }
 0x63b   : > { %12620 = vrcp.f32 %v8727_v29  ;;  %v18218_v39 = vrot.slane %v9843_v19, %v16197_v25  ;;  %v9859_v61 = vcombine.high %v18164_v47, %v18167_v33  ;;  %20430 = vst [vmem:[#allocation38_spill] sm:$0xff] %v18222_v59  ;;  %v8768_v16 = vrot.slane %v8767_v48, 1  ;;  %v18225_v62 = vpop.eup %12604 }
 0x63c   : > { %v8762_v32 = vadd.f32 %v8761_v15, %v8760_v37  ;;  %12622 = vrcp.f32 %v8734_v63  ;;  %v7325_v58 = vcombine.low %v18017_v6, %v6272_v54  ;;  %20431 = vst [vmem:[#allocation36_spill] sm:$0xff] %v18225_v62  ;;  %v9442_v55 = vsel %vm7377_vm7, %v18222_v59, 0.0  ;;  %v18233_v8 = vpop.eup %12606 }
 0x63d   : > { %12624 = vrcp.f32 %v8741_v44  ;;  %v18230_v51 = vrot.slane %v9859_v61, %v16197_v25  ;;  %v7326_v49 = vcombine.high %v18017_v6, %v6272_v54  ;;  %20432 = vst [vmem:[#allocation29_spill] sm:$0xff] %v18233_v8  ;;  %v9443_v47 = vrot.slane %v9442_v55, 4 }
 0x63e   : > { %v9449_v33 = vsel %vm7377_vm7, %v18225_v62, 0.0  ;;  %v8769_v14 = vadd.f32 %v8768_v16, %v8767_v48  ;;  %12626 = vrcp.f32 %v8748_v35  ;;  %v18237_v1 = vpop.eup %12608  ;;  %v9456_v4 = vsel %vm7377_vm7, %v18233_v8, 0.0 }
 0x63f   : > { %20433 = vst [vmem:[#allocation9_spill] sm:$0xff] %v18237_v1  ;;  %v9450_v57 = vrot.slane %v9449_v33, 4  ;;  %12628 = vrcp.f32 %v8755_v21  ;;  %v9876_v10 = vcombine.low %v18218_v39, %v18230_v51  ;;  %v18243_v17 = vpop.eup %12610  ;;  %v9444_v6 = vadd.f32 %v9443_v47, %v9442_v55 }
 0x640   : > { %20434 = vst [vmem:[#allocation26_spill] sm:$0xff] %v18243_v17  ;;  %v9457_v29 = vrot.slane %v9456_v4, 4  ;;  %v9463_v22 = vsel %vm7377_vm7, %v18237_v1, 0.0  ;;  %12630 = vrcp.f32 %v8762_v32  ;;  %v18247_v3 = vpop.eup %12612  ;;  %v18250_v43 = vadd.f32 %v9436_v34, %v18119_v7 }
 0x641   : > { %20435 = vst [vmem:[#allocation43_spill] sm:$0xff] %v18247_v3  ;;  %v9464_v37 = vrot.slane %v9463_v22, 4  ;;  %v9470_v63 = vsel %vm7377_vm7, %v18243_v17, 0.0  ;;  %12632 = vrcp.f32 %v8769_v14  ;;  %10978 = vrot.lane.b32.xlu0 %v9876_v10, %s13002_s27  ;;  %v18255_v53 = vadd.f32 %v9450_v57, %v9449_v33  ;;  %v20442_v33 = vld [vmem:[#allocation55_spill] sm:$0xff] }
 0x642   : > { %v9458_v9 = vadd.f32 %v9457_v29, %v9456_v4  ;;  %v9471_v36 = vrot.slane %v9470_v63, 4  ;;  %v9477_v40 = vsel %vm7377_vm7, %v18247_v3, 0.0  ;;  %v20437_v15 = vrot.slane %v18082_v13, 2 }
 0x643   : > { %20436 = vst [vmem:[#allocation45_spill] sm:$0xff] %v18255_v53  ;;  %v9478_v24 = vrot.slane %v9477_v40, 4  ;;  %v7333_v34 = vrot.slane %v7325_v58, %v16190_v2  ;;  %v18266_v26 = vpop.eup %12614  ;;  %v9445_v19 = vrot.slane %v9444_v6, 2  ;;  %v18268_v54 = vadd.f32 %v9464_v37, %v9463_v22  ;;  %v20453_v58 = vld [vmem:[#allocation49_spill] sm:$0xff] }
 0x644   : > { %v18262_v7 = vadd.f32 %v20437_v15, %v18082_v13  ;;  %20438 = vst [vmem:[#allocation44_spill] sm:$0xff] %v18266_v26  ;;  %v9472_v44 = vadd.f32 %v9471_v36, %v9470_v63  ;;  %v7340_v35 = vrot.slane %v7326_v49, %v16190_v2  ;;  %v20440_v48 = vrot.slane %v18091_v45, 2  ;;  %v20446_v63 = vld [vmem:[#allocation35_spill] sm:$0xff] }
 0x645   : > { %20439 = vst [vmem:[#allocation46_spill] sm:$0xff] %v18268_v54  ;;  %v9459_v61 = vrot.slane %v9458_v9, 2  ;;  %v7341_v32 = vcombine.low %v18086_v42, %v7333_v34  ;;  %v18279_v55 = vadd.f32 %v9478_v24, %v9477_v40  ;;  %v7342_v47 = vcombine.high %v18086_v42, %v7333_v34  ;;  %v20448_v34 = vld [vmem:[#allocation41_spill] sm:$0xff]  ;;  %v20449_v42 = vld [vmem:[#allocation11_spill] sm:$0xff] }
 0x646   : > { %v18274_v21 = vadd.f32 %v20440_v48, %v18091_v45  ;;  %v12617_v16 = vpop.eup %12616  ;;  %v20443_v49 = vrot.slane %v20442_v33, 2  ;;  %v9473_v45 = vrot.slane %v9472_v44, 2  ;;  %v18291_v4 = vsel %vm7377_vm7, %v18266_v26, 0.0 }
 0x647   : > { %20441 = vst [vmem:[#allocation40_spill] sm:$0xff] %v18279_v55  ;;  %v18287_v57 = vpop.eup %12618  ;;  %v18294_v10 = vrot.slane %v7341_v32, %v16197_v25  ;;  %v7357_v29 = vcombine.low %v18094_v50, %v7340_v35  ;;  %v18297_v37 = vadd.f32 %v9445_v19, %v9444_v6  ;;  %v9690_v36 = vmul.f32 %v12617_v16, %v20446_v63 }
 0x648   : > { %v18285_v14 = vadd.f32 %v20443_v49, %v20442_v33  ;;  %20444 = vst [vmem:[#allocation57_spill] sm:$0xff] %v18287_v57  ;;  %v12621_v22 = vpop.eup %12620  ;;  %v18302_v40 = vrot.slane %v7342_v47, %v16197_v25  ;;  %v18304_v24 = vadd.f32 %v9459_v61, %v9458_v9  ;;  %v7358_v32 = vcombine.high %v18094_v50, %v7340_v35  ;;  %v20451_v35 = vld [vmem:[#allocation48_spill] sm:$0xff] }
 0x649   : > { %20445 = vst [vmem:[#allocation20_spill] sm:$0xff] %v18297_v37  ;;  %v12623_v15 = vpop.eup %12622  ;;  %v9691_v48 = vmul.f32 %v12621_v22, %v20448_v34  ;;  %v18309_v33 = vrot.slane %v7357_v29, %v16197_v25  ;;  %v18316_v47 = vcombine.high %v18294_v10, %v20169_v30  ;;  %v18318_v61 = vadd.f32 %v9473_v45, %v9472_v44  ;;  %v20452_v34 = vld [vmem:[#allocation34_spill] sm:$0xff] }
 0x64a   : > { %20447 = vst [vmem:[#allocation54_spill] sm:$0xff] %v18304_v24  ;;  %v12625_v49 = vpop.eup %12624  ;;  %v9692_v16 = vmul.f32 %v12623_v15, %v20449_v42  ;;  %v18322_v50 = vsel %vm7377_vm7, %v18287_v57, 0.0  ;;  %v18326_v22 = vrot.slane %v7358_v32, %v16197_v25  ;;  %v18331_v15 = vcombine.high %v18302_v40, %v20169_v30 }
 0x64b   : > { %v12627_v9 = vpop.eup %12626  ;;  %20450 = vst [vmem:[#allocation55_spill] sm:$0xff] %v18318_v61  ;;  %v9693_v29 = vmul.f32 %v12625_v49, %v20451_v35  ;;  %v8218_v44 = vsel %vm7377_vm7, %v18294_v10, -inf  ;;  %v18338_v49 = vcombine.high %v18309_v33, %v20169_v30  ;;  %v8225_v19 = vsel %vm7377_vm7, %v18316_v47, -inf }
 0x64c   : > { %v12629_v63 = vpop.eup %12628  ;;  %v9694_v6 = vmul.f32 %v12627_v9, %v20452_v34  ;;  %v9878_v42 = vcombine.low %v9690_v36, %v9692_v16  ;;  %v18342_v32 = vcombine.high %v18326_v22, %v20169_v30  ;;  %v20454_v16 = vld [vmem:[#allocation42_spill] sm:$0xff]  ;;  %v8219_v34 = vrot.slane %v8218_v44, 4 }
 0x64d   : > { %v12631_v45 = vpop.eup %12630  ;;  %v9695_v13 = vmul.f32 %v12629_v63, %v20453_v58  ;;  %v9886_v23 = vcombine.low %v9691_v48, %v9693_v29  ;;  %v20455_v58 = vld [vmem:[#allocation47_spill] sm:$0xff]  ;;  %v8226_v63 = vrot.slane %v8225_v19, 4  ;;  %v8232_v30 = vsel %vm7377_vm7, %v18302_v40, -inf }
 0x64e   : > { %v12633_v36 = vpop.eup %12632  ;;  %v9696_v9 = vmul.f32 %v12631_v45, %v20454_v16  ;;  %v18346_v35 = vrot.slane %v9878_v42, %v16190_v2  ;;  %v8220_v26 = vmax.f32 %v8218_v44, %v8219_v34  ;;  %v8233_v3 = vrot.slane %v8232_v30, 4 }
 0x64f   : > { %v9697_v48 = vmul.f32 %v12633_v36, %v20455_v58  ;;  %v18352_v29 = vrot.slane %v9886_v23, %v16190_v2  ;;  %v8239_v42 = vsel %vm7377_vm7, %v18331_v15, -inf  ;;  %v8227_v17 = vmax.f32 %v8225_v19, %v8226_v63 }
 0x650   : > { %v9894_v57 = vcombine.low %v9694_v6, %v9696_v9  ;;  %v8240_v1 = vrot.slane %v8239_v42, 4  ;;  %v8221_v23 = vrot.slane %v8220_v26, 2  ;;  %v8234_v58 = vmax.f32 %v8232_v30, %v8233_v3 }
 0x651   : > { %v9902_v45 = vcombine.low %v9695_v13, %v9697_v48  ;;  %v9910_v16 = vcombine.low %v18346_v35, %v18352_v29  ;;  %v8246_v8 = vsel %vm7377_vm7, %v18309_v33, -inf  ;;  %v8228_v13 = vrot.slane %v8227_v17, 2 }
 0x652   : > { %v18361_v36 = vrot.slane %v9894_v57, %v16190_v2  ;;  %v8241_v9 = vmax.f32 %v8239_v42, %v8240_v1  ;;  %v8222_v34 = vmax.f32 %v8220_v26, %v8221_v23  ;;  %v8235_v48 = vrot.slane %v8234_v58, 2 }
 0x653   : > { %v18366_v6 = vrot.slane %v9902_v45, %v16190_v2  ;;  %v18369_v44 = vrot.slane %v9910_v16, %v16197_v25  ;;  %v8247_v19 = vrot.slane %v8246_v8, 4  ;;  %v8253_v57 = vsel %vm7377_vm7, %v18338_v49, -inf }
 0x654   : > { %v8229_v63 = vmax.f32 %v8227_v17, %v8228_v13  ;;  %v8242_v30 = vrot.slane %v8241_v9, 2  ;;  %v8254_v62 = vrot.slane %v8253_v57, 4  ;;  %v8223_v59 = vrot.slane %v8222_v34, 1 }
 0x655   : > { %20456 = vst [vmem:[#allocation35_spill] sm:$0xff] %v18369_v44  ;;  %v9926_v3 = vcombine.low %v18361_v36, %v18366_v6  ;;  %v8236_v45 = vmax.f32 %v8234_v58, %v8235_v48  ;;  %v8248_v55 = vmax.f32 %v8246_v8, %v8247_v19  ;;  %v8260_v16 = vsel %vm7377_vm7, %v18326_v22, -inf }
 0x656   : > { %v8230_v26 = vrot.slane %v8229_v63, 1  ;;  %v8243_v42 = vmax.f32 %v8241_v9, %v8242_v30  ;;  %v8255_v23 = vmax.f32 %v8253_v57, %v8254_v62  ;;  %v8224_v61 = vmax.f32 %v8222_v34, %v8223_v59 }
 0x657   : > { %v18378_v1 = vrot.slane %v9926_v3, %v16197_v25  ;;  %v8237_v54 = vrot.slane %v8236_v45, 1  ;;  %v8249_v24 = vrot.slane %v8248_v55, 2  ;;  %v8261_v37 = vrot.slane %v8260_v16, 4 }
 0x658   : > { %v8231_v13 = vmax.f32 %v8229_v63, %v8230_v26  ;;  %v8244_v53 = vrot.slane %v8243_v42, 1  ;;  %v8256_v58 = vrot.slane %v8255_v23, 2  ;;  %v8267_v3 = vsel %vm7377_vm7, %v18342_v32, -inf }
 0x659   : > { %20457 = vst [vmem:[#allocation41_spill] sm:$0xff] %v18378_v1  ;;  %v9943_v17 = vcombine.high %v18369_v44, %v18378_v1  ;;  %v8238_v8 = vmax.f32 %v8236_v45, %v8237_v54  ;;  %v8250_v48 = vmax.f32 %v8248_v55, %v8249_v24  ;;  %v8262_v19 = vmax.f32 %v8260_v16, %v8261_v37  ;;  %v20482_v1 = vld [vmem:[#allocation53_spill] sm:$0xff] }
 0x65a   : > { %v8245_v9 = vmax.f32 %v8243_v42, %v8244_v53  ;;  %v8257_v62 = vmax.f32 %v8255_v23, %v8256_v58  ;;  %v8268_v59 = vrot.slane %v8267_v3, 4  ;;  %v8394_v34 = vsub.f32 %v18294_v10, %v8224_v61 }
 0x65b   : > { %10916 = vrot.lane.b32.xlu1 %v9943_v17, %s13001_s18  ;;  %v8251_v57 = vrot.slane %v8250_v48, 1  ;;  %v8263_v30 = vrot.slane %v8262_v19, 2  ;;  %v8395_v44 = vsub.f32 %v18316_v47, %v8231_v13  ;;  %v8396_v63 = vsub.f32 %v18302_v40, %v8238_v8 }
 0x65c   : > { %v8258_v26 = vrot.slane %v8257_v62, 1  ;;  %v8269_v54 = vmax.f32 %v8267_v3, %v8268_v59  ;;  %v8397_v55 = vsub.f32 %v18331_v15, %v8245_v9  ;;  %v8642_v37 = vmul.f32 1.442695, %v8394_v34 }
 0x65d   : > { %v8252_v24 = vmax.f32 %v8250_v48, %v8251_v57  ;;  %v8264_v45 = vmax.f32 %v8262_v19, %v8263_v30  ;;  %v8644_v16 = vmul.f32 1.442695, %v8395_v44  ;;  %v8646_v17 = vmul.f32 1.442695, %v8396_v63 }
 0x65e   : > { %v8259_v53 = vmax.f32 %v8257_v62, %v8258_v26  ;;  %v8270_v42 = vrot.slane %v8269_v54, 2  ;;  %12634 = vpow2.f32 %v8642_v37  ;;  %v8648_v23 = vmul.f32 1.442695, %v8397_v55 }
 0x65f   : > { %v8265_v10 = vrot.slane %v8264_v45, 1  ;;  %v8398_v61 = vsub.f32 %v18309_v33, %v8252_v24  ;;  %12636 = vpow2.f32 %v8644_v16  ;;  %v9911_v40 = vcombine.high %v18346_v35, %v18352_v29  ;;  %v20458_v29 = vld [vmem:[#allocation61_spill] sm:$0xff] }
 0x660   : > { %v8271_v47 = vmax.f32 %v8269_v54, %v8270_v42  ;;  %v8399_v13 = vsub.f32 %v18338_v49, %v8259_v53  ;;  %12638 = vpow2.f32 %v8646_v17  ;;  %v9927_v15 = vcombine.high %v18361_v36, %v18366_v6  ;;  %v20463_v54 = vld [vmem:[#allocation64_spill] sm:$0xff]  ;;  %v20465_v24 = vld [vmem:[#allocation65_spill] sm:$0xff]  ;;  %v20466_v53 = vld [vmem:[#allocation66_spill] sm:$0xff] }
 0x661   : > { %v8266_v44 = vmax.f32 %v8264_v45, %v8265_v10  ;;  %12640 = vpow2.f32 %v8648_v23  ;;  %v8650_v58 = vmul.f32 1.442695, %v8398_v61  ;;  %v9925_v8 = vrot.slane %v9911_v40, %v16197_v25 }
 0x662   : > { %v8272_v48 = vrot.slane %v8271_v47, 1  ;;  %v8652_v19 = vmul.f32 1.442695, %v8399_v13  ;;  %v9941_v33 = vrot.slane %v9927_v15, %v16197_v25  ;;  %v9877_v3 = vcombine.high %v18218_v39, %v18230_v51 }
 0x663   : > { %v8400_v35 = vsub.f32 %v18326_v22, %v8266_v44  ;;  %12642 = vpow2.f32 %v8650_v58  ;;  %v8775_v49 = vrot.slane %v18285_v14, 1  ;;  %v8780_v9 = vrot.slane %v20458_v29, 2  ;;  %v20460_v22 = vld [vmem:[#allocation50_spill] sm:$0xff]  ;;  %v20468_v44 = vld [vmem:[#allocation67_spill] sm:$0xff] }
 0x664   : > { %v20459_v36 = vrot.slane %v18291_v4, 4  ;;  %v9492_v62 = vrot.slane %v18322_v50, 4  ;;  %12644 = vpow2.f32 %v8652_v19  ;;  %v9944_v59 = vcombine.low %v9925_v8, %v9941_v33  ;;  %11042 = vrot.lane.b32.xlu0 %v9877_v3, %s13003_s9 }
 0x665   : > { %v8273_v34 = vmax.f32 %v8271_v47, %v8272_v48  ;;  %v8654_v39 = vmul.f32 1.442695, %v8400_v35  ;;  %v8781_v51 = vadd.f32 %v8780_v9, %v20458_v29  ;;  %v20461_v57 = vrot.slane %v20460_v22, 2 }
 0x666   : > { %v9486_v6 = vadd.f32 %v20459_v36, %v18291_v4  ;;  %10980 = vrot.lane.b32.xlu1 %v9944_v59, %s13002_s27  ;;  %v8776_v63 = vadd.f32 %v8775_v49, %v18285_v14  ;;  %v20462_v4 = vld [vmem:[#allocation63_spill] sm:$0xff]  ;;  %v20464_v55 = vrot.slane %v20463_v54, 2  ;;  %v8808_v45 = vrot.slane %v20465_v24, 2 }
 0x667   : > { %v8788_v30 = vadd.f32 %v20461_v57, %v20460_v22  ;;  %v8794_v26 = vrot.slane %v20462_v4, 2  ;;  %12646 = vpow2.f32 %v8654_v39  ;;  %v8782_v16 = vrot.slane %v8781_v51, 1 }
 0x668   : > { %v8802_v37 = vadd.f32 %v20464_v55, %v20463_v54  ;;  %v20467_v42 = vrot.slane %v20466_v53, 2  ;;  %v9945_v10 = vcombine.high %v9925_v8, %v9941_v33  ;;  %v8809_v14 = vadd.f32 %v8808_v45, %v20465_v24  ;;  %v20469_v54 = vld [vmem:[#allocation73_spill] sm:$0xff] }
 0x669   : > { %v8789_v17 = vrot.slane %v8788_v30, 1  ;;  %v8795_v61 = vadd.f32 %v8794_v26, %v20462_v4  ;;  %v9487_v47 = vrot.slane %v9486_v6, 2  ;;  %v8783_v13 = vadd.f32 %v8782_v16, %v8781_v51 }
 0x66a   : > { %v8816_v23 = vadd.f32 %v20467_v42, %v20466_v53  ;;  %v8803_v40 = vrot.slane %v8802_v37, 1  ;;  %v8822_v58 = vrot.slane %v20468_v44, 2  ;;  %v8401_v48 = vsub.f32 %v18342_v32, %v8273_v34  ;;  %11044 = vrot.lane.b32.xlu1 %v9945_v10, %s13003_s9 }
 0x66b   : > { %v8790_v15 = vadd.f32 %v8789_v17, %v8788_v30  ;;  %v8796_v19 = vrot.slane %v8795_v61, 1  ;;  %v8810_v3 = vrot.slane %v8809_v14, 1  ;;  %v18426_v49 = vpop.eup %12634  ;;  %v18429_v8 = vadd.f32 %v9492_v62, %v18322_v50 }
 0x66c   : > { %v8817_v35 = vrot.slane %v8816_v23, 1  ;;  %v8804_v33 = vadd.f32 %v8803_v40, %v8802_v37  ;;  %v8823_v29 = vadd.f32 %v8822_v58, %v20468_v44  ;;  %12648 = vrcp.f32 %v8776_v63  ;;  %v18432_v9 = vpop.eup %12636 }
 0x66d   : > { %v9498_v36 = vsel %vm7377_vm7, %v18426_v49, 0.0  ;;  %v8797_v32 = vadd.f32 %v8796_v19, %v8795_v61  ;;  %v8811_v59 = vadd.f32 %v8810_v3, %v8809_v14  ;;  %12650 = vrcp.f32 %v8783_v13  ;;  %v18436_v34 = vpop.eup %12638  ;;  %v20481_v61 = vld [vmem:[#allocation52_spill] sm:$0xff] }
 0x66e   : > { %v9499_v39 = vrot.slane %v9498_v36, 4  ;;  %v9505_v51 = vsel %vm7377_vm7, %v18432_v9, 0.0  ;;  %v8824_v50 = vrot.slane %v8823_v29, 1  ;;  %12652 = vrcp.f32 %v8790_v15  ;;  %v18440_v62 = vpop.eup %12640 }
 0x66f   : > { %v8656_v22 = vmul.f32 1.442695, %v8401_v48  ;;  %v9512_v57 = vsel %vm7377_vm7, %v18436_v34, 0.0  ;;  %v8818_v30 = vadd.f32 %v8817_v35, %v8816_v23  ;;  %12654 = vrcp.f32 %v8797_v32  ;;  %v20474_v48 = vld [vmem:[#allocation77_spill] sm:$0xff] }
 0x670   : > { %v9506_v63 = vrot.slane %v9505_v51, 4  ;;  %v9513_v4 = vrot.slane %v9512_v57, 4  ;;  %v9519_v26 = vsel %vm7377_vm7, %v18440_v62, 0.0  ;;  %v20470_v55 = vrot.slane %v20469_v54, 2  ;;  %v18449_v24 = vpop.eup %12642 }
 0x671   : > { %20471 = vst [vmem:[#allocation11_spill] sm:$0xff] %v18449_v24  ;;  %v18451_v45 = vadd.f32 %v9487_v47, %v9486_v6  ;;  %v9500_v16 = vadd.f32 %v9499_v39, %v9498_v36  ;;  %v8825_v17 = vadd.f32 %v8824_v50, %v8823_v29  ;;  %12656 = vrcp.f32 %v8804_v33  ;;  %v18453_v53 = vpop.eup %12644  ;;  %v20475_v29 = vld [vmem:[#allocation76_spill] sm:$0xff]  ;;  %v20477_v50 = vld [vmem:[#allocation79_spill] sm:$0xff] }
 0x672   : > { %v8830_v37 = vadd.f32 %v20470_v55, %v20469_v54  ;;  %20472 = vst [vmem:[#allocation48_spill] sm:$0xff] %v18453_v53  ;;  %v9514_v42 = vadd.f32 %v9513_v4, %v9512_v57  ;;  %v9520_v23 = vrot.slane %v9519_v26, 4  ;;  %v9526_v10 = vsel %vm7377_vm7, %v18449_v24, 0.0 }
 0x673   : > { %12658 = vrcp.f32 %v8811_v59  ;;  %v9527_v40 = vrot.slane %v9526_v10, 4  ;;  %v9533_v14 = vsel %vm7377_vm7, %v18453_v53, 0.0  ;;  %v18460_v6 = vadd.f32 %v9506_v63, %v9505_v51 }
 0x674   : > { %12660 = vpow2.f32 %v8656_v22  ;;  %v9534_v47 = vrot.slane %v9533_v14, 4  ;;  %v8831_v13 = vrot.slane %v8830_v37, 1  ;;  %v18462_v15 = vpop.eup %12646  ;;  %v9501_v44 = vrot.slane %v9500_v16, 2 }
 0x675   : > { %12662 = vrcp.f32 %v8818_v30  ;;  %20473 = vst [vmem:[#allocation34_spill] sm:$0xff] %v18462_v15  ;;  %v9528_v58 = vadd.f32 %v9527_v40, %v9526_v10  ;;  %v8836_v19 = vrot.slane %v20474_v48, 2  ;;  %v9515_v3 = vrot.slane %v9514_v42, 2 }
 0x676   : > { %12664 = vrcp.f32 %v8825_v17  ;;  %v18465_v35 = vadd.f32 %v9520_v23, %v9519_v26  ;;  %v9540_v33 = vsel %vm7377_vm7, %v18462_v15, 0.0  ;;  %v20476_v36 = vrot.slane %v20475_v29, 2 }
 0x677   : > { %v9529_v59 = vrot.slane %v9528_v58, 2  ;;  %v18472_v39 = vadd.f32 %v9534_v47, %v9533_v14  ;;  %v8837_v51 = vadd.f32 %v8836_v19, %v20474_v48  ;;  %v8850_v22 = vrot.slane %v20477_v50, 2  ;;  %v20479_v48 = vld [vmem:[#allocation58_spill] sm:$0xff] }
 0x678   : > { %v8844_v32 = vadd.f32 %v20476_v36, %v20475_v29  ;;  %v9541_v57 = vrot.slane %v9540_v33, 4  ;;  %v8832_v30 = vadd.f32 %v8831_v13, %v8830_v37  ;;  %v20478_v63 = vrot.slane %v16781_v11, 2 }
 0x679   : > { %v8864_v26 = vrot.slane %v16802_v60, 2  ;;  %v12649_v54 = vpop.eup %12648  ;;  %v18480_v55 = vadd.f32 %v9501_v44, %v9500_v16  ;;  %v8838_v23 = vrot.slane %v8837_v51, 1  ;;  %v18483_v14 = vadd.f32 %v9515_v3, %v9514_v42  ;;  %v20480_v16 = vld [vmem:[#allocation51_spill] sm:$0xff] }
 0x67a   : > { %v8858_v4 = vadd.f32 %v20478_v63, %v16781_v11  ;;  %v8845_v10 = vrot.slane %v8844_v32, 1  ;;  %v12651_v40 = vpop.eup %12650  ;;  %v9698_v37 = vmul.f32 %v12649_v54, %v20479_v48  ;;  %v8851_v13 = vadd.f32 %v8850_v22, %v20477_v50  ;;  %v20483_v22 = vld [vmem:[#allocation81_spill] sm:$0xff] }
 0x67b   : > { %v12653_v19 = vpop.eup %12652  ;;  %v18488_v11 = vadd.f32 %v9529_v59, %v9528_v58  ;;  %v9699_v44 = vmul.f32 %v12651_v40, %v20480_v16  ;;  %v18492_v17 = vadd.f32 %v9541_v57, %v9540_v33  ;;  %v8865_v47 = vadd.f32 %v8864_v26, %v16802_v60  ;;  %v20485_v57 = vld [vmem:[#allocation56_spill] sm:$0xff] }
 0x67c   : > { %v8859_v36 = vrot.slane %v8858_v4, 1  ;;  %v12655_v63 = vpop.eup %12654  ;;  %v9700_v42 = vmul.f32 %v12653_v19, %v20481_v61  ;;  %v8852_v3 = vrot.slane %v8851_v13, 1  ;;  %v8839_v48 = vadd.f32 %v8838_v23, %v8837_v51 }
 0x67d   : > { %v9701_v54 = vmul.f32 %v12655_v63, %v20482_v1  ;;  %v8846_v50 = vadd.f32 %v8845_v10, %v8844_v32  ;;  %v20484_v58 = vrot.slane %v20483_v22, 2  ;;  %v8866_v53 = vrot.slane %v8865_v47, 1  ;;  %v20487_v1 = vld [vmem:[#allocation59_spill] sm:$0xff]  ;;  %v20489_v63 = vld [vmem:[#allocation88_spill] sm:$0xff] }
 0x67e   : > { %v12657_v29 = vpop.eup %12656  ;;  %v9946_v15 = vcombine.low %v9698_v37, %v9700_v42  ;;  %v8853_v40 = vadd.f32 %v8852_v3, %v8851_v13  ;;  %v8860_v16 = vadd.f32 %v8859_v36, %v8858_v4  ;;  %v8878_v60 = vrot.slane %v16877_v27, 2  ;;  %v20490_v3 = vld [vmem:[#allocation86_spill] sm:$0xff] }
 0x67f   : > { %v8872_v59 = vadd.f32 %v20484_v58, %v20483_v22  ;;  %v9702_v24 = vmul.f32 %v12657_v29, %v20485_v57  ;;  %v9954_v61 = vcombine.low %v9699_v44, %v9701_v54  ;;  %v8867_v23 = vadd.f32 %v8866_v53, %v8865_v47  ;;  %v20488_v44 = vld [vmem:[#allocation60_spill] sm:$0xff] }
 0x680   : > { %v12659_v33 = vpop.eup %12658  ;;  %v9953_v51 = vrot.slane %v9946_v15, %v16190_v2  ;;  %12666 = vrcp.f32 %v8832_v30  ;;  %v8879_v13 = vadd.f32 %v8878_v60, %v16877_v27  ;;  %v8887_v42 = vrot.slane %v20489_v63, 1  ;;  %v20492_v15 = vld [vmem:[#allocation62_spill] sm:$0xff]  ;;  %v20494_v60 = vld [vmem:[#allocation91_spill] sm:$0xff] }
 0x681   : > { %v8873_v19 = vrot.slane %v8872_v59, 1  ;;  %v18502_v26 = vpop.eup %12660  ;;  %v9703_v32 = vmul.f32 %v12659_v33, %v20487_v1  ;;  %v9961_v37 = vrot.slane %v9954_v61, %v16190_v2  ;;  %12668 = vrcp.f32 %v8839_v48 }
 0x682   : > { %20486 = vst [vmem:[#allocation49_spill] sm:$0xff] %v18502_v26  ;;  %v12663_v10 = vpop.eup %12662  ;;  %12670 = vrcp.f32 %v8846_v50  ;;  %v20491_v54 = vrot.slane %v20490_v3, 2  ;;  %v8880_v47 = vrot.slane %v8879_v13, 1  ;;  %v18516_v58 = vsel %vm7377_vm7, %v18502_v26, 0.0 }
 0x683   : > { %v8874_v4 = vadd.f32 %v8873_v19, %v8872_v59  ;;  %v12665_v29 = vpop.eup %12664  ;;  %v9704_v36 = vmul.f32 %v12663_v10, %v20488_v44  ;;  %v9978_v30 = vcombine.low %v9953_v51, %v9961_v37  ;;  %12672 = vrcp.f32 %v8853_v40  ;;  %v20497_v10 = vld [vmem:[#allocation92_spill] sm:$0xff] }
 0x684   : > { %v8893_v22 = vadd.f32 %v20491_v54, %v20490_v3  ;;  %v9705_v53 = vmul.f32 %v12665_v29, %v20492_v15  ;;  %12674 = vrcp.f32 %v8860_v16  ;;  %v9979_v48 = vcombine.high %v9953_v51, %v9961_v37  ;;  %v20496_v51 = vld [vmem:[#allocation94_spill] sm:$0xff]  ;;  %v20499_v29 = vld [vmem:[#allocation95_spill] sm:$0xff] }
 0x685   : > { %v9962_v27 = vcombine.low %v9702_v24, %v9704_v36  ;;  %v8881_v50 = vadd.f32 %v8880_v47, %v8879_v13  ;;  %12676 = vrcp.f32 %v8867_v23  ;;  %v8888_v33 = vadd.f32 %v8887_v42, %v20489_v63 }
 0x686   : > { %v9970_v59 = vcombine.low %v9703_v32, %v9705_v53  ;;  %v18521_v61 = vrot.slane %v9978_v30, %v16197_v25  ;;  %12678 = vrcp.f32 %v8874_v4  ;;  %v8894_v19 = vrot.slane %v8893_v22, 1 }
 0x687   : > { %v9969_v57 = vrot.slane %v9962_v27, %v16190_v2  ;;  %12680 = vrcp.f32 %v8881_v50  ;;  %v8901_v1 = vrot.slane %v20494_v60, 1  ;;  %v20495_v24 = vrot.slane %v16904_v56, 2 }
 0x688   : > { %20493 = vst [vmem:[#allocation42_spill] sm:$0xff] %v18521_v61  ;;  %v9977_v40 = vrot.slane %v9970_v59, %v16190_v2  ;;  %v8895_v32 = vadd.f32 %v8894_v19, %v8893_v22  ;;  %v8915_v23 = vrot.slane %v20496_v51, 1  ;;  %v20498_v37 = vrot.slane %v20497_v10, 2  ;;  %v20500_v22 = vld [vmem:[#allocation93_spill] sm:$0xff] }
 0x689   : > { %v8907_v16 = vadd.f32 %v20495_v24, %v16904_v56  ;;  %v8929_v44 = vrot.slane %v20499_v29, 1  ;;  %v8902_v63 = vadd.f32 %v8901_v1, %v20494_v60  ;;  %v18535_v3 = vrot.slane %v9979_v48, %v16197_v25  ;;  %v20503_v60 = vld [vmem:[#allocation106_spill] sm:$0xff] }
 0x68a   : > { %v8921_v13 = vadd.f32 %v20498_v37, %v20497_v10  ;;  %v9994_v4 = vcombine.low %v9969_v57, %v9977_v40  ;;  %v9995_v36 = vcombine.high %v9969_v57, %v9977_v40  ;;  %v8916_v54 = vadd.f32 %v8915_v23, %v20496_v51  ;;  %v20504_v51 = vld [vmem:[#allocation68_spill] sm:$0xff] }
 0x68b   : > { %v8908_v42 = vrot.slane %v8907_v16, 1  ;;  %v20501_v15 = vrot.slane %v20500_v22, 2  ;;  %12682 = vrcp.f32 %v8888_v33  ;;  %v8930_v40 = vadd.f32 %v8929_v44, %v20499_v29  ;;  %v20508_v44 = vld [vmem:[#allocation108_spill] sm:$0xff] }
 0x68c   : > { %v8922_v56 = vrot.slane %v8921_v13, 1  ;;  %v18542_v30 = vrot.slane %v9994_v4, %v16197_v25  ;;  %v10009_v47 = vrot.slane %v9995_v36, %v16197_v25  ;;  %12684 = vrcp.f32 %v8895_v32  ;;  %v20505_v32 = vld [vmem:[#allocation69_spill] sm:$0xff] }
 0x68d   : > { %v8935_v53 = vadd.f32 %v20501_v15, %v20500_v22  ;;  %v8909_v27 = vadd.f32 %v8908_v42, %v8907_v16  ;;  %v12667_v48 = vpop.eup %12666  ;;  %12686 = vrcp.f32 %v8902_v63  ;;  %v8943_v1 = vrot.slane %v20503_v60, 1  ;;  %v20509_v42 = vld [vmem:[#allocation70_spill] sm:$0xff]  ;;  %v20510_v15 = vld [vmem:[#allocation104_spill] sm:$0xff] }
 0x68e   : > { %20502 = vst [vmem:[#allocation47_spill] sm:$0xff] %v18542_v30  ;;  %v8923_v50 = vadd.f32 %v8922_v56, %v8921_v13  ;;  %v10011_v19 = vcombine.high %v18521_v61, %v18542_v30  ;;  %v12669_v24 = vpop.eup %12668  ;;  %v9706_v23 = vmul.f32 %v12667_v48, %v20504_v51  ;;  %v10012_v16 = vcombine.low %v18535_v3, %v10009_v47  ;;  %v20506_v13 = vld [vmem:[#allocation102_spill] sm:$0xff]  ;;  %v20512_v48 = vld [vmem:[#allocation71_spill] sm:$0xff] }
 0x68f   : > { %v8936_v57 = vrot.slane %v8935_v53, 1  ;;  %12688 = vrcp.f32 %v8909_v27  ;;  %v12671_v10 = vpop.eup %12670  ;;  %v9707_v37 = vmul.f32 %v12669_v24, %v20505_v32  ;;  %v20507_v4 = vrot.slane %v20506_v13, 2  ;;  %v20513_v32 = vld [vmem:[#allocation72_spill] sm:$0xff] }
 0x690   : > { %10918 = vrot.lane.b32.xlu0 %v10011_v19, %s13001_s18  ;;  %12690 = vrcp.f32 %v8916_v54  ;;  %v8957_v36 = vrot.slane %v20508_v44, 1  ;;  %v12673_v63 = vpop.eup %12672  ;;  %v9708_v56 = vmul.f32 %v12671_v10, %v20509_v42  ;;  %v10013_v22 = vcombine.high %v18535_v3, %v10009_v47  ;;  %v20514_v10 = vld [vmem:[#allocation117_spill] sm:$0xff]  ;;  %v20515_v47 = vld [vmem:[#allocation74_spill] sm:$0xff] }
 0x691   : > { %v8937_v33 = vadd.f32 %v8936_v57, %v8935_v53  ;;  %v8949_v29 = vadd.f32 %v20507_v4, %v20506_v13  ;;  %12692 = vrcp.f32 %v8923_v50  ;;  %v20511_v53 = vrot.slane %v20510_v15, 2  ;;  %v12675_v57 = vpop.eup %12674 }
 0x692   : > { %v9709_v19 = vmul.f32 %v12673_v63, %v20512_v48  ;;  %12694 = vrcp.f32 %v8930_v40  ;;  %v8944_v54 = vadd.f32 %v8943_v1, %v20503_v60  ;;  %v12677_v51 = vpop.eup %12676  ;;  %v9710_v13 = vmul.f32 %v12675_v57, %v20513_v32  ;;  %v20517_v57 = vld [vmem:[#allocation107_spill] sm:$0xff] }
 0x693   : > { %v8963_v27 = vadd.f32 %v20511_v53, %v20510_v15  ;;  %v8950_v24 = vrot.slane %v8949_v29, 1  ;;  %v10014_v4 = vcombine.low %v9706_v23, %v9708_v56  ;;  %12696 = vrcp.f32 %v8937_v33  ;;  %v12679_v3 = vpop.eup %12678  ;;  %v20516_v53 = vld [vmem:[#allocation75_spill] sm:$0xff]  ;;  %v20519_v56 = vld [vmem:[#allocation78_spill] sm:$0xff] }
 0x694   : > { %v8971_v42 = vrot.slane %v20514_v10, 1  ;;  %v9711_v50 = vmul.f32 %v12677_v51, %v20515_v47  ;;  %v10022_v59 = vcombine.low %v9707_v37, %v9709_v19  ;;  %10982 = vrot.lane.b32.xlu0 %v10012_v16, %s13002_s27  ;;  %v8958_v15 = vadd.f32 %v8957_v36, %v20508_v44  ;;  %v12681_v40 = vpop.eup %12680  ;;  %v20520_v37 = vld [vmem:[#allocation118_spill] sm:$0xff]  ;;  %v20521_v16 = vld [vmem:[#allocation109_spill] sm:$0xff] }
 0x695   : > { %v8964_v63 = vrot.slane %v8963_v27, 1  ;;  %v9712_v60 = vmul.f32 %v12679_v3, %v20516_v53  ;;  %v10021_v1 = vrot.slane %v10014_v4, %v16190_v2  ;;  %v8951_v48 = vadd.f32 %v8950_v24, %v8949_v29 }
 0x696   : > { %v20518_v23 = vrot.slane %v20517_v57, 2  ;;  %v9713_v32 = vmul.f32 %v12681_v40, %v20519_v56  ;;  %v10029_v51 = vrot.slane %v10022_v59, %v16190_v2  ;;  %v8985_v19 = vrot.slane %v20520_v37, 1  ;;  %v20523_v56 = vld [vmem:[#allocation119_spill] sm:$0xff] }
 0x697   : > { %v20522_v44 = vrot.slane %v20521_v16, 2  ;;  %v10030_v47 = vcombine.low %v9710_v13, %v9712_v60  ;;  %v8972_v3 = vadd.f32 %v8971_v42, %v20514_v10  ;;  %12698 = vrcp.f32 %v8944_v54  ;;  %v20524_v42 = vld [vmem:[#allocation80_spill] sm:$0xff] }
 0x698   : > { %v8977_v33 = vadd.f32 %v20518_v23, %v20517_v57  ;;  %v10038_v29 = vcombine.low %v9711_v50, %v9713_v32  ;;  %v10046_v24 = vcombine.low %v10021_v1, %v10029_v51  ;;  %v10047_v4 = vcombine.high %v10021_v1, %v10029_v51  ;;  %11046 = vrot.lane.b32.xlu0 %v10013_v22, %s13003_s9  ;;  %v12683_v40 = vpop.eup %12682 }
 0x699   : > { %v8991_v36 = vadd.f32 %v20522_v44, %v20521_v16  ;;  %v8965_v57 = vadd.f32 %v8964_v63, %v8963_v27  ;;  %v8986_v59 = vadd.f32 %v8985_v19, %v20520_v37  ;;  %12700 = vrcp.f32 %v8951_v48  ;;  %v12685_v30 = vpop.eup %12684  ;;  %v20526_v27 = vld [vmem:[#allocation83_spill] sm:$0xff]  ;;  %v20527_v37 = vld [vmem:[#allocation82_spill] sm:$0xff]  ;;  %v20528_v44 = vld [vmem:[#allocation85_spill] sm:$0xff] }
 0x69a   : > { %v8978_v53 = vrot.slane %v8977_v33, 1  ;;  %v8999_v61 = vrot.slane %v20523_v56, 1  ;;  %v10037_v13 = vrot.slane %v10030_v47, %v16190_v2  ;;  %v10045_v10 = vrot.slane %v10038_v29, %v16190_v2  ;;  %v12687_v60 = vpop.eup %12686 }
 0x69b   : > { %v8992_v23 = vrot.slane %v8991_v36, 1  ;;  %v9714_v54 = vmul.f32 %v12683_v40, %v20524_v42  ;;  %v18589_v1 = vrot.slane %v10046_v24, %v16197_v25  ;;  %v18592_v22 = vrot.slane %v10047_v4, %v16197_v25 }
 0x69c   : > { %v8979_v50 = vadd.f32 %v8978_v53, %v8977_v33  ;;  %v9715_v63 = vmul.f32 %v12685_v30, %v20526_v27  ;;  %12702 = vrcp.f32 %v8958_v15  ;;  %v12689_v48 = vpop.eup %12688  ;;  %v10062_v32 = vcombine.low %v10037_v13, %v10045_v10  ;;  %v20529_v53 = vld [vmem:[#allocation115_spill] sm:$0xff]  ;;  %v20532_v15 = vld [vmem:[#allocation84_spill] sm:$0xff] }
 0x69d   : > { %20525 = vst [vmem:[#allocation61_spill] sm:$0xff] %v18589_v1  ;;  %v10063_v51 = vcombine.high %v10037_v13, %v10045_v10  ;;  %v9716_v19 = vmul.f32 %v12687_v60, %v20527_v37  ;;  %12704 = vrcp.f32 %v8965_v57  ;;  %v12691_v16 = vpop.eup %12690  ;;  %v9717_v47 = vmul.f32 %v12689_v48, %v20528_v44  ;;  %v20533_v60 = vld [vmem:[#allocation87_spill] sm:$0xff]  ;;  %v20534_v48 = vld [vmem:[#allocation89_spill] sm:$0xff] }
 0x69e   : > { %v8993_v33 = vadd.f32 %v8992_v23, %v8991_v36  ;;  %12706 = vrcp.f32 %v8972_v3  ;;  %v20530_v29 = vrot.slane %v20529_v53, 2  ;;  %v12693_v4 = vpop.eup %12692  ;;  %v18601_v40 = vrot.slane %v10062_v32, %v16197_v25  ;;  %v20535_v44 = vld [vmem:[#allocation123_spill] sm:$0xff] }
 0x69f   : > { %v10077_v30 = vrot.slane %v10063_v51, %v16197_v25  ;;  %v9718_v13 = vmul.f32 %v12691_v16, %v20532_v15  ;;  %v10082_v10 = vcombine.low %v9714_v54, %v9716_v19  ;;  %v12695_v42 = vpop.eup %12694  ;;  %v9719_v27 = vmul.f32 %v12693_v4, %v20533_v60  ;;  %v20536_v51 = vld [vmem:[#allocation90_spill] sm:$0xff] }
 0x6a0   : > { %v9005_v24 = vadd.f32 %v20530_v29, %v20529_v53  ;;  %20531 = vst [vmem:[#allocation50_spill] sm:$0xff] %v18601_v40  ;;  %v10090_v36 = vcombine.low %v9715_v63, %v9717_v47  ;;  %12708 = vrcp.f32 %v8979_v50  ;;  %v12697_v3 = vpop.eup %12696  ;;  %v10079_v23 = vcombine.high %v18589_v1, %v18601_v40  ;;  %v20547_v1 = vld [vmem:[#allocation98_spill] sm:$0xff] }
 0x6a1   : > { %v9720_v37 = vmul.f32 %v12695_v42, %v20534_v48  ;;  %v9013_v53 = vrot.slane %v20535_v44, 1  ;;  %v9721_v29 = vmul.f32 %v12697_v3, %v20536_v51  ;;  %v10089_v54 = vrot.slane %v10082_v10, %v16190_v2  ;;  %v20537_v42 = vld [vmem:[#allocation120_spill] sm:$0xff] }
 0x6a2   : > { %v9006_v32 = vrot.slane %v9005_v24, 1  ;;  %v10097_v19 = vrot.slane %v10090_v36, %v16190_v2  ;;  %12710 = vrcp.f32 %v8986_v59  ;;  %10920 = vrot.lane.b32.xlu1 %v10079_v23, %s13001_s18  ;;  %v10080_v50 = vcombine.low %v18592_v22, %v10077_v30  ;;  %v20539_v36 = vld [vmem:[#allocation125_spill] sm:$0xff]  ;;  %v20540_v51 = vld [vmem:[#allocation124_spill] sm:$0xff] }
 0x6a3   : > { %v10098_v63 = vcombine.low %v9718_v13, %v9720_v37  ;;  %12712 = vrcp.f32 %v8993_v33  ;;  %v9000_v16 = vadd.f32 %v8999_v61, %v20523_v56  ;;  %v10106_v47 = vcombine.low %v9719_v27, %v9721_v29  ;;  %v20542_v13 = vld [vmem:[#allocation127_spill] sm:$0xff] }
 0x6a4   : > { %v10114_v4 = vcombine.low %v10089_v54, %v10097_v19  ;;  %v10115_v15 = vcombine.high %v10089_v54, %v10097_v19  ;;  %v20538_v60 = vrot.slane %v20537_v42, 2  ;;  %v12699_v48 = vpop.eup %12698  ;;  %v10081_v10 = vcombine.high %v18592_v22, %v10077_v30  ;;  %v20543_v30 = vld [vmem:[#allocation96_spill] sm:$0xff] }
 0x6a5   : > { %v9027_v59 = vrot.slane %v20539_v36, 1  ;;  %v20541_v23 = vrot.slane %v20540_v51, 2  ;;  %v9041_v33 = vrot.slane %v20542_v13, 1  ;;  %v10105_v61 = vrot.slane %v10098_v63, %v16190_v2 }
 0x6a6   : > { %v9019_v3 = vadd.f32 %v20538_v60, %v20537_v42  ;;  %v10113_v56 = vrot.slane %v10106_v47, %v16190_v2  ;;  %v9007_v27 = vadd.f32 %v9006_v32, %v9005_v24  ;;  %v9014_v37 = vadd.f32 %v9013_v53, %v20535_v44  ;;  %v12701_v29 = vpop.eup %12700  ;;  %10984 = vrot.lane.b32.xlu1 %v10080_v50, %s13002_s27  ;;  %v20546_v53 = vld [vmem:[#allocation97_spill] sm:$0xff] }
 0x6a7   : > { %v9033_v57 = vadd.f32 %v20541_v23, %v20540_v51  ;;  %v18631_v22 = vrot.slane %v10114_v4, %v16197_v25  ;;  %v9722_v54 = vmul.f32 %v12699_v48, %v20543_v30  ;;  %v18635_v51 = vrot.slane %v10115_v15, %v16197_v25  ;;  %v20544_v23 = vld [vmem:[#allocation126_spill] sm:$0xff] }
 0x6a8   : > { %v9020_v19 = vrot.slane %v9019_v3, 1  ;;  %v10130_v60 = vcombine.low %v10105_v61, %v10113_v56  ;;  %v10131_v63 = vcombine.high %v10105_v61, %v10113_v56  ;;  %v20545_v24 = vrot.slane %v20544_v23, 2 }
 0x6a9   : > { %v9034_v42 = vrot.slane %v9033_v57, 1  ;;  %v12703_v44 = vpop.eup %12702  ;;  %v9723_v47 = vmul.f32 %v12701_v29, %v20546_v53  ;;  %v9028_v50 = vadd.f32 %v9027_v59, %v20539_v36  ;;  %v9042_v4 = vadd.f32 %v9041_v33, %v20542_v13  ;;  %v20549_v29 = vld [vmem:[#allocation134_spill] sm:$0xff] }
 0x6aa   : > { %v9047_v32 = vadd.f32 %v20545_v24, %v20544_v23  ;;  %12714 = vrcp.f32 %v9000_v16  ;;  %v12705_v48 = vpop.eup %12704  ;;  %v18644_v30 = vrot.slane %v10130_v60, %v16197_v25  ;;  %v9724_v15 = vmul.f32 %v12703_v44, %v20547_v1  ;;  %11048 = vrot.lane.b32.xlu1 %v10081_v10, %s13003_s9  ;;  %v20548_v23 = vld [vmem:[#allocation99_spill] sm:$0xff]  ;;  %v20551_v1 = vld [vmem:[#allocation138_spill] sm:$0xff]  ;;  %v20552_v60 = vld [vmem:[#allocation100_spill] sm:$0xff] }
 0x6ab   : > { %v9021_v40 = vadd.f32 %v9020_v19, %v9019_v3  ;;  %v12707_v56 = vpop.eup %12706  ;;  %v9725_v24 = vmul.f32 %v12705_v48, %v20548_v23  ;;  %v9035_v26 = vadd.f32 %v9034_v42, %v9033_v57  ;;  %12716 = vrcp.f32 %v9007_v27  ;;  %v20553_v57 = vld [vmem:[#allocation101_spill] sm:$0xff] }
 0x6ac   : > { %v9048_v61 = vrot.slane %v9047_v32, 1  ;;  %v20550_v36 = vrot.slane %v20549_v29, 2  ;;  %v10147_v16 = vcombine.high %v18631_v22, %v18644_v30  ;;  %v10150_v13 = vcombine.low %v9722_v54, %v9724_v15 }
 0x6ad   : > { %v10145_v33 = vrot.slane %v10131_v63, %v16197_v25  ;;  %v9055_v3 = vrot.slane %v20551_v1, 1  ;;  %v12709_v19 = vpop.eup %12708  ;;  %v9726_v44 = vmul.f32 %v12707_v56, %v20552_v60  ;;  %v10158_v10 = vcombine.low %v9723_v47, %v9725_v24  ;;  %v20554_v63 = vld [vmem:[#allocation140_spill] sm:$0xff] }
 0x6ae   : > { %v9061_v59 = vadd.f32 %v20550_v36, %v20549_v29  ;;  %v9049_v53 = vadd.f32 %v9048_v61, %v9047_v32  ;;  %12718 = vrcp.f32 %v9014_v37  ;;  %10922 = vrot.lane.b32.xlu0 %v10147_v16, %s13001_s18  ;;  %v9727_v27 = vmul.f32 %v12709_v19, %v20553_v57  ;;  %v20555_v29 = vld [vmem:[#allocation135_spill] sm:$0xff] }
 0x6af   : > { %v10157_v42 = vrot.slane %v10150_v13, %v16190_v2  ;;  %12720 = vrcp.f32 %v9021_v40  ;;  %v12711_v23 = vpop.eup %12710  ;;  %v10165_v54 = vrot.slane %v10158_v10, %v16190_v2  ;;  %v9069_v15 = vrot.slane %v20554_v63, 1  ;;  %v20557_v37 = vld [vmem:[#allocation103_spill] sm:$0xff]  ;;  %v20558_v40 = vld [vmem:[#allocation105_spill] sm:$0xff] }
 0x6b0   : > { %v9062_v48 = vrot.slane %v9061_v59, 1  ;;  %12722 = vrcp.f32 %v9028_v50  ;;  %v20556_v56 = vrot.slane %v20555_v29, 2  ;;  %v12713_v32 = vpop.eup %12712  ;;  %v9728_v61 = vmul.f32 %v12711_v23, %v20557_v37  ;;  %v20566_v37 = vld [vmem:[#allocation146_spill] sm:$0xff] }
 0x6b1   : > { %v10148_v24 = vcombine.low %v18635_v51, %v10145_v33  ;;  %12724 = vrcp.f32 %v9035_v26  ;;  %v9056_v36 = vadd.f32 %v9055_v3, %v20551_v1  ;;  %v9729_v16 = vmul.f32 %v12713_v32, %v20558_v40  ;;  %v20561_v32 = vld [vmem:[#allocation139_spill] sm:$0xff] }
 0x6b2   : > { %v9075_v47 = vadd.f32 %v20556_v56, %v20555_v29  ;;  %v10182_v13 = vcombine.low %v10157_v42, %v10165_v54  ;;  %v10149_v19 = vcombine.high %v18635_v51, %v10145_v33  ;;  %12726 = vrcp.f32 %v9042_v4  ;;  %v20559_v56 = vld [vmem:[#allocation145_spill] sm:$0xff]  ;;  %v20563_v33 = vld [vmem:[#allocation147_spill] sm:$0xff] }
 0x6b3   : > { %v10166_v50 = vcombine.low %v9726_v44, %v9728_v61  ;;  %10986 = vrot.lane.b32.xlu0 %v10148_v24, %s13002_s27  ;;  %12728 = vrcp.f32 %v9049_v53  ;;  %v9063_v60 = vadd.f32 %v9062_v48, %v9061_v59  ;;  %v10174_v57 = vcombine.low %v9727_v27, %v9729_v16  ;;  %v20564_v27 = vld [vmem:[#allocation141_spill] sm:$0xff] }
 0x6b4   : > { %v9076_v10 = vrot.slane %v9075_v47, 1  ;;  %v10183_v29 = vcombine.high %v10157_v42, %v10165_v54  ;;  %v9070_v23 = vadd.f32 %v9069_v15, %v20554_v63  ;;  %v9083_v26 = vrot.slane %v20559_v56, 1 }
 0x6b5   : > { %v10173_v1 = vrot.slane %v10166_v50, %v16190_v2  ;;  %v18675_v3 = vrot.slane %v10182_v13, %v16197_v25  ;;  %v20562_v51 = vrot.slane %v20561_v32, 2  ;;  %v9097_v44 = vrot.slane %v20563_v33, 1 }
 0x6b6   : > { %v10181_v59 = vrot.slane %v10174_v57, %v16190_v2  ;;  %v9077_v53 = vadd.f32 %v9076_v10, %v9075_v47  ;;  %v20565_v42 = vrot.slane %v20564_v27, 2  ;;  %12730 = vrcp.f32 %v9056_v36 }
 0x6b7   : > { %20560 = vst [vmem:[#allocation63_spill] sm:$0xff] %v18675_v3  ;;  %v9089_v4 = vadd.f32 %v20562_v51, %v20561_v32  ;;  %v12715_v54 = vpop.eup %12714  ;;  %11050 = vrot.lane.b32.xlu0 %v10149_v19, %s13003_s9  ;;  %12732 = vrcp.f32 %v9063_v60  ;;  %v9111_v15 = vrot.slane %v17447_v28, 1  ;;  %v20567_v61 = vrot.slane %v20566_v37, 2  ;;  %v20569_v32 = vld [vmem:[#allocation110_spill] sm:$0xff] }
 0x6b8   : > { %v9103_v48 = vadd.f32 %v20565_v42, %v20564_v27  ;;  %v10198_v40 = vcombine.low %v10173_v1, %v10181_v59  ;;  %v18691_v16 = vrot.slane %v10183_v29, %v16197_v25  ;;  %v10199_v47 = vcombine.high %v10173_v1, %v10181_v59  ;;  %v12717_v50 = vpop.eup %12716  ;;  %v20570_v29 = vld [vmem:[#allocation111_spill] sm:$0xff] }
 0x6b9   : > { %v9090_v63 = vrot.slane %v9089_v4, 1  ;;  %v9117_v24 = vadd.f32 %v20567_v61, %v20566_v37  ;;  %v9084_v36 = vadd.f32 %v9083_v26, %v20559_v56  ;;  %v9098_v10 = vadd.f32 %v9097_v44, %v20563_v33  ;;  %v20572_v44 = vld [vmem:[#allocation112_spill] sm:$0xff] }
 0x6ba   : > { %v9104_v13 = vrot.slane %v9103_v48, 1  ;;  %12734 = vrcp.f32 %v9070_v23  ;;  %v18696_v60 = vrot.slane %v10198_v40, %v16197_v25  ;;  %v10213_v57 = vrot.slane %v10199_v47, %v16197_v25 }
 0x6bb   : > { %v9118_v19 = vrot.slane %v9117_v24, 1  ;;  %v9730_v51 = vmul.f32 %v12715_v54, %v20569_v32  ;;  %v9091_v27 = vadd.f32 %v9090_v63, %v9089_v4  ;;  %v12719_v42 = vpop.eup %12718  ;;  %v9731_v37 = vmul.f32 %v12717_v50, %v20570_v29  ;;  %v20573_v63 = vld [vmem:[#allocation113_spill] sm:$0xff] }
 0x6bc   : > { %20568 = vst [vmem:[#allocation64_spill] sm:$0xff] %v18696_v60  ;;  %12736 = vrcp.f32 %v9077_v53  ;;  %v9112_v1 = vadd.f32 %v9111_v15, %v17447_v28  ;;  %v20571_v56 = vrot.slane %v17439_v12, 2  ;;  %v12721_v23 = vpop.eup %12720  ;;  %v10215_v33 = vcombine.high %v18675_v3, %v18696_v60  ;;  %v20574_v15 = vld [vmem:[#allocation114_spill] sm:$0xff]  ;;  %v20613_v60 = vld [vmem:[#allocation149_spill] sm:$0xff] }
 0x6bd   : > { %v9732_v59 = vmul.f32 %v12719_v42, %v20572_v44  ;;  %v9105_v61 = vadd.f32 %v9104_v13, %v9103_v48  ;;  %v9119_v40 = vadd.f32 %v9118_v19, %v9117_v24  ;;  %v12723_v54 = vpop.eup %12722  ;;  %v10216_v4 = vcombine.low %v18691_v16, %v10213_v57  ;;  %v20575_v48 = vld [vmem:[#allocation116_spill] sm:$0xff]  ;;  %v20577_v44 = vld [vmem:[#allocation122_spill] sm:$0xff] }
 0x6be   : > { %v9131_v26 = vadd.f32 %v20571_v56, %v17439_v12  ;;  %v9733_v47 = vmul.f32 %v12721_v23, %v20573_v63  ;;  %12738 = vrcp.f32 %v9084_v36  ;;  %v9125_v28 = vrot.slane %v17451_v52, 1  ;;  %v12725_v53 = vpop.eup %12724  ;;  %10924 = vrot.lane.b32.xlu1 %v10215_v33, %s13001_s18  ;;  %v20576_v56 = vld [vmem:[#allocation121_spill] sm:$0xff] }
 0x6bf   : > { %v10217_v12 = vcombine.high %v18691_v16, %v10213_v57  ;;  %v9734_v50 = vmul.f32 %v12723_v54, %v20574_v15  ;;  %v10218_v32 = vcombine.low %v9730_v51, %v9732_v59  ;;  %12740 = vrcp.f32 %v9091_v27  ;;  %v12727_v42 = vpop.eup %12726  ;;  %v20578_v51 = vld [vmem:[#allocation153_spill] sm:$0xff]  ;;  %v20580_v54 = vld [vmem:[#allocation155_spill] sm:$0xff] }
 0x6c0   : > { %v9735_v24 = vmul.f32 %v12725_v53, %v20575_v48  ;;  %v10226_v13 = vcombine.low %v9731_v37, %v9733_v47  ;;  %12742 = vrcp.f32 %v9098_v10  ;;  %v9132_v19 = vrot.slane %v9131_v26, 1  ;;  %v12729_v29 = vpop.eup %12728  ;;  %v20581_v47 = vld [vmem:[#allocation154_spill] sm:$0xff] }
 0x6c1   : > { %v9736_v36 = vmul.f32 %v12727_v42, %v20576_v56  ;;  %v10225_v23 = vrot.slane %v10218_v32, %v16190_v2  ;;  %12744 = vrcp.f32 %v9105_v61  ;;  %v9139_v33 = vrot.slane %v17468_v31, 1 }
 0x6c2   : > { %v9737_v16 = vmul.f32 %v12729_v29, %v20577_v44  ;;  %v10233_v57 = vrot.slane %v10226_v13, %v16190_v2  ;;  %v20579_v27 = vrot.slane %v20578_v51, 2  ;;  %v9153_v37 = vrot.slane %v20580_v54, 1  ;;  %10988 = vrot.lane.b32.xlu1 %v10216_v4, %s13002_s27 }
 0x6c3   : > { %v10234_v10 = vcombine.low %v9734_v50, %v9736_v36  ;;  %v9126_v63 = vadd.f32 %v9125_v28, %v17451_v52  ;;  %v20582_v61 = vrot.slane %v20581_v47, 2  ;;  %12746 = vrcp.f32 %v9112_v1  ;;  %v12731_v15 = vpop.eup %12730  ;;  %v20583_v28 = vld [vmem:[#allocation128_spill] sm:$0xff] }
 0x6c4   : > { %v9145_v59 = vadd.f32 %v20579_v27, %v20578_v51  ;;  %v10242_v32 = vcombine.low %v9735_v24, %v9737_v16  ;;  %v10250_v42 = vcombine.low %v10225_v23, %v10233_v57  ;;  %v9133_v48 = vadd.f32 %v9132_v19, %v9131_v26  ;;  %v12733_v29 = vpop.eup %12732  ;;  %v20585_v24 = vld [vmem:[#allocation129_spill] sm:$0xff] }
 0x6c5   : > { %v9159_v53 = vadd.f32 %v20582_v61, %v20581_v47  ;;  %v10241_v56 = vrot.slane %v10234_v10, %v16190_v2  ;;  %v10251_v44 = vcombine.high %v10225_v23, %v10233_v57  ;;  %v9140_v51 = vadd.f32 %v9139_v33, %v17468_v31  ;;  %v20586_v33 = vld [vmem:[#allocation130_spill] sm:$0xff] }
 0x6c6   : > { %v9146_v13 = vrot.slane %v9145_v59, 1  ;;  %v9167_v4 = vrot.slane %v17580_v41, 1  ;;  %v10249_v52 = vrot.slane %v10242_v32, %v16190_v2  ;;  %v9738_v50 = vmul.f32 %v12731_v15, %v20583_v28  ;;  %11052 = vrot.lane.b32.xlu1 %v10217_v12, %s13003_s9  ;;  %v20587_v47 = vld [vmem:[#allocation162_spill] sm:$0xff]  ;;  %v20590_v15 = vld [vmem:[#allocation164_spill] sm:$0xff] }
 0x6c7   : > { %v9154_v36 = vadd.f32 %v9153_v37, %v20580_v54  ;;  %v9160_v1 = vrot.slane %v9159_v53, 1  ;;  %v12735_v27 = vpop.eup %12734  ;;  %v18737_v26 = vrot.slane %v10250_v42, %v16197_v25  ;;  %v9739_v19 = vmul.f32 %v12733_v29, %v20585_v24  ;;  %v20589_v61 = vld [vmem:[#allocation166_spill] sm:$0xff] }
 0x6c8   : > { %v9147_v23 = vadd.f32 %v9146_v13, %v9145_v59  ;;  %12748 = vrcp.f32 %v9119_v40  ;;  %v10266_v31 = vcombine.low %v10241_v56, %v10249_v52  ;;  %v9740_v16 = vmul.f32 %v12735_v27, %v20586_v33  ;;  %v20592_v40 = vld [vmem:[#allocation131_spill] sm:$0xff]  ;;  %v20593_v33 = vld [vmem:[#allocation132_spill] sm:$0xff] }
 0x6c9   : > { %20584 = vst [vmem:[#allocation65_spill] sm:$0xff] %v18737_v26  ;;  %v10267_v57 = vcombine.high %v10241_v56, %v10249_v52  ;;  %12750 = vrcp.f32 %v9126_v63  ;;  %v12737_v10 = vpop.eup %12736  ;;  %v20588_v54 = vrot.slane %v20587_v47, 2  ;;  %v9181_v12 = vrot.slane %v20589_v61, 1 }
 0x6ca   : > { %12752 = vrcp.f32 %v9133_v48  ;;  %v20591_v32 = vrot.slane %v20590_v15, 2  ;;  %v18749_v59 = vrot.slane %v10266_v31, %v16197_v25  ;;  %v9741_v13 = vmul.f32 %v12737_v10, %v20592_v40  ;;  %v20594_v10 = vld [vmem:[#allocation133_spill] sm:$0xff]  ;;  %v20597_v40 = vld [vmem:[#allocation168_spill] sm:$0xff] }
 0x6cb   : > { %v9173_v37 = vadd.f32 %v20588_v54, %v20587_v47  ;;  %v10286_v29 = vcombine.low %v9738_v50, %v9740_v16  ;;  %v10265_v63 = vrot.slane %v10251_v44, %v16197_v25  ;;  %v12739_v56 = vpop.eup %12738  ;;  %v10281_v48 = vrot.slane %v10267_v57, %v16197_v25 }
 0x6cc   : > { %v9187_v42 = vadd.f32 %v20591_v32, %v20590_v15  ;;  %v9161_v52 = vadd.f32 %v9160_v1, %v9159_v53  ;;  %12754 = vrcp.f32 %v9140_v51  ;;  %v9168_v28 = vadd.f32 %v9167_v4, %v17580_v41  ;;  %v12741_v27 = vpop.eup %12740  ;;  %v20595_v53 = vld [vmem:[#allocation136_spill] sm:$0xff]  ;;  %v20596_v1 = vld [vmem:[#allocation137_spill] sm:$0xff] }
 0x6cd   : > { %v10283_v24 = vcombine.high %v18737_v26, %v18749_v59  ;;  %v9742_v47 = vmul.f32 %v12739_v56, %v20593_v33  ;;  %v10294_v31 = vcombine.low %v9739_v19, %v9741_v13  ;;  %v9174_v54 = vrot.slane %v9173_v37, 1  ;;  %v12743_v15 = vpop.eup %12742 }
 0x6ce   : > { %v9743_v50 = vmul.f32 %v12741_v27, %v20594_v10  ;;  %12756 = vrcp.f32 %v9147_v23  ;;  %v9182_v44 = vadd.f32 %v9181_v12, %v20589_v61  ;;  %v9188_v16 = vrot.slane %v9187_v42, 1  ;;  %v12745_v57 = vpop.eup %12744  ;;  %v20598_v27 = vld [vmem:[#allocation167_spill] sm:$0xff] }
 0x6cf   : > { %10926 = vrot.lane.b32.xlu0 %v10283_v24, %s13001_s18  ;;  %v9744_v41 = vmul.f32 %v12743_v15, %v20595_v53  ;;  %v10293_v51 = vrot.slane %v10286_v29, %v16190_v2  ;;  %v10301_v4 = vrot.slane %v10294_v31, %v16190_v2  ;;  %12758 = vrcp.f32 %v9154_v36  ;;  %v20600_v31 = vld [vmem:[#allocation142_spill] sm:$0xff] }
 0x6d0   : > { %v9745_v19 = vmul.f32 %v12745_v57, %v20596_v1  ;;  %v10284_v32 = vcombine.low %v10265_v63, %v10281_v48  ;;  %12760 = vrcp.f32 %v9161_v52  ;;  %v9195_v13 = vrot.slane %v20597_v40, 1  ;;  %v12747_v23 = vpop.eup %12746  ;;  %v20601_v1 = vld [vmem:[#allocation175_spill] sm:$0xff] }
 0x6d1   : > { %v10302_v56 = vcombine.low %v9742_v47, %v9744_v41  ;;  %v10318_v61 = vcombine.low %v10293_v51, %v10301_v4  ;;  %v9175_v12 = vadd.f32 %v9174_v54, %v9173_v37  ;;  %v20599_v24 = vrot.slane %v20598_v27, 2  ;;  %v20602_v41 = vld [vmem:[#allocation171_spill] sm:$0xff] }
 0x6d2   : > { %v10310_v15 = vcombine.low %v9743_v50, %v9745_v19  ;;  %v10319_v10 = vcombine.high %v10293_v51, %v10301_v4  ;;  %v10285_v29 = vcombine.high %v10265_v63, %v10281_v48  ;;  %v9189_v53 = vadd.f32 %v9188_v16, %v9187_v42  ;;  %v20605_v48 = vld [vmem:[#allocation179_spill] sm:$0xff]  ;;  %v20606_v51 = vld [vmem:[#allocation176_spill] sm:$0xff] }
 0x6d3   : > { %v9201_v33 = vadd.f32 %v20599_v24, %v20598_v27  ;;  %v10309_v36 = vrot.slane %v10302_v56, %v16190_v2  ;;  %10990 = vrot.lane.b32.xlu0 %v10284_v32, %s13002_s27  ;;  %v9746_v52 = vmul.f32 %v12747_v23, %v20600_v31  ;;  %v9196_v57 = vadd.f32 %v9195_v13, %v20597_v40 }
 0x6d4   : > { %v9209_v47 = vrot.slane %v20601_v1, 1  ;;  %v10317_v37 = vrot.slane %v10310_v15, %v16190_v2  ;;  %v20603_v27 = vrot.slane %v20602_v41, 2  ;;  %12762 = vrcp.f32 %v9168_v28  ;;  %v20608_v28 = vld [vmem:[#allocation143_spill] sm:$0xff]  ;;  %v20609_v15 = vld [vmem:[#allocation144_spill] sm:$0xff] }
 0x6d5   : > { %v9202_v54 = vrot.slane %v9201_v33, 1  ;;  %v12749_v63 = vpop.eup %12748  ;;  %v18779_v42 = vrot.slane %v10318_v61, %v16197_v25  ;;  %12764 = vrcp.f32 %v9175_v12  ;;  %v9223_v16 = vrot.slane %v20605_v48, 1 }
 0x6d6   : > { %v9215_v50 = vadd.f32 %v20603_v27, %v20602_v41  ;;  %v20607_v4 = vrot.slane %v20606_v51, 2  ;;  %v12751_v32 = vpop.eup %12750  ;;  %v10334_v40 = vcombine.low %v10309_v36, %v10317_v37  ;;  %v18786_v13 = vrot.slane %v10319_v10, %v16197_v25  ;;  %v20611_v27 = vld [vmem:[#allocation148_spill] sm:$0xff] }
 0x6d7   : > { %20604 = vst [vmem:[#allocation66_spill] sm:$0xff] %v18779_v42  ;;  %v10335_v23 = vcombine.high %v10309_v36, %v10317_v37  ;;  %v12753_v24 = vpop.eup %12752  ;;  %11054 = vrot.lane.b32.xlu0 %v10285_v29, %s13003_s9  ;;  %v9747_v61 = vmul.f32 %v12749_v63, %v20608_v28  ;;  %v9748_v12 = vmul.f32 %v12751_v32, %v20609_v15  ;;  %12766 = vrcp.f32 %v9182_v44  ;;  %v20612_v28 = vld [vmem:[#allocation182_spill] sm:$0xff] }
 0x6d8   : > { %v9229_v19 = vadd.f32 %v20607_v4, %v20606_v51  ;;  %v9216_v56 = vrot.slane %v9215_v50, 1  ;;  %v18792_v41 = vrot.slane %v10334_v40, %v16197_v25  ;;  %v9749_v51 = vmul.f32 %v12753_v24, %v20611_v27  ;;  %v20621_v27 = vld [vmem:[#allocation152_spill] sm:$0xff] }
 0x6d9   : > { %v9203_v4 = vadd.f32 %v9202_v54, %v9201_v33  ;;  %v9210_v10 = vadd.f32 %v9209_v47, %v20601_v1  ;;  %v12755_v3 = vpop.eup %12754  ;;  %v10349_v36 = vrot.slane %v10335_v23, %v16197_v25  ;;  %v10354_v37 = vcombine.low %v9746_v52, %v9748_v12  ;;  %v20615_v54 = vld [vmem:[#allocation178_spill] sm:$0xff] }
 0x6da   : > { %v9230_v31 = vrot.slane %v9229_v19, 1  ;;  %20610 = vst [vmem:[#allocation67_spill] sm:$0xff] %v18792_v41  ;;  %12768 = vrcp.f32 %v9189_v53  ;;  %v9224_v29 = vadd.f32 %v9223_v16, %v20605_v48  ;;  %v10351_v63 = vcombine.high %v18779_v42, %v18792_v41  ;;  %v20614_v53 = vld [vmem:[#allocation150_spill] sm:$0xff]  ;;  %v20617_v16 = vld [vmem:[#allocation184_spill] sm:$0xff] }
 0x6db   : > { %v9217_v44 = vadd.f32 %v9216_v56, %v9215_v50  ;;  %v9237_v40 = vrot.slane %v20612_v28, 1  ;;  %v12757_v15 = vpop.eup %12756  ;;  %v9750_v24 = vmul.f32 %v12755_v3, %v20613_v60  ;;  %v10361_v33 = vrot.slane %v10354_v37, %v16190_v2  ;;  %v20618_v56 = vld [vmem:[#allocation151_spill] sm:$0xff] }
 0x6dc   : > { %v9231_v32 = vadd.f32 %v9230_v31, %v9229_v19  ;;  %v10362_v1 = vcombine.low %v9747_v61, %v9749_v51  ;;  %12770 = vrcp.f32 %v9196_v57  ;;  %v12759_v47 = vpop.eup %12758  ;;  %10928 = vrot.lane.b32.xlu1 %v10351_v63, %s13001_s18  ;;  %v9751_v52 = vmul.f32 %v12757_v15, %v20614_v53  ;;  %v20619_v60 = vld [vmem:[#allocation183_spill] sm:$0xff] }
 0x6dd   : > { %12772 = vrcp.f32 %v9203_v4  ;;  %v20616_v48 = vrot.slane %v20615_v54, 2  ;;  %v9251_v19 = vrot.slane %v20617_v16, 1  ;;  %v12761_v23 = vpop.eup %12760  ;;  %v9752_v12 = vmul.f32 %v12759_v47, %v20618_v56 }
 0x6de   : > { %v10369_v3 = vrot.slane %v10362_v1, %v16190_v2  ;;  %12774 = vrcp.f32 %v9210_v10  ;;  %v20620_v57 = vrot.slane %v20619_v60, 2  ;;  %v10352_v31 = vcombine.low %v18786_v13, %v10349_v36 }
 0x6df   : > { %v9243_v50 = vadd.f32 %v20616_v48, %v20615_v54  ;;  %v9753_v51 = vmul.f32 %v12761_v23, %v20621_v27  ;;  %12776 = vrcp.f32 %v9217_v44  ;;  %v10370_v37 = vcombine.low %v9750_v24, %v9752_v12  ;;  %v20622_v54 = vld [vmem:[#allocation185_spill] sm:$0xff]  ;;  %v20624_v12 = vld [vmem:[#allocation186_spill] sm:$0xff]  ;;  %v20627_v27 = vld [vmem:[#allocation196_spill] sm:$0xff] }
 0x6e0   : > { %v9257_v61 = vadd.f32 %v20620_v57, %v20619_v60  ;;  %v10386_v63 = vcombine.low %v10361_v33, %v10369_v3  ;;  %v10387_v15 = vcombine.high %v10361_v33, %v10369_v3  ;;  %10992 = vrot.lane.b32.xlu1 %v10352_v31, %s13002_s27  ;;  %v10353_v47 = vcombine.high %v18786_v13, %v10349_v36 }
 0x6e1   : > { %v9244_v4 = vrot.slane %v9243_v50, 1  ;;  %v10378_v1 = vcombine.low %v9751_v52, %v9753_v51  ;;  %v9238_v10 = vadd.f32 %v9237_v40, %v20612_v28  ;;  %v20623_v48 = vrot.slane %v20622_v54, 2  ;;  %v12763_v60 = vpop.eup %12762  ;;  %v20626_v40 = vld [vmem:[#allocation156_spill] sm:$0xff] }
 0x6e2   : > { %v9258_v53 = vrot.slane %v9257_v61, 1  ;;  %v10377_v23 = vrot.slane %v10370_v37, %v16190_v2  ;;  %v9252_v24 = vadd.f32 %v9251_v19, %v20617_v16  ;;  %v9265_v33 = vrot.slane %v20624_v12, 1  ;;  %v12765_v3 = vpop.eup %12764 }
 0x6e3   : > { %v9271_v56 = vadd.f32 %v20623_v48, %v20622_v54  ;;  %v9245_v44 = vadd.f32 %v9244_v4, %v9243_v50  ;;  %v10385_v57 = vrot.slane %v10378_v1, %v16190_v2  ;;  %v18827_v13 = vrot.slane %v10386_v63, %v16197_v25  ;;  %v20628_v4 = vld [vmem:[#allocation193_spill] sm:$0xff]  ;;  %v20631_v54 = vld [vmem:[#allocation158_spill] sm:$0xff] }
 0x6e4   : > { %v18830_v36 = vrot.slane %v10387_v15, %v16197_v25  ;;  %v9754_v52 = vmul.f32 %v12763_v60, %v20626_v40  ;;  %v9259_v31 = vadd.f32 %v9258_v53, %v9257_v61  ;;  %12778 = vrcp.f32 %v9224_v29  ;;  %v12767_v51 = vpop.eup %12766  ;;  %11056 = vrot.lane.b32.xlu1 %v10353_v47, %s13003_s9  ;;  %v20630_v1 = vld [vmem:[#allocation157_spill] sm:$0xff] }
 0x6e5   : > { %20625 = vst [vmem:[#allocation73_spill] sm:$0xff] %v18827_v13  ;;  %v9272_v28 = vrot.slane %v9271_v56, 1  ;;  %v9279_v50 = vrot.slane %v20627_v27, 1  ;;  %v10402_v16 = vcombine.low %v10377_v23, %v10385_v57  ;;  %v10403_v19 = vcombine.high %v10377_v23, %v10385_v57 }
 0x6e6   : > { %12780 = vrcp.f32 %v9231_v32  ;;  %v20629_v37 = vrot.slane %v20628_v4, 2  ;;  %v9755_v15 = vmul.f32 %v12765_v3, %v20630_v1  ;;  %v9756_v48 = vmul.f32 %v12767_v51, %v20631_v54  ;;  %v20633_v32 = vld [vmem:[#allocation159_spill] sm:$0xff] }
 0x6e7   : > { %v9266_v60 = vadd.f32 %v9265_v33, %v20624_v12  ;;  %12782 = vrcp.f32 %v9238_v10  ;;  %v12769_v29 = vpop.eup %12768  ;;  %v18842_v61 = vrot.slane %v10402_v16, %v16197_v25  ;;  %v10417_v53 = vrot.slane %v10403_v19, %v16197_v25  ;;  %v20634_v12 = vld [vmem:[#allocation199_spill] sm:$0xff] }
 0x6e8   : > { %v9285_v63 = vadd.f32 %v20629_v37, %v20628_v4  ;;  %v9273_v47 = vadd.f32 %v9272_v28, %v9271_v56  ;;  %12784 = vrcp.f32 %v9245_v44  ;;  %v9757_v23 = vmul.f32 %v12769_v29, %v20633_v32  ;;  %v20635_v4 = vld [vmem:[#allocation160_spill] sm:$0xff]  ;;  %v20639_v54 = vld [vmem:[#allocation163_spill] sm:$0xff] }
 0x6e9   : > { %20632 = vst [vmem:[#allocation77_spill] sm:$0xff] %v18842_v61  ;;  %v10422_v57 = vcombine.low %v9754_v52, %v9756_v48  ;;  %12786 = vrcp.f32 %v9252_v24  ;;  %v9280_v40 = vadd.f32 %v9279_v50, %v20627_v27  ;;  %v12771_v3 = vpop.eup %12770  ;;  %v10419_v51 = vcombine.high %v18827_v13, %v18842_v61  ;;  %v20636_v24 = vld [vmem:[#allocation161_spill] sm:$0xff]  ;;  %v20637_v27 = vld [vmem:[#allocation194_spill] sm:$0xff]  ;;  %v20640_v29 = vld [vmem:[#allocation204_spill] sm:$0xff] }
 0x6ea   : > { %12788 = vrcp.f32 %v9259_v31  ;;  %v9286_v10 = vrot.slane %v9285_v63, 1  ;;  %v9293_v33 = vrot.slane %v20634_v12, 1  ;;  %v12773_v16 = vpop.eup %12772  ;;  %v9758_v37 = vmul.f32 %v12771_v3, %v20635_v4 }
 0x6eb   : > { %v10430_v19 = vcombine.low %v9755_v15, %v9757_v23  ;;  %v10420_v56 = vcombine.low %v18830_v36, %v10417_v53  ;;  %12790 = vrcp.f32 %v9266_v60  ;;  %v12775_v44 = vpop.eup %12774  ;;  %10930 = vrot.lane.b32.xlu0 %v10419_v51, %s13001_s18  ;;  %v9759_v28 = vmul.f32 %v12773_v16, %v20636_v24  ;;  %v20641_v60 = vld [vmem:[#allocation197_spill] sm:$0xff]  ;;  %v20645_v24 = vld [vmem:[#allocation200_spill] sm:$0xff] }
 0x6ec   : > { %v10429_v52 = vrot.slane %v10422_v57, %v16190_v2  ;;  %12792 = vrcp.f32 %v9273_v47  ;;  %v20638_v31 = vrot.slane %v20637_v27, 2  ;;  %v12777_v1 = vpop.eup %12776  ;;  %v9760_v48 = vmul.f32 %v12775_v44, %v20639_v54  ;;  %v20643_v51 = vld [vmem:[#allocation165_spill] sm:$0xff] }
 0x6ed   : > { %v10437_v15 = vrot.slane %v10430_v19, %v16190_v2  ;;  %v9307_v32 = vrot.slane %v20640_v29, 1  ;;  %v20642_v23 = vrot.slane %v20641_v60, 2  ;;  %v9761_v16 = vmul.f32 %v12777_v1, %v20643_v51  ;;  %v20644_v57 = vld [vmem:[#allocation205_spill] sm:$0xff] }
 0x6ee   : > { %v9299_v50 = vadd.f32 %v20638_v31, %v20637_v27  ;;  %v9321_v47 = vrot.slane %v20644_v57, 1  ;;  %v20646_v13 = vrot.slane %v20645_v24, 2  ;;  %v10438_v31 = vcombine.low %v9758_v37, %v9760_v48 }
 0x6ef   : > { %v9313_v3 = vadd.f32 %v20642_v23, %v20641_v60  ;;  %v10454_v61 = vcombine.low %v10429_v52, %v10437_v15  ;;  %v10421_v44 = vcombine.high %v18830_v36, %v10417_v53  ;;  %v9287_v19 = vadd.f32 %v9286_v10, %v9285_v63  ;;  %10994 = vrot.lane.b32.xlu0 %v10420_v56, %s13002_s27  ;;  %v20647_v10 = vld [vmem:[#allocation169_spill] sm:$0xff] }
 0x6f0   : > { %v9300_v4 = vrot.slane %v9299_v50, 1  ;;  %v9327_v27 = vadd.f32 %v20646_v13, %v20645_v24  ;;  %v10446_v54 = vcombine.low %v9759_v28, %v9761_v16  ;;  %v10455_v42 = vcombine.high %v10429_v52, %v10437_v15  ;;  %v20650_v16 = vld [vmem:[#allocation172_spill] sm:$0xff] }
 0x6f1   : > { %v9294_v60 = vadd.f32 %v9293_v33, %v20634_v12  ;;  %v9314_v23 = vrot.slane %v9313_v3, 1  ;;  %v10445_v1 = vrot.slane %v10438_v31, %v16190_v2  ;;  %v9308_v41 = vadd.f32 %v9307_v32, %v20640_v29  ;;  %v12779_v13 = vpop.eup %12778  ;;  %v20649_v29 = vld [vmem:[#allocation170_spill] sm:$0xff] }
 0x6f2   : > { %v9301_v51 = vadd.f32 %v9300_v4, %v9299_v50  ;;  %v9322_v26 = vadd.f32 %v9321_v47, %v20644_v57  ;;  %v10453_v37 = vrot.slane %v10446_v54, %v16190_v2  ;;  %v18877_v36 = vrot.slane %v10454_v61, %v16197_v25  ;;  %v20651_v47 = vld [vmem:[#allocation173_spill] sm:$0xff] }
 0x6f3   : > { %v9328_v63 = vrot.slane %v9327_v27, 1  ;;  %12794 = vrcp.f32 %v9280_v40  ;;  %v12781_v53 = vpop.eup %12780  ;;  %v9762_v56 = vmul.f32 %v12779_v13, %v20647_v10  ;;  %v9315_v12 = vadd.f32 %v9314_v23, %v9313_v3  ;;  %11058 = vrot.lane.b32.xlu0 %v10421_v44, %s13003_s9  ;;  %v20654_v10 = vld [vmem:[#allocation180_spill] sm:$0xff] }
 0x6f4   : > { %12796 = vrcp.f32 %v9287_v19  ;;  %v9335_v33 = vrot.slane %v17985_v20, 1  ;;  %v12783_v28 = vpop.eup %12782  ;;  %v10470_v52 = vcombine.low %v10445_v1, %v10453_v37  ;;  %v10471_v50 = vcombine.high %v10445_v1, %v10453_v37  ;;  %v20652_v19 = vld [vmem:[#allocation174_spill] sm:$0xff] }
 0x6f5   : > { %12798 = vrcp.f32 %v9294_v60  ;;  %v20648_v48 = vrot.slane %v17964_v46, 2  ;;  %v12785_v15 = vpop.eup %12784  ;;  %v10469_v40 = vrot.slane %v10455_v42, %v16197_v25  ;;  %v9763_v32 = vmul.f32 %v12781_v53, %v20649_v29 }
 0x6f6   : > { %v9764_v3 = vmul.f32 %v12783_v28, %v20650_v16  ;;  %12800 = vrcp.f32 %v9301_v51  ;;  %v12787_v4 = vpop.eup %12786  ;;  %v18889_v57 = vrot.slane %v10470_v52, %v16197_v25  ;;  %v9765_v24 = vmul.f32 %v12785_v15, %v20651_v47  ;;  %v20653_v51 = vld [vmem:[#allocation177_spill] sm:$0xff]  ;;  %v20657_v15 = vld [vmem:[#allocation211_spill] sm:$0xff] }
 0x6f7   : > { %v9341_v61 = vadd.f32 %v20648_v48, %v17964_v46  ;;  %v9329_v31 = vadd.f32 %v9328_v63, %v9327_v27  ;;  %12802 = vrcp.f32 %v9308_v41  ;;  %v12789_v44 = vpop.eup %12788  ;;  %v9766_v54 = vmul.f32 %v12787_v4, %v20652_v19 }
 0x6f8   : > { %v10490_v46 = vcombine.low %v9762_v56, %v9764_v3  ;;  %12804 = vrcp.f32 %v9315_v12  ;;  %v9336_v42 = vadd.f32 %v9335_v33, %v17985_v20  ;;  %v12791_v60 = vpop.eup %12790  ;;  %v10487_v23 = vcombine.high %v18877_v36, %v18889_v57  ;;  %v20655_v56 = vld [vmem:[#allocation181_spill] sm:$0xff] }
 0x6f9   : > { %v10485_v1 = vrot.slane %v10471_v50, %v16197_v25  ;;  %v9767_v13 = vmul.f32 %v12789_v44, %v20653_v51  ;;  %v9342_v37 = vrot.slane %v9341_v61, 1  ;;  %v12793_v53 = vpop.eup %12792  ;;  %v9768_v27 = vmul.f32 %v12791_v60, %v20654_v10  ;;  %v20659_v44 = vld [vmem:[#allocation25_spill] sm:$0xff]  ;;  %v20662_v10 = vld [vmem:[#allocation187_spill] sm:$0xff] }
 0x6fa   : > { %v10497_v41 = vrot.slane %v10490_v46, %v16190_v2  ;;  %v10498_v63 = vcombine.low %v9763_v32, %v9765_v24  ;;  %12806 = vrcp.f32 %v9322_v26  ;;  %10932 = vrot.lane.b32.xlu1 %v10487_v23, %s13001_s18  ;;  %v9769_v20 = vmul.f32 %v12793_v53, %v20655_v56 }
 0x6fb   : > { %12808 = vrcp.f32 %v9329_v31  ;;  %v9349_v12 = vrot.slane %v17987_v0, 1  ;;  %v20656_v33 = vrot.slane %v17979_v18, 2  ;;  %v10506_v50 = vcombine.low %v9766_v54, %v9768_v27 }
 0x6fc   : > { %v10505_v52 = vrot.slane %v10498_v63, %v16190_v2  ;;  %v9363_v48 = vrot.slane %v18002_v5, 1  ;;  %v20658_v29 = vrot.slane %v20657_v15, 2  ;;  %v10488_v32 = vcombine.low %v10469_v40, %v10485_v1 }
 0x6fd   : > { %v9355_v28 = vadd.f32 %v20656_v33, %v17979_v18  ;;  %v10514_v16 = vcombine.low %v9767_v13, %v9769_v20  ;;  %v9343_v3 = vadd.f32 %v9342_v37, %v9341_v61  ;;  %v10489_v47 = vcombine.high %v10469_v40, %v10485_v1  ;;  %v20660_v61 = vld [vmem:[#allocation28_spill] sm:$0xff] }
 0x6fe   : > { %v9369_v26 = vadd.f32 %v20658_v29, %v20657_v15  ;;  %v10522_v24 = vcombine.low %v10497_v41, %v10505_v52  ;;  %v9350_v31 = vadd.f32 %v9349_v12, %v17987_v0  ;;  %v9377_v19 = vrot.slane %v20659_v44, 1  ;;  %10996 = vrot.lane.b32.xlu1 %v10488_v32, %s13002_s27  ;;  %v20665_v15 = vld [vmem:[#allocation190_spill] sm:$0xff] }
 0x6ff   : > { %v9356_v4 = vrot.slane %v9355_v28, 1  ;;  %v10513_v18 = vrot.slane %v10506_v50, %v16190_v2  ;;  %v10521_v54 = vrot.slane %v10514_v16, %v16190_v2  ;;  %v10523_v46 = vcombine.high %v10497_v41, %v10505_v52  ;;  %v20663_v41 = vld [vmem:[#allocation188_spill] sm:$0xff]  ;;  %v20666_v16 = vld [vmem:[#allocation221_spill] sm:$0xff] }
 0x700   : > { %v9370_v60 = vrot.slane %v9369_v26, 1  ;;  %v12795_v23 = vpop.eup %12794  ;;  %v9364_v13 = vadd.f32 %v9363_v48, %v18002_v5  ;;  %v20661_v40 = vrot.slane %v20660_v61, 2  ;;  %12810 = vrcp.f32 %v9336_v42 }
 0x701   : > { %v9357_v51 = vadd.f32 %v9356_v4, %v9355_v28  ;;  %v12797_v0 = vpop.eup %12796  ;;  %v18921_v37 = vrot.slane %v10522_v24, %v16197_v25  ;;  %v10538_v53 = vcombine.low %v10513_v18, %v10521_v54  ;;  %v9770_v27 = vmul.f32 %v12795_v23, %v20662_v10  ;;  %v20664_v28 = vld [vmem:[#allocation189_spill] sm:$0xff] }
 0x702   : > { %v9383_v1 = vadd.f32 %v20661_v40, %v20660_v61  ;;  %v10539_v63 = vcombine.high %v10513_v18, %v10521_v54  ;;  %v12799_v56 = vpop.eup %12798  ;;  %v9771_v20 = vmul.f32 %v12797_v0, %v20663_v41  ;;  %v9378_v12 = vadd.f32 %v9377_v19, %v20659_v44  ;;  %11060 = vrot.lane.b32.xlu1 %v10489_v47, %s13003_s9  ;;  %v20667_v18 = vld [vmem:[#allocation191_spill] sm:$0xff]  ;;  %v20671_v0 = vld [vmem:[#allocation12_spill] sm:$0xff] }
 0x703   : > { %12812 = vrcp.f32 %v9343_v3  ;;  %v12801_v5 = vpop.eup %12800  ;;  %v18928_v42 = vrot.slane %v10538_v53, %v16197_v25  ;;  %v9772_v52 = vmul.f32 %v12799_v56, %v20664_v28  ;;  %v9371_v50 = vadd.f32 %v9370_v60, %v9369_v26  ;;  %v20668_v26 = vld [vmem:[#allocation192_spill] sm:$0xff]  ;;  %v20673_v56 = vld [vmem:[#allocation219_spill] sm:$0xff] }
 0x704   : > { %v9384_v33 = vrot.slane %v9383_v1, 1  ;;  %12814 = vrcp.f32 %v9350_v31  ;;  %v12803_v48 = vpop.eup %12802  ;;  %v9773_v29 = vmul.f32 %v12801_v5, %v20665_v15  ;;  %v10537_v32 = vrot.slane %v10523_v46, %v16197_v25 }
 0x705   : > { %12816 = vrcp.f32 %v9357_v51  ;;  %v9391_v4 = vrot.slane %v20666_v16, 1  ;;  %v12805_v24 = vpop.eup %12804  ;;  %v10555_v3 = vcombine.high %v18921_v37, %v18928_v42  ;;  %v10558_v47 = vcombine.low %v9770_v27, %v9772_v52  ;;  %v20669_v51 = vld [vmem:[#allocation217_spill] sm:$0xff] }
 0x706   : > { %v10553_v44 = vrot.slane %v10539_v63, %v16197_v25  ;;  %v9385_v19 = vadd.f32 %v9384_v33, %v9383_v1  ;;  %v9774_v54 = vmul.f32 %v12803_v48, %v20667_v18  ;;  %v9775_v31 = vmul.f32 %v12805_v24, %v20668_v26  ;;  %v20672_v1 = vld [vmem:[#allocation195_spill] sm:$0xff] }
 0x707   : > { %v10566_v60 = vcombine.low %v9771_v20, %v9773_v29  ;;  %12818 = vrcp.f32 %v9364_v13  ;;  %v12807_v23 = vpop.eup %12806  ;;  %10934 = vrot.lane.b32.xlu0 %v10555_v3, %s13001_s18  ;;  %v10565_v46 = vrot.slane %v10558_v47, %v16190_v2  ;;  %v20670_v61 = vrot.slane %v20669_v51, 2  ;;  %v20675_v20 = vld [vmem:[#allocation198_spill] sm:$0xff] }
 0x708   : > { %12820 = vrcp.f32 %v9371_v50  ;;  %v9405_v53 = vrot.slane %v20671_v0, 1  ;;  %v12809_v10 = vpop.eup %12808  ;;  %v9776_v27 = vmul.f32 %v12807_v23, %v20672_v1  ;;  %v20674_v13 = vrot.slane %v20673_v56, 2 }
 0x709   : > { %v9397_v40 = vadd.f32 %v20670_v61, %v20669_v51  ;;  %v10573_v63 = vrot.slane %v10566_v60, %v16190_v2  ;;  %12822 = vrcp.f32 %v9378_v12  ;;  %v9777_v33 = vmul.f32 %v12809_v10, %v20675_v20  ;;  %v20679_v10 = vld [vmem:[#allocation201_spill] sm:$0xff] }
 0x70a   : > { %v9411_v41 = vadd.f32 %v20674_v13, %v20673_v56  ;;  %v10556_v5 = vcombine.low %v10537_v32, %v10553_v44  ;;  %12824 = vrcp.f32 %v9385_v19  ;;  %v10574_v52 = vcombine.low %v9774_v54, %v9776_v27 }
 0x70b   : > { %v9398_v28 = vrot.slane %v9397_v40, 1  ;;  %v10590_v50 = vcombine.low %v10565_v46, %v10573_v63  ;;  %v9392_v48 = vadd.f32 %v9391_v4, %v20666_v16  ;;  %v20676_v29 = vrot.slane %v18516_v58, 4 }
 0x70c   : > { %v9412_v15 = vrot.slane %v9411_v41, 1  ;;  %v10582_v12 = vcombine.low %v9775_v31, %v9777_v33  ;;  %10998 = vrot.lane.b32.xlu0 %v10556_v5, %s13002_s27  ;;  %v10591_v3 = vcombine.high %v10565_v46, %v10573_v63  ;;  %v20677_v47 = vrot.slane %v18108_v38, 2  ;;  %v20680_v63 = vld [vmem:[#allocation202_spill] sm:$0xff]  ;;  %v20681_v33 = vld [vmem:[#allocation203_spill] sm:$0xff] }
 0x70d   : > { %v18955_v24 = vadd.f32 %v20676_v29, %v18516_v58  ;;  %v10557_v19 = vcombine.high %v10537_v32, %v10553_v44  ;;  %v9399_v26 = vadd.f32 %v9398_v28, %v9397_v40  ;;  %v9406_v54 = vadd.f32 %v9405_v53, %v20671_v0  ;;  %v12811_v4 = vpop.eup %12810  ;;  %v18972_v44 = vpop.permute.xlu0 %10914 }
 0x70e   : > { %v9425_v18 = vadd.f32 %v20677_v47, %v18108_v38  ;;  %v9419_v16 = vrot.slane %v18262_v7, 1  ;;  %v10581_v60 = vrot.slane %v10574_v52, %v16190_v2  ;;  %v10589_v58 = vrot.slane %v10582_v12, %v16190_v2  ;;  %v20682_v52 = vld [vmem:[#allocation206_spill] sm:$0xff] }
 0x70f   : > { %v18966_v31 = vrot.slane %v10590_v50, %v16197_v25  ;;  %v9413_v46 = vadd.f32 %v9412_v15, %v9411_v41  ;;  %v9433_v51 = vrot.slane %v18274_v21, 1  ;;  %v20678_v38 = vrot.slane %v18250_v43, 2  ;;  %v20683_v15 = vld [vmem:[#allocation45_spill] sm:$0xff] }
 0x710   : > { %v9426_v23 = vrot.slane %v9425_v18, 1  ;;  %12826 = vrcp.f32 %v9392_v48  ;;  %v12813_v61 = vpop.eup %12812  ;;  %v10606_v40 = vcombine.low %v10581_v60, %v10589_v58  ;;  %v18975_v0 = vrot.slane %v10591_v3, %v16197_v25  ;;  %11062 = vrot.lane.b32.xlu0 %v10557_v19, %s13003_s9 }
 0x711   : > { %v9439_v32 = vadd.f32 %v20678_v38, %v18250_v43  ;;  %v10607_v53 = vcombine.high %v10581_v60, %v10589_v58  ;;  %v9778_v1 = vmul.f32 %v12811_v4, %v20679_v10  ;;  %v12815_v27 = vpop.eup %12814  ;;  %v9779_v56 = vmul.f32 %v12813_v61, %v20680_v63  ;;  %v20686_v60 = vld [vmem:[#allocation20_spill] sm:$0xff]  ;;  %v18995_v58 = vpop.permute.xlu0 %10978 }
 0x712   : > { %v9420_v13 = vadd.f32 %v9419_v16, %v18262_v7  ;;  %12828 = vrcp.f32 %v9399_v26  ;;  %v12817_v43 = vpop.eup %12816  ;;  %v18982_v20 = vrot.slane %v10606_v40, %v16197_v25  ;;  %v9780_v5 = vmul.f32 %v12815_v27, %v20681_v33 }
 0x713   : > { %v9440_v41 = vrot.slane %v9439_v32, 1  ;;  %v9427_v28 = vadd.f32 %v9426_v23, %v9425_v18  ;;  %12830 = vrcp.f32 %v9406_v54  ;;  %v9781_v50 = vmul.f32 %v12817_v43, %v20682_v52  ;;  %v20685_v18 = vld [vmem:[#allocation207_spill] sm:$0xff] }
 0x714   : > { %v9434_v48 = vadd.f32 %v9433_v51, %v18274_v21  ;;  %12832 = vrcp.f32 %v9413_v46  ;;  %v20684_v29 = vrot.slane %v20683_v15, 2  ;;  %v12819_v7 = vpop.eup %12818  ;;  %v10623_v3 = vcombine.high %v18966_v31, %v18982_v20  ;;  %v20687_v46 = vld [vmem:[#allocation208_spill] sm:$0xff] }
 0x715   : > { %v10621_v47 = vrot.slane %v10607_v53, %v16197_v25  ;;  %v10626_v19 = vcombine.low %v9778_v1, %v9780_v5  ;;  %v9441_v26 = vadd.f32 %v9440_v41, %v9439_v32  ;;  %v12821_v16 = vpop.eup %12820  ;;  %v9782_v54 = vmul.f32 %v12819_v7, %v20685_v18  ;;  %v20688_v32 = vld [vmem:[#allocation209_spill] sm:$0xff]  ;;  %v20689_v1 = vld [vmem:[#allocation54_spill] sm:$0xff] }
 0x716   : > { %v9453_v12 = vadd.f32 %v20684_v29, %v20683_v15  ;;  %v10634_v4 = vcombine.low %v9779_v56, %v9781_v50  ;;  %12834 = vrcp.f32 %v9420_v13  ;;  %v9447_v21 = vrot.slane %v20686_v60, 1  ;;  %v12823_v23 = vpop.eup %12822  ;;  %10936 = vrot.lane.b32.xlu1 %v10623_v3, %s13001_s18  ;;  %v20690_v56 = vld [vmem:[#allocation210_spill] sm:$0xff]  ;;  %v20693_v50 = vld [vmem:[#allocation55_spill] sm:$0xff]  ;;  %v20694_v3 = vld [vmem:[#allocation40_spill] sm:$0xff] }
 0x717   : > { %v9783_v51 = vmul.f32 %v12821_v16, %v20687_v46  ;;  %v10633_v38 = vrot.slane %v10626_v19, %v16190_v2  ;;  %12836 = vrcp.f32 %v9427_v28  ;;  %v12825_v40 = vpop.eup %12824  ;;  %v9784_v53 = vmul.f32 %v12823_v23, %v20688_v32  ;;  %v20691_v41 = vld [vmem:[#allocation46_spill] sm:$0xff]  ;;  %v19017_v23 = vpop.permute.xlu0 %11042 }
 0x718   : > { %v9454_v61 = vrot.slane %v9453_v12, 1  ;;  %v10641_v10 = vrot.slane %v10634_v4, %v16190_v2  ;;  %12838 = vrcp.f32 %v9434_v48  ;;  %v9461_v27 = vrot.slane %v20689_v1, 1 }
 0x719   : > { %v10624_v63 = vcombine.low %v18975_v0, %v10621_v47  ;;  %v9785_v13 = vmul.f32 %v12825_v40, %v20690_v56  ;;  %12840 = vrcp.f32 %v9441_v26  ;;  %v20692_v43 = vrot.slane %v20691_v41, 2 }
 0x71a   : > { %v10642_v5 = vcombine.low %v9782_v54, %v9784_v53  ;;  %v10658_v28 = vcombine.low %v10633_v38, %v10641_v10  ;;  %v9448_v52 = vadd.f32 %v9447_v21, %v20686_v60  ;;  %v9475_v15 = vrot.slane %v20693_v50, 1  ;;  %v20697_v53 = vld [vmem:[#allocation27_spill] sm:$0xff] }
 0x71b   : > { %v9467_v33 = vadd.f32 %v20692_v43, %v20691_v41  ;;  %11000 = vrot.lane.b32.xlu1 %v10624_v63, %s13002_s27  ;;  %v10650_v48 = vcombine.low %v9783_v51, %v9785_v13  ;;  %v9455_v29 = vadd.f32 %v9454_v61, %v9453_v12  ;;  %v20695_v19 = vrot.slane %v20694_v3, 2  ;;  %v20698_v63 = vld [vmem:[#allocation212_spill] sm:$0xff]  ;;  %v19031_v43 = vpop.permute.xlu1 %10916 }
 0x71c   : > { %v10625_v26 = vcombine.high %v18975_v0, %v10621_v47  ;;  %v10659_v18 = vcombine.high %v10633_v38, %v10641_v10  ;;  %v9462_v4 = vadd.f32 %v9461_v27, %v20689_v1  ;;  %v9489_v54 = vrot.slane %v18451_v45, 1 }
 0x71d   : > { %v9468_v7 = vrot.slane %v9467_v33, 1  ;;  %v9481_v16 = vadd.f32 %v20695_v19, %v20694_v3  ;;  %v12827_v60 = vpop.eup %12826  ;;  %v10649_v21 = vrot.slane %v10642_v5, %v16190_v2  ;;  %v10657_v46 = vrot.slane %v10650_v48, %v16190_v2  ;;  %v20699_v5 = vld [vmem:[#allocation213_spill] sm:$0xff]  ;;  %v19042_v3 = vpop.permute.xlu0 %10918 }
 0x71e   : > { %v19022_v61 = vrot.slane %v10658_v28, %v16197_v25  ;;  %v9476_v40 = vadd.f32 %v9475_v15, %v20693_v50  ;;  %v20696_v0 = vrot.slane %v18429_v8, 2  ;;  %12842 = vrcp.f32 %v9448_v52  ;;  %v20700_v50 = vld [vmem:[#allocation214_spill] sm:$0xff] }
 0x71f   : > { %v9469_v12 = vadd.f32 %v9468_v7, %v9467_v33  ;;  %v9482_v51 = vrot.slane %v9481_v16, 1  ;;  %v12829_v38 = vpop.eup %12828  ;;  %11064 = vrot.lane.b32.xlu1 %v10625_v26, %s13003_s9  ;;  %v10674_v32 = vcombine.low %v10649_v21, %v10657_v46  ;;  %v9786_v10 = vmul.f32 %v12827_v60, %v20697_v53  ;;  %v20702_v60 = vld [vmem:[#allocation215_spill] sm:$0xff] }
 0x720   : > { %v9495_v47 = vadd.f32 %v20696_v0, %v18429_v8  ;;  %v10675_v1 = vcombine.high %v10649_v21, %v10657_v46  ;;  %12844 = vrcp.f32 %v9455_v29  ;;  %v12831_v27 = vpop.eup %12830  ;;  %v9787_v56 = vmul.f32 %v12829_v38, %v20698_v63 }
 0x721   : > { %v9483_v13 = vadd.f32 %v9482_v51, %v9481_v16  ;;  %12846 = vrcp.f32 %v9462_v4  ;;  %v12833_v33 = vpop.eup %12832  ;;  %v19034_v8 = vrot.slane %v10674_v32, %v16197_v25  ;;  %v9788_v28 = vmul.f32 %v12831_v27, %v20699_v5  ;;  %v20705_v27 = vld [vmem:[#allocation220_spill] sm:$0xff] }
 0x722   : > { %v9496_v41 = vrot.slane %v9495_v47, 1  ;;  %v9490_v52 = vadd.f32 %v9489_v54, %v18451_v45  ;;  %12848 = vrcp.f32 %v9469_v12  ;;  %v9789_v15 = vmul.f32 %v12833_v33, %v20700_v50 }
 0x723   : > { %12850 = vrcp.f32 %v9476_v40  ;;  %v20701_v29 = vrot.slane %v18460_v6, 2  ;;  %v12835_v19 = vpop.eup %12834  ;;  %v10691_v16 = vcombine.high %v19022_v61, %v19034_v8  ;;  %v10694_v26 = vcombine.low %v9786_v10, %v9788_v28  ;;  %v20703_v40 = vld [vmem:[#allocation216_spill] sm:$0xff] }
 0x724   : > { %v9497_v48 = vadd.f32 %v9496_v41, %v9495_v47  ;;  %v10673_v4 = vrot.slane %v10659_v18, %v16197_v25  ;;  %v10689_v45 = vrot.slane %v10675_v1, %v16197_v25  ;;  %v12837_v54 = vpop.eup %12836  ;;  %v9790_v21 = vmul.f32 %v12835_v19, %v20702_v60  ;;  %v20704_v18 = vld [vmem:[#allocation218_spill] sm:$0xff]  ;;  %v19056_v1 = vpop.permute.xlu1 %10980 }
 0x725   : > { %v9509_v7 = vadd.f32 %v20701_v29, %v18460_v6  ;;  %v10702_v46 = vcombine.low %v9787_v56, %v9789_v15  ;;  %12852 = vrcp.f32 %v9483_v13  ;;  %v9503_v12 = vrot.slane %v18480_v55, 1  ;;  %v12839_v51 = vpop.eup %12838  ;;  %10938 = vrot.lane.b32.xlu0 %v10691_v16, %s13001_s18  ;;  %v19070_v29 = vpop.permute.xlu0 %10982 }
 0x726   : > { %v9550_v6 = vrot.slane %v18955_v24, 2  ;;  %v9791_v0 = vmul.f32 %v12837_v54, %v20703_v40  ;;  %12854 = vrcp.f32 %v9490_v52  ;;  %v12841_v38 = vpop.eup %12840  ;;  %v9792_v32 = vmul.f32 %v12839_v51, %v20704_v18  ;;  %v20709_v40 = vld [vmem:[#allocation38_spill] sm:$0xff] }
 0x727   : > { %v9510_v47 = vrot.slane %v9509_v7, 1  ;;  %v10709_v53 = vrot.slane %v10702_v46, %v16190_v2  ;;  %12856 = vrcp.f32 %v9497_v48  ;;  %v9517_v10 = vrot.slane %v18483_v14, 1 }
 0x728   : > { %v9793_v63 = vmul.f32 %v12841_v38, %v20705_v27  ;;  %v10701_v56 = vrot.slane %v10694_v26, %v16190_v2  ;;  %v10692_v13 = vcombine.low %v10673_v4, %v10689_v45  ;;  %v20706_v41 = vrot.slane %v18465_v35, 2 }
 0x729   : > { %v20707_v5 = vrot.slane %v18492_v17, 2  ;;  %v10710_v52 = vcombine.low %v9790_v21, %v9792_v32  ;;  %v9504_v50 = vadd.f32 %v9503_v12, %v18480_v55  ;;  %v20708_v15 = vrot.slane %v18472_v39, 2  ;;  %v20710_v32 = vld [vmem:[#allocation36_spill] sm:$0xff] }
 0x72a   : > { %v9523_v33 = vadd.f32 %v20706_v41, %v18465_v35  ;;  %v10718_v19 = vcombine.low %v9791_v0, %v9793_v63  ;;  %v10726_v16 = vcombine.low %v10701_v56, %v10709_v53  ;;  %11002 = vrot.lane.b32.xlu0 %v10692_v13, %s13002_s27  ;;  %v10693_v26 = vcombine.high %v10673_v4, %v10689_v45 }
 0x72b   : > { %v9544_v28 = vadd.f32 %v20707_v5, %v18492_v17  ;;  %v9537_v48 = vadd.f32 %v20708_v15, %v18472_v39  ;;  %v9511_v54 = vadd.f32 %v9510_v47, %v9509_v7  ;;  %v9518_v35 = vadd.f32 %v9517_v10, %v18483_v14  ;;  %v12843_v21 = vpop.eup %12842  ;;  %v19079_v7 = vpop.permute.xlu1 %11044 }
 0x72c   : > { %v9524_v60 = vrot.slane %v9523_v33, 1  ;;  %v9531_v17 = vrot.slane %v18488_v11, 1  ;;  %v10717_v55 = vrot.slane %v10710_v52, %v16190_v2  ;;  %v10725_v46 = vrot.slane %v10718_v19, %v16190_v2  ;;  %v20712_v52 = vld [vmem:[#allocation9_spill] sm:$0xff] }
 0x72d   : > { %v10727_v12 = vcombine.high %v10701_v56, %v10709_v53  ;;  %v9551_v39 = vadd.f32 %v9550_v6, %v18955_v24  ;;  %v12845_v51 = vpop.eup %12844  ;;  %v9794_v0 = vmul.f32 %v12843_v21, %v20709_v40  ;;  %v9538_v38 = vrot.slane %v9537_v48, 1  ;;  %v20711_v24 = vld [vmem:[#allocation29_spill] sm:$0xff]  ;;  %v19087_v56 = vpop.permute.xlu0 %11046  ;;  %v20714_v40 = vld [vmem:[#allocation43_spill] sm:$0xff] }
 0x72e   : > { %v9545_v18 = vrot.slane %v9544_v28, 1  ;;  %12858 = vrcp.f32 %v9504_v50  ;;  %v12847_v14 = vpop.eup %12846  ;;  %v19082_v4 = vrot.slane %v10726_v16, %v16197_v25  ;;  %v10742_v45 = vcombine.low %v10717_v55, %v10725_v46  ;;  %11066 = vrot.lane.b32.xlu0 %v10693_v26, %s13003_s9 }
 0x72f   : > { %v10743_v47 = vcombine.high %v10717_v55, %v10725_v46  ;;  %v9795_v53 = vmul.f32 %v12845_v51, %v20710_v32  ;;  %v12849_v10 = vpop.eup %12848  ;;  %v9796_v6 = vmul.f32 %v12847_v14, %v20711_v24  ;;  %v9525_v27 = vadd.f32 %v9524_v60, %v9523_v33  ;;  %v20713_v60 = vld [vmem:[#allocation26_spill] sm:$0xff] }
 0x730   : > { %v9552_v63 = vrot.slane %v9551_v39, 1  ;;  %12860 = vrcp.f32 %v9511_v54  ;;  %v12851_v13 = vpop.eup %12850  ;;  %v19090_v41 = vrot.slane %v10742_v45, %v16197_v25  ;;  %v10741_v5 = vrot.slane %v10727_v12, %v16197_v25  ;;  %v19100_v45 = vpop.permute.xlu1 %10920 }
 0x731   : > { %v9797_v50 = vmul.f32 %v12849_v10, %v20712_v52  ;;  %v9532_v15 = vadd.f32 %v9531_v17, %v18488_v11  ;;  %v10762_v19 = vcombine.low %v9794_v0, %v9796_v6  ;;  %v9539_v16 = vadd.f32 %v9538_v38, %v9537_v48  ;;  %v20716_v17 = vld [vmem:[#allocation57_spill] sm:$0xff] }
 0x732   : > { %v9546_v26 = vadd.f32 %v9545_v18, %v9544_v28  ;;  %12862 = vrcp.f32 %v9518_v35  ;;  %v12853_v21 = vpop.eup %12852  ;;  %v10759_v33 = vcombine.high %v19082_v4, %v19090_v41  ;;  %v10757_v54 = vrot.slane %v10743_v47, %v16197_v25  ;;  %v20715_v28 = vld [vmem:[#allocation44_spill] sm:$0xff]  ;;  %v19107_v18 = vpop.permute.xlu0 %10922 }
 0x733   : > { %v9798_v55 = vmul.f32 %v12851_v13, %v20713_v60  ;;  %v10770_v46 = vcombine.low %v9795_v53, %v9797_v50  ;;  %v12855_v51 = vpop.eup %12854  ;;  %v9799_v12 = vmul.f32 %v12853_v21, %v20714_v40  ;;  %v9553_v14 = vadd.f32 %v9552_v63, %v9551_v39 }
 0x734   : > { %12864 = vrcp.f32 %v9525_v27  ;;  %v12857_v11 = vpop.eup %12856  ;;  %10940 = vrot.lane.b32.xlu1 %v10759_v33, %s13001_s18  ;;  %v9800_v48 = vmul.f32 %v12855_v51, %v20715_v28  ;;  %v10769_v38 = vrot.slane %v10762_v19, %v16190_v2  ;;  %v10760_v47 = vcombine.low %v10741_v5, %v10757_v54  ;;  %v19112_v6 = vpop.permute.xlu1 %10984 }
 0x735   : > { %v10777_v35 = vrot.slane %v10770_v46, %v16190_v2  ;;  %12866 = vrcp.f32 %v9532_v15  ;;  %v9801_v0 = vmul.f32 %v12857_v11, %v20716_v17  ;;  %v10761_v63 = vcombine.high %v10741_v5, %v10757_v54 }
 0x736   : > { %12868 = vrcp.f32 %v9539_v16  ;;  %v10778_v39 = vcombine.low %v9798_v55, %v9800_v48  ;;  %v19117_v19 = vpop.permute.xlu0 %10986 }
 0x737   : > { %12870 = vrcp.f32 %v9546_v26  ;;  %v10786_v32 = vcombine.low %v9799_v12, %v9801_v0  ;;  %v10794_v53 = vcombine.low %v10769_v38, %v10777_v35  ;;  %v10795_v13 = vcombine.high %v10769_v38, %v10777_v35  ;;  %v20717_v35 = vld [vmem:[#allocation11_spill] sm:$0xff] }
 0x738   : > { %12872 = vrcp.f32 %v9553_v14  ;;  %11004 = vrot.lane.b32.xlu1 %v10760_v47, %s13002_s27  ;;  %v10785_v10 = vrot.slane %v10778_v39, %v16190_v2  ;;  %v19130_v51 = vpop.permute.xlu1 %11048  ;;  %v10554_v12 = vcombine.low %v18921_v37, %v18928_v42  ;;  %v10758_v0 = vcombine.low %v19082_v4, %v19090_v41  ;;  %v20718_v39 = vld [vmem:[#allocation48_spill] sm:$0xff] }
 0x739   : > { %v10793_v24 = vrot.slane %v10786_v32, %v16190_v2  ;;  %v19115_v52 = vrot.slane %v10794_v53, %v16197_v25  ;;  %v10809_v60 = vrot.slane %v10795_v13, %v16197_v25 }
 0x73b   : > { %v12859_v27 = vpop.eup %12858  ;;  %v10810_v50 = vcombine.low %v10785_v10, %v10793_v24  ;;  %v10811_v15 = vcombine.high %v10785_v10, %v10793_v24  ;;  %v20719_v24 = vld [vmem:[#allocation34_spill] sm:$0xff] }
 0x73c   : > { %11068 = vrot.lane.b32.xlu1 %v10761_v63, %s13003_s9  ;;  %v9802_v21 = vmul.f32 %v12859_v27, %v18426_v49  ;;  %v10622_v49 = vcombine.low %v18966_v31, %v18982_v20  ;;  %v20720_v63 = vld [vmem:[#allocation49_spill] sm:$0xff] }
 0x73d   : > { %v12861_v16 = vpop.eup %12860  ;;  %v19121_v26 = vrot.slane %v10810_v50, %v16197_v25  ;;  %v10825_v46 = vrot.slane %v10811_v15, %v16197_v25 }
 0x73e   : > { %v9803_v54 = vmul.f32 %v12861_v16, %v18432_v9  ;;  %v11051_v9 = vpop.permute.xlu0 %11050  ;;  %v19151_v16 = vpop.permute.xlu1 %10924 }
 0x73f   : > { %v12863_v33 = vpop.eup %12862  ;;  %v10827_v5 = vcombine.high %v19115_v52, %v19121_v26  ;;  %v10826_v38 = vcombine.low %v19115_v52, %v19121_v26  ;;  %v10828_v10 = vcombine.low %v10809_v60, %v10825_v46 }
 0x740   : > { %v9804_v55 = vmul.f32 %v12863_v33, %v18436_v34  ;;  %v10690_v34 = vcombine.low %v19022_v61, %v19034_v8  ;;  %v20721_v33 = vld [vmem:[#allocation37_spill] sm:$0xff] }
 0x741   : > { %v12865_v40 = vpop.eup %12864  ;;  %10942 = vrot.lane.b32.xlu0 %v10827_v5, %s13001_s18  ;;  %v20722_v5 = vld [vmem:[#allocation22_spill] sm:$0xff] }
 0x742   : > { %v12867_v14 = vpop.eup %12866  ;;  %v9805_v11 = vmul.f32 %v12865_v40, %v18440_v62  ;;  %v10830_v28 = vcombine.low %v9802_v21, %v9804_v55  ;;  %v9874_v55 = vcombine.low %v20722_v5, %v20721_v33 }
 0x743   : > { %v12869_v48 = vpop.eup %12868  ;;  %v9806_v17 = vmul.f32 %v12867_v14, %v20717_v35  ;;  %v10829_v14 = vcombine.high %v10809_v60, %v10825_v46 }
 0x744   : > { %v12871_v47 = vpop.eup %12870  ;;  %v9807_v32 = vmul.f32 %v12869_v48, %v20718_v39  ;;  %v10838_v53 = vcombine.low %v9803_v54, %v9805_v11  ;;  %v10837_v50 = vrot.slane %v10830_v28, %v16190_v2  ;;  %v10927_v11 = vpop.permute.xlu0 %10926  ;;  %v11091_v28 = vsel %vm11090_vm8, %v9874_v55, %v18972_v44  ;;  %v20723_v39 = vld [vmem:[#allocation47_spill] sm:$0xff] }
 0x745   : > { %v12873_v62 = vpop.eup %12872  ;;  %v9808_v27 = vmul.f32 %v12871_v47, %v20719_v24  ;;  %11006 = vrot.lane.b32.xlu0 %v10828_v10, %s13002_s27 }
 0x746   : > { %v9809_v13 = vmul.f32 %v12873_v62, %v20720_v63  ;;  %v10845_v15 = vrot.slane %v10838_v53, %v16190_v2  ;;  %v10989_v62 = vpop.permute.xlu1 %10988  ;;  %v10146_v63 = vcombine.low %v18631_v22, %v18644_v30 }
 0x747   : > { %v10846_v21 = vcombine.low %v9806_v17, %v9808_v27  ;;  %v11108_v17 = vsel %vm11107_vm9, %v11091_v28, %v18995_v58 }
 0x748   : > { %v10854_v54 = vcombine.low %v9807_v32, %v9809_v13  ;;  %v10862_v40 = vcombine.low %v10837_v50, %v10845_v15  ;;  %v11125_v47 = vsel %vm11124_vm10, %v11108_v17, %v19017_v23  ;;  %v20724_v32 = vld [vmem:[#allocation42_spill] sm:$0xff]  ;;  %v10863_v44 = vcombine.high %v10837_v50, %v10845_v15  ;;  %v10991_v23 = vpop.permute.xlu0 %10990  ;;  %v20729_v17 = vld [vmem:[#allocation61_spill] sm:$0xff] }
 0x749   : > { %v10853_v48 = vrot.slane %v10846_v21, %v16190_v2  ;;  %11070 = vrot.lane.b32.xlu0 %v10829_v14, %s13003_s9  ;;  %v10010_v60 = vcombine.low %v20724_v32, %v20723_v39  ;;  %v20725_v21 = vld [vmem:[#allocation65_spill] sm:$0xff] }
 0x74a   : > { %v10861_v35 = vrot.slane %v10854_v54, %v16190_v2  ;;  %v19167_v46 = vrot.slane %v10862_v40, %v16197_v25  ;;  %v11053_v30 = vpop.permute.xlu1 %11052  ;;  %v10282_v33 = vcombine.low %v20725_v21, %v18749_v59  ;;  %v20726_v54 = vld [vmem:[#allocation41_spill] sm:$0xff]  ;;  %v20727_v40 = vld [vmem:[#allocation35_spill] sm:$0xff] }
 0x74b   : > { %v11093_v2 = vsel %vm11090_vm8, %v10010_v60, %v19042_v3  ;;  %v10877_v3 = vrot.slane %v10863_v44, %v16197_v25  ;;  %v9942_v14 = vcombine.low %v20727_v40, %v20726_v54  ;;  %v20730_v60 = vld [vmem:[#allocation64_spill] sm:$0xff] }
 0x74c   : > { %v10878_v53 = vcombine.low %v10853_v48, %v10861_v35  ;;  %v10879_v10 = vcombine.high %v10853_v48, %v10861_v35  ;;  %v11110_v58 = vsel %vm11107_vm9, %v11093_v2, %v19070_v29  ;;  %v11095_v29 = vsel %vm11090_vm8, %v10146_v63, %v19107_v18  ;;  %v11055_v5 = vpop.permute.xlu0 %11054  ;;  %v20728_v35 = vld [vmem:[#allocation50_spill] sm:$0xff]  ;;  %v20732_v2 = vld [vmem:[#allocation67_spill] sm:$0xff] }
 0x74d   : > { %11157 = vrot.lane.b32.xlu0 %v11125_v47, %s13004_s13  ;;  %v11127_v27 = vsel %vm11124_vm10, %v11110_v58, %v19087_v56  ;;  %v11112_v22 = vsel %vm11107_vm9, %v11095_v29, %v19117_v19  ;;  %v11097_v55 = vsel %vm11090_vm8, %v10282_v33, %v10927_v11  ;;  %v11092_v59 = vsel %vm11090_vm8, %v9942_v14, %v19031_v43  ;;  %v20733_v58 = vld [vmem:[#allocation66_spill] sm:$0xff] }
 0x74e   : > { %v19172_v24 = vrot.slane %v10878_v53, %v16197_v25  ;;  %v10893_v50 = vrot.slane %v10879_v10, %v16197_v25  ;;  %v11129_v56 = vsel %vm11124_vm10, %v11112_v22, %v11051_v9  ;;  %v11114_v18 = vsel %vm11107_vm9, %v11097_v55, %v10991_v23  ;;  %v10929_v9 = vpop.permute.xlu1 %10928  ;;  %v20731_v53 = vld [vmem:[#allocation63_spill] sm:$0xff] }
 0x74f   : > { %v11131_v19 = vsel %vm11124_vm10, %v11114_v18, %v11055_v5  ;;  %v11109_v11 = vsel %vm11107_vm9, %v11092_v59, %v19056_v1  ;;  %v10078_v47 = vcombine.low %v20729_v17, %v20728_v35  ;;  %v10214_v44 = vcombine.low %v20731_v53, %v20730_v60 }
 0x750   : > { %v10895_v13 = vcombine.high %v19167_v46, %v19172_v24  ;;  %v10894_v15 = vcombine.low %v19167_v46, %v19172_v24  ;;  %v10896_v25 = vcombine.low %v10877_v3, %v10893_v50  ;;  %v10897_v28 = vcombine.high %v10877_v3, %v10893_v50  ;;  %v20734_v3 = vld [vmem:[#allocation77_spill] sm:$0xff]  ;;  %v20740_v24 = vld [vmem:[#allocation23_spill] sm:$0xff] }
 0x751   : > { %11161 = vrot.lane.b32.xlu0 %v11127_v27, %s13004_s13  ;;  %v11126_v48 = vsel %vm11124_vm10, %v11109_v11, %v19079_v7  ;;  %v11094_v39 = vsel %vm11090_vm8, %v10078_v47, %v19100_v45  ;;  %v11096_v7 = vsel %vm11090_vm8, %v10214_v44, %v19151_v16  ;;  %v10350_v23 = vcombine.low %v20733_v58, %v20732_v2  ;;  %v20735_v50 = vld [vmem:[#allocation73_spill] sm:$0xff]  ;;  %v20736_v44 = vld [vmem:[#allocation39_spill] sm:$0xff] }
 0x752   : > { %10944 = vrot.lane.b32.xlu1 %v10895_v13, %s13001_s18  ;;  %v11111_v43 = vsel %vm11107_vm9, %v11094_v39, %v19112_v6  ;;  %v10993_v32 = vpop.permute.xlu1 %10992  ;;  %v11113_v10 = vsel %vm11107_vm9, %v11096_v7, %v10989_v62  ;;  %v10418_v29 = vcombine.low %v20735_v50, %v20734_v3  ;;  %s19378_s18 = scalar_lea.hbm %s19443_s6, %s11883_s29 }
 0x753   : > { %v11128_v1 = vsel %vm11124_vm10, %v11111_v43, %v19130_v51  ;;  %v11130_v45 = vsel %vm11124_vm10, %v11113_v10, %v11053_v30  ;;  %v11098_v63 = vsel %vm11090_vm8, %v10350_v23, %v10929_v9 }
 0x754   : > { %v11115_v51 = vsel %vm11107_vm9, %v11098_v63, %v10993_v32 }
 0x755   : > { %11165 = vrot.lane.b32.xlu0 %v11129_v56, %s13004_s13 }
 0x756   : > { %11008 = vrot.lane.b32.xlu1 %v10896_v25, %s13002_s27  ;;  %v11057_v27 = vpop.permute.xlu1 %11056  ;;  %v10486_v25 = vcombine.low %v18877_v36, %v18889_v57 }
 0x757   : > { %v11132_v13 = vsel %vm11124_vm10, %v11115_v51, %v11057_v27 }
 0x759   : > { %11169 = vrot.lane.b32.xlu0 %v11131_v19, %s13004_s13 }
 0x75a   : > { %11072 = vrot.lane.b32.xlu1 %v10897_v28, %s13003_s9  ;;  %s13005_s9 = smov [#allocation3]  }
 0x75d   : > { %v10931_v6 = vpop.permute.xlu0 %10930 }
 0x75e   : > { %11159 = vrot.lane.b32.xlu1 %v11126_v48, %s13004_s13  ;;  %v11099_v62 = vsel %vm11090_vm8, %v10418_v29, %v10931_v6  ;;  %v20738_v6 = vld [vmem:[#allocation13_spill] sm:$0xff]  ;;  %v20739_v29 = vld [vmem:[#allocation14_spill] sm:$0xff] }
 0x761   : > { %v10995_v16 = vpop.permute.xlu0 %10994 }
 0x762   : > { %11163 = vrot.lane.b32.xlu1 %v11128_v1, %s13004_s13  ;;  %v11116_v22 = vsel %vm11107_vm9, %v11099_v62, %v10995_v16 }
 0x765   : > { %v11059_v30 = vpop.permute.xlu0 %11058 }
 0x766   : > { %11167 = vrot.lane.b32.xlu1 %v11130_v45, %s13004_s13  ;;  %v11133_v56 = vsel %vm11124_vm10, %v11116_v22, %v11059_v30 }
 0x767   : > { %11173 = vrot.lane.b32.xlu0 %v11133_v56, %s13004_s13 }
 0x76a   : > { %11171 = vrot.lane.b32.xlu1 %v11132_v13, %s13004_s13 }
 0x76c   : > { %v10933_v21 = vpop.permute.xlu1 %10932 }
 0x76d   : > { %v11100_v5 = vsel %vm11090_vm8, %v10486_v25, %v10933_v21  ;;  %v20741_v21 = vld [vmem:[#allocation24_spill] sm:$0xff] }
 0x770   : > { %v10997_v33 = vpop.permute.xlu1 %10996 }
 0x771   : > { %v11117_v55 = vsel %vm11107_vm9, %v11100_v5, %v10997_v33 }
 0x774   : > { %v11061_v18 = vpop.permute.xlu1 %11060 }
 0x775   : > { %v11134_v54 = vsel %vm11124_vm10, %v11117_v55, %v11061_v18  ;;  %v20742_v55 = vld [vmem:[#allocation33_spill] sm:$0xff] }
 0x776   : > { %11175 = vrot.lane.b32.xlu1 %v11134_v54, %s13004_s13 }
 0x779   : > { %v10935_v40 = vpop.permute.xlu0 %10934 }
 0x77a   : > { %v11101_v19 = vsel %vm11090_vm8, %v10554_v12, %v10935_v40 }
 0x77e   : > { %v10999_v14 = vpop.permute.xlu0 %10998 }
 0x77f   : > { %v11118_v28 = vsel %vm11107_vm9, %v11101_v19, %v10999_v14  ;;  %v20743_v14 = vld [vmem:[#allocation30_spill] sm:$0xff] }
 0x782   : > { %v11063_v9 = vpop.permute.xlu0 %11062 }
 0x783   : > { %v11135_v36 = vsel %vm11124_vm10, %v11118_v28, %v11063_v9 }
 0x784   : > { %11177 = vrot.lane.b32.xlu0 %v11135_v36, %s13004_s13  ;;  %v20744_v36 = vld [vmem:[#allocation15_spill] sm:$0xff] }
 0x788   : > { %v10937_v57 = vpop.permute.xlu1 %10936 }
 0x789   : > { %v11102_v11 = vsel %vm11090_vm8, %v10622_v49, %v10937_v57 }
 0x78d   : > { %v11001_v59 = vpop.permute.xlu1 %11000 }
 0x78e   : > { %v11119_v48 = vsel %vm11107_vm9, %v11102_v11, %v11001_v59 }
 0x791   : > { %v11065_v35 = vpop.permute.xlu1 %11064 }
 0x792   : > { %v11136_v37 = vsel %vm11124_vm10, %v11119_v48, %v11065_v35  ;;  %v20745_v48 = vld [vmem:[#allocation31_spill] sm:$0xff] }
 0x793   : > { %11179 = vrot.lane.b32.xlu1 %v11136_v37, %s13004_s13 }
 0x797   : > { %v10939_v42 = vpop.permute.xlu0 %10938 }
 0x798   : > { %v11103_v17 = vsel %vm11090_vm8, %v10690_v34, %v10939_v42 }
 0x79c   : > { %v11003_v12 = vpop.permute.xlu0 %11002 }
 0x79d   : > { %v11120_v47 = vsel %vm11107_vm9, %v11103_v17, %v11003_v12  ;;  %v20746_v12 = vld [vmem:[#allocation16_spill] sm:$0xff] }
 0x7a0   : > { %v11067_v31 = vpop.permute.xlu0 %11066 }
 0x7a1   : > { %v11137_v20 = vsel %vm11124_vm10, %v11120_v47, %v11067_v31 }
 0x7a2   : > { %11181 = vrot.lane.b32.xlu0 %v11137_v20, %s13004_s13  ;;  %v20747_v20 = vld [vmem:[#allocation32_spill] sm:$0xff] }
 0x7a6   : > { %v10941_v49 = vpop.permute.xlu1 %10940 }
 0x7a7   : > { %v11104_v43 = vsel %vm11090_vm8, %v10758_v0, %v10941_v49 }
 0x7aa   : > { %v11005_v39 = vpop.permute.xlu1 %11004 }
 0x7ab   : > { %v11121_v32 = vsel %vm11107_vm9, %v11104_v43, %v11005_v39 }
 0x7ae   : > { %v11069_v61 = vpop.permute.xlu1 %11068 }
 0x7af   : > { %v11138_v8 = vsel %vm11124_vm10, %v11121_v32, %v11069_v61  ;;  %v20748_v32 = vld [vmem:[#allocation21_spill] sm:$0xff] }
 0x7b0   : > { %11183 = vrot.lane.b32.xlu1 %v11138_v8, %s13004_s13 }
 0x7b3   : > { %v10943_v34 = vpop.permute.xlu0 %10942 }
 0x7b4   : > { %v11105_v60 = vsel %vm11090_vm8, %v10826_v38, %v10943_v34  ;;  %v20737_v38 = vld [vmem:[#allocation17_spill] sm:$0xff] }
 0x7b7   : > { %v11007_v1 = vpop.permute.xlu0 %11006 }
 0x7b8   : > { %v11122_v53 = vsel %vm11107_vm9, %v11105_v60, %v11007_v1  ;;  %v20749_v1 = vld [vmem:[#allocation18_spill] sm:$0xff] }
 0x7bb   : > { %v11071_v4 = vpop.permute.xlu0 %11070 }
 0x7bc   : > { %v11139_v41 = vsel %vm11124_vm10, %v11122_v53, %v11071_v4 }
 0x7bd   : > { %11185 = vrot.lane.b32.xlu0 %v11139_v41, %s13004_s13  ;;  %v20750_v41 = vld [vmem:[#allocation10_spill] sm:$0xff] }
 0x7bf   : > { %v11158_v0 = vpop.permute.xlu0 %11157 }
 0x7c0   : > { %v11205_v7 = vsel %vm529_vm3, %v20736_v44, %v11158_v0 }
 0x7c1   : > { %v11222_v10 = vsel %vm11221_vm11, %v11205_v7, %v20736_v44 }
 0x7c2   : > { %11238 = vst [vmem:[%s19288_s7] sm:$0xff] %v11222_v10  ;;  %v20751_v10 = vld [vmem:[#allocation19_spill] sm:$0xff] }
 0x7c3   : > { %v11162_v26 = vpop.permute.xlu0 %11161 }
 0x7c4   : > { %v10945_v52 = vpop.permute.xlu1 %10944  ;;  %v11207_v45 = vsel %vm529_vm3, %v20737_v38, %v11162_v26 }
 0x7c5   : > { %v11224_v2 = vsel %vm11221_vm11, %v11207_v45, %v20737_v38  ;;  %v11106_v51 = vsel %vm11090_vm8, %v10894_v15, %v10945_v52 }
 0x7c6   : > { %11240 = vst [vmem:[%s19288_s7 + $0x10] sm:$0xff] %v11224_v2 }
 0x7c7   : > { %v11166_v23 = vpop.permute.xlu0 %11165 }
 0x7c8   : > { %v11009_v58 = vpop.permute.xlu1 %11008  ;;  %v11209_v27 = vsel %vm529_vm3, %v20738_v6, %v11166_v23 }
 0x7c9   : > { %v11226_v63 = vsel %vm11221_vm11, %v11209_v27, %v20738_v6  ;;  %v11123_v13 = vsel %vm11107_vm9, %v11106_v51, %v11009_v58 }
 0x7ca   : > { %11242 = vst [vmem:[%s19288_s7 + $0x20] sm:$0xff] %v11226_v63 }
 0x7cb   : > { %v11170_v3 = vpop.permute.xlu0 %11169 }
 0x7cc   : > { %v11073_v16 = vpop.permute.xlu1 %11072  ;;  %v11211_v62 = vsel %vm529_vm3, %v20739_v29, %v11170_v3 }
 0x7cd   : > { %v11140_v50 = vsel %vm11124_vm10, %v11123_v13, %v11073_v16  ;;  %v11228_v22 = vsel %vm11221_vm11, %v11211_v62, %v20739_v29 }
 0x7ce   : > { %11187 = vrot.lane.b32.xlu1 %v11140_v50, %s13004_s13  ;;  %11244 = vst [vmem:[%s19288_s7 + $0x30] sm:$0xff] %v11228_v22  ;;  %s12904_s13 = sshll.u32 %s13005_s9, 4  ;;  %s12905_s13 = int_to_ptr.vmem [resolvable:$false] %s12904_s13 }
 0x7cf   : > { %s12906_s30 = scalar_lea.vmem %s12905_s13, 4096  ;;  %p12907_p5 = scmp.lt.s32.totalorder %s19371_s8, %s12905_s13 }
 0x7d0   : > { %v11160_v46 = vpop.permute.xlu1 %11159  ;;  %p12908_p6 = scmp.lt.s32.totalorder %s12906_s30, %s12900_s25 }
 0x7d1   : > { %v11206_v15 = vsel %vm529_vm3, %v20740_v24, %v11160_v46 }
 0x7d2   : > { %v11223_v30 = vsel %vm11221_vm11, %v11206_v15, %v20740_v24  ;;  %p12909_p7 = por %p12908_p6, %p12907_p5 }
 0x7d3   : > { %11239 = vst [vmem:[%s19288_s7 + $0x8] sm:$0xff] %v11223_v30 }
 0x7d4   : > { %v11164_v56 = vpop.permute.xlu1 %11163  ;;  %p12910_p9 = pnand %p12909_p7, %p12903_p4 }
 0x7d5   : > { %v11208_v33 = vsel %vm529_vm3, %v20741_v21, %v11164_v56 }
 0x7d6   : > { %v11225_v25 = vsel %vm11221_vm11, %v11208_v33, %v20741_v21 }
 0x7d7   : > { %11241 = vst [vmem:[%s19288_s7 + $0x18] sm:$0xff] %v11225_v25 }
 0x7d8   : > { %v11168_v5 = vpop.permute.xlu1 %11167 }
 0x7d9   : > { %v11210_v18 = vsel %vm529_vm3, %v20742_v55, %v11168_v5  ;;  %v11174_v9 = vpop.permute.xlu0 %11173 }
 0x7da   : > { %v11227_v54 = vsel %vm11221_vm11, %v11210_v18, %v20742_v55  ;;  %v11213_v57 = vsel %vm529_vm3, %v20744_v36, %v11174_v9 }
 0x7db   : > { %11243 = vst [vmem:[%s19288_s7 + $0x28] sm:$0xff] %v11227_v54  ;;  %v11230_v59 = vsel %vm11221_vm11, %v11213_v57, %v20744_v36 }
 0x7dc   : > { %v11172_v40 = vpop.permute.xlu1 %11171  ;;  %11246 = vst [vmem:[%s19288_s7 + $0x40] sm:$0xff] %v11230_v59 }
 0x7dd   : > { %v11212_v19 = vsel %vm529_vm3, %v20743_v14, %v11172_v40 }
 0x7de   : > { %v11229_v28 = vsel %vm11221_vm11, %v11212_v19, %v20743_v14 }
 0x7df   : > { %11245 = vst [vmem:[%s19288_s7 + $0x38] sm:$0xff] %v11229_v28 }
 0x7e8   : > { %v11176_v11 = vpop.permute.xlu1 %11175 }
 0x7e9   : > { %v11214_v35 = vsel %vm529_vm3, %v20745_v48, %v11176_v11 }
 0x7ea   : > { %v11231_v37 = vsel %vm11221_vm11, %v11214_v35, %v20745_v48 }
 0x7eb   : > { %11247 = vst [vmem:[%s19288_s7 + $0x48] sm:$0xff] %v11231_v37 }
 0x7f6   : > { %v11178_v42 = vpop.permute.xlu0 %11177 }
 0x7f7   : > { %v11215_v17 = vsel %vm529_vm3, %v20746_v12, %v11178_v42 }
 0x7f8   : > { %v11232_v47 = vsel %vm11221_vm11, %v11215_v17, %v20746_v12 }
 0x7f9   : > { %11248 = vst [vmem:[%s19288_s7 + $0x50] sm:$0xff] %v11232_v47 }
 0x805   : > { %v11180_v31 = vpop.permute.xlu1 %11179 }
 0x806   : > { %v11216_v49 = vsel %vm529_vm3, %v20747_v20, %v11180_v31 }
 0x807   : > { %v11233_v39 = vsel %vm11221_vm11, %v11216_v49, %v20747_v20 }
 0x808   : > { %11249 = vst [vmem:[%s19288_s7 + $0x58] sm:$0xff] %v11233_v39 }
 0x814   : > { %v11182_v43 = vpop.permute.xlu0 %11181 }
 0x815   : > { %v11217_v61 = vsel %vm529_vm3, %v20748_v32, %v11182_v43 }
 0x816   : > { %v11234_v8 = vsel %vm11221_vm11, %v11217_v61, %v20748_v32 }
 0x817   : > { %11250 = vst [vmem:[%s19288_s7 + $0x60] sm:$0xff] %v11234_v8 }
 0x822   : > { %v11184_v34 = vpop.permute.xlu1 %11183 }
 0x823   : > { %v11218_v60 = vsel %vm529_vm3, %v20749_v1, %v11184_v34 }
 0x824   : > { %v11235_v53 = vsel %vm11221_vm11, %v11218_v60, %v20749_v1 }
 0x825   : > { %11251 = vst [vmem:[%s19288_s7 + $0x68] sm:$0xff] %v11235_v53 }
 0x82f   : > { %v11186_v4 = vpop.permute.xlu0 %11185 }
 0x830   : > { %v11219_v0 = vsel %vm529_vm3, %v20750_v41, %v11186_v4 }
 0x831   : > { %v11236_v44 = vsel %vm11221_vm11, %v11219_v0, %v20750_v41 }
 0x832   : > { %11252 = vst [vmem:[%s19288_s7 + $0x70] sm:$0xff] %v11236_v44 }
 0x840   : > { %v11188_v7 = vpop.permute.xlu1 %11187 }
 0x841   : > { %v11220_v52 = vsel %vm529_vm3, %v20751_v10, %v11188_v7 }
 0x842   : > { %v11237_v26 = vsel %vm11221_vm11, %v11220_v52, %v20751_v10 }
 0x843   : > { %11253 = vst [vmem:[%s19288_s7 + $0x78] sm:$0xff] %v11237_v26 }
 0x844   : > { %12913 = shalt.err (!%p12910_p9)
}
 0x845   : > { %s12914_s12 = scalar_lea.hbm %s19378_s18, 2048  ;;  %s12918_s19 = scalar_lea.hbm %s19443_s6, 8192 }
 0x846   : > { %p12915_p10 = scmp.ne.s32.totalorder %s19378_s18, %s12914_s12  ;;  %p12919_p13 = scmp.lt.s32.totalorder %s19378_s18, %s19443_s6 }
 0x847   : > { %p12920_p0 = scmp.lt.s32.totalorder %s12918_s19, %s12914_s12 }
 0x848   : > { %p12916_p11 = pnand %p12915_p10, %p13093_p3 }
 0x849   : > { %p12921_p1 = por %p12920_p0, %p12919_p13 }
 0x84a   : > { %p12917_p12 = pneg %p12916_p11 }
 0x84c   : > { %p12922_p2 = pnand %p12921_p1, %p12917_p12 }
 0x84e   : > { %12925 = shalt.err (!%p12922_p2)
}
 0x84f   : > { %s13006_s16 = smov 128  }
 0x850   : > { %12021 = dma.vmem_to_hbm [thread:$0]  (%p13093_p3), %s19371_s8, 2048, %s19378_s18, %s19385_s24, %s13006_s16, %s13006_s16, %s13002_s27  }
 0x851 PF: > { %p12027_p4 = scmp.ge.s32.totalorder %s12992_s28, 2  ;;  %s11286_s17 = sand.u32 1, %s12964_s21  }
 0x852   : > { %s11287_s25 = scalar_lea.sflag [#allocation4], %s11286_s17 }
 0x853   : > { %p12024_p5 = pnand %p12027_p4, %p13102_p8 }
 0x855   : > { %p12025_p6 = pneg %p12024_p5 }
 0x857   : > { %12959 = dma.done.wait (%p12025_p6), %s11287_s25, 2048  }
 0x858   : > { %12961 = vsyncadd (%p12025_p6), %s11287_s25, 4294965248  ;;  %s19_s28 = sadd.s32 1, %s12992_s28   ;;  %s20752_s25 = sld [smem:[#allocation6_spill]] }
 0x859   : > { %p16_p7 = scmp.ge.s32.totalorder %s19_s28, 6   ;;  %s20753_s10 = sld [smem:[#allocation7_spill]] }
 0x85a   : > { %s20754_s27 = sld [smem:[#allocation8_spill]]  ;;  %s20755_s21 = smov %s12968_s22 }
 0x85b   : > { %s20756_s22 = smov %s12972_s23  ;;  %s20757_s23 = smov %s13111_s15 }
 0x85c   : > { %s20758_s24 = smov %s12984_s26  ;;  %18 = sbr.rel (!%p16_p7) target bundleno = 5 (0x5), region = 90 }
 0x85f   : > { %s20759_s26 = smov %s20753_s10 }
 0x861   :  { %11292 = vsyncpa [#allocation4], 1 }
 0x862   :  { %11294 = vsyncpa [#allocation4 + $0x1], 1 }

</bundles_post_ra>
